<compile_context>
chip_gen: v6e
topology: v6e:2x2x1
jax: 0.10.0
libtpu: 0.0.40
codegen_flags: <defaults>
</compile_context>

<pallas_src>
import functools
import math

import numpy as np

import jax
import jax.numpy as jnp
from jax.experimental import pallas as pl
from jax.experimental.pallas import tpu as pltpu

_BN_EPS = 1e-5


# ---------------------------------------------------------------------------
# Fused UNet kernel (one grid step = one group of lane-folded batch elements)
# ---------------------------------------------------------------------------
def _seq2seq_kernel(x_ref, w_ref, b_ref, sh_ref, pool_ref, up_ref,
                    o_rec_ref, o_lat_ref, *, num_conv, encoder_blocks, out_ch):
    f32 = jnp.float32
    bf16 = jnp.bfloat16

    li = 0  # running conv-layer index (static Python, network is unrolled)

    def conv3(pieces, lvl, relu=True):
        """3-tap 'same' conv (BN pre-folded) + optional ReLU.

        pieces : list of (C_i, L) f32 values = implicit channel concat; the
                 packed weight is sliced per channel group, so no concat copy.
        lvl    : pyramid level -> selects the (L, L) left/right shift matrices
                 (they also encode the per-batch-element zero padding).
        """
        nonlocal li
        c_out = out_ch[li]
        L = pieces[0].shape[-1]
        sl = sh_ref[lvl, 0, 0:L, 0:L]            # bf16, x[j-1] selector
        sr = sh_ref[lvl, 1, 0:L, 0:L]            # bf16, x[j+1] selector
        y = b_ref[li, 0:c_out]                   # (c_out, 1) broadcasts over L
        c0 = 0
        for p in pieces:
            cp = p.shape[0]
            pb = p.astype(bf16)
            # Shifted taps stay in vregs; the 0/1 selection matmul is exact.
            p_l = jnp.dot(pb, sl, preferred_element_type=f32).astype(bf16)
            p_r = jnp.dot(pb, sr, preferred_element_type=f32).astype(bf16)
            y = y + jnp.dot(w_ref[li, 0, 0:c_out, c0:c0 + cp], p_l,
                            preferred_element_type=f32)
            y = y + jnp.dot(w_ref[li, 1, 0:c_out, c0:c0 + cp], pb,
                            preferred_element_type=f32)
            y = y + jnp.dot(w_ref[li, 2, 0:c_out, c0:c0 + cp], p_r,
                            preferred_element_type=f32)
            c0 += cp
        li += 1
        return jnp.maximum(y, 0.0) if relu else y

    def nconv(pieces, lvl):
        x = conv3(pieces, lvl)
        for _ in range(num_conv - 1):
            x = conv3([x], lvl)
        return x

    x = x_ref[0]                                 # (C0, L_fold) for this step
    x = nconv([x], 0)                            # self.inc
    skips = [x]

    for d in range(encoder_blocks):              # DownBlock = MaxPool1d(2) -> N_Conv
        L = x.shape[-1]
        xb = x.astype(bf16)
        x = jnp.maximum(
            jnp.dot(xb, pool_ref[d, 0, 0:L, 0:L // 2],
                    preferred_element_type=f32),
            jnp.dot(xb, pool_ref[d, 1, 0:L, 0:L // 2],
                    preferred_element_type=f32))
        x = nconv([x], d + 1)
        skips.append(x)

    o_lat_ref[0] = x                             # x_latent

    # UpBlock = nearest-2x upsample -> cat([skip, upsampled]) -> N_Conv
    for u, skip in enumerate(skips[:-1][::-1]):
        L = x.shape[-1]
        x_up = jnp.dot(x.astype(bf16), up_ref[u, 0:L, 0:2 * L],
                       preferred_element_type=f32)
        x = nconv([skip, x_up], encoder_blocks - 1 - u)

    # OutConv: 1x1 conv, no BN / no ReLU (stored as center tap of last layer)
    c_out = out_ch[li]
    c_in = x.shape[0]
    o_rec_ref[0] = (jnp.dot(w_ref[li, 1, 0:c_out, 0:c_in], x.astype(bf16),
                            preferred_element_type=f32)
                    + b_ref[li, 0:c_out])


# ---------------------------------------------------------------------------
# Host-side parameter folding / packing
# ---------------------------------------------------------------------------
def _fold_conv(w, b, bn, use_bn):
    """(c_out, c_in, k) PyTorch Conv1d weight -> (3, c_out, c_in) with eval-mode
    BatchNorm folded in.  bn = (gamma, beta, running_mean, running_var) or None
    (None -> default running stats: mean=0, var=1, gamma=1, beta=0)."""
    w = w.astype(jnp.float32)
    b = b.astype(jnp.float32)
    c_out, c_in, k = w.shape
    if use_bn:
        if bn is None:
            gamma = jnp.ones((c_out,), jnp.float32)
            beta = jnp.zeros((c_out,), jnp.float32)
            mean = jnp.zeros((c_out,), jnp.float32)
            var = jnp.ones((c_out,), jnp.float32)
        else:
            gamma, beta, mean, var = [jnp.asarray(a, jnp.float32) for a in bn]
        s = gamma / jnp.sqrt(var + _BN_EPS)
        w = w * s[:, None, None]
        b = (b - mean) * s + beta
    if k == 3:
        w3 = jnp.transpose(w, (2, 0, 1))
    else:                                        # 1x1 OutConv -> center tap
        w3 = jnp.zeros((3, c_out, c_in), jnp.float32).at[1].set(w[:, :, 0])
    return w3, b


def _fold_layers(params):
    """Forward-ordered list of (w (3, c_out, c_in) f32, b (c_out,) f32)."""
    layers = []

    def add(entry, use_bn):
        w, b = entry[0], entry[1]
        bn = entry[2] if len(entry) > 2 else None
        layers.append(_fold_conv(w, b, bn, use_bn))

    for e in params["inc"]:
        add(e, True)
    for blk in params["down"]:
        for e in blk:
            add(e, True)
    for blk in params["up"]:
        for e in blk:
            add(e, True)
    add(params["outc"], False)
    return layers


def _pack_layers(layers):
    """Pack all layers into two resident arrays (+ static out-channel tuple)."""
    n = len(layers)
    c_out_max = max(int(w.shape[1]) for w, _ in layers)
    c_in_max = max(int(w.shape[2]) for w, _ in layers)
    w_all = jnp.zeros((n, 3, c_out_max, c_in_max), jnp.float32)
    b_all = jnp.zeros((n, c_out_max, 1), jnp.float32)
    for i, (w, b) in enumerate(layers):
        w_all = w_all.at[i, :, :w.shape[1], :w.shape[2]].set(w)
        b_all = b_all.at[i, :b.shape[0], 0].set(b)
    out_ch = tuple(int(w.shape[1]) for w, _ in layers)
    return w_all.astype(jnp.bfloat16), b_all, out_ch


def _build_selection_constants(l_fold, l_seg, encoder_blocks,
                               dtype=jnp.bfloat16):
    """Host-precomputed 0/1 matrices (shift taps, maxpool even/odd selectors,
    nearest-2x upsample) for every pyramid level.  l_fold is the lane-folded
    length of one grid step, l_seg the per-batch-element length (the shift
    matrices zero the taps at every element boundary -> exact 'same' padding
    even with the batch folded into lanes)."""
    n_lvl = encoder_blocks + 1
    sh = np.zeros((n_lvl, 2, l_fold, l_fold), np.float32)
    for k in range(n_lvl):
        L = l_fold >> k
        seg = l_seg >> k
        r = np.arange(L)[:, None]
        c = np.arange(L)[None, :]
        sh[k, 0, :L, :L] = ((c == r + 1) & (c % seg != 0))        # -> x[j-1]
        sh[k, 1, :L, :L] = ((c == r - 1) & (c % seg != seg - 1))  # -> x[j+1]

    pool = np.zeros((encoder_blocks, 2, l_fold, l_fold // 2), np.float32)
    for d in range(encoder_blocks):
        L = l_fold >> d
        r = np.arange(L)[:, None]
        c = np.arange(L // 2)[None, :]
        pool[d, 0, :L, :L // 2] = (r == 2 * c)
        pool[d, 1, :L, :L // 2] = (r == 2 * c + 1)

    ups = np.zeros((encoder_blocks, l_fold // 2, l_fold), np.float32)
    l_lat = l_fold >> encoder_blocks
    for u in range(encoder_blocks):
        lu = l_lat << u
        r = np.arange(lu)[:, None]
        c = np.arange(2 * lu)[None, :]
        ups[u, :lu, :2 * lu] = ((c == 2 * r) | (c == 2 * r + 1))

    return (jnp.asarray(sh, dtype), jnp.asarray(pool, dtype),
            jnp.asarray(ups, dtype))


def _default_num_steps(n):
    """v7x has 2 TensorCores/chip -> keep a 2-wide 'parallel' grid; v5e/v6e are
    single-TC, so fold the whole batch into the lane axis (grid=(1,))."""
    try:
        kind = jax.devices()[0].device_kind.lower()
    except Exception:
        kind = ""
    if "v7" in kind and n % 2 == 0:
        return 2
    return 1


def _const_spec(shape):
    zeros = (0,) * len(shape)
    return pl.BlockSpec(shape, lambda g, _z=zeros: _z)


# ---------------------------------------------------------------------------
# pallas_call wrapper
# ---------------------------------------------------------------------------
def seq2seq_forward(w_all, b_all, sh_all, pool_all, up_all, x, *,
                    num_conv, encoder_blocks, out_ch, num_steps):
    N, C0, L = x.shape
    assert N % num_steps == 0 and L % (2 ** encoder_blocks) == 0
    G = num_steps
    B = N // G                                   # batch elems folded per step
    l_fold = B * L
    l_lat_fold = l_fold >> encoder_blocks
    c_rec = out_ch[-1]
    c_lat = out_ch[num_conv * (1 + encoder_blocks) - 1]

    # Fold batch into the lane axis: (N, C, L) -> (G, C, B*L)
    xf = (x.astype(jnp.float32)
          .reshape(G, B, C0, L).transpose(0, 2, 1, 3).reshape(G, C0, l_fold))

    kernel = functools.partial(_seq2seq_kernel, num_conv=num_conv,
                               encoder_blocks=encoder_blocks, out_ch=out_ch)

    rec, lat = pl.pallas_call(
        kernel,
        out_shape=(jax.ShapeDtypeStruct((G, c_rec, l_fold), jnp.float32),
                   jax.ShapeDtypeStruct((G, c_lat, l_lat_fold), jnp.float32)),
        grid=(G,),
        in_specs=[pl.BlockSpec((1, C0, l_fold), lambda g: (g, 0, 0)),
                  _const_spec(w_all.shape),      # all weights: one resident DMA
                  _const_spec(b_all.shape),      # all biases: one resident DMA
                  _const_spec(sh_all.shape),     # shift-tap matrices
                  _const_spec(pool_all.shape),   # maxpool selectors
                  _const_spec(up_all.shape)],    # upsample selectors
        out_specs=(pl.BlockSpec((1, c_rec, l_fold), lambda g: (g, 0, 0)),
                   pl.BlockSpec((1, c_lat, l_lat_fold), lambda g: (g, 0, 0))),
        compiler_params=pltpu.CompilerParams(
            dimension_semantics=("parallel",)),
    )(xf, w_all, b_all, sh_all, pool_all, up_all)

    # Un-fold the lane axis back to (N, C, L) on host/XLA side.
    x_rec = (rec.reshape(G, c_rec, B, L).transpose(0, 2, 1, 3)
             .reshape(N, c_rec, L))
    l_lat = L >> encoder_blocks
    x_lat = (lat.reshape(G, c_lat, B, l_lat).transpose(0, 2, 1, 3)
             .reshape(N, c_lat, l_lat))
    return x_rec, x_lat


# ---------------------------------------------------------------------------
# Pure-JAX reference (mirrors the kernel's bf16 rounding; f32 accumulation)
# ---------------------------------------------------------------------------
def _reference_forward(layers, x, *, num_conv, encoder_blocks):
    li = 0

    def conv(xs, relu=True):
        nonlocal li
        w3, b = layers[li]
        li += 1
        wb = w3.astype(jnp.bfloat16)
        xb = xs.astype(jnp.bfloat16)
        L = xs.shape[-1]
        xp = jnp.pad(xb, ((0, 0), (0, 0), (1, 1)))
        y = (jnp.einsum("oi,nil->nol", wb[0], xp[:, :, 0:L],
                        preferred_element_type=jnp.float32)
             + jnp.einsum("oi,nil->nol", wb[1], xp[:, :, 1:L + 1],
                          preferred_element_type=jnp.float32)
             + jnp.einsum("oi,nil->nol", wb[2], xp[:, :, 2:L + 2],
                          preferred_element_type=jnp.float32)
             + b[None, :, None])
        return jnp.maximum(y, 0.0) if relu else y

    def nconv(xs):
        xs = conv(xs)
        for _ in range(num_conv - 1):
            xs = conv(xs)
        return xs

    h = nconv(x)
    skips = [h]
    for _ in range(encoder_blocks):
        hb = h.astype(jnp.bfloat16).astype(jnp.float32)
        h = jnp.max(hb.reshape(h.shape[0], h.shape[1], -1, 2), axis=-1)
        h = nconv(h)
        skips.append(h)
    h_lat = h
    for skip in skips[:-1][::-1]:
        hu = jnp.repeat(h.astype(jnp.bfloat16).astype(jnp.float32), 2, axis=-1)
        h = nconv(jnp.concatenate([skip, hu], axis=1))
    h_rec = conv(h, relu=False)
    return h_rec, h_lat


# ---------------------------------------------------------------------------
# Parameter init (deterministic, PyTorch-Conv1d-style uniform bounds)
# ---------------------------------------------------------------------------
def _conv_params(key, c_in, c_out, k):
    k_w, k_b = jax.random.split(key)
    bound = 1.0 / math.sqrt(c_in * k)
    w = jax.random.uniform(k_w, (c_out, c_in, k), jnp.float32, -bound, bound)
    b = jax.random.uniform(k_b, (c_out,), jnp.float32, -bound, bound)
    return w, b


def _nconv_params(key, c_in, c_out, num_conv, k=3):
    keys = jax.random.split(key, num_conv)
    layers = []
    for i in range(num_conv):
        cin = c_in if i == 0 else c_out
        layers.append(_conv_params(keys[i], cin, c_out, k))
    return layers


def init_params(key, embedding_dim, features, num_conv):
    rev_features = features[::-1]
    encoder_blocks = len(features) - 1
    keys = jax.random.split(key, 2 + encoder_blocks + (len(rev_features) - 1))
    it = iter(range(len(keys)))
    params = {}
    params["inc"] = _nconv_params(keys[next(it)], embedding_dim, features[0],
                                  num_conv)
    params["down"] = [
        _nconv_params(keys[next(it)], features[i], features[i + 1], num_conv)
        for i in range(encoder_blocks)
    ]
    # UpBlock conv input = skip channels (rev[i+1]) + upsampled channels (rev[i])
    params["up"] = [
        _nconv_params(keys[next(it)], rev_features[i + 1] + rev_features[i],
                      rev_features[i + 1], num_conv)
        for i in range(len(rev_features) - 1)
    ]
    params["outc"] = _conv_params(keys[next(it)], features[0], embedding_dim, 1)
    return params


if __name__ == "__main__":
    # Architecture exactly as Seq2Seq.build_graph: features = [4,4,4,4,8,8]
    embedding_dim = 4
    num_conv = 2
    features = [4] + [4] * 3 + [8] * 2
    encoder_blocks = len(features) - 1           # 5 -> L_min = 128 / 32 = 4

    key = jax.random.PRNGKey(0)
    k_params, k_x = jax.random.split(key)
    params = init_params(k_params, embedding_dim, features, num_conv)

    N, L = 2, 128                                # L = 128 as implied by build_graph
    x = jax.random.normal(k_x, (N, embedding_dim, L), jnp.float32)

    layers = _fold_layers(params)                # BN folded, forward order
    w_all, b_all, out_ch = _pack_layers(layers)  # two resident arrays

    G = _default_num_steps(N)                    # 2 on v7x, 1 on v5e/v6e
    B = N // G
    sh_all, pool_all, up_all = _build_selection_constants(B * L, L,
                                                          encoder_blocks)

    fwd = jax.jit(functools.partial(
        seq2seq_forward, num_conv=num_conv, encoder_blocks=encoder_blocks,
        out_ch=out_ch, num_steps=G))
    x_rec, x_latent = fwd(w_all, b_all, sh_all, pool_all, up_all, x)
    jax.block_until_ready((x_rec, x_latent))

    assert x_rec.shape == (N, embedding_dim, L)
    assert x_latent.shape == (N, features[-1], L // (2 ** encoder_blocks))
    assert bool(jnp.all(jnp.isfinite(x_rec)))
    assert bool(jnp.all(jnp.isfinite(x_latent)))

    # Tolerance-based validation against a pure-JAX reference (same bf16
    # weight rounding / f32 accumulation); not bit-exact across MXU paths.
    ref_fn = jax.jit(functools.partial(_reference_forward, num_conv=num_conv,
                                       encoder_blocks=encoder_blocks))
    r_rec, r_lat = ref_fn(layers, x)
    jax.block_until_ready((r_rec, r_lat))
    assert float(jnp.max(jnp.abs(x_rec - r_rec))) < 1e-2
    assert float(jnp.max(jnp.abs(x_latent - r_lat))) < 1e-2

    print("KERNEL_OK")
</pallas_src>

<mosaic_0001>
module attributes {stable_mosaic.version = 11 : i64} {
  func.func @_seq2seq_kernel(%arg0: i32, %arg1: memref<1x4x256xf32, #tpu.memory_space<vmem>>, %arg2: memref<23x3x8x16xbf16, #tpu.memory_space<vmem>>, %arg3: memref<23x8x1xf32, #tpu.memory_space<vmem>>, %arg4: memref<6x2x256x256xbf16, #tpu.memory_space<vmem>>, %arg5: memref<5x2x256x128xbf16, #tpu.memory_space<vmem>>, %arg6: memref<5x128x256xbf16, #tpu.memory_space<vmem>>, %arg7: memref<1x4x256xf32, #tpu.memory_space<vmem>>, %arg8: memref<1x8x8xf32, #tpu.memory_space<vmem>>) attributes {dimension_semantics = [#tpu.dimension_semantics<parallel>], iteration_bounds = array<i64: 1>, scalar_prefetch = 0 : i64, scratch_operands = 0 : i64, tpu.core_type = #tpu.core_type<tc>, window_params = [{transform_indices = @transform_0, window_bounds = array<i64: 1, 4, 256>}, {pipeline_mode = #tpu.pipeline_mode<synchronous>, transform_indices = @transform_1, window_bounds = array<i64: 23, 3, 8, 16>}, {pipeline_mode = #tpu.pipeline_mode<synchronous>, transform_indices = @transform_2, window_bounds = array<i64: 23, 8, 1>}, {pipeline_mode = #tpu.pipeline_mode<synchronous>, transform_indices = @transform_3, window_bounds = array<i64: 6, 2, 256, 256>}, {pipeline_mode = #tpu.pipeline_mode<synchronous>, transform_indices = @transform_4, window_bounds = array<i64: 5, 2, 256, 128>}, {pipeline_mode = #tpu.pipeline_mode<synchronous>, transform_indices = @transform_5, window_bounds = array<i64: 5, 128, 256>}, {transform_indices = @transform_6, window_bounds = array<i64: 1, 4, 256>}, {transform_indices = @transform_7, window_bounds = array<i64: 1, 8, 8>}]} {
    %c0 = arith.constant 0 : index
    %c0_0 = arith.constant 0 : index
    %c0_1 = arith.constant 0 : index
    %0 = vector.load %arg1[%c0, %c0_0, %c0_1] : memref<1x4x256xf32, #tpu.memory_space<vmem>>, vector<1x4x256xf32>
    %1 = vector.shape_cast %0 : vector<1x4x256xf32> to vector<4x256xf32>
    %c0_2 = arith.constant 0 : index
    %c0_3 = arith.constant 0 : index
    %c0_4 = arith.constant 0 : index
    %c0_5 = arith.constant 0 : index
    %2 = vector.load %arg4[%c0_2, %c0_3, %c0_4, %c0_5] : memref<6x2x256x256xbf16, #tpu.memory_space<vmem>>, vector<1x1x256x256xbf16>
    %3 = vector.shape_cast %2 : vector<1x1x256x256xbf16> to vector<256x256xbf16>
    %c0_6 = arith.constant 0 : index
    %c1 = arith.constant 1 : index
    %c0_7 = arith.constant 0 : index
    %c0_8 = arith.constant 0 : index
    %4 = vector.load %arg4[%c0_6, %c1, %c0_7, %c0_8] : memref<6x2x256x256xbf16, #tpu.memory_space<vmem>>, vector<1x1x256x256xbf16>
    %5 = vector.shape_cast %4 : vector<1x1x256x256xbf16> to vector<256x256xbf16>
    %c0_9 = arith.constant 0 : index
    %c0_10 = arith.constant 0 : index
    %c0_11 = arith.constant 0 : index
    %6 = vector.load %arg3[%c0_9, %c0_10, %c0_11] : memref<23x8x1xf32, #tpu.memory_space<vmem>>, vector<1x4x1xf32>
    %7 = vector.shape_cast %6 : vector<1x4x1xf32> to vector<4x1xf32>
    %8 = arith.truncf %1 : vector<4x256xf32> to vector<4x256xbf16>
    %cst = arith.constant dense<0.000000e+00> : vector<4x256xf32>
    %9 = tpu.matmul %8, %3, %cst {dimension_numbers = #tpu.dot_dimension_numbers<[1], [0], [0], [1], [0, 0, 1, 1], [], []>} : vector<4x256xbf16>, vector<256x256xbf16>, vector<4x256xf32> -> vector<4x256xf32>
    %10 = arith.truncf %9 : vector<4x256xf32> to vector<4x256xbf16>
    %cst_12 = arith.constant dense<0.000000e+00> : vector<4x256xf32>
    %11 = tpu.matmul %8, %5, %cst_12 {dimension_numbers = #tpu.dot_dimension_numbers<[1], [0], [0], [1], [0, 0, 1, 1], [], []>} : vector<4x256xbf16>, vector<256x256xbf16>, vector<4x256xf32> -> vector<4x256xf32>
    %12 = arith.truncf %11 : vector<4x256xf32> to vector<4x256xbf16>
    %c0_13 = arith.constant 0 : index
    %c0_14 = arith.constant 0 : index
    %c0_15 = arith.constant 0 : index
    %c0_16 = arith.constant 0 : index
    %13 = vector.load %arg2[%c0_13, %c0_14, %c0_15, %c0_16] : memref<23x3x8x16xbf16, #tpu.memory_space<vmem>>, vector<1x1x4x4xbf16>
    %14 = vector.shape_cast %13 : vector<1x1x4x4xbf16> to vector<4x4xbf16>
    %cst_17 = arith.constant dense<0.000000e+00> : vector<4x256xf32>
    %15 = tpu.matmul %14, %10, %cst_17 {dimension_numbers = #tpu.dot_dimension_numbers<[1], [0], [0], [1], [0, 0, 1, 1], [], []>} : vector<4x4xbf16>, vector<4x256xbf16>, vector<4x256xf32> -> vector<4x256xf32>
    %16 = vector.broadcast %7 : vector<4x1xf32> to vector<4x256xf32>
    %17 = arith.addf %16, %15 : vector<4x256xf32>
    %c0_18 = arith.constant 0 : index
    %c1_19 = arith.constant 1 : index
    %c0_20 = arith.constant 0 : index
    %c0_21 = arith.constant 0 : index
    %18 = vector.load %arg2[%c0_18, %c1_19, %c0_20, %c0_21] : memref<23x3x8x16xbf16, #tpu.memory_space<vmem>>, vector<1x1x4x4xbf16>
    %19 = vector.shape_cast %18 : vector<1x1x4x4xbf16> to vector<4x4xbf16>
    %cst_22 = arith.constant dense<0.000000e+00> : vector<4x256xf32>
    %20 = tpu.matmul %19, %8, %cst_22 {dimension_numbers = #tpu.dot_dimension_numbers<[1], [0], [0], [1], [0, 0, 1, 1], [], []>} : vector<4x4xbf16>, vector<4x256xbf16>, vector<4x256xf32> -> vector<4x256xf32>
    %21 = arith.addf %17, %20 : vector<4x256xf32>
    %c0_23 = arith.constant 0 : index
    %c2 = arith.constant 2 : index
    %c0_24 = arith.constant 0 : index
    %c0_25 = arith.constant 0 : index
    %22 = vector.load %arg2[%c0_23, %c2, %c0_24, %c0_25] : memref<23x3x8x16xbf16, #tpu.memory_space<vmem>>, vector<1x1x4x4xbf16>
    %23 = vector.shape_cast %22 : vector<1x1x4x4xbf16> to vector<4x4xbf16>
    %cst_26 = arith.constant dense<0.000000e+00> : vector<4x256xf32>
    %24 = tpu.matmul %23, %12, %cst_26 {dimension_numbers = #tpu.dot_dimension_numbers<[1], [0], [0], [1], [0, 0, 1, 1], [], []>} : vector<4x4xbf16>, vector<4x256xbf16>, vector<4x256xf32> -> vector<4x256xf32>
    %25 = arith.addf %21, %24 : vector<4x256xf32>
    %cst_27 = arith.constant 0.000000e+00 : f32
    %26 = vector.broadcast %cst_27 : f32 to vector<4x256xf32>
    %27 = arith.maximumf %25, %26 : vector<4x256xf32>
    %c0_28 = arith.constant 0 : index
    %c0_29 = arith.constant 0 : index
    %c0_30 = arith.constant 0 : index
    %c0_31 = arith.constant 0 : index
    %28 = vector.load %arg4[%c0_28, %c0_29, %c0_30, %c0_31] : memref<6x2x256x256xbf16, #tpu.memory_space<vmem>>, vector<1x1x256x256xbf16>
    %29 = vector.shape_cast %28 : vector<1x1x256x256xbf16> to vector<256x256xbf16>
    %c0_32 = arith.constant 0 : index
    %c1_33 = arith.constant 1 : index
    %c0_34 = arith.constant 0 : index
    %c0_35 = arith.constant 0 : index
    %30 = vector.load %arg4[%c0_32, %c1_33, %c0_34, %c0_35] : memref<6x2x256x256xbf16, #tpu.memory_space<vmem>>, vector<1x1x256x256xbf16>
    %31 = vector.shape_cast %30 : vector<1x1x256x256xbf16> to vector<256x256xbf16>
    %c1_36 = arith.constant 1 : index
    %c0_37 = arith.constant 0 : index
    %c0_38 = arith.constant 0 : index
    %32 = vector.load %arg3[%c1_36, %c0_37, %c0_38] : memref<23x8x1xf32, #tpu.memory_space<vmem>>, vector<1x4x1xf32>
    %33 = vector.shape_cast %32 : vector<1x4x1xf32> to vector<4x1xf32>
    %34 = arith.truncf %27 : vector<4x256xf32> to vector<4x256xbf16>
    %cst_39 = arith.constant dense<0.000000e+00> : vector<4x256xf32>
    %35 = tpu.matmul %34, %29, %cst_39 {dimension_numbers = #tpu.dot_dimension_numbers<[1], [0], [0], [1], [0, 0, 1, 1], [], []>} : vector<4x256xbf16>, vector<256x256xbf16>, vector<4x256xf32> -> vector<4x256xf32>
    %36 = arith.truncf %35 : vector<4x256xf32> to vector<4x256xbf16>
    %cst_40 = arith.constant dense<0.000000e+00> : vector<4x256xf32>
    %37 = tpu.matmul %34, %31, %cst_40 {dimension_numbers = #tpu.dot_dimension_numbers<[1], [0], [0], [1], [0, 0, 1, 1], [], []>} : vector<4x256xbf16>, vector<256x256xbf16>, vector<4x256xf32> -> vector<4x256xf32>
    %38 = arith.truncf %37 : vector<4x256xf32> to vector<4x256xbf16>
    %c1_41 = arith.constant 1 : index
    %c0_42 = arith.constant 0 : index
    %c0_43 = arith.constant 0 : index
    %c0_44 = arith.constant 0 : index
    %39 = vector.load %arg2[%c1_41, %c0_42, %c0_43, %c0_44] : memref<23x3x8x16xbf16, #tpu.memory_space<vmem>>, vector<1x1x4x4xbf16>
    %40 = vector.shape_cast %39 : vector<1x1x4x4xbf16> to vector<4x4xbf16>
    %cst_45 = arith.constant dense<0.000000e+00> : vector<4x256xf32>
    %41 = tpu.matmul %40, %36, %cst_45 {dimension_numbers = #tpu.dot_dimension_numbers<[1], [0], [0], [1], [0, 0, 1, 1], [], []>} : vector<4x4xbf16>, vector<4x256xbf16>, vector<4x256xf32> -> vector<4x256xf32>
    %42 = vector.broadcast %33 : vector<4x1xf32> to vector<4x256xf32>
    %43 = arith.addf %42, %41 : vector<4x256xf32>
    %c1_46 = arith.constant 1 : index
    %c1_47 = arith.constant 1 : index
    %c0_48 = arith.constant 0 : index
    %c0_49 = arith.constant 0 : index
    %44 = vector.load %arg2[%c1_46, %c1_47, %c0_48, %c0_49] : memref<23x3x8x16xbf16, #tpu.memory_space<vmem>>, vector<1x1x4x4xbf16>
    %45 = vector.shape_cast %44 : vector<1x1x4x4xbf16> to vector<4x4xbf16>
    %cst_50 = arith.constant dense<0.000000e+00> : vector<4x256xf32>
    %46 = tpu.matmul %45, %34, %cst_50 {dimension_numbers = #tpu.dot_dimension_numbers<[1], [0], [0], [1], [0, 0, 1, 1], [], []>} : vector<4x4xbf16>, vector<4x256xbf16>, vector<4x256xf32> -> vector<4x256xf32>
    %47 = arith.addf %43, %46 : vector<4x256xf32>
    %c1_51 = arith.constant 1 : index
    %c2_52 = arith.constant 2 : index
    %c0_53 = arith.constant 0 : index
    %c0_54 = arith.constant 0 : index
    %48 = vector.load %arg2[%c1_51, %c2_52, %c0_53, %c0_54] : memref<23x3x8x16xbf16, #tpu.memory_space<vmem>>, vector<1x1x4x4xbf16>
    %49 = vector.shape_cast %48 : vector<1x1x4x4xbf16> to vector<4x4xbf16>
    %cst_55 = arith.constant dense<0.000000e+00> : vector<4x256xf32>
    %50 = tpu.matmul %49, %38, %cst_55 {dimension_numbers = #tpu.dot_dimension_numbers<[1], [0], [0], [1], [0, 0, 1, 1], [], []>} : vector<4x4xbf16>, vector<4x256xbf16>, vector<4x256xf32> -> vector<4x256xf32>
    %51 = arith.addf %47, %50 : vector<4x256xf32>
    %cst_56 = arith.constant 0.000000e+00 : f32
    %52 = vector.broadcast %cst_56 : f32 to vector<4x256xf32>
    %53 = arith.maximumf %51, %52 : vector<4x256xf32>
    %54 = arith.truncf %53 : vector<4x256xf32> to vector<4x256xbf16>
    %c0_57 = arith.constant 0 : index
    %c0_58 = arith.constant 0 : index
    %c0_59 = arith.constant 0 : index
    %c0_60 = arith.constant 0 : index
    %55 = vector.load %arg5[%c0_57, %c0_58, %c0_59, %c0_60] : memref<5x2x256x128xbf16, #tpu.memory_space<vmem>>, vector<1x1x256x128xbf16>
    %56 = vector.shape_cast %55 : vector<1x1x256x128xbf16> to vector<256x128xbf16>
    %cst_61 = arith.constant dense<0.000000e+00> : vector<4x128xf32>
    %57 = tpu.matmul %54, %56, %cst_61 {dimension_numbers = #tpu.dot_dimension_numbers<[1], [0], [0], [1], [0, 0, 1, 1], [], []>} : vector<4x256xbf16>, vector<256x128xbf16>, vector<4x128xf32> -> vector<4x128xf32>
    %c0_62 = arith.constant 0 : index
    %c1_63 = arith.constant 1 : index
    %c0_64 = arith.constant 0 : index
    %c0_65 = arith.constant 0 : index
    %58 = vector.load %arg5[%c0_62, %c1_63, %c0_64, %c0_65] : memref<5x2x256x128xbf16, #tpu.memory_space<vmem>>, vector<1x1x256x128xbf16>
    %59 = vector.shape_cast %58 : vector<1x1x256x128xbf16> to vector<256x128xbf16>
    %cst_66 = arith.constant dense<0.000000e+00> : vector<4x128xf32>
    %60 = tpu.matmul %54, %59, %cst_66 {dimension_numbers = #tpu.dot_dimension_numbers<[1], [0], [0], [1], [0, 0, 1, 1], [], []>} : vector<4x256xbf16>, vector<256x128xbf16>, vector<4x128xf32> -> vector<4x128xf32>
    %61 = arith.maximumf %57, %60 : vector<4x128xf32>
    %c1_67 = arith.constant 1 : index
    %c0_68 = arith.constant 0 : index
    %c0_69 = arith.constant 0 : index
    %c0_70 = arith.constant 0 : index
    %62 = vector.load %arg4[%c1_67, %c0_68, %c0_69, %c0_70] : memref<6x2x256x256xbf16, #tpu.memory_space<vmem>>, vector<1x1x128x128xbf16>
    %63 = vector.shape_cast %62 : vector<1x1x128x128xbf16> to vector<128x128xbf16>
    %c1_71 = arith.constant 1 : index
    %c1_72 = arith.constant 1 : index
    %c0_73 = arith.constant 0 : index
    %c0_74 = arith.constant 0 : index
    %64 = vector.load %arg4[%c1_71, %c1_72, %c0_73, %c0_74] : memref<6x2x256x256xbf16, #tpu.memory_space<vmem>>, vector<1x1x128x128xbf16>
    %65 = vector.shape_cast %64 : vector<1x1x128x128xbf16> to vector<128x128xbf16>
    %c2_75 = arith.constant 2 : index
    %c0_76 = arith.constant 0 : index
    %c0_77 = arith.constant 0 : index
    %66 = vector.load %arg3[%c2_75, %c0_76, %c0_77] : memref<23x8x1xf32, #tpu.memory_space<vmem>>, vector<1x4x1xf32>
    %67 = vector.shape_cast %66 : vector<1x4x1xf32> to vector<4x1xf32>
    %68 = arith.truncf %61 : vector<4x128xf32> to vector<4x128xbf16>
    %cst_78 = arith.constant dense<0.000000e+00> : vector<4x128xf32>
    %69 = tpu.matmul %68, %63, %cst_78 {dimension_numbers = #tpu.dot_dimension_numbers<[1], [0], [0], [1], [0, 0, 1, 1], [], []>} : vector<4x128xbf16>, vector<128x128xbf16>, vector<4x128xf32> -> vector<4x128xf32>
    %70 = arith.truncf %69 : vector<4x128xf32> to vector<4x128xbf16>
    %cst_79 = arith.constant dense<0.000000e+00> : vector<4x128xf32>
    %71 = tpu.matmul %68, %65, %cst_79 {dimension_numbers = #tpu.dot_dimension_numbers<[1], [0], [0], [1], [0, 0, 1, 1], [], []>} : vector<4x128xbf16>, vector<128x128xbf16>, vector<4x128xf32> -> vector<4x128xf32>
    %72 = arith.truncf %71 : vector<4x128xf32> to vector<4x128xbf16>
    %c2_80 = arith.constant 2 : index
    %c0_81 = arith.constant 0 : index
    %c0_82 = arith.constant 0 : index
    %c0_83 = arith.constant 0 : index
    %73 = vector.load %arg2[%c2_80, %c0_81, %c0_82, %c0_83] : memref<23x3x8x16xbf16, #tpu.memory_space<vmem>>, vector<1x1x4x4xbf16>
    %74 = vector.shape_cast %73 : vector<1x1x4x4xbf16> to vector<4x4xbf16>
    %cst_84 = arith.constant dense<0.000000e+00> : vector<4x128xf32>
    %75 = tpu.matmul %74, %70, %cst_84 {dimension_numbers = #tpu.dot_dimension_numbers<[1], [0], [0], [1], [0, 0, 1, 1], [], []>} : vector<4x4xbf16>, vector<4x128xbf16>, vector<4x128xf32> -> vector<4x128xf32>
    %76 = vector.broadcast %67 : vector<4x1xf32> to vector<4x128xf32>
    %77 = arith.addf %76, %75 : vector<4x128xf32>
    %c2_85 = arith.constant 2 : index
    %c1_86 = arith.constant 1 : index
    %c0_87 = arith.constant 0 : index
    %c0_88 = arith.constant 0 : index
    %78 = vector.load %arg2[%c2_85, %c1_86, %c0_87, %c0_88] : memref<23x3x8x16xbf16, #tpu.memory_space<vmem>>, vector<1x1x4x4xbf16>
    %79 = vector.shape_cast %78 : vector<1x1x4x4xbf16> to vector<4x4xbf16>
    %cst_89 = arith.constant dense<0.000000e+00> : vector<4x128xf32>
    %80 = tpu.matmul %79, %68, %cst_89 {dimension_numbers = #tpu.dot_dimension_numbers<[1], [0], [0], [1], [0, 0, 1, 1], [], []>} : vector<4x4xbf16>, vector<4x128xbf16>, vector<4x128xf32> -> vector<4x128xf32>
    %81 = arith.addf %77, %80 : vector<4x128xf32>
    %c2_90 = arith.constant 2 : index
    %c2_91 = arith.constant 2 : index
    %c0_92 = arith.constant 0 : index
    %c0_93 = arith.constant 0 : index
    %82 = vector.load %arg2[%c2_90, %c2_91, %c0_92, %c0_93] : memref<23x3x8x16xbf16, #tpu.memory_space<vmem>>, vector<1x1x4x4xbf16>
    %83 = vector.shape_cast %82 : vector<1x1x4x4xbf16> to vector<4x4xbf16>
    %cst_94 = arith.constant dense<0.000000e+00> : vector<4x128xf32>
    %84 = tpu.matmul %83, %72, %cst_94 {dimension_numbers = #tpu.dot_dimension_numbers<[1], [0], [0], [1], [0, 0, 1, 1], [], []>} : vector<4x4xbf16>, vector<4x128xbf16>, vector<4x128xf32> -> vector<4x128xf32>
    %85 = arith.addf %81, %84 : vector<4x128xf32>
    %cst_95 = arith.constant 0.000000e+00 : f32
    %86 = vector.broadcast %cst_95 : f32 to vector<4x128xf32>
    %87 = arith.maximumf %85, %86 : vector<4x128xf32>
    %c1_96 = arith.constant 1 : index
    %c0_97 = arith.constant 0 : index
    %c0_98 = arith.constant 0 : index
    %c0_99 = arith.constant 0 : index
    %88 = vector.load %arg4[%c1_96, %c0_97, %c0_98, %c0_99] : memref<6x2x256x256xbf16, #tpu.memory_space<vmem>>, vector<1x1x128x128xbf16>
    %89 = vector.shape_cast %88 : vector<1x1x128x128xbf16> to vector<128x128xbf16>
    %c1_100 = arith.constant 1 : index
    %c1_101 = arith.constant 1 : index
    %c0_102 = arith.constant 0 : index
    %c0_103 = arith.constant 0 : index
    %90 = vector.load %arg4[%c1_100, %c1_101, %c0_102, %c0_103] : memref<6x2x256x256xbf16, #tpu.memory_space<vmem>>, vector<1x1x128x128xbf16>
    %91 = vector.shape_cast %90 : vector<1x1x128x128xbf16> to vector<128x128xbf16>
    %c3 = arith.constant 3 : index
    %c0_104 = arith.constant 0 : index
    %c0_105 = arith.constant 0 : index
    %92 = vector.load %arg3[%c3, %c0_104, %c0_105] : memref<23x8x1xf32, #tpu.memory_space<vmem>>, vector<1x4x1xf32>
    %93 = vector.shape_cast %92 : vector<1x4x1xf32> to vector<4x1xf32>
    %94 = arith.truncf %87 : vector<4x128xf32> to vector<4x128xbf16>
    %cst_106 = arith.constant dense<0.000000e+00> : vector<4x128xf32>
    %95 = tpu.matmul %94, %89, %cst_106 {dimension_numbers = #tpu.dot_dimension_numbers<[1], [0], [0], [1], [0, 0, 1, 1], [], []>} : vector<4x128xbf16>, vector<128x128xbf16>, vector<4x128xf32> -> vector<4x128xf32>
    %96 = arith.truncf %95 : vector<4x128xf32> to vector<4x128xbf16>
    %cst_107 = arith.constant dense<0.000000e+00> : vector<4x128xf32>
    %97 = tpu.matmul %94, %91, %cst_107 {dimension_numbers = #tpu.dot_dimension_numbers<[1], [0], [0], [1], [0, 0, 1, 1], [], []>} : vector<4x128xbf16>, vector<128x128xbf16>, vector<4x128xf32> -> vector<4x128xf32>
    %98 = arith.truncf %97 : vector<4x128xf32> to vector<4x128xbf16>
    %c3_108 = arith.constant 3 : index
    %c0_109 = arith.constant 0 : index
    %c0_110 = arith.constant 0 : index
    %c0_111 = arith.constant 0 : index
    %99 = vector.load %arg2[%c3_108, %c0_109, %c0_110, %c0_111] : memref<23x3x8x16xbf16, #tpu.memory_space<vmem>>, vector<1x1x4x4xbf16>
    %100 = vector.shape_cast %99 : vector<1x1x4x4xbf16> to vector<4x4xbf16>
    %cst_112 = arith.constant dense<0.000000e+00> : vector<4x128xf32>
    %101 = tpu.matmul %100, %96, %cst_112 {dimension_numbers = #tpu.dot_dimension_numbers<[1], [0], [0], [1], [0, 0, 1, 1], [], []>} : vector<4x4xbf16>, vector<4x128xbf16>, vector<4x128xf32> -> vector<4x128xf32>
    %102 = vector.broadcast %93 : vector<4x1xf32> to vector<4x128xf32>
    %103 = arith.addf %102, %101 : vector<4x128xf32>
    %c3_113 = arith.constant 3 : index
    %c1_114 = arith.constant 1 : index
    %c0_115 = arith.constant 0 : index
    %c0_116 = arith.constant 0 : index
    %104 = vector.load %arg2[%c3_113, %c1_114, %c0_115, %c0_116] : memref<23x3x8x16xbf16, #tpu.memory_space<vmem>>, vector<1x1x4x4xbf16>
    %105 = vector.shape_cast %104 : vector<1x1x4x4xbf16> to vector<4x4xbf16>
    %cst_117 = arith.constant dense<0.000000e+00> : vector<4x128xf32>
    %106 = tpu.matmul %105, %94, %cst_117 {dimension_numbers = #tpu.dot_dimension_numbers<[1], [0], [0], [1], [0, 0, 1, 1], [], []>} : vector<4x4xbf16>, vector<4x128xbf16>, vector<4x128xf32> -> vector<4x128xf32>
    %107 = arith.addf %103, %106 : vector<4x128xf32>
    %c3_118 = arith.constant 3 : index
    %c2_119 = arith.constant 2 : index
    %c0_120 = arith.constant 0 : index
    %c0_121 = arith.constant 0 : index
    %108 = vector.load %arg2[%c3_118, %c2_119, %c0_120, %c0_121] : memref<23x3x8x16xbf16, #tpu.memory_space<vmem>>, vector<1x1x4x4xbf16>
    %109 = vector.shape_cast %108 : vector<1x1x4x4xbf16> to vector<4x4xbf16>
    %cst_122 = arith.constant dense<0.000000e+00> : vector<4x128xf32>
    %110 = tpu.matmul %109, %98, %cst_122 {dimension_numbers = #tpu.dot_dimension_numbers<[1], [0], [0], [1], [0, 0, 1, 1], [], []>} : vector<4x4xbf16>, vector<4x128xbf16>, vector<4x128xf32> -> vector<4x128xf32>
    %111 = arith.addf %107, %110 : vector<4x128xf32>
    %cst_123 = arith.constant 0.000000e+00 : f32
    %112 = vector.broadcast %cst_123 : f32 to vector<4x128xf32>
    %113 = arith.maximumf %111, %112 : vector<4x128xf32>
    %114 = arith.truncf %113 : vector<4x128xf32> to vector<4x128xbf16>
    %c1_124 = arith.constant 1 : index
    %c0_125 = arith.constant 0 : index
    %c0_126 = arith.constant 0 : index
    %c0_127 = arith.constant 0 : index
    %115 = vector.load %arg5[%c1_124, %c0_125, %c0_126, %c0_127] : memref<5x2x256x128xbf16, #tpu.memory_space<vmem>>, vector<1x1x128x64xbf16>
    %116 = vector.shape_cast %115 : vector<1x1x128x64xbf16> to vector<128x64xbf16>
    %cst_128 = arith.constant dense<0.000000e+00> : vector<4x64xf32>
    %117 = tpu.matmul %114, %116, %cst_128 {dimension_numbers = #tpu.dot_dimension_numbers<[1], [0], [0], [1], [0, 0, 1, 1], [], []>} : vector<4x128xbf16>, vector<128x64xbf16>, vector<4x64xf32> -> vector<4x64xf32>
    %c1_129 = arith.constant 1 : index
    %c1_130 = arith.constant 1 : index
    %c0_131 = arith.constant 0 : index
    %c0_132 = arith.constant 0 : index
    %118 = vector.load %arg5[%c1_129, %c1_130, %c0_131, %c0_132] : memref<5x2x256x128xbf16, #tpu.memory_space<vmem>>, vector<1x1x128x64xbf16>
    %119 = vector.shape_cast %118 : vector<1x1x128x64xbf16> to vector<128x64xbf16>
    %cst_133 = arith.constant dense<0.000000e+00> : vector<4x64xf32>
    %120 = tpu.matmul %114, %119, %cst_133 {dimension_numbers = #tpu.dot_dimension_numbers<[1], [0], [0], [1], [0, 0, 1, 1], [], []>} : vector<4x128xbf16>, vector<128x64xbf16>, vector<4x64xf32> -> vector<4x64xf32>
    %121 = arith.maximumf %117, %120 : vector<4x64xf32>
    %c2_134 = arith.constant 2 : index
    %c0_135 = arith.constant 0 : index
    %c0_136 = arith.constant 0 : index
    %c0_137 = arith.constant 0 : index
    %122 = vector.load %arg4[%c2_134, %c0_135, %c0_136, %c0_137] : memref<6x2x256x256xbf16, #tpu.memory_space<vmem>>, vector<1x1x64x64xbf16>
    %123 = vector.shape_cast %122 : vector<1x1x64x64xbf16> to vector<64x64xbf16>
    %c2_138 = arith.constant 2 : index
    %c1_139 = arith.constant 1 : index
    %c0_140 = arith.constant 0 : index
    %c0_141 = arith.constant 0 : index
    %124 = vector.load %arg4[%c2_138, %c1_139, %c0_140, %c0_141] : memref<6x2x256x256xbf16, #tpu.memory_space<vmem>>, vector<1x1x64x64xbf16>
    %125 = vector.shape_cast %124 : vector<1x1x64x64xbf16> to vector<64x64xbf16>
    %c4 = arith.constant 4 : index
    %c0_142 = arith.constant 0 : index
    %c0_143 = arith.constant 0 : index
    %126 = vector.load %arg3[%c4, %c0_142, %c0_143] : memref<23x8x1xf32, #tpu.memory_space<vmem>>, vector<1x4x1xf32>
    %127 = vector.shape_cast %126 : vector<1x4x1xf32> to vector<4x1xf32>
    %128 = arith.truncf %121 : vector<4x64xf32> to vector<4x64xbf16>
    %cst_144 = arith.constant dense<0.000000e+00> : vector<4x64xf32>
    %129 = tpu.matmul %128, %123, %cst_144 {dimension_numbers = #tpu.dot_dimension_numbers<[1], [0], [0], [1], [0, 0, 1, 1], [], []>} : vector<4x64xbf16>, vector<64x64xbf16>, vector<4x64xf32> -> vector<4x64xf32>
    %130 = arith.truncf %129 : vector<4x64xf32> to vector<4x64xbf16>
    %cst_145 = arith.constant dense<0.000000e+00> : vector<4x64xf32>
    %131 = tpu.matmul %128, %125, %cst_145 {dimension_numbers = #tpu.dot_dimension_numbers<[1], [0], [0], [1], [0, 0, 1, 1], [], []>} : vector<4x64xbf16>, vector<64x64xbf16>, vector<4x64xf32> -> vector<4x64xf32>
    %132 = arith.truncf %131 : vector<4x64xf32> to vector<4x64xbf16>
    %c4_146 = arith.constant 4 : index
    %c0_147 = arith.constant 0 : index
    %c0_148 = arith.constant 0 : index
    %c0_149 = arith.constant 0 : index
    %133 = vector.load %arg2[%c4_146, %c0_147, %c0_148, %c0_149] : memref<23x3x8x16xbf16, #tpu.memory_space<vmem>>, vector<1x1x4x4xbf16>
    %134 = vector.shape_cast %133 : vector<1x1x4x4xbf16> to vector<4x4xbf16>
    %cst_150 = arith.constant dense<0.000000e+00> : vector<4x64xf32>
    %135 = tpu.matmul %134, %130, %cst_150 {dimension_numbers = #tpu.dot_dimension_numbers<[1], [0], [0], [1], [0, 0, 1, 1], [], []>} : vector<4x4xbf16>, vector<4x64xbf16>, vector<4x64xf32> -> vector<4x64xf32>
    %136 = vector.broadcast %127 : vector<4x1xf32> to vector<4x64xf32>
    %137 = arith.addf %136, %135 : vector<4x64xf32>
    %c4_151 = arith.constant 4 : index
    %c1_152 = arith.constant 1 : index
    %c0_153 = arith.constant 0 : index
    %c0_154 = arith.constant 0 : index
    %138 = vector.load %arg2[%c4_151, %c1_152, %c0_153, %c0_154] : memref<23x3x8x16xbf16, #tpu.memory_space<vmem>>, vector<1x1x4x4xbf16>
    %139 = vector.shape_cast %138 : vector<1x1x4x4xbf16> to vector<4x4xbf16>
    %cst_155 = arith.constant dense<0.000000e+00> : vector<4x64xf32>
    %140 = tpu.matmul %139, %128, %cst_155 {dimension_numbers = #tpu.dot_dimension_numbers<[1], [0], [0], [1], [0, 0, 1, 1], [], []>} : vector<4x4xbf16>, vector<4x64xbf16>, vector<4x64xf32> -> vector<4x64xf32>
    %141 = arith.addf %137, %140 : vector<4x64xf32>
    %c4_156 = arith.constant 4 : index
    %c2_157 = arith.constant 2 : index
    %c0_158 = arith.constant 0 : index
    %c0_159 = arith.constant 0 : index
    %142 = vector.load %arg2[%c4_156, %c2_157, %c0_158, %c0_159] : memref<23x3x8x16xbf16, #tpu.memory_space<vmem>>, vector<1x1x4x4xbf16>
    %143 = vector.shape_cast %142 : vector<1x1x4x4xbf16> to vector<4x4xbf16>
    %cst_160 = arith.constant dense<0.000000e+00> : vector<4x64xf32>
    %144 = tpu.matmul %143, %132, %cst_160 {dimension_numbers = #tpu.dot_dimension_numbers<[1], [0], [0], [1], [0, 0, 1, 1], [], []>} : vector<4x4xbf16>, vector<4x64xbf16>, vector<4x64xf32> -> vector<4x64xf32>
    %145 = arith.addf %141, %144 : vector<4x64xf32>
    %cst_161 = arith.constant 0.000000e+00 : f32
    %146 = vector.broadcast %cst_161 : f32 to vector<4x64xf32>
    %147 = arith.maximumf %145, %146 : vector<4x64xf32>
    %c2_162 = arith.constant 2 : index
    %c0_163 = arith.constant 0 : index
    %c0_164 = arith.constant 0 : index
    %c0_165 = arith.constant 0 : index
    %148 = vector.load %arg4[%c2_162, %c0_163, %c0_164, %c0_165] : memref<6x2x256x256xbf16, #tpu.memory_space<vmem>>, vector<1x1x64x64xbf16>
    %149 = vector.shape_cast %148 : vector<1x1x64x64xbf16> to vector<64x64xbf16>
    %c2_166 = arith.constant 2 : index
    %c1_167 = arith.constant 1 : index
    %c0_168 = arith.constant 0 : index
    %c0_169 = arith.constant 0 : index
    %150 = vector.load %arg4[%c2_166, %c1_167, %c0_168, %c0_169] : memref<6x2x256x256xbf16, #tpu.memory_space<vmem>>, vector<1x1x64x64xbf16>
    %151 = vector.shape_cast %150 : vector<1x1x64x64xbf16> to vector<64x64xbf16>
    %c5 = arith.constant 5 : index
    %c0_170 = arith.constant 0 : index
    %c0_171 = arith.constant 0 : index
    %152 = vector.load %arg3[%c5, %c0_170, %c0_171] : memref<23x8x1xf32, #tpu.memory_space<vmem>>, vector<1x4x1xf32>
    %153 = vector.shape_cast %152 : vector<1x4x1xf32> to vector<4x1xf32>
    %154 = arith.truncf %147 : vector<4x64xf32> to vector<4x64xbf16>
    %cst_172 = arith.constant dense<0.000000e+00> : vector<4x64xf32>
    %155 = tpu.matmul %154, %149, %cst_172 {dimension_numbers = #tpu.dot_dimension_numbers<[1], [0], [0], [1], [0, 0, 1, 1], [], []>} : vector<4x64xbf16>, vector<64x64xbf16>, vector<4x64xf32> -> vector<4x64xf32>
    %156 = arith.truncf %155 : vector<4x64xf32> to vector<4x64xbf16>
    %cst_173 = arith.constant dense<0.000000e+00> : vector<4x64xf32>
    %157 = tpu.matmul %154, %151, %cst_173 {dimension_numbers = #tpu.dot_dimension_numbers<[1], [0], [0], [1], [0, 0, 1, 1], [], []>} : vector<4x64xbf16>, vector<64x64xbf16>, vector<4x64xf32> -> vector<4x64xf32>
    %158 = arith.truncf %157 : vector<4x64xf32> to vector<4x64xbf16>
    %c5_174 = arith.constant 5 : index
    %c0_175 = arith.constant 0 : index
    %c0_176 = arith.constant 0 : index
    %c0_177 = arith.constant 0 : index
    %159 = vector.load %arg2[%c5_174, %c0_175, %c0_176, %c0_177] : memref<23x3x8x16xbf16, #tpu.memory_space<vmem>>, vector<1x1x4x4xbf16>
    %160 = vector.shape_cast %159 : vector<1x1x4x4xbf16> to vector<4x4xbf16>
    %cst_178 = arith.constant dense<0.000000e+00> : vector<4x64xf32>
    %161 = tpu.matmul %160, %156, %cst_178 {dimension_numbers = #tpu.dot_dimension_numbers<[1], [0], [0], [1], [0, 0, 1, 1], [], []>} : vector<4x4xbf16>, vector<4x64xbf16>, vector<4x64xf32> -> vector<4x64xf32>
    %162 = vector.broadcast %153 : vector<4x1xf32> to vector<4x64xf32>
    %163 = arith.addf %162, %161 : vector<4x64xf32>
    %c5_179 = arith.constant 5 : index
    %c1_180 = arith.constant 1 : index
    %c0_181 = arith.constant 0 : index
    %c0_182 = arith.constant 0 : index
    %164 = vector.load %arg2[%c5_179, %c1_180, %c0_181, %c0_182] : memref<23x3x8x16xbf16, #tpu.memory_space<vmem>>, vector<1x1x4x4xbf16>
    %165 = vector.shape_cast %164 : vector<1x1x4x4xbf16> to vector<4x4xbf16>
    %cst_183 = arith.constant dense<0.000000e+00> : vector<4x64xf32>
    %166 = tpu.matmul %165, %154, %cst_183 {dimension_numbers = #tpu.dot_dimension_numbers<[1], [0], [0], [1], [0, 0, 1, 1], [], []>} : vector<4x4xbf16>, vector<4x64xbf16>, vector<4x64xf32> -> vector<4x64xf32>
    %167 = arith.addf %163, %166 : vector<4x64xf32>
    %c5_184 = arith.constant 5 : index
    %c2_185 = arith.constant 2 : index
    %c0_186 = arith.constant 0 : index
    %c0_187 = arith.constant 0 : index
    %168 = vector.load %arg2[%c5_184, %c2_185, %c0_186, %c0_187] : memref<23x3x8x16xbf16, #tpu.memory_space<vmem>>, vector<1x1x4x4xbf16>
    %169 = vector.shape_cast %168 : vector<1x1x4x4xbf16> to vector<4x4xbf16>
    %cst_188 = arith.constant dense<0.000000e+00> : vector<4x64xf32>
    %170 = tpu.matmul %169, %158, %cst_188 {dimension_numbers = #tpu.dot_dimension_numbers<[1], [0], [0], [1], [0, 0, 1, 1], [], []>} : vector<4x4xbf16>, vector<4x64xbf16>, vector<4x64xf32> -> vector<4x64xf32>
    %171 = arith.addf %167, %170 : vector<4x64xf32>
    %cst_189 = arith.constant 0.000000e+00 : f32
    %172 = vector.broadcast %cst_189 : f32 to vector<4x64xf32>
    %173 = arith.maximumf %171, %172 : vector<4x64xf32>
    %174 = arith.truncf %173 : vector<4x64xf32> to vector<4x64xbf16>
    %c2_190 = arith.constant 2 : index
    %c0_191 = arith.constant 0 : index
    %c0_192 = arith.constant 0 : index
    %c0_193 = arith.constant 0 : index
    %175 = vector.load %arg5[%c2_190, %c0_191, %c0_192, %c0_193] : memref<5x2x256x128xbf16, #tpu.memory_space<vmem>>, vector<1x1x64x32xbf16>
    %176 = vector.shape_cast %175 : vector<1x1x64x32xbf16> to vector<64x32xbf16>
    %cst_194 = arith.constant dense<0.000000e+00> : vector<4x32xf32>
    %177 = tpu.matmul %174, %176, %cst_194 {dimension_numbers = #tpu.dot_dimension_numbers<[1], [0], [0], [1], [0, 0, 1, 1], [], []>} : vector<4x64xbf16>, vector<64x32xbf16>, vector<4x32xf32> -> vector<4x32xf32>
    %c2_195 = arith.constant 2 : index
    %c1_196 = arith.constant 1 : index
    %c0_197 = arith.constant 0 : index
    %c0_198 = arith.constant 0 : index
    %178 = vector.load %arg5[%c2_195, %c1_196, %c0_197, %c0_198] : memref<5x2x256x128xbf16, #tpu.memory_space<vmem>>, vector<1x1x64x32xbf16>
    %179 = vector.shape_cast %178 : vector<1x1x64x32xbf16> to vector<64x32xbf16>
    %cst_199 = arith.constant dense<0.000000e+00> : vector<4x32xf32>
    %180 = tpu.matmul %174, %179, %cst_199 {dimension_numbers = #tpu.dot_dimension_numbers<[1], [0], [0], [1], [0, 0, 1, 1], [], []>} : vector<4x64xbf16>, vector<64x32xbf16>, vector<4x32xf32> -> vector<4x32xf32>
    %181 = arith.maximumf %177, %180 : vector<4x32xf32>
    %c3_200 = arith.constant 3 : index
    %c0_201 = arith.constant 0 : index
    %c0_202 = arith.constant 0 : index
    %c0_203 = arith.constant 0 : index
    %182 = vector.load %arg4[%c3_200, %c0_201, %c0_202, %c0_203] : memref<6x2x256x256xbf16, #tpu.memory_space<vmem>>, vector<1x1x32x32xbf16>
    %183 = vector.shape_cast %182 : vector<1x1x32x32xbf16> to vector<32x32xbf16>
    %c3_204 = arith.constant 3 : index
    %c1_205 = arith.constant 1 : index
    %c0_206 = arith.constant 0 : index
    %c0_207 = arith.constant 0 : index
    %184 = vector.load %arg4[%c3_204, %c1_205, %c0_206, %c0_207] : memref<6x2x256x256xbf16, #tpu.memory_space<vmem>>, vector<1x1x32x32xbf16>
    %185 = vector.shape_cast %184 : vector<1x1x32x32xbf16> to vector<32x32xbf16>
    %c6 = arith.constant 6 : index
    %c0_208 = arith.constant 0 : index
    %c0_209 = arith.constant 0 : index
    %186 = vector.load %arg3[%c6, %c0_208, %c0_209] : memref<23x8x1xf32, #tpu.memory_space<vmem>>, vector<1x4x1xf32>
    %187 = vector.shape_cast %186 : vector<1x4x1xf32> to vector<4x1xf32>
    %188 = arith.truncf %181 : vector<4x32xf32> to vector<4x32xbf16>
    %cst_210 = arith.constant dense<0.000000e+00> : vector<4x32xf32>
    %189 = tpu.matmul %188, %183, %cst_210 {dimension_numbers = #tpu.dot_dimension_numbers<[1], [0], [0], [1], [0, 0, 1, 1], [], []>} : vector<4x32xbf16>, vector<32x32xbf16>, vector<4x32xf32> -> vector<4x32xf32>
    %190 = arith.truncf %189 : vector<4x32xf32> to vector<4x32xbf16>
    %cst_211 = arith.constant dense<0.000000e+00> : vector<4x32xf32>
    %191 = tpu.matmul %188, %185, %cst_211 {dimension_numbers = #tpu.dot_dimension_numbers<[1], [0], [0], [1], [0, 0, 1, 1], [], []>} : vector<4x32xbf16>, vector<32x32xbf16>, vector<4x32xf32> -> vector<4x32xf32>
    %192 = arith.truncf %191 : vector<4x32xf32> to vector<4x32xbf16>
    %c6_212 = arith.constant 6 : index
    %c0_213 = arith.constant 0 : index
    %c0_214 = arith.constant 0 : index
    %c0_215 = arith.constant 0 : index
    %193 = vector.load %arg2[%c6_212, %c0_213, %c0_214, %c0_215] : memref<23x3x8x16xbf16, #tpu.memory_space<vmem>>, vector<1x1x4x4xbf16>
    %194 = vector.shape_cast %193 : vector<1x1x4x4xbf16> to vector<4x4xbf16>
    %cst_216 = arith.constant dense<0.000000e+00> : vector<4x32xf32>
    %195 = tpu.matmul %194, %190, %cst_216 {dimension_numbers = #tpu.dot_dimension_numbers<[1], [0], [0], [1], [0, 0, 1, 1], [], []>} : vector<4x4xbf16>, vector<4x32xbf16>, vector<4x32xf32> -> vector<4x32xf32>
    %196 = vector.broadcast %187 : vector<4x1xf32> to vector<4x32xf32>
    %197 = arith.addf %196, %195 : vector<4x32xf32>
    %c6_217 = arith.constant 6 : index
    %c1_218 = arith.constant 1 : index
    %c0_219 = arith.constant 0 : index
    %c0_220 = arith.constant 0 : index
    %198 = vector.load %arg2[%c6_217, %c1_218, %c0_219, %c0_220] : memref<23x3x8x16xbf16, #tpu.memory_space<vmem>>, vector<1x1x4x4xbf16>
    %199 = vector.shape_cast %198 : vector<1x1x4x4xbf16> to vector<4x4xbf16>
    %cst_221 = arith.constant dense<0.000000e+00> : vector<4x32xf32>
    %200 = tpu.matmul %199, %188, %cst_221 {dimension_numbers = #tpu.dot_dimension_numbers<[1], [0], [0], [1], [0, 0, 1, 1], [], []>} : vector<4x4xbf16>, vector<4x32xbf16>, vector<4x32xf32> -> vector<4x32xf32>
    %201 = arith.addf %197, %200 : vector<4x32xf32>
    %c6_222 = arith.constant 6 : index
    %c2_223 = arith.constant 2 : index
    %c0_224 = arith.constant 0 : index
    %c0_225 = arith.constant 0 : index
    %202 = vector.load %arg2[%c6_222, %c2_223, %c0_224, %c0_225] : memref<23x3x8x16xbf16, #tpu.memory_space<vmem>>, vector<1x1x4x4xbf16>
    %203 = vector.shape_cast %202 : vector<1x1x4x4xbf16> to vector<4x4xbf16>
    %cst_226 = arith.constant dense<0.000000e+00> : vector<4x32xf32>
    %204 = tpu.matmul %203, %192, %cst_226 {dimension_numbers = #tpu.dot_dimension_numbers<[1], [0], [0], [1], [0, 0, 1, 1], [], []>} : vector<4x4xbf16>, vector<4x32xbf16>, vector<4x32xf32> -> vector<4x32xf32>
    %205 = arith.addf %201, %204 : vector<4x32xf32>
    %cst_227 = arith.constant 0.000000e+00 : f32
    %206 = vector.broadcast %cst_227 : f32 to vector<4x32xf32>
    %207 = arith.maximumf %205, %206 : vector<4x32xf32>
    %c3_228 = arith.constant 3 : index
    %c0_229 = arith.constant 0 : index
    %c0_230 = arith.constant 0 : index
    %c0_231 = arith.constant 0 : index
    %208 = vector.load %arg4[%c3_228, %c0_229, %c0_230, %c0_231] : memref<6x2x256x256xbf16, #tpu.memory_space<vmem>>, vector<1x1x32x32xbf16>
    %209 = vector.shape_cast %208 : vector<1x1x32x32xbf16> to vector<32x32xbf16>
    %c3_232 = arith.constant 3 : index
    %c1_233 = arith.constant 1 : index
    %c0_234 = arith.constant 0 : index
    %c0_235 = arith.constant 0 : index
    %210 = vector.load %arg4[%c3_232, %c1_233, %c0_234, %c0_235] : memref<6x2x256x256xbf16, #tpu.memory_space<vmem>>, vector<1x1x32x32xbf16>
    %211 = vector.shape_cast %210 : vector<1x1x32x32xbf16> to vector<32x32xbf16>
    %c7 = arith.constant 7 : index
    %c0_236 = arith.constant 0 : index
    %c0_237 = arith.constant 0 : index
    %212 = vector.load %arg3[%c7, %c0_236, %c0_237] : memref<23x8x1xf32, #tpu.memory_space<vmem>>, vector<1x4x1xf32>
    %213 = vector.shape_cast %212 : vector<1x4x1xf32> to vector<4x1xf32>
    %214 = arith.truncf %207 : vector<4x32xf32> to vector<4x32xbf16>
    %cst_238 = arith.constant dense<0.000000e+00> : vector<4x32xf32>
    %215 = tpu.matmul %214, %209, %cst_238 {dimension_numbers = #tpu.dot_dimension_numbers<[1], [0], [0], [1], [0, 0, 1, 1], [], []>} : vector<4x32xbf16>, vector<32x32xbf16>, vector<4x32xf32> -> vector<4x32xf32>
    %216 = arith.truncf %215 : vector<4x32xf32> to vector<4x32xbf16>
    %cst_239 = arith.constant dense<0.000000e+00> : vector<4x32xf32>
    %217 = tpu.matmul %214, %211, %cst_239 {dimension_numbers = #tpu.dot_dimension_numbers<[1], [0], [0], [1], [0, 0, 1, 1], [], []>} : vector<4x32xbf16>, vector<32x32xbf16>, vector<4x32xf32> -> vector<4x32xf32>
    %218 = arith.truncf %217 : vector<4x32xf32> to vector<4x32xbf16>
    %c7_240 = arith.constant 7 : index
    %c0_241 = arith.constant 0 : index
    %c0_242 = arith.constant 0 : index
    %c0_243 = arith.constant 0 : index
    %219 = vector.load %arg2[%c7_240, %c0_241, %c0_242, %c0_243] : memref<23x3x8x16xbf16, #tpu.memory_space<vmem>>, vector<1x1x4x4xbf16>
    %220 = vector.shape_cast %219 : vector<1x1x4x4xbf16> to vector<4x4xbf16>
    %cst_244 = arith.constant dense<0.000000e+00> : vector<4x32xf32>
    %221 = tpu.matmul %220, %216, %cst_244 {dimension_numbers = #tpu.dot_dimension_numbers<[1], [0], [0], [1], [0, 0, 1, 1], [], []>} : vector<4x4xbf16>, vector<4x32xbf16>, vector<4x32xf32> -> vector<4x32xf32>
    %222 = vector.broadcast %213 : vector<4x1xf32> to vector<4x32xf32>
    %223 = arith.addf %222, %221 : vector<4x32xf32>
    %c7_245 = arith.constant 7 : index
    %c1_246 = arith.constant 1 : index
    %c0_247 = arith.constant 0 : index
    %c0_248 = arith.constant 0 : index
    %224 = vector.load %arg2[%c7_245, %c1_246, %c0_247, %c0_248] : memref<23x3x8x16xbf16, #tpu.memory_space<vmem>>, vector<1x1x4x4xbf16>
    %225 = vector.shape_cast %224 : vector<1x1x4x4xbf16> to vector<4x4xbf16>
    %cst_249 = arith.constant dense<0.000000e+00> : vector<4x32xf32>
    %226 = tpu.matmul %225, %214, %cst_249 {dimension_numbers = #tpu.dot_dimension_numbers<[1], [0], [0], [1], [0, 0, 1, 1], [], []>} : vector<4x4xbf16>, vector<4x32xbf16>, vector<4x32xf32> -> vector<4x32xf32>
    %227 = arith.addf %223, %226 : vector<4x32xf32>
    %c7_250 = arith.constant 7 : index
    %c2_251 = arith.constant 2 : index
    %c0_252 = arith.constant 0 : index
    %c0_253 = arith.constant 0 : index
    %228 = vector.load %arg2[%c7_250, %c2_251, %c0_252, %c0_253] : memref<23x3x8x16xbf16, #tpu.memory_space<vmem>>, vector<1x1x4x4xbf16>
    %229 = vector.shape_cast %228 : vector<1x1x4x4xbf16> to vector<4x4xbf16>
    %cst_254 = arith.constant dense<0.000000e+00> : vector<4x32xf32>
    %230 = tpu.matmul %229, %218, %cst_254 {dimension_numbers = #tpu.dot_dimension_numbers<[1], [0], [0], [1], [0, 0, 1, 1], [], []>} : vector<4x4xbf16>, vector<4x32xbf16>, vector<4x32xf32> -> vector<4x32xf32>
    %231 = arith.addf %227, %230 : vector<4x32xf32>
    %cst_255 = arith.constant 0.000000e+00 : f32
    %232 = vector.broadcast %cst_255 : f32 to vector<4x32xf32>
    %233 = arith.maximumf %231, %232 : vector<4x32xf32>
    %234 = arith.truncf %233 : vector<4x32xf32> to vector<4x32xbf16>
    %c3_256 = arith.constant 3 : index
    %c0_257 = arith.constant 0 : index
    %c0_258 = arith.constant 0 : index
    %c0_259 = arith.constant 0 : index
    %235 = vector.load %arg5[%c3_256, %c0_257, %c0_258, %c0_259] : memref<5x2x256x128xbf16, #tpu.memory_space<vmem>>, vector<1x1x32x16xbf16>
    %236 = vector.shape_cast %235 : vector<1x1x32x16xbf16> to vector<32x16xbf16>
    %cst_260 = arith.constant dense<0.000000e+00> : vector<4x16xf32>
    %237 = tpu.matmul %234, %236, %cst_260 {dimension_numbers = #tpu.dot_dimension_numbers<[1], [0], [0], [1], [0, 0, 1, 1], [], []>} : vector<4x32xbf16>, vector<32x16xbf16>, vector<4x16xf32> -> vector<4x16xf32>
    %c3_261 = arith.constant 3 : index
    %c1_262 = arith.constant 1 : index
    %c0_263 = arith.constant 0 : index
    %c0_264 = arith.constant 0 : index
    %238 = vector.load %arg5[%c3_261, %c1_262, %c0_263, %c0_264] : memref<5x2x256x128xbf16, #tpu.memory_space<vmem>>, vector<1x1x32x16xbf16>
    %239 = vector.shape_cast %238 : vector<1x1x32x16xbf16> to vector<32x16xbf16>
    %cst_265 = arith.constant dense<0.000000e+00> : vector<4x16xf32>
    %240 = tpu.matmul %234, %239, %cst_265 {dimension_numbers = #tpu.dot_dimension_numbers<[1], [0], [0], [1], [0, 0, 1, 1], [], []>} : vector<4x32xbf16>, vector<32x16xbf16>, vector<4x16xf32> -> vector<4x16xf32>
    %241 = arith.maximumf %237, %240 : vector<4x16xf32>
    %c4_266 = arith.constant 4 : index
    %c0_267 = arith.constant 0 : index
    %c0_268 = arith.constant 0 : index
    %c0_269 = arith.constant 0 : index
    %242 = vector.load %arg4[%c4_266, %c0_267, %c0_268, %c0_269] : memref<6x2x256x256xbf16, #tpu.memory_space<vmem>>, vector<1x1x16x16xbf16>
    %243 = vector.shape_cast %242 : vector<1x1x16x16xbf16> to vector<16x16xbf16>
    %c4_270 = arith.constant 4 : index
    %c1_271 = arith.constant 1 : index
    %c0_272 = arith.constant 0 : index
    %c0_273 = arith.constant 0 : index
    %244 = vector.load %arg4[%c4_270, %c1_271, %c0_272, %c0_273] : memref<6x2x256x256xbf16, #tpu.memory_space<vmem>>, vector<1x1x16x16xbf16>
    %245 = vector.shape_cast %244 : vector<1x1x16x16xbf16> to vector<16x16xbf16>
    %c8 = arith.constant 8 : index
    %c0_274 = arith.constant 0 : index
    %c0_275 = arith.constant 0 : index
    %246 = vector.load %arg3[%c8, %c0_274, %c0_275] : memref<23x8x1xf32, #tpu.memory_space<vmem>>, vector<1x8x1xf32>
    %247 = vector.shape_cast %246 : vector<1x8x1xf32> to vector<8x1xf32>
    %248 = arith.truncf %241 : vector<4x16xf32> to vector<4x16xbf16>
    %cst_276 = arith.constant dense<0.000000e+00> : vector<4x16xf32>
    %249 = tpu.matmul %248, %243, %cst_276 {dimension_numbers = #tpu.dot_dimension_numbers<[1], [0], [0], [1], [0, 0, 1, 1], [], []>} : vector<4x16xbf16>, vector<16x16xbf16>, vector<4x16xf32> -> vector<4x16xf32>
    %250 = arith.truncf %249 : vector<4x16xf32> to vector<4x16xbf16>
    %cst_277 = arith.constant dense<0.000000e+00> : vector<4x16xf32>
    %251 = tpu.matmul %248, %245, %cst_277 {dimension_numbers = #tpu.dot_dimension_numbers<[1], [0], [0], [1], [0, 0, 1, 1], [], []>} : vector<4x16xbf16>, vector<16x16xbf16>, vector<4x16xf32> -> vector<4x16xf32>
    %252 = arith.truncf %251 : vector<4x16xf32> to vector<4x16xbf16>
    %c8_278 = arith.constant 8 : index
    %c0_279 = arith.constant 0 : index
    %c0_280 = arith.constant 0 : index
    %c0_281 = arith.constant 0 : index
    %253 = vector.load %arg2[%c8_278, %c0_279, %c0_280, %c0_281] : memref<23x3x8x16xbf16, #tpu.memory_space<vmem>>, vector<1x1x8x4xbf16>
    %254 = vector.shape_cast %253 : vector<1x1x8x4xbf16> to vector<8x4xbf16>
    %cst_282 = arith.constant dense<0.000000e+00> : vector<8x16xf32>
    %255 = tpu.matmul %254, %250, %cst_282 {dimension_numbers = #tpu.dot_dimension_numbers<[1], [0], [0], [1], [0, 0, 1, 1], [], []>} : vector<8x4xbf16>, vector<4x16xbf16>, vector<8x16xf32> -> vector<8x16xf32>
    %256 = vector.broadcast %247 : vector<8x1xf32> to vector<8x16xf32>
    %257 = arith.addf %256, %255 : vector<8x16xf32>
    %c8_283 = arith.constant 8 : index
    %c1_284 = arith.constant 1 : index
    %c0_285 = arith.constant 0 : index
    %c0_286 = arith.constant 0 : index
    %258 = vector.load %arg2[%c8_283, %c1_284, %c0_285, %c0_286] : memref<23x3x8x16xbf16, #tpu.memory_space<vmem>>, vector<1x1x8x4xbf16>
    %259 = vector.shape_cast %258 : vector<1x1x8x4xbf16> to vector<8x4xbf16>
    %cst_287 = arith.constant dense<0.000000e+00> : vector<8x16xf32>
    %260 = tpu.matmul %259, %248, %cst_287 {dimension_numbers = #tpu.dot_dimension_numbers<[1], [0], [0], [1], [0, 0, 1, 1], [], []>} : vector<8x4xbf16>, vector<4x16xbf16>, vector<8x16xf32> -> vector<8x16xf32>
    %261 = arith.addf %257, %260 : vector<8x16xf32>
    %c8_288 = arith.constant 8 : index
    %c2_289 = arith.constant 2 : index
    %c0_290 = arith.constant 0 : index
    %c0_291 = arith.constant 0 : index
    %262 = vector.load %arg2[%c8_288, %c2_289, %c0_290, %c0_291] : memref<23x3x8x16xbf16, #tpu.memory_space<vmem>>, vector<1x1x8x4xbf16>
    %263 = vector.shape_cast %262 : vector<1x1x8x4xbf16> to vector<8x4xbf16>
    %cst_292 = arith.constant dense<0.000000e+00> : vector<8x16xf32>
    %264 = tpu.matmul %263, %252, %cst_292 {dimension_numbers = #tpu.dot_dimension_numbers<[1], [0], [0], [1], [0, 0, 1, 1], [], []>} : vector<8x4xbf16>, vector<4x16xbf16>, vector<8x16xf32> -> vector<8x16xf32>
    %265 = arith.addf %261, %264 : vector<8x16xf32>
    %cst_293 = arith.constant 0.000000e+00 : f32
    %266 = vector.broadcast %cst_293 : f32 to vector<8x16xf32>
    %267 = arith.maximumf %265, %266 : vector<8x16xf32>
    %c4_294 = arith.constant 4 : index
    %c0_295 = arith.constant 0 : index
    %c0_296 = arith.constant 0 : index
    %c0_297 = arith.constant 0 : index
    %268 = vector.load %arg4[%c4_294, %c0_295, %c0_296, %c0_297] : memref<6x2x256x256xbf16, #tpu.memory_space<vmem>>, vector<1x1x16x16xbf16>
    %269 = vector.shape_cast %268 : vector<1x1x16x16xbf16> to vector<16x16xbf16>
    %c4_298 = arith.constant 4 : index
    %c1_299 = arith.constant 1 : index
    %c0_300 = arith.constant 0 : index
    %c0_301 = arith.constant 0 : index
    %270 = vector.load %arg4[%c4_298, %c1_299, %c0_300, %c0_301] : memref<6x2x256x256xbf16, #tpu.memory_space<vmem>>, vector<1x1x16x16xbf16>
    %271 = vector.shape_cast %270 : vector<1x1x16x16xbf16> to vector<16x16xbf16>
    %c9 = arith.constant 9 : index
    %c0_302 = arith.constant 0 : index
    %c0_303 = arith.constant 0 : index
    %272 = vector.load %arg3[%c9, %c0_302, %c0_303] : memref<23x8x1xf32, #tpu.memory_space<vmem>>, vector<1x8x1xf32>
    %273 = vector.shape_cast %272 : vector<1x8x1xf32> to vector<8x1xf32>
    %274 = arith.truncf %267 : vector<8x16xf32> to vector<8x16xbf16>
    %cst_304 = arith.constant dense<0.000000e+00> : vector<8x16xf32>
    %275 = tpu.matmul %274, %269, %cst_304 {dimension_numbers = #tpu.dot_dimension_numbers<[1], [0], [0], [1], [0, 0, 1, 1], [], []>} : vector<8x16xbf16>, vector<16x16xbf16>, vector<8x16xf32> -> vector<8x16xf32>
    %276 = arith.truncf %275 : vector<8x16xf32> to vector<8x16xbf16>
    %cst_305 = arith.constant dense<0.000000e+00> : vector<8x16xf32>
    %277 = tpu.matmul %274, %271, %cst_305 {dimension_numbers = #tpu.dot_dimension_numbers<[1], [0], [0], [1], [0, 0, 1, 1], [], []>} : vector<8x16xbf16>, vector<16x16xbf16>, vector<8x16xf32> -> vector<8x16xf32>
    %278 = arith.truncf %277 : vector<8x16xf32> to vector<8x16xbf16>
    %c9_306 = arith.constant 9 : index
    %c0_307 = arith.constant 0 : index
    %c0_308 = arith.constant 0 : index
    %c0_309 = arith.constant 0 : index
    %279 = vector.load %arg2[%c9_306, %c0_307, %c0_308, %c0_309] : memref<23x3x8x16xbf16, #tpu.memory_space<vmem>>, vector<1x1x8x8xbf16>
    %280 = vector.shape_cast %279 : vector<1x1x8x8xbf16> to vector<8x8xbf16>
    %cst_310 = arith.constant dense<0.000000e+00> : vector<8x16xf32>
    %281 = tpu.matmul %280, %276, %cst_310 {dimension_numbers = #tpu.dot_dimension_numbers<[1], [0], [0], [1], [0, 0, 1, 1], [], []>} : vector<8x8xbf16>, vector<8x16xbf16>, vector<8x16xf32> -> vector<8x16xf32>
    %282 = vector.broadcast %273 : vector<8x1xf32> to vector<8x16xf32>
    %283 = arith.addf %282, %281 : vector<8x16xf32>
    %c9_311 = arith.constant 9 : index
    %c1_312 = arith.constant 1 : index
    %c0_313 = arith.constant 0 : index
    %c0_314 = arith.constant 0 : index
    %284 = vector.load %arg2[%c9_311, %c1_312, %c0_313, %c0_314] : memref<23x3x8x16xbf16, #tpu.memory_space<vmem>>, vector<1x1x8x8xbf16>
    %285 = vector.shape_cast %284 : vector<1x1x8x8xbf16> to vector<8x8xbf16>
    %cst_315 = arith.constant dense<0.000000e+00> : vector<8x16xf32>
    %286 = tpu.matmul %285, %274, %cst_315 {dimension_numbers = #tpu.dot_dimension_numbers<[1], [0], [0], [1], [0, 0, 1, 1], [], []>} : vector<8x8xbf16>, vector<8x16xbf16>, vector<8x16xf32> -> vector<8x16xf32>
    %287 = arith.addf %283, %286 : vector<8x16xf32>
    %c9_316 = arith.constant 9 : index
    %c2_317 = arith.constant 2 : index
    %c0_318 = arith.constant 0 : index
    %c0_319 = arith.constant 0 : index
    %288 = vector.load %arg2[%c9_316, %c2_317, %c0_318, %c0_319] : memref<23x3x8x16xbf16, #tpu.memory_space<vmem>>, vector<1x1x8x8xbf16>
    %289 = vector.shape_cast %288 : vector<1x1x8x8xbf16> to vector<8x8xbf16>
    %cst_320 = arith.constant dense<0.000000e+00> : vector<8x16xf32>
    %290 = tpu.matmul %289, %278, %cst_320 {dimension_numbers = #tpu.dot_dimension_numbers<[1], [0], [0], [1], [0, 0, 1, 1], [], []>} : vector<8x8xbf16>, vector<8x16xbf16>, vector<8x16xf32> -> vector<8x16xf32>
    %291 = arith.addf %287, %290 : vector<8x16xf32>
    %cst_321 = arith.constant 0.000000e+00 : f32
    %292 = vector.broadcast %cst_321 : f32 to vector<8x16xf32>
    %293 = arith.maximumf %291, %292 : vector<8x16xf32>
    %294 = arith.truncf %293 : vector<8x16xf32> to vector<8x16xbf16>
    %c4_322 = arith.constant 4 : index
    %c0_323 = arith.constant 0 : index
    %c0_324 = arith.constant 0 : index
    %c0_325 = arith.constant 0 : index
    %295 = vector.load %arg5[%c4_322, %c0_323, %c0_324, %c0_325] : memref<5x2x256x128xbf16, #tpu.memory_space<vmem>>, vector<1x1x16x8xbf16>
    %296 = vector.shape_cast %295 : vector<1x1x16x8xbf16> to vector<16x8xbf16>
    %cst_326 = arith.constant dense<0.000000e+00> : vector<8x8xf32>
    %297 = tpu.matmul %294, %296, %cst_326 {dimension_numbers = #tpu.dot_dimension_numbers<[1], [0], [0], [1], [0, 0, 1, 1], [], []>} : vector<8x16xbf16>, vector<16x8xbf16>, vector<8x8xf32> -> vector<8x8xf32>
    %c4_327 = arith.constant 4 : index
    %c1_328 = arith.constant 1 : index
    %c0_329 = arith.constant 0 : index
    %c0_330 = arith.constant 0 : index
    %298 = vector.load %arg5[%c4_327, %c1_328, %c0_329, %c0_330] : memref<5x2x256x128xbf16, #tpu.memory_space<vmem>>, vector<1x1x16x8xbf16>
    %299 = vector.shape_cast %298 : vector<1x1x16x8xbf16> to vector<16x8xbf16>
    %cst_331 = arith.constant dense<0.000000e+00> : vector<8x8xf32>
    %300 = tpu.matmul %294, %299, %cst_331 {dimension_numbers = #tpu.dot_dimension_numbers<[1], [0], [0], [1], [0, 0, 1, 1], [], []>} : vector<8x16xbf16>, vector<16x8xbf16>, vector<8x8xf32> -> vector<8x8xf32>
    %301 = arith.maximumf %297, %300 : vector<8x8xf32>
    %c5_332 = arith.constant 5 : index
    %c0_333 = arith.constant 0 : index
    %c0_334 = arith.constant 0 : index
    %c0_335 = arith.constant 0 : index
    %302 = vector.load %arg4[%c5_332, %c0_333, %c0_334, %c0_335] : memref<6x2x256x256xbf16, #tpu.memory_space<vmem>>, vector<1x1x8x8xbf16>
    %303 = vector.shape_cast %302 : vector<1x1x8x8xbf16> to vector<8x8xbf16>
    %c5_336 = arith.constant 5 : index
    %c1_337 = arith.constant 1 : index
    %c0_338 = arith.constant 0 : index
    %c0_339 = arith.constant 0 : index
    %304 = vector.load %arg4[%c5_336, %c1_337, %c0_338, %c0_339] : memref<6x2x256x256xbf16, #tpu.memory_space<vmem>>, vector<1x1x8x8xbf16>
    %305 = vector.shape_cast %304 : vector<1x1x8x8xbf16> to vector<8x8xbf16>
    %c10 = arith.constant 10 : index
    %c0_340 = arith.constant 0 : index
    %c0_341 = arith.constant 0 : index
    %306 = vector.load %arg3[%c10, %c0_340, %c0_341] : memref<23x8x1xf32, #tpu.memory_space<vmem>>, vector<1x8x1xf32>
    %307 = vector.shape_cast %306 : vector<1x8x1xf32> to vector<8x1xf32>
    %308 = arith.truncf %301 : vector<8x8xf32> to vector<8x8xbf16>
    %cst_342 = arith.constant dense<0.000000e+00> : vector<8x8xf32>
    %309 = tpu.matmul %308, %303, %cst_342 {dimension_numbers = #tpu.dot_dimension_numbers<[1], [0], [0], [1], [0, 0, 1, 1], [], []>} : vector<8x8xbf16>, vector<8x8xbf16>, vector<8x8xf32> -> vector<8x8xf32>
    %310 = arith.truncf %309 : vector<8x8xf32> to vector<8x8xbf16>
    %cst_343 = arith.constant dense<0.000000e+00> : vector<8x8xf32>
    %311 = tpu.matmul %308, %305, %cst_343 {dimension_numbers = #tpu.dot_dimension_numbers<[1], [0], [0], [1], [0, 0, 1, 1], [], []>} : vector<8x8xbf16>, vector<8x8xbf16>, vector<8x8xf32> -> vector<8x8xf32>
    %312 = arith.truncf %311 : vector<8x8xf32> to vector<8x8xbf16>
    %c10_344 = arith.constant 10 : index
    %c0_345 = arith.constant 0 : index
    %c0_346 = arith.constant 0 : index
    %c0_347 = arith.constant 0 : index
    %313 = vector.load %arg2[%c10_344, %c0_345, %c0_346, %c0_347] : memref<23x3x8x16xbf16, #tpu.memory_space<vmem>>, vector<1x1x8x8xbf16>
    %314 = vector.shape_cast %313 : vector<1x1x8x8xbf16> to vector<8x8xbf16>
    %cst_348 = arith.constant dense<0.000000e+00> : vector<8x8xf32>
    %315 = tpu.matmul %314, %310, %cst_348 {dimension_numbers = #tpu.dot_dimension_numbers<[1], [0], [0], [1], [0, 0, 1, 1], [], []>} : vector<8x8xbf16>, vector<8x8xbf16>, vector<8x8xf32> -> vector<8x8xf32>
    %316 = vector.broadcast %307 : vector<8x1xf32> to vector<8x8xf32>
    %317 = arith.addf %316, %315 : vector<8x8xf32>
    %c10_349 = arith.constant 10 : index
    %c1_350 = arith.constant 1 : index
    %c0_351 = arith.constant 0 : index
    %c0_352 = arith.constant 0 : index
    %318 = vector.load %arg2[%c10_349, %c1_350, %c0_351, %c0_352] : memref<23x3x8x16xbf16, #tpu.memory_space<vmem>>, vector<1x1x8x8xbf16>
    %319 = vector.shape_cast %318 : vector<1x1x8x8xbf16> to vector<8x8xbf16>
    %cst_353 = arith.constant dense<0.000000e+00> : vector<8x8xf32>
    %320 = tpu.matmul %319, %308, %cst_353 {dimension_numbers = #tpu.dot_dimension_numbers<[1], [0], [0], [1], [0, 0, 1, 1], [], []>} : vector<8x8xbf16>, vector<8x8xbf16>, vector<8x8xf32> -> vector<8x8xf32>
    %321 = arith.addf %317, %320 : vector<8x8xf32>
    %c10_354 = arith.constant 10 : index
    %c2_355 = arith.constant 2 : index
    %c0_356 = arith.constant 0 : index
    %c0_357 = arith.constant 0 : index
    %322 = vector.load %arg2[%c10_354, %c2_355, %c0_356, %c0_357] : memref<23x3x8x16xbf16, #tpu.memory_space<vmem>>, vector<1x1x8x8xbf16>
    %323 = vector.shape_cast %322 : vector<1x1x8x8xbf16> to vector<8x8xbf16>
    %cst_358 = arith.constant dense<0.000000e+00> : vector<8x8xf32>
    %324 = tpu.matmul %323, %312, %cst_358 {dimension_numbers = #tpu.dot_dimension_numbers<[1], [0], [0], [1], [0, 0, 1, 1], [], []>} : vector<8x8xbf16>, vector<8x8xbf16>, vector<8x8xf32> -> vector<8x8xf32>
    %325 = arith.addf %321, %324 : vector<8x8xf32>
    %cst_359 = arith.constant 0.000000e+00 : f32
    %326 = vector.broadcast %cst_359 : f32 to vector<8x8xf32>
    %327 = arith.maximumf %325, %326 : vector<8x8xf32>
    %c5_360 = arith.constant 5 : index
    %c0_361 = arith.constant 0 : index
    %c0_362 = arith.constant 0 : index
    %c0_363 = arith.constant 0 : index
    %328 = vector.load %arg4[%c5_360, %c0_361, %c0_362, %c0_363] : memref<6x2x256x256xbf16, #tpu.memory_space<vmem>>, vector<1x1x8x8xbf16>
    %329 = vector.shape_cast %328 : vector<1x1x8x8xbf16> to vector<8x8xbf16>
    %c5_364 = arith.constant 5 : index
    %c1_365 = arith.constant 1 : index
    %c0_366 = arith.constant 0 : index
    %c0_367 = arith.constant 0 : index
    %330 = vector.load %arg4[%c5_364, %c1_365, %c0_366, %c0_367] : memref<6x2x256x256xbf16, #tpu.memory_space<vmem>>, vector<1x1x8x8xbf16>
    %331 = vector.shape_cast %330 : vector<1x1x8x8xbf16> to vector<8x8xbf16>
    %c11 = arith.constant 11 : index
    %c0_368 = arith.constant 0 : index
    %c0_369 = arith.constant 0 : index
    %332 = vector.load %arg3[%c11, %c0_368, %c0_369] : memref<23x8x1xf32, #tpu.memory_space<vmem>>, vector<1x8x1xf32>
    %333 = vector.shape_cast %332 : vector<1x8x1xf32> to vector<8x1xf32>
    %334 = arith.truncf %327 : vector<8x8xf32> to vector<8x8xbf16>
    %cst_370 = arith.constant dense<0.000000e+00> : vector<8x8xf32>
    %335 = tpu.matmul %334, %329, %cst_370 {dimension_numbers = #tpu.dot_dimension_numbers<[1], [0], [0], [1], [0, 0, 1, 1], [], []>} : vector<8x8xbf16>, vector<8x8xbf16>, vector<8x8xf32> -> vector<8x8xf32>
    %336 = arith.truncf %335 : vector<8x8xf32> to vector<8x8xbf16>
    %cst_371 = arith.constant dense<0.000000e+00> : vector<8x8xf32>
    %337 = tpu.matmul %334, %331, %cst_371 {dimension_numbers = #tpu.dot_dimension_numbers<[1], [0], [0], [1], [0, 0, 1, 1], [], []>} : vector<8x8xbf16>, vector<8x8xbf16>, vector<8x8xf32> -> vector<8x8xf32>
    %338 = arith.truncf %337 : vector<8x8xf32> to vector<8x8xbf16>
    %c11_372 = arith.constant 11 : index
    %c0_373 = arith.constant 0 : index
    %c0_374 = arith.constant 0 : index
    %c0_375 = arith.constant 0 : index
    %339 = vector.load %arg2[%c11_372, %c0_373, %c0_374, %c0_375] : memref<23x3x8x16xbf16, #tpu.memory_space<vmem>>, vector<1x1x8x8xbf16>
    %340 = vector.shape_cast %339 : vector<1x1x8x8xbf16> to vector<8x8xbf16>
    %cst_376 = arith.constant dense<0.000000e+00> : vector<8x8xf32>
    %341 = tpu.matmul %340, %336, %cst_376 {dimension_numbers = #tpu.dot_dimension_numbers<[1], [0], [0], [1], [0, 0, 1, 1], [], []>} : vector<8x8xbf16>, vector<8x8xbf16>, vector<8x8xf32> -> vector<8x8xf32>
    %342 = vector.broadcast %333 : vector<8x1xf32> to vector<8x8xf32>
    %343 = arith.addf %342, %341 : vector<8x8xf32>
    %c11_377 = arith.constant 11 : index
    %c1_378 = arith.constant 1 : index
    %c0_379 = arith.constant 0 : index
    %c0_380 = arith.constant 0 : index
    %344 = vector.load %arg2[%c11_377, %c1_378, %c0_379, %c0_380] : memref<23x3x8x16xbf16, #tpu.memory_space<vmem>>, vector<1x1x8x8xbf16>
    %345 = vector.shape_cast %344 : vector<1x1x8x8xbf16> to vector<8x8xbf16>
    %cst_381 = arith.constant dense<0.000000e+00> : vector<8x8xf32>
    %346 = tpu.matmul %345, %334, %cst_381 {dimension_numbers = #tpu.dot_dimension_numbers<[1], [0], [0], [1], [0, 0, 1, 1], [], []>} : vector<8x8xbf16>, vector<8x8xbf16>, vector<8x8xf32> -> vector<8x8xf32>
    %347 = arith.addf %343, %346 : vector<8x8xf32>
    %c11_382 = arith.constant 11 : index
    %c2_383 = arith.constant 2 : index
    %c0_384 = arith.constant 0 : index
    %c0_385 = arith.constant 0 : index
    %348 = vector.load %arg2[%c11_382, %c2_383, %c0_384, %c0_385] : memref<23x3x8x16xbf16, #tpu.memory_space<vmem>>, vector<1x1x8x8xbf16>
    %349 = vector.shape_cast %348 : vector<1x1x8x8xbf16> to vector<8x8xbf16>
    %cst_386 = arith.constant dense<0.000000e+00> : vector<8x8xf32>
    %350 = tpu.matmul %349, %338, %cst_386 {dimension_numbers = #tpu.dot_dimension_numbers<[1], [0], [0], [1], [0, 0, 1, 1], [], []>} : vector<8x8xbf16>, vector<8x8xbf16>, vector<8x8xf32> -> vector<8x8xf32>
    %351 = arith.addf %347, %350 : vector<8x8xf32>
    %cst_387 = arith.constant 0.000000e+00 : f32
    %352 = vector.broadcast %cst_387 : f32 to vector<8x8xf32>
    %353 = arith.maximumf %351, %352 : vector<8x8xf32>
    %c0_388 = arith.constant 0 : index
    %c0_389 = arith.constant 0 : index
    %c0_390 = arith.constant 0 : index
    %354 = vector.load %arg8[%c0_388, %c0_389, %c0_390] : memref<1x8x8xf32, #tpu.memory_space<vmem>>, vector<1x8x8xf32>
    %355 = vector.shape_cast %354 : vector<1x8x8xf32> to vector<8x8xf32>
    %356 = vector.shape_cast %353 : vector<8x8xf32> to vector<1x8x8xf32>
    tpu.vector_store %arg8[%c0_388, %c0_389, %c0_390], %356 {strides = array<i32>} : memref<1x8x8xf32, #tpu.memory_space<vmem>>, vector<1x8x8xf32>,
    %357 = arith.truncf %353 : vector<8x8xf32> to vector<8x8xbf16>
    %c0_391 = arith.constant 0 : index
    %c0_392 = arith.constant 0 : index
    %c0_393 = arith.constant 0 : index
    %358 = vector.load %arg6[%c0_391, %c0_392, %c0_393] : memref<5x128x256xbf16, #tpu.memory_space<vmem>>, vector<1x8x16xbf16>
    %359 = vector.shape_cast %358 : vector<1x8x16xbf16> to vector<8x16xbf16>
    %cst_394 = arith.constant dense<0.000000e+00> : vector<8x16xf32>
    %360 = tpu.matmul %357, %359, %cst_394 {dimension_numbers = #tpu.dot_dimension_numbers<[1], [0], [0], [1], [0, 0, 1, 1], [], []>} : vector<8x8xbf16>, vector<8x16xbf16>, vector<8x16xf32> -> vector<8x16xf32>
    %c4_395 = arith.constant 4 : index
    %c0_396 = arith.constant 0 : index
    %c0_397 = arith.constant 0 : index
    %c0_398 = arith.constant 0 : index
    %361 = vector.load %arg4[%c4_395, %c0_396, %c0_397, %c0_398] : memref<6x2x256x256xbf16, #tpu.memory_space<vmem>>, vector<1x1x16x16xbf16>
    %362 = vector.shape_cast %361 : vector<1x1x16x16xbf16> to vector<16x16xbf16>
    %c4_399 = arith.constant 4 : index
    %c1_400 = arith.constant 1 : index
    %c0_401 = arith.constant 0 : index
    %c0_402 = arith.constant 0 : index
    %363 = vector.load %arg4[%c4_399, %c1_400, %c0_401, %c0_402] : memref<6x2x256x256xbf16, #tpu.memory_space<vmem>>, vector<1x1x16x16xbf16>
    %364 = vector.shape_cast %363 : vector<1x1x16x16xbf16> to vector<16x16xbf16>
    %c12 = arith.constant 12 : index
    %c0_403 = arith.constant 0 : index
    %c0_404 = arith.constant 0 : index
    %365 = vector.load %arg3[%c12, %c0_403, %c0_404] : memref<23x8x1xf32, #tpu.memory_space<vmem>>, vector<1x8x1xf32>
    %366 = vector.shape_cast %365 : vector<1x8x1xf32> to vector<8x1xf32>
    %367 = arith.truncf %293 : vector<8x16xf32> to vector<8x16xbf16>
    %cst_405 = arith.constant dense<0.000000e+00> : vector<8x16xf32>
    %368 = tpu.matmul %367, %362, %cst_405 {dimension_numbers = #tpu.dot_dimension_numbers<[1], [0], [0], [1], [0, 0, 1, 1], [], []>} : vector<8x16xbf16>, vector<16x16xbf16>, vector<8x16xf32> -> vector<8x16xf32>
    %369 = arith.truncf %368 : vector<8x16xf32> to vector<8x16xbf16>
    %cst_406 = arith.constant dense<0.000000e+00> : vector<8x16xf32>
    %370 = tpu.matmul %367, %364, %cst_406 {dimension_numbers = #tpu.dot_dimension_numbers<[1], [0], [0], [1], [0, 0, 1, 1], [], []>} : vector<8x16xbf16>, vector<16x16xbf16>, vector<8x16xf32> -> vector<8x16xf32>
    %371 = arith.truncf %370 : vector<8x16xf32> to vector<8x16xbf16>
    %c12_407 = arith.constant 12 : index
    %c0_408 = arith.constant 0 : index
    %c0_409 = arith.constant 0 : index
    %c0_410 = arith.constant 0 : index
    %372 = vector.load %arg2[%c12_407, %c0_408, %c0_409, %c0_410] : memref<23x3x8x16xbf16, #tpu.memory_space<vmem>>, vector<1x1x8x8xbf16>
    %373 = vector.shape_cast %372 : vector<1x1x8x8xbf16> to vector<8x8xbf16>
    %cst_411 = arith.constant dense<0.000000e+00> : vector<8x16xf32>
    %374 = tpu.matmul %373, %369, %cst_411 {dimension_numbers = #tpu.dot_dimension_numbers<[1], [0], [0], [1], [0, 0, 1, 1], [], []>} : vector<8x8xbf16>, vector<8x16xbf16>, vector<8x16xf32> -> vector<8x16xf32>
    %375 = vector.broadcast %366 : vector<8x1xf32> to vector<8x16xf32>
    %376 = arith.addf %375, %374 : vector<8x16xf32>
    %c12_412 = arith.constant 12 : index
    %c1_413 = arith.constant 1 : index
    %c0_414 = arith.constant 0 : index
    %c0_415 = arith.constant 0 : index
    %377 = vector.load %arg2[%c12_412, %c1_413, %c0_414, %c0_415] : memref<23x3x8x16xbf16, #tpu.memory_space<vmem>>, vector<1x1x8x8xbf16>
    %378 = vector.shape_cast %377 : vector<1x1x8x8xbf16> to vector<8x8xbf16>
    %cst_416 = arith.constant dense<0.000000e+00> : vector<8x16xf32>
    %379 = tpu.matmul %378, %367, %cst_416 {dimension_numbers = #tpu.dot_dimension_numbers<[1], [0], [0], [1], [0, 0, 1, 1], [], []>} : vector<8x8xbf16>, vector<8x16xbf16>, vector<8x16xf32> -> vector<8x16xf32>
    %380 = arith.addf %376, %379 : vector<8x16xf32>
    %c12_417 = arith.constant 12 : index
    %c2_418 = arith.constant 2 : index
    %c0_419 = arith.constant 0 : index
    %c0_420 = arith.constant 0 : index
    %381 = vector.load %arg2[%c12_417, %c2_418, %c0_419, %c0_420] : memref<23x3x8x16xbf16, #tpu.memory_space<vmem>>, vector<1x1x8x8xbf16>
    %382 = vector.shape_cast %381 : vector<1x1x8x8xbf16> to vector<8x8xbf16>
    %cst_421 = arith.constant dense<0.000000e+00> : vector<8x16xf32>
    %383 = tpu.matmul %382, %371, %cst_421 {dimension_numbers = #tpu.dot_dimension_numbers<[1], [0], [0], [1], [0, 0, 1, 1], [], []>} : vector<8x8xbf16>, vector<8x16xbf16>, vector<8x16xf32> -> vector<8x16xf32>
    %384 = arith.addf %380, %383 : vector<8x16xf32>
    %385 = arith.truncf %360 : vector<8x16xf32> to vector<8x16xbf16>
    %cst_422 = arith.constant dense<0.000000e+00> : vector<8x16xf32>
    %386 = tpu.matmul %385, %362, %cst_422 {dimension_numbers = #tpu.dot_dimension_numbers<[1], [0], [0], [1], [0, 0, 1, 1], [], []>} : vector<8x16xbf16>, vector<16x16xbf16>, vector<8x16xf32> -> vector<8x16xf32>
    %387 = arith.truncf %386 : vector<8x16xf32> to vector<8x16xbf16>
    %cst_423 = arith.constant dense<0.000000e+00> : vector<8x16xf32>
    %388 = tpu.matmul %385, %364, %cst_423 {dimension_numbers = #tpu.dot_dimension_numbers<[1], [0], [0], [1], [0, 0, 1, 1], [], []>} : vector<8x16xbf16>, vector<16x16xbf16>, vector<8x16xf32> -> vector<8x16xf32>
    %389 = arith.truncf %388 : vector<8x16xf32> to vector<8x16xbf16>
    %c12_424 = arith.constant 12 : index
    %c0_425 = arith.constant 0 : index
    %c0_426 = arith.constant 0 : index
    %c8_427 = arith.constant 8 : index
    %390 = vector.load %arg2[%c12_424, %c0_425, %c0_426, %c8_427] : memref<23x3x8x16xbf16, #tpu.memory_space<vmem>>, vector<1x1x8x8xbf16>
    %391 = vector.shape_cast %390 : vector<1x1x8x8xbf16> to vector<8x8xbf16>
    %cst_428 = arith.constant dense<0.000000e+00> : vector<8x16xf32>
    %392 = tpu.matmul %391, %387, %cst_428 {dimension_numbers = #tpu.dot_dimension_numbers<[1], [0], [0], [1], [0, 0, 1, 1], [], []>} : vector<8x8xbf16>, vector<8x16xbf16>, vector<8x16xf32> -> vector<8x16xf32>
    %393 = arith.addf %384, %392 : vector<8x16xf32>
    %c12_429 = arith.constant 12 : index
    %c1_430 = arith.constant 1 : index
    %c0_431 = arith.constant 0 : index
    %c8_432 = arith.constant 8 : index
    %394 = vector.load %arg2[%c12_429, %c1_430, %c0_431, %c8_432] : memref<23x3x8x16xbf16, #tpu.memory_space<vmem>>, vector<1x1x8x8xbf16>
    %395 = vector.shape_cast %394 : vector<1x1x8x8xbf16> to vector<8x8xbf16>
    %cst_433 = arith.constant dense<0.000000e+00> : vector<8x16xf32>
    %396 = tpu.matmul %395, %385, %cst_433 {dimension_numbers = #tpu.dot_dimension_numbers<[1], [0], [0], [1], [0, 0, 1, 1], [], []>} : vector<8x8xbf16>, vector<8x16xbf16>, vector<8x16xf32> -> vector<8x16xf32>
    %397 = arith.addf %393, %396 : vector<8x16xf32>
    %c12_434 = arith.constant 12 : index
    %c2_435 = arith.constant 2 : index
    %c0_436 = arith.constant 0 : index
    %c8_437 = arith.constant 8 : index
    %398 = vector.load %arg2[%c12_434, %c2_435, %c0_436, %c8_437] : memref<23x3x8x16xbf16, #tpu.memory_space<vmem>>, vector<1x1x8x8xbf16>
    %399 = vector.shape_cast %398 : vector<1x1x8x8xbf16> to vector<8x8xbf16>
    %cst_438 = arith.constant dense<0.000000e+00> : vector<8x16xf32>
    %400 = tpu.matmul %399, %389, %cst_438 {dimension_numbers = #tpu.dot_dimension_numbers<[1], [0], [0], [1], [0, 0, 1, 1], [], []>} : vector<8x8xbf16>, vector<8x16xbf16>, vector<8x16xf32> -> vector<8x16xf32>
    %401 = arith.addf %397, %400 : vector<8x16xf32>
    %cst_439 = arith.constant 0.000000e+00 : f32
    %402 = vector.broadcast %cst_439 : f32 to vector<8x16xf32>
    %403 = arith.maximumf %401, %402 : vector<8x16xf32>
    %c4_440 = arith.constant 4 : index
    %c0_441 = arith.constant 0 : index
    %c0_442 = arith.constant 0 : index
    %c0_443 = arith.constant 0 : index
    %404 = vector.load %arg4[%c4_440, %c0_441, %c0_442, %c0_443] : memref<6x2x256x256xbf16, #tpu.memory_space<vmem>>, vector<1x1x16x16xbf16>
    %405 = vector.shape_cast %404 : vector<1x1x16x16xbf16> to vector<16x16xbf16>
    %c4_444 = arith.constant 4 : index
    %c1_445 = arith.constant 1 : index
    %c0_446 = arith.constant 0 : index
    %c0_447 = arith.constant 0 : index
    %406 = vector.load %arg4[%c4_444, %c1_445, %c0_446, %c0_447] : memref<6x2x256x256xbf16, #tpu.memory_space<vmem>>, vector<1x1x16x16xbf16>
    %407 = vector.shape_cast %406 : vector<1x1x16x16xbf16> to vector<16x16xbf16>
    %c13 = arith.constant 13 : index
    %c0_448 = arith.constant 0 : index
    %c0_449 = arith.constant 0 : index
    %408 = vector.load %arg3[%c13, %c0_448, %c0_449] : memref<23x8x1xf32, #tpu.memory_space<vmem>>, vector<1x8x1xf32>
    %409 = vector.shape_cast %408 : vector<1x8x1xf32> to vector<8x1xf32>
    %410 = arith.truncf %403 : vector<8x16xf32> to vector<8x16xbf16>
    %cst_450 = arith.constant dense<0.000000e+00> : vector<8x16xf32>
    %411 = tpu.matmul %410, %405, %cst_450 {dimension_numbers = #tpu.dot_dimension_numbers<[1], [0], [0], [1], [0, 0, 1, 1], [], []>} : vector<8x16xbf16>, vector<16x16xbf16>, vector<8x16xf32> -> vector<8x16xf32>
    %412 = arith.truncf %411 : vector<8x16xf32> to vector<8x16xbf16>
    %cst_451 = arith.constant dense<0.000000e+00> : vector<8x16xf32>
    %413 = tpu.matmul %410, %407, %cst_451 {dimension_numbers = #tpu.dot_dimension_numbers<[1], [0], [0], [1], [0, 0, 1, 1], [], []>} : vector<8x16xbf16>, vector<16x16xbf16>, vector<8x16xf32> -> vector<8x16xf32>
    %414 = arith.truncf %413 : vector<8x16xf32> to vector<8x16xbf16>
    %c13_452 = arith.constant 13 : index
    %c0_453 = arith.constant 0 : index
    %c0_454 = arith.constant 0 : index
    %c0_455 = arith.constant 0 : index
    %415 = vector.load %arg2[%c13_452, %c0_453, %c0_454, %c0_455] : memref<23x3x8x16xbf16, #tpu.memory_space<vmem>>, vector<1x1x8x8xbf16>
    %416 = vector.shape_cast %415 : vector<1x1x8x8xbf16> to vector<8x8xbf16>
    %cst_456 = arith.constant dense<0.000000e+00> : vector<8x16xf32>
    %417 = tpu.matmul %416, %412, %cst_456 {dimension_numbers = #tpu.dot_dimension_numbers<[1], [0], [0], [1], [0, 0, 1, 1], [], []>} : vector<8x8xbf16>, vector<8x16xbf16>, vector<8x16xf32> -> vector<8x16xf32>
    %418 = vector.broadcast %409 : vector<8x1xf32> to vector<8x16xf32>
    %419 = arith.addf %418, %417 : vector<8x16xf32>
    %c13_457 = arith.constant 13 : index
    %c1_458 = arith.constant 1 : index
    %c0_459 = arith.constant 0 : index
    %c0_460 = arith.constant 0 : index
    %420 = vector.load %arg2[%c13_457, %c1_458, %c0_459, %c0_460] : memref<23x3x8x16xbf16, #tpu.memory_space<vmem>>, vector<1x1x8x8xbf16>
    %421 = vector.shape_cast %420 : vector<1x1x8x8xbf16> to vector<8x8xbf16>
    %cst_461 = arith.constant dense<0.000000e+00> : vector<8x16xf32>
    %422 = tpu.matmul %421, %410, %cst_461 {dimension_numbers = #tpu.dot_dimension_numbers<[1], [0], [0], [1], [0, 0, 1, 1], [], []>} : vector<8x8xbf16>, vector<8x16xbf16>, vector<8x16xf32> -> vector<8x16xf32>
    %423 = arith.addf %419, %422 : vector<8x16xf32>
    %c13_462 = arith.constant 13 : index
    %c2_463 = arith.constant 2 : index
    %c0_464 = arith.constant 0 : index
    %c0_465 = arith.constant 0 : index
    %424 = vector.load %arg2[%c13_462, %c2_463, %c0_464, %c0_465] : memref<23x3x8x16xbf16, #tpu.memory_space<vmem>>, vector<1x1x8x8xbf16>
    %425 = vector.shape_cast %424 : vector<1x1x8x8xbf16> to vector<8x8xbf16>
    %cst_466 = arith.constant dense<0.000000e+00> : vector<8x16xf32>
    %426 = tpu.matmul %425, %414, %cst_466 {dimension_numbers = #tpu.dot_dimension_numbers<[1], [0], [0], [1], [0, 0, 1, 1], [], []>} : vector<8x8xbf16>, vector<8x16xbf16>, vector<8x16xf32> -> vector<8x16xf32>
    %427 = arith.addf %423, %426 : vector<8x16xf32>
    %cst_467 = arith.constant 0.000000e+00 : f32
    %428 = vector.broadcast %cst_467 : f32 to vector<8x16xf32>
    %429 = arith.maximumf %427, %428 : vector<8x16xf32>
    %430 = arith.truncf %429 : vector<8x16xf32> to vector<8x16xbf16>
    %c1_468 = arith.constant 1 : index
    %c0_469 = arith.constant 0 : index
    %c0_470 = arith.constant 0 : index
    %431 = vector.load %arg6[%c1_468, %c0_469, %c0_470] : memref<5x128x256xbf16, #tpu.memory_space<vmem>>, vector<1x16x32xbf16>
    %432 = vector.shape_cast %431 : vector<1x16x32xbf16> to vector<16x32xbf16>
    %cst_471 = arith.constant dense<0.000000e+00> : vector<8x32xf32>
    %433 = tpu.matmul %430, %432, %cst_471 {dimension_numbers = #tpu.dot_dimension_numbers<[1], [0], [0], [1], [0, 0, 1, 1], [], []>} : vector<8x16xbf16>, vector<16x32xbf16>, vector<8x32xf32> -> vector<8x32xf32>
    %c3_472 = arith.constant 3 : index
    %c0_473 = arith.constant 0 : index
    %c0_474 = arith.constant 0 : index
    %c0_475 = arith.constant 0 : index
    %434 = vector.load %arg4[%c3_472, %c0_473, %c0_474, %c0_475] : memref<6x2x256x256xbf16, #tpu.memory_space<vmem>>, vector<1x1x32x32xbf16>
    %435 = vector.shape_cast %434 : vector<1x1x32x32xbf16> to vector<32x32xbf16>
    %c3_476 = arith.constant 3 : index
    %c1_477 = arith.constant 1 : index
    %c0_478 = arith.constant 0 : index
    %c0_479 = arith.constant 0 : index
    %436 = vector.load %arg4[%c3_476, %c1_477, %c0_478, %c0_479] : memref<6x2x256x256xbf16, #tpu.memory_space<vmem>>, vector<1x1x32x32xbf16>
    %437 = vector.shape_cast %436 : vector<1x1x32x32xbf16> to vector<32x32xbf16>
    %c14 = arith.constant 14 : index
    %c0_480 = arith.constant 0 : index
    %c0_481 = arith.constant 0 : index
    %438 = vector.load %arg3[%c14, %c0_480, %c0_481] : memref<23x8x1xf32, #tpu.memory_space<vmem>>, vector<1x4x1xf32>
    %439 = vector.shape_cast %438 : vector<1x4x1xf32> to vector<4x1xf32>
    %440 = arith.truncf %233 : vector<4x32xf32> to vector<4x32xbf16>
    %cst_482 = arith.constant dense<0.000000e+00> : vector<4x32xf32>
    %441 = tpu.matmul %440, %435, %cst_482 {dimension_numbers = #tpu.dot_dimension_numbers<[1], [0], [0], [1], [0, 0, 1, 1], [], []>} : vector<4x32xbf16>, vector<32x32xbf16>, vector<4x32xf32> -> vector<4x32xf32>
    %442 = arith.truncf %441 : vector<4x32xf32> to vector<4x32xbf16>
    %cst_483 = arith.constant dense<0.000000e+00> : vector<4x32xf32>
    %443 = tpu.matmul %440, %437, %cst_483 {dimension_numbers = #tpu.dot_dimension_numbers<[1], [0], [0], [1], [0, 0, 1, 1], [], []>} : vector<4x32xbf16>, vector<32x32xbf16>, vector<4x32xf32> -> vector<4x32xf32>
    %444 = arith.truncf %443 : vector<4x32xf32> to vector<4x32xbf16>
    %c14_484 = arith.constant 14 : index
    %c0_485 = arith.constant 0 : index
    %c0_486 = arith.constant 0 : index
    %c0_487 = arith.constant 0 : index
    %445 = vector.load %arg2[%c14_484, %c0_485, %c0_486, %c0_487] : memref<23x3x8x16xbf16, #tpu.memory_space<vmem>>, vector<1x1x4x4xbf16>
    %446 = vector.shape_cast %445 : vector<1x1x4x4xbf16> to vector<4x4xbf16>
    %cst_488 = arith.constant dense<0.000000e+00> : vector<4x32xf32>
    %447 = tpu.matmul %446, %442, %cst_488 {dimension_numbers = #tpu.dot_dimension_numbers<[1], [0], [0], [1], [0, 0, 1, 1], [], []>} : vector<4x4xbf16>, vector<4x32xbf16>, vector<4x32xf32> -> vector<4x32xf32>
    %448 = vector.broadcast %439 : vector<4x1xf32> to vector<4x32xf32>
    %449 = arith.addf %448, %447 : vector<4x32xf32>
    %c14_489 = arith.constant 14 : index
    %c1_490 = arith.constant 1 : index
    %c0_491 = arith.constant 0 : index
    %c0_492 = arith.constant 0 : index
    %450 = vector.load %arg2[%c14_489, %c1_490, %c0_491, %c0_492] : memref<23x3x8x16xbf16, #tpu.memory_space<vmem>>, vector<1x1x4x4xbf16>
    %451 = vector.shape_cast %450 : vector<1x1x4x4xbf16> to vector<4x4xbf16>
    %cst_493 = arith.constant dense<0.000000e+00> : vector<4x32xf32>
    %452 = tpu.matmul %451, %440, %cst_493 {dimension_numbers = #tpu.dot_dimension_numbers<[1], [0], [0], [1], [0, 0, 1, 1], [], []>} : vector<4x4xbf16>, vector<4x32xbf16>, vector<4x32xf32> -> vector<4x32xf32>
    %453 = arith.addf %449, %452 : vector<4x32xf32>
    %c14_494 = arith.constant 14 : index
    %c2_495 = arith.constant 2 : index
    %c0_496 = arith.constant 0 : index
    %c0_497 = arith.constant 0 : index
    %454 = vector.load %arg2[%c14_494, %c2_495, %c0_496, %c0_497] : memref<23x3x8x16xbf16, #tpu.memory_space<vmem>>, vector<1x1x4x4xbf16>
    %455 = vector.shape_cast %454 : vector<1x1x4x4xbf16> to vector<4x4xbf16>
    %cst_498 = arith.constant dense<0.000000e+00> : vector<4x32xf32>
    %456 = tpu.matmul %455, %444, %cst_498 {dimension_numbers = #tpu.dot_dimension_numbers<[1], [0], [0], [1], [0, 0, 1, 1], [], []>} : vector<4x4xbf16>, vector<4x32xbf16>, vector<4x32xf32> -> vector<4x32xf32>
    %457 = arith.addf %453, %456 : vector<4x32xf32>
    %458 = arith.truncf %433 : vector<8x32xf32> to vector<8x32xbf16>
    %cst_499 = arith.constant dense<0.000000e+00> : vector<8x32xf32>
    %459 = tpu.matmul %458, %435, %cst_499 {dimension_numbers = #tpu.dot_dimension_numbers<[1], [0], [0], [1], [0, 0, 1, 1], [], []>} : vector<8x32xbf16>, vector<32x32xbf16>, vector<8x32xf32> -> vector<8x32xf32>
    %460 = arith.truncf %459 : vector<8x32xf32> to vector<8x32xbf16>
    %cst_500 = arith.constant dense<0.000000e+00> : vector<8x32xf32>
    %461 = tpu.matmul %458, %437, %cst_500 {dimension_numbers = #tpu.dot_dimension_numbers<[1], [0], [0], [1], [0, 0, 1, 1], [], []>} : vector<8x32xbf16>, vector<32x32xbf16>, vector<8x32xf32> -> vector<8x32xf32>
    %462 = arith.truncf %461 : vector<8x32xf32> to vector<8x32xbf16>
    %c14_501 = arith.constant 14 : index
    %c0_502 = arith.constant 0 : index
    %c0_503 = arith.constant 0 : index
    %c4_504 = arith.constant 4 : index
    %463 = vector.load %arg2[%c14_501, %c0_502, %c0_503, %c4_504] : memref<23x3x8x16xbf16, #tpu.memory_space<vmem>>, vector<1x1x4x8xbf16>
    %464 = vector.shape_cast %463 : vector<1x1x4x8xbf16> to vector<4x8xbf16>
    %cst_505 = arith.constant dense<0.000000e+00> : vector<4x32xf32>
    %465 = tpu.matmul %464, %460, %cst_505 {dimension_numbers = #tpu.dot_dimension_numbers<[1], [0], [0], [1], [0, 0, 1, 1], [], []>} : vector<4x8xbf16>, vector<8x32xbf16>, vector<4x32xf32> -> vector<4x32xf32>
    %466 = arith.addf %457, %465 : vector<4x32xf32>
    %c14_506 = arith.constant 14 : index
    %c1_507 = arith.constant 1 : index
    %c0_508 = arith.constant 0 : index
    %c4_509 = arith.constant 4 : index
    %467 = vector.load %arg2[%c14_506, %c1_507, %c0_508, %c4_509] : memref<23x3x8x16xbf16, #tpu.memory_space<vmem>>, vector<1x1x4x8xbf16>
    %468 = vector.shape_cast %467 : vector<1x1x4x8xbf16> to vector<4x8xbf16>
    %cst_510 = arith.constant dense<0.000000e+00> : vector<4x32xf32>
    %469 = tpu.matmul %468, %458, %cst_510 {dimension_numbers = #tpu.dot_dimension_numbers<[1], [0], [0], [1], [0, 0, 1, 1], [], []>} : vector<4x8xbf16>, vector<8x32xbf16>, vector<4x32xf32> -> vector<4x32xf32>
    %470 = arith.addf %466, %469 : vector<4x32xf32>
    %c14_511 = arith.constant 14 : index
    %c2_512 = arith.constant 2 : index
    %c0_513 = arith.constant 0 : index
    %c4_514 = arith.constant 4 : index
    %471 = vector.load %arg2[%c14_511, %c2_512, %c0_513, %c4_514] : memref<23x3x8x16xbf16, #tpu.memory_space<vmem>>, vector<1x1x4x8xbf16>
    %472 = vector.shape_cast %471 : vector<1x1x4x8xbf16> to vector<4x8xbf16>
    %cst_515 = arith.constant dense<0.000000e+00> : vector<4x32xf32>
    %473 = tpu.matmul %472, %462, %cst_515 {dimension_numbers = #tpu.dot_dimension_numbers<[1], [0], [0], [1], [0, 0, 1, 1], [], []>} : vector<4x8xbf16>, vector<8x32xbf16>, vector<4x32xf32> -> vector<4x32xf32>
    %474 = arith.addf %470, %473 : vector<4x32xf32>
    %cst_516 = arith.constant 0.000000e+00 : f32
    %475 = vector.broadcast %cst_516 : f32 to vector<4x32xf32>
    %476 = arith.maximumf %474, %475 : vector<4x32xf32>
    %c3_517 = arith.constant 3 : index
    %c0_518 = arith.constant 0 : index
    %c0_519 = arith.constant 0 : index
    %c0_520 = arith.constant 0 : index
    %477 = vector.load %arg4[%c3_517, %c0_518, %c0_519, %c0_520] : memref<6x2x256x256xbf16, #tpu.memory_space<vmem>>, vector<1x1x32x32xbf16>
    %478 = vector.shape_cast %477 : vector<1x1x32x32xbf16> to vector<32x32xbf16>
    %c3_521 = arith.constant 3 : index
    %c1_522 = arith.constant 1 : index
    %c0_523 = arith.constant 0 : index
    %c0_524 = arith.constant 0 : index
    %479 = vector.load %arg4[%c3_521, %c1_522, %c0_523, %c0_524] : memref<6x2x256x256xbf16, #tpu.memory_space<vmem>>, vector<1x1x32x32xbf16>
    %480 = vector.shape_cast %479 : vector<1x1x32x32xbf16> to vector<32x32xbf16>
    %c15 = arith.constant 15 : index
    %c0_525 = arith.constant 0 : index
    %c0_526 = arith.constant 0 : index
    %481 = vector.load %arg3[%c15, %c0_525, %c0_526] : memref<23x8x1xf32, #tpu.memory_space<vmem>>, vector<1x4x1xf32>
    %482 = vector.shape_cast %481 : vector<1x4x1xf32> to vector<4x1xf32>
    %483 = arith.truncf %476 : vector<4x32xf32> to vector<4x32xbf16>
    %cst_527 = arith.constant dense<0.000000e+00> : vector<4x32xf32>
    %484 = tpu.matmul %483, %478, %cst_527 {dimension_numbers = #tpu.dot_dimension_numbers<[1], [0], [0], [1], [0, 0, 1, 1], [], []>} : vector<4x32xbf16>, vector<32x32xbf16>, vector<4x32xf32> -> vector<4x32xf32>
    %485 = arith.truncf %484 : vector<4x32xf32> to vector<4x32xbf16>
    %cst_528 = arith.constant dense<0.000000e+00> : vector<4x32xf32>
    %486 = tpu.matmul %483, %480, %cst_528 {dimension_numbers = #tpu.dot_dimension_numbers<[1], [0], [0], [1], [0, 0, 1, 1], [], []>} : vector<4x32xbf16>, vector<32x32xbf16>, vector<4x32xf32> -> vector<4x32xf32>
    %487 = arith.truncf %486 : vector<4x32xf32> to vector<4x32xbf16>
    %c15_529 = arith.constant 15 : index
    %c0_530 = arith.constant 0 : index
    %c0_531 = arith.constant 0 : index
    %c0_532 = arith.constant 0 : index
    %488 = vector.load %arg2[%c15_529, %c0_530, %c0_531, %c0_532] : memref<23x3x8x16xbf16, #tpu.memory_space<vmem>>, vector<1x1x4x4xbf16>
    %489 = vector.shape_cast %488 : vector<1x1x4x4xbf16> to vector<4x4xbf16>
    %cst_533 = arith.constant dense<0.000000e+00> : vector<4x32xf32>
    %490 = tpu.matmul %489, %485, %cst_533 {dimension_numbers = #tpu.dot_dimension_numbers<[1], [0], [0], [1], [0, 0, 1, 1], [], []>} : vector<4x4xbf16>, vector<4x32xbf16>, vector<4x32xf32> -> vector<4x32xf32>
    %491 = vector.broadcast %482 : vector<4x1xf32> to vector<4x32xf32>
    %492 = arith.addf %491, %490 : vector<4x32xf32>
    %c15_534 = arith.constant 15 : index
    %c1_535 = arith.constant 1 : index
    %c0_536 = arith.constant 0 : index
    %c0_537 = arith.constant 0 : index
    %493 = vector.load %arg2[%c15_534, %c1_535, %c0_536, %c0_537] : memref<23x3x8x16xbf16, #tpu.memory_space<vmem>>, vector<1x1x4x4xbf16>
    %494 = vector.shape_cast %493 : vector<1x1x4x4xbf16> to vector<4x4xbf16>
    %cst_538 = arith.constant dense<0.000000e+00> : vector<4x32xf32>
    %495 = tpu.matmul %494, %483, %cst_538 {dimension_numbers = #tpu.dot_dimension_numbers<[1], [0], [0], [1], [0, 0, 1, 1], [], []>} : vector<4x4xbf16>, vector<4x32xbf16>, vector<4x32xf32> -> vector<4x32xf32>
    %496 = arith.addf %492, %495 : vector<4x32xf32>
    %c15_539 = arith.constant 15 : index
    %c2_540 = arith.constant 2 : index
    %c0_541 = arith.constant 0 : index
    %c0_542 = arith.constant 0 : index
    %497 = vector.load %arg2[%c15_539, %c2_540, %c0_541, %c0_542] : memref<23x3x8x16xbf16, #tpu.memory_space<vmem>>, vector<1x1x4x4xbf16>
    %498 = vector.shape_cast %497 : vector<1x1x4x4xbf16> to vector<4x4xbf16>
    %cst_543 = arith.constant dense<0.000000e+00> : vector<4x32xf32>
    %499 = tpu.matmul %498, %487, %cst_543 {dimension_numbers = #tpu.dot_dimension_numbers<[1], [0], [0], [1], [0, 0, 1, 1], [], []>} : vector<4x4xbf16>, vector<4x32xbf16>, vector<4x32xf32> -> vector<4x32xf32>
    %500 = arith.addf %496, %499 : vector<4x32xf32>
    %cst_544 = arith.constant 0.000000e+00 : f32
    %501 = vector.broadcast %cst_544 : f32 to vector<4x32xf32>
    %502 = arith.maximumf %500, %501 : vector<4x32xf32>
    %503 = arith.truncf %502 : vector<4x32xf32> to vector<4x32xbf16>
    %c2_545 = arith.constant 2 : index
    %c0_546 = arith.constant 0 : index
    %c0_547 = arith.constant 0 : index
    %504 = vector.load %arg6[%c2_545, %c0_546, %c0_547] : memref<5x128x256xbf16, #tpu.memory_space<vmem>>, vector<1x32x64xbf16>
    %505 = vector.shape_cast %504 : vector<1x32x64xbf16> to vector<32x64xbf16>
    %cst_548 = arith.constant dense<0.000000e+00> : vector<4x64xf32>
    %506 = tpu.matmul %503, %505, %cst_548 {dimension_numbers = #tpu.dot_dimension_numbers<[1], [0], [0], [1], [0, 0, 1, 1], [], []>} : vector<4x32xbf16>, vector<32x64xbf16>, vector<4x64xf32> -> vector<4x64xf32>
    %c2_549 = arith.constant 2 : index
    %c0_550 = arith.constant 0 : index
    %c0_551 = arith.constant 0 : index
    %c0_552 = arith.constant 0 : index
    %507 = vector.load %arg4[%c2_549, %c0_550, %c0_551, %c0_552] : memref<6x2x256x256xbf16, #tpu.memory_space<vmem>>, vector<1x1x64x64xbf16>
    %508 = vector.shape_cast %507 : vector<1x1x64x64xbf16> to vector<64x64xbf16>
    %c2_553 = arith.constant 2 : index
    %c1_554 = arith.constant 1 : index
    %c0_555 = arith.constant 0 : index
    %c0_556 = arith.constant 0 : index
    %509 = vector.load %arg4[%c2_553, %c1_554, %c0_555, %c0_556] : memref<6x2x256x256xbf16, #tpu.memory_space<vmem>>, vector<1x1x64x64xbf16>
    %510 = vector.shape_cast %509 : vector<1x1x64x64xbf16> to vector<64x64xbf16>
    %c16 = arith.constant 16 : index
    %c0_557 = arith.constant 0 : index
    %c0_558 = arith.constant 0 : index
    %511 = vector.load %arg3[%c16, %c0_557, %c0_558] : memref<23x8x1xf32, #tpu.memory_space<vmem>>, vector<1x4x1xf32>
    %512 = vector.shape_cast %511 : vector<1x4x1xf32> to vector<4x1xf32>
    %513 = arith.truncf %173 : vector<4x64xf32> to vector<4x64xbf16>
    %cst_559 = arith.constant dense<0.000000e+00> : vector<4x64xf32>
    %514 = tpu.matmul %513, %508, %cst_559 {dimension_numbers = #tpu.dot_dimension_numbers<[1], [0], [0], [1], [0, 0, 1, 1], [], []>} : vector<4x64xbf16>, vector<64x64xbf16>, vector<4x64xf32> -> vector<4x64xf32>
    %515 = arith.truncf %514 : vector<4x64xf32> to vector<4x64xbf16>
    %cst_560 = arith.constant dense<0.000000e+00> : vector<4x64xf32>
    %516 = tpu.matmul %513, %510, %cst_560 {dimension_numbers = #tpu.dot_dimension_numbers<[1], [0], [0], [1], [0, 0, 1, 1], [], []>} : vector<4x64xbf16>, vector<64x64xbf16>, vector<4x64xf32> -> vector<4x64xf32>
    %517 = arith.truncf %516 : vector<4x64xf32> to vector<4x64xbf16>
    %c16_561 = arith.constant 16 : index
    %c0_562 = arith.constant 0 : index
    %c0_563 = arith.constant 0 : index
    %c0_564 = arith.constant 0 : index
    %518 = vector.load %arg2[%c16_561, %c0_562, %c0_563, %c0_564] : memref<23x3x8x16xbf16, #tpu.memory_space<vmem>>, vector<1x1x4x4xbf16>
    %519 = vector.shape_cast %518 : vector<1x1x4x4xbf16> to vector<4x4xbf16>
    %cst_565 = arith.constant dense<0.000000e+00> : vector<4x64xf32>
    %520 = tpu.matmul %519, %515, %cst_565 {dimension_numbers = #tpu.dot_dimension_numbers<[1], [0], [0], [1], [0, 0, 1, 1], [], []>} : vector<4x4xbf16>, vector<4x64xbf16>, vector<4x64xf32> -> vector<4x64xf32>
    %521 = vector.broadcast %512 : vector<4x1xf32> to vector<4x64xf32>
    %522 = arith.addf %521, %520 : vector<4x64xf32>
    %c16_566 = arith.constant 16 : index
    %c1_567 = arith.constant 1 : index
    %c0_568 = arith.constant 0 : index
    %c0_569 = arith.constant 0 : index
    %523 = vector.load %arg2[%c16_566, %c1_567, %c0_568, %c0_569] : memref<23x3x8x16xbf16, #tpu.memory_space<vmem>>, vector<1x1x4x4xbf16>
    %524 = vector.shape_cast %523 : vector<1x1x4x4xbf16> to vector<4x4xbf16>
    %cst_570 = arith.constant dense<0.000000e+00> : vector<4x64xf32>
    %525 = tpu.matmul %524, %513, %cst_570 {dimension_numbers = #tpu.dot_dimension_numbers<[1], [0], [0], [1], [0, 0, 1, 1], [], []>} : vector<4x4xbf16>, vector<4x64xbf16>, vector<4x64xf32> -> vector<4x64xf32>
    %526 = arith.addf %522, %525 : vector<4x64xf32>
    %c16_571 = arith.constant 16 : index
    %c2_572 = arith.constant 2 : index
    %c0_573 = arith.constant 0 : index
    %c0_574 = arith.constant 0 : index
    %527 = vector.load %arg2[%c16_571, %c2_572, %c0_573, %c0_574] : memref<23x3x8x16xbf16, #tpu.memory_space<vmem>>, vector<1x1x4x4xbf16>
    %528 = vector.shape_cast %527 : vector<1x1x4x4xbf16> to vector<4x4xbf16>
    %cst_575 = arith.constant dense<0.000000e+00> : vector<4x64xf32>
    %529 = tpu.matmul %528, %517, %cst_575 {dimension_numbers = #tpu.dot_dimension_numbers<[1], [0], [0], [1], [0, 0, 1, 1], [], []>} : vector<4x4xbf16>, vector<4x64xbf16>, vector<4x64xf32> -> vector<4x64xf32>
    %530 = arith.addf %526, %529 : vector<4x64xf32>
    %531 = arith.truncf %506 : vector<4x64xf32> to vector<4x64xbf16>
    %cst_576 = arith.constant dense<0.000000e+00> : vector<4x64xf32>
    %532 = tpu.matmul %531, %508, %cst_576 {dimension_numbers = #tpu.dot_dimension_numbers<[1], [0], [0], [1], [0, 0, 1, 1], [], []>} : vector<4x64xbf16>, vector<64x64xbf16>, vector<4x64xf32> -> vector<4x64xf32>
    %533 = arith.truncf %532 : vector<4x64xf32> to vector<4x64xbf16>
    %cst_577 = arith.constant dense<0.000000e+00> : vector<4x64xf32>
    %534 = tpu.matmul %531, %510, %cst_577 {dimension_numbers = #tpu.dot_dimension_numbers<[1], [0], [0], [1], [0, 0, 1, 1], [], []>} : vector<4x64xbf16>, vector<64x64xbf16>, vector<4x64xf32> -> vector<4x64xf32>
    %535 = arith.truncf %534 : vector<4x64xf32> to vector<4x64xbf16>
    %c16_578 = arith.constant 16 : index
    %c0_579 = arith.constant 0 : index
    %c0_580 = arith.constant 0 : index
    %c4_581 = arith.constant 4 : index
    %536 = vector.load %arg2[%c16_578, %c0_579, %c0_580, %c4_581] : memref<23x3x8x16xbf16, #tpu.memory_space<vmem>>, vector<1x1x4x4xbf16>
    %537 = vector.shape_cast %536 : vector<1x1x4x4xbf16> to vector<4x4xbf16>
    %cst_582 = arith.constant dense<0.000000e+00> : vector<4x64xf32>
    %538 = tpu.matmul %537, %533, %cst_582 {dimension_numbers = #tpu.dot_dimension_numbers<[1], [0], [0], [1], [0, 0, 1, 1], [], []>} : vector<4x4xbf16>, vector<4x64xbf16>, vector<4x64xf32> -> vector<4x64xf32>
    %539 = arith.addf %530, %538 : vector<4x64xf32>
    %c16_583 = arith.constant 16 : index
    %c1_584 = arith.constant 1 : index
    %c0_585 = arith.constant 0 : index
    %c4_586 = arith.constant 4 : index
    %540 = vector.load %arg2[%c16_583, %c1_584, %c0_585, %c4_586] : memref<23x3x8x16xbf16, #tpu.memory_space<vmem>>, vector<1x1x4x4xbf16>
    %541 = vector.shape_cast %540 : vector<1x1x4x4xbf16> to vector<4x4xbf16>
    %cst_587 = arith.constant dense<0.000000e+00> : vector<4x64xf32>
    %542 = tpu.matmul %541, %531, %cst_587 {dimension_numbers = #tpu.dot_dimension_numbers<[1], [0], [0], [1], [0, 0, 1, 1], [], []>} : vector<4x4xbf16>, vector<4x64xbf16>, vector<4x64xf32> -> vector<4x64xf32>
    %543 = arith.addf %539, %542 : vector<4x64xf32>
    %c16_588 = arith.constant 16 : index
    %c2_589 = arith.constant 2 : index
    %c0_590 = arith.constant 0 : index
    %c4_591 = arith.constant 4 : index
    %544 = vector.load %arg2[%c16_588, %c2_589, %c0_590, %c4_591] : memref<23x3x8x16xbf16, #tpu.memory_space<vmem>>, vector<1x1x4x4xbf16>
    %545 = vector.shape_cast %544 : vector<1x1x4x4xbf16> to vector<4x4xbf16>
    %cst_592 = arith.constant dense<0.000000e+00> : vector<4x64xf32>
    %546 = tpu.matmul %545, %535, %cst_592 {dimension_numbers = #tpu.dot_dimension_numbers<[1], [0], [0], [1], [0, 0, 1, 1], [], []>} : vector<4x4xbf16>, vector<4x64xbf16>, vector<4x64xf32> -> vector<4x64xf32>
    %547 = arith.addf %543, %546 : vector<4x64xf32>
    %cst_593 = arith.constant 0.000000e+00 : f32
    %548 = vector.broadcast %cst_593 : f32 to vector<4x64xf32>
    %549 = arith.maximumf %547, %548 : vector<4x64xf32>
    %c2_594 = arith.constant 2 : index
    %c0_595 = arith.constant 0 : index
    %c0_596 = arith.constant 0 : index
    %c0_597 = arith.constant 0 : index
    %550 = vector.load %arg4[%c2_594, %c0_595, %c0_596, %c0_597] : memref<6x2x256x256xbf16, #tpu.memory_space<vmem>>, vector<1x1x64x64xbf16>
    %551 = vector.shape_cast %550 : vector<1x1x64x64xbf16> to vector<64x64xbf16>
    %c2_598 = arith.constant 2 : index
    %c1_599 = arith.constant 1 : index
    %c0_600 = arith.constant 0 : index
    %c0_601 = arith.constant 0 : index
    %552 = vector.load %arg4[%c2_598, %c1_599, %c0_600, %c0_601] : memref<6x2x256x256xbf16, #tpu.memory_space<vmem>>, vector<1x1x64x64xbf16>
    %553 = vector.shape_cast %552 : vector<1x1x64x64xbf16> to vector<64x64xbf16>
    %c17 = arith.constant 17 : index
    %c0_602 = arith.constant 0 : index
    %c0_603 = arith.constant 0 : index
    %554 = vector.load %arg3[%c17, %c0_602, %c0_603] : memref<23x8x1xf32, #tpu.memory_space<vmem>>, vector<1x4x1xf32>
    %555 = vector.shape_cast %554 : vector<1x4x1xf32> to vector<4x1xf32>
    %556 = arith.truncf %549 : vector<4x64xf32> to vector<4x64xbf16>
    %cst_604 = arith.constant dense<0.000000e+00> : vector<4x64xf32>
    %557 = tpu.matmul %556, %551, %cst_604 {dimension_numbers = #tpu.dot_dimension_numbers<[1], [0], [0], [1], [0, 0, 1, 1], [], []>} : vector<4x64xbf16>, vector<64x64xbf16>, vector<4x64xf32> -> vector<4x64xf32>
    %558 = arith.truncf %557 : vector<4x64xf32> to vector<4x64xbf16>
    %cst_605 = arith.constant dense<0.000000e+00> : vector<4x64xf32>
    %559 = tpu.matmul %556, %553, %cst_605 {dimension_numbers = #tpu.dot_dimension_numbers<[1], [0], [0], [1], [0, 0, 1, 1], [], []>} : vector<4x64xbf16>, vector<64x64xbf16>, vector<4x64xf32> -> vector<4x64xf32>
    %560 = arith.truncf %559 : vector<4x64xf32> to vector<4x64xbf16>
    %c17_606 = arith.constant 17 : index
    %c0_607 = arith.constant 0 : index
    %c0_608 = arith.constant 0 : index
    %c0_609 = arith.constant 0 : index
    %561 = vector.load %arg2[%c17_606, %c0_607, %c0_608, %c0_609] : memref<23x3x8x16xbf16, #tpu.memory_space<vmem>>, vector<1x1x4x4xbf16>
    %562 = vector.shape_cast %561 : vector<1x1x4x4xbf16> to vector<4x4xbf16>
    %cst_610 = arith.constant dense<0.000000e+00> : vector<4x64xf32>
    %563 = tpu.matmul %562, %558, %cst_610 {dimension_numbers = #tpu.dot_dimension_numbers<[1], [0], [0], [1], [0, 0, 1, 1], [], []>} : vector<4x4xbf16>, vector<4x64xbf16>, vector<4x64xf32> -> vector<4x64xf32>
    %564 = vector.broadcast %555 : vector<4x1xf32> to vector<4x64xf32>
    %565 = arith.addf %564, %563 : vector<4x64xf32>
    %c17_611 = arith.constant 17 : index
    %c1_612 = arith.constant 1 : index
    %c0_613 = arith.constant 0 : index
    %c0_614 = arith.constant 0 : index
    %566 = vector.load %arg2[%c17_611, %c1_612, %c0_613, %c0_614] : memref<23x3x8x16xbf16, #tpu.memory_space<vmem>>, vector<1x1x4x4xbf16>
    %567 = vector.shape_cast %566 : vector<1x1x4x4xbf16> to vector<4x4xbf16>
    %cst_615 = arith.constant dense<0.000000e+00> : vector<4x64xf32>
    %568 = tpu.matmul %567, %556, %cst_615 {dimension_numbers = #tpu.dot_dimension_numbers<[1], [0], [0], [1], [0, 0, 1, 1], [], []>} : vector<4x4xbf16>, vector<4x64xbf16>, vector<4x64xf32> -> vector<4x64xf32>
    %569 = arith.addf %565, %568 : vector<4x64xf32>
    %c17_616 = arith.constant 17 : index
    %c2_617 = arith.constant 2 : index
    %c0_618 = arith.constant 0 : index
    %c0_619 = arith.constant 0 : index
    %570 = vector.load %arg2[%c17_616, %c2_617, %c0_618, %c0_619] : memref<23x3x8x16xbf16, #tpu.memory_space<vmem>>, vector<1x1x4x4xbf16>
    %571 = vector.shape_cast %570 : vector<1x1x4x4xbf16> to vector<4x4xbf16>
    %cst_620 = arith.constant dense<0.000000e+00> : vector<4x64xf32>
    %572 = tpu.matmul %571, %560, %cst_620 {dimension_numbers = #tpu.dot_dimension_numbers<[1], [0], [0], [1], [0, 0, 1, 1], [], []>} : vector<4x4xbf16>, vector<4x64xbf16>, vector<4x64xf32> -> vector<4x64xf32>
    %573 = arith.addf %569, %572 : vector<4x64xf32>
    %cst_621 = arith.constant 0.000000e+00 : f32
    %574 = vector.broadcast %cst_621 : f32 to vector<4x64xf32>
    %575 = arith.maximumf %573, %574 : vector<4x64xf32>
    %576 = arith.truncf %575 : vector<4x64xf32> to vector<4x64xbf16>
    %c3_622 = arith.constant 3 : index
    %c0_623 = arith.constant 0 : index
    %c0_624 = arith.constant 0 : index
    %577 = vector.load %arg6[%c3_622, %c0_623, %c0_624] : memref<5x128x256xbf16, #tpu.memory_space<vmem>>, vector<1x64x128xbf16>
    %578 = vector.shape_cast %577 : vector<1x64x128xbf16> to vector<64x128xbf16>
    %cst_625 = arith.constant dense<0.000000e+00> : vector<4x128xf32>
    %579 = tpu.matmul %576, %578, %cst_625 {dimension_numbers = #tpu.dot_dimension_numbers<[1], [0], [0], [1], [0, 0, 1, 1], [], []>} : vector<4x64xbf16>, vector<64x128xbf16>, vector<4x128xf32> -> vector<4x128xf32>
    %c1_626 = arith.constant 1 : index
    %c0_627 = arith.constant 0 : index
    %c0_628 = arith.constant 0 : index
    %c0_629 = arith.constant 0 : index
    %580 = vector.load %arg4[%c1_626, %c0_627, %c0_628, %c0_629] : memref<6x2x256x256xbf16, #tpu.memory_space<vmem>>, vector<1x1x128x128xbf16>
    %581 = vector.shape_cast %580 : vector<1x1x128x128xbf16> to vector<128x128xbf16>
    %c1_630 = arith.constant 1 : index
    %c1_631 = arith.constant 1 : index
    %c0_632 = arith.constant 0 : index
    %c0_633 = arith.constant 0 : index
    %582 = vector.load %arg4[%c1_630, %c1_631, %c0_632, %c0_633] : memref<6x2x256x256xbf16, #tpu.memory_space<vmem>>, vector<1x1x128x128xbf16>
    %583 = vector.shape_cast %582 : vector<1x1x128x128xbf16> to vector<128x128xbf16>
    %c18 = arith.constant 18 : index
    %c0_634 = arith.constant 0 : index
    %c0_635 = arith.constant 0 : index
    %584 = vector.load %arg3[%c18, %c0_634, %c0_635] : memref<23x8x1xf32, #tpu.memory_space<vmem>>, vector<1x4x1xf32>
    %585 = vector.shape_cast %584 : vector<1x4x1xf32> to vector<4x1xf32>
    %586 = arith.truncf %113 : vector<4x128xf32> to vector<4x128xbf16>
    %cst_636 = arith.constant dense<0.000000e+00> : vector<4x128xf32>
    %587 = tpu.matmul %586, %581, %cst_636 {dimension_numbers = #tpu.dot_dimension_numbers<[1], [0], [0], [1], [0, 0, 1, 1], [], []>} : vector<4x128xbf16>, vector<128x128xbf16>, vector<4x128xf32> -> vector<4x128xf32>
    %588 = arith.truncf %587 : vector<4x128xf32> to vector<4x128xbf16>
    %cst_637 = arith.constant dense<0.000000e+00> : vector<4x128xf32>
    %589 = tpu.matmul %586, %583, %cst_637 {dimension_numbers = #tpu.dot_dimension_numbers<[1], [0], [0], [1], [0, 0, 1, 1], [], []>} : vector<4x128xbf16>, vector<128x128xbf16>, vector<4x128xf32> -> vector<4x128xf32>
    %590 = arith.truncf %589 : vector<4x128xf32> to vector<4x128xbf16>
    %c18_638 = arith.constant 18 : index
    %c0_639 = arith.constant 0 : index
    %c0_640 = arith.constant 0 : index
    %c0_641 = arith.constant 0 : index
    %591 = vector.load %arg2[%c18_638, %c0_639, %c0_640, %c0_641] : memref<23x3x8x16xbf16, #tpu.memory_space<vmem>>, vector<1x1x4x4xbf16>
    %592 = vector.shape_cast %591 : vector<1x1x4x4xbf16> to vector<4x4xbf16>
    %cst_642 = arith.constant dense<0.000000e+00> : vector<4x128xf32>
    %593 = tpu.matmul %592, %588, %cst_642 {dimension_numbers = #tpu.dot_dimension_numbers<[1], [0], [0], [1], [0, 0, 1, 1], [], []>} : vector<4x4xbf16>, vector<4x128xbf16>, vector<4x128xf32> -> vector<4x128xf32>
    %594 = vector.broadcast %585 : vector<4x1xf32> to vector<4x128xf32>
    %595 = arith.addf %594, %593 : vector<4x128xf32>
    %c18_643 = arith.constant 18 : index
    %c1_644 = arith.constant 1 : index
    %c0_645 = arith.constant 0 : index
    %c0_646 = arith.constant 0 : index
    %596 = vector.load %arg2[%c18_643, %c1_644, %c0_645, %c0_646] : memref<23x3x8x16xbf16, #tpu.memory_space<vmem>>, vector<1x1x4x4xbf16>
    %597 = vector.shape_cast %596 : vector<1x1x4x4xbf16> to vector<4x4xbf16>
    %cst_647 = arith.constant dense<0.000000e+00> : vector<4x128xf32>
    %598 = tpu.matmul %597, %586, %cst_647 {dimension_numbers = #tpu.dot_dimension_numbers<[1], [0], [0], [1], [0, 0, 1, 1], [], []>} : vector<4x4xbf16>, vector<4x128xbf16>, vector<4x128xf32> -> vector<4x128xf32>
    %599 = arith.addf %595, %598 : vector<4x128xf32>
    %c18_648 = arith.constant 18 : index
    %c2_649 = arith.constant 2 : index
    %c0_650 = arith.constant 0 : index
    %c0_651 = arith.constant 0 : index
    %600 = vector.load %arg2[%c18_648, %c2_649, %c0_650, %c0_651] : memref<23x3x8x16xbf16, #tpu.memory_space<vmem>>, vector<1x1x4x4xbf16>
    %601 = vector.shape_cast %600 : vector<1x1x4x4xbf16> to vector<4x4xbf16>
    %cst_652 = arith.constant dense<0.000000e+00> : vector<4x128xf32>
    %602 = tpu.matmul %601, %590, %cst_652 {dimension_numbers = #tpu.dot_dimension_numbers<[1], [0], [0], [1], [0, 0, 1, 1], [], []>} : vector<4x4xbf16>, vector<4x128xbf16>, vector<4x128xf32> -> vector<4x128xf32>
    %603 = arith.addf %599, %602 : vector<4x128xf32>
    %604 = arith.truncf %579 : vector<4x128xf32> to vector<4x128xbf16>
    %cst_653 = arith.constant dense<0.000000e+00> : vector<4x128xf32>
    %605 = tpu.matmul %604, %581, %cst_653 {dimension_numbers = #tpu.dot_dimension_numbers<[1], [0], [0], [1], [0, 0, 1, 1], [], []>} : vector<4x128xbf16>, vector<128x128xbf16>, vector<4x128xf32> -> vector<4x128xf32>
    %606 = arith.truncf %605 : vector<4x128xf32> to vector<4x128xbf16>
    %cst_654 = arith.constant dense<0.000000e+00> : vector<4x128xf32>
    %607 = tpu.matmul %604, %583, %cst_654 {dimension_numbers = #tpu.dot_dimension_numbers<[1], [0], [0], [1], [0, 0, 1, 1], [], []>} : vector<4x128xbf16>, vector<128x128xbf16>, vector<4x128xf32> -> vector<4x128xf32>
    %608 = arith.truncf %607 : vector<4x128xf32> to vector<4x128xbf16>
    %c18_655 = arith.constant 18 : index
    %c0_656 = arith.constant 0 : index
    %c0_657 = arith.constant 0 : index
    %c4_658 = arith.constant 4 : index
    %609 = vector.load %arg2[%c18_655, %c0_656, %c0_657, %c4_658] : memref<23x3x8x16xbf16, #tpu.memory_space<vmem>>, vector<1x1x4x4xbf16>
    %610 = vector.shape_cast %609 : vector<1x1x4x4xbf16> to vector<4x4xbf16>
    %cst_659 = arith.constant dense<0.000000e+00> : vector<4x128xf32>
    %611 = tpu.matmul %610, %606, %cst_659 {dimension_numbers = #tpu.dot_dimension_numbers<[1], [0], [0], [1], [0, 0, 1, 1], [], []>} : vector<4x4xbf16>, vector<4x128xbf16>, vector<4x128xf32> -> vector<4x128xf32>
    %612 = arith.addf %603, %611 : vector<4x128xf32>
    %c18_660 = arith.constant 18 : index
    %c1_661 = arith.constant 1 : index
    %c0_662 = arith.constant 0 : index
    %c4_663 = arith.constant 4 : index
    %613 = vector.load %arg2[%c18_660, %c1_661, %c0_662, %c4_663] : memref<23x3x8x16xbf16, #tpu.memory_space<vmem>>, vector<1x1x4x4xbf16>
    %614 = vector.shape_cast %613 : vector<1x1x4x4xbf16> to vector<4x4xbf16>
    %cst_664 = arith.constant dense<0.000000e+00> : vector<4x128xf32>
    %615 = tpu.matmul %614, %604, %cst_664 {dimension_numbers = #tpu.dot_dimension_numbers<[1], [0], [0], [1], [0, 0, 1, 1], [], []>} : vector<4x4xbf16>, vector<4x128xbf16>, vector<4x128xf32> -> vector<4x128xf32>
    %616 = arith.addf %612, %615 : vector<4x128xf32>
    %c18_665 = arith.constant 18 : index
    %c2_666 = arith.constant 2 : index
    %c0_667 = arith.constant 0 : index
    %c4_668 = arith.constant 4 : index
    %617 = vector.load %arg2[%c18_665, %c2_666, %c0_667, %c4_668] : memref<23x3x8x16xbf16, #tpu.memory_space<vmem>>, vector<1x1x4x4xbf16>
    %618 = vector.shape_cast %617 : vector<1x1x4x4xbf16> to vector<4x4xbf16>
    %cst_669 = arith.constant dense<0.000000e+00> : vector<4x128xf32>
    %619 = tpu.matmul %618, %608, %cst_669 {dimension_numbers = #tpu.dot_dimension_numbers<[1], [0], [0], [1], [0, 0, 1, 1], [], []>} : vector<4x4xbf16>, vector<4x128xbf16>, vector<4x128xf32> -> vector<4x128xf32>
    %620 = arith.addf %616, %619 : vector<4x128xf32>
    %cst_670 = arith.constant 0.000000e+00 : f32
    %621 = vector.broadcast %cst_670 : f32 to vector<4x128xf32>
    %622 = arith.maximumf %620, %621 : vector<4x128xf32>
    %c1_671 = arith.constant 1 : index
    %c0_672 = arith.constant 0 : index
    %c0_673 = arith.constant 0 : index
    %c0_674 = arith.constant 0 : index
    %623 = vector.load %arg4[%c1_671, %c0_672, %c0_673, %c0_674] : memref<6x2x256x256xbf16, #tpu.memory_space<vmem>>, vector<1x1x128x128xbf16>
    %624 = vector.shape_cast %623 : vector<1x1x128x128xbf16> to vector<128x128xbf16>
    %c1_675 = arith.constant 1 : index
    %c1_676 = arith.constant 1 : index
    %c0_677 = arith.constant 0 : index
    %c0_678 = arith.constant 0 : index
    %625 = vector.load %arg4[%c1_675, %c1_676, %c0_677, %c0_678] : memref<6x2x256x256xbf16, #tpu.memory_space<vmem>>, vector<1x1x128x128xbf16>
    %626 = vector.shape_cast %625 : vector<1x1x128x128xbf16> to vector<128x128xbf16>
    %c19 = arith.constant 19 : index
    %c0_679 = arith.constant 0 : index
    %c0_680 = arith.constant 0 : index
    %627 = vector.load %arg3[%c19, %c0_679, %c0_680] : memref<23x8x1xf32, #tpu.memory_space<vmem>>, vector<1x4x1xf32>
    %628 = vector.shape_cast %627 : vector<1x4x1xf32> to vector<4x1xf32>
    %629 = arith.truncf %622 : vector<4x128xf32> to vector<4x128xbf16>
    %cst_681 = arith.constant dense<0.000000e+00> : vector<4x128xf32>
    %630 = tpu.matmul %629, %624, %cst_681 {dimension_numbers = #tpu.dot_dimension_numbers<[1], [0], [0], [1], [0, 0, 1, 1], [], []>} : vector<4x128xbf16>, vector<128x128xbf16>, vector<4x128xf32> -> vector<4x128xf32>
    %631 = arith.truncf %630 : vector<4x128xf32> to vector<4x128xbf16>
    %cst_682 = arith.constant dense<0.000000e+00> : vector<4x128xf32>
    %632 = tpu.matmul %629, %626, %cst_682 {dimension_numbers = #tpu.dot_dimension_numbers<[1], [0], [0], [1], [0, 0, 1, 1], [], []>} : vector<4x128xbf16>, vector<128x128xbf16>, vector<4x128xf32> -> vector<4x128xf32>
    %633 = arith.truncf %632 : vector<4x128xf32> to vector<4x128xbf16>
    %c19_683 = arith.constant 19 : index
    %c0_684 = arith.constant 0 : index
    %c0_685 = arith.constant 0 : index
    %c0_686 = arith.constant 0 : index
    %634 = vector.load %arg2[%c19_683, %c0_684, %c0_685, %c0_686] : memref<23x3x8x16xbf16, #tpu.memory_space<vmem>>, vector<1x1x4x4xbf16>
    %635 = vector.shape_cast %634 : vector<1x1x4x4xbf16> to vector<4x4xbf16>
    %cst_687 = arith.constant dense<0.000000e+00> : vector<4x128xf32>
    %636 = tpu.matmul %635, %631, %cst_687 {dimension_numbers = #tpu.dot_dimension_numbers<[1], [0], [0], [1], [0, 0, 1, 1], [], []>} : vector<4x4xbf16>, vector<4x128xbf16>, vector<4x128xf32> -> vector<4x128xf32>
    %637 = vector.broadcast %628 : vector<4x1xf32> to vector<4x128xf32>
    %638 = arith.addf %637, %636 : vector<4x128xf32>
    %c19_688 = arith.constant 19 : index
    %c1_689 = arith.constant 1 : index
    %c0_690 = arith.constant 0 : index
    %c0_691 = arith.constant 0 : index
    %639 = vector.load %arg2[%c19_688, %c1_689, %c0_690, %c0_691] : memref<23x3x8x16xbf16, #tpu.memory_space<vmem>>, vector<1x1x4x4xbf16>
    %640 = vector.shape_cast %639 : vector<1x1x4x4xbf16> to vector<4x4xbf16>
    %cst_692 = arith.constant dense<0.000000e+00> : vector<4x128xf32>
    %641 = tpu.matmul %640, %629, %cst_692 {dimension_numbers = #tpu.dot_dimension_numbers<[1], [0], [0], [1], [0, 0, 1, 1], [], []>} : vector<4x4xbf16>, vector<4x128xbf16>, vector<4x128xf32> -> vector<4x128xf32>
    %642 = arith.addf %638, %641 : vector<4x128xf32>
    %c19_693 = arith.constant 19 : index
    %c2_694 = arith.constant 2 : index
    %c0_695 = arith.constant 0 : index
    %c0_696 = arith.constant 0 : index
    %643 = vector.load %arg2[%c19_693, %c2_694, %c0_695, %c0_696] : memref<23x3x8x16xbf16, #tpu.memory_space<vmem>>, vector<1x1x4x4xbf16>
    %644 = vector.shape_cast %643 : vector<1x1x4x4xbf16> to vector<4x4xbf16>
    %cst_697 = arith.constant dense<0.000000e+00> : vector<4x128xf32>
    %645 = tpu.matmul %644, %633, %cst_697 {dimension_numbers = #tpu.dot_dimension_numbers<[1], [0], [0], [1], [0, 0, 1, 1], [], []>} : vector<4x4xbf16>, vector<4x128xbf16>, vector<4x128xf32> -> vector<4x128xf32>
    %646 = arith.addf %642, %645 : vector<4x128xf32>
    %cst_698 = arith.constant 0.000000e+00 : f32
    %647 = vector.broadcast %cst_698 : f32 to vector<4x128xf32>
    %648 = arith.maximumf %646, %647 : vector<4x128xf32>
    %649 = arith.truncf %648 : vector<4x128xf32> to vector<4x128xbf16>
    %c4_699 = arith.constant 4 : index
    %c0_700 = arith.constant 0 : index
    %c0_701 = arith.constant 0 : index
    %650 = vector.load %arg6[%c4_699, %c0_700, %c0_701] : memref<5x128x256xbf16, #tpu.memory_space<vmem>>, vector<1x128x256xbf16>
    %651 = vector.shape_cast %650 : vector<1x128x256xbf16> to vector<128x256xbf16>
    %cst_702 = arith.constant dense<0.000000e+00> : vector<4x256xf32>
    %652 = tpu.matmul %649, %651, %cst_702 {dimension_numbers = #tpu.dot_dimension_numbers<[1], [0], [0], [1], [0, 0, 1, 1], [], []>} : vector<4x128xbf16>, vector<128x256xbf16>, vector<4x256xf32> -> vector<4x256xf32>
    %c0_703 = arith.constant 0 : index
    %c0_704 = arith.constant 0 : index
    %c0_705 = arith.constant 0 : index
    %c0_706 = arith.constant 0 : index
    %653 = vector.load %arg4[%c0_703, %c0_704, %c0_705, %c0_706] : memref<6x2x256x256xbf16, #tpu.memory_space<vmem>>, vector<1x1x256x256xbf16>
    %654 = vector.shape_cast %653 : vector<1x1x256x256xbf16> to vector<256x256xbf16>
    %c0_707 = arith.constant 0 : index
    %c1_708 = arith.constant 1 : index
    %c0_709 = arith.constant 0 : index
    %c0_710 = arith.constant 0 : index
    %655 = vector.load %arg4[%c0_707, %c1_708, %c0_709, %c0_710] : memref<6x2x256x256xbf16, #tpu.memory_space<vmem>>, vector<1x1x256x256xbf16>
    %656 = vector.shape_cast %655 : vector<1x1x256x256xbf16> to vector<256x256xbf16>
    %c20 = arith.constant 20 : index
    %c0_711 = arith.constant 0 : index
    %c0_712 = arith.constant 0 : index
    %657 = vector.load %arg3[%c20, %c0_711, %c0_712] : memref<23x8x1xf32, #tpu.memory_space<vmem>>, vector<1x4x1xf32>
    %658 = vector.shape_cast %657 : vector<1x4x1xf32> to vector<4x1xf32>
    %659 = arith.truncf %53 : vector<4x256xf32> to vector<4x256xbf16>
    %cst_713 = arith.constant dense<0.000000e+00> : vector<4x256xf32>
    %660 = tpu.matmul %659, %654, %cst_713 {dimension_numbers = #tpu.dot_dimension_numbers<[1], [0], [0], [1], [0, 0, 1, 1], [], []>} : vector<4x256xbf16>, vector<256x256xbf16>, vector<4x256xf32> -> vector<4x256xf32>
    %661 = arith.truncf %660 : vector<4x256xf32> to vector<4x256xbf16>
    %cst_714 = arith.constant dense<0.000000e+00> : vector<4x256xf32>
    %662 = tpu.matmul %659, %656, %cst_714 {dimension_numbers = #tpu.dot_dimension_numbers<[1], [0], [0], [1], [0, 0, 1, 1], [], []>} : vector<4x256xbf16>, vector<256x256xbf16>, vector<4x256xf32> -> vector<4x256xf32>
    %663 = arith.truncf %662 : vector<4x256xf32> to vector<4x256xbf16>
    %c20_715 = arith.constant 20 : index
    %c0_716 = arith.constant 0 : index
    %c0_717 = arith.constant 0 : index
    %c0_718 = arith.constant 0 : index
    %664 = vector.load %arg2[%c20_715, %c0_716, %c0_717, %c0_718] : memref<23x3x8x16xbf16, #tpu.memory_space<vmem>>, vector<1x1x4x4xbf16>
    %665 = vector.shape_cast %664 : vector<1x1x4x4xbf16> to vector<4x4xbf16>
    %cst_719 = arith.constant dense<0.000000e+00> : vector<4x256xf32>
    %666 = tpu.matmul %665, %661, %cst_719 {dimension_numbers = #tpu.dot_dimension_numbers<[1], [0], [0], [1], [0, 0, 1, 1], [], []>} : vector<4x4xbf16>, vector<4x256xbf16>, vector<4x256xf32> -> vector<4x256xf32>
    %667 = vector.broadcast %658 : vector<4x1xf32> to vector<4x256xf32>
    %668 = arith.addf %667, %666 : vector<4x256xf32>
    %c20_720 = arith.constant 20 : index
    %c1_721 = arith.constant 1 : index
    %c0_722 = arith.constant 0 : index
    %c0_723 = arith.constant 0 : index
    %669 = vector.load %arg2[%c20_720, %c1_721, %c0_722, %c0_723] : memref<23x3x8x16xbf16, #tpu.memory_space<vmem>>, vector<1x1x4x4xbf16>
    %670 = vector.shape_cast %669 : vector<1x1x4x4xbf16> to vector<4x4xbf16>
    %cst_724 = arith.constant dense<0.000000e+00> : vector<4x256xf32>
    %671 = tpu.matmul %670, %659, %cst_724 {dimension_numbers = #tpu.dot_dimension_numbers<[1], [0], [0], [1], [0, 0, 1, 1], [], []>} : vector<4x4xbf16>, vector<4x256xbf16>, vector<4x256xf32> -> vector<4x256xf32>
    %672 = arith.addf %668, %671 : vector<4x256xf32>
    %c20_725 = arith.constant 20 : index
    %c2_726 = arith.constant 2 : index
    %c0_727 = arith.constant 0 : index
    %c0_728 = arith.constant 0 : index
    %673 = vector.load %arg2[%c20_725, %c2_726, %c0_727, %c0_728] : memref<23x3x8x16xbf16, #tpu.memory_space<vmem>>, vector<1x1x4x4xbf16>
    %674 = vector.shape_cast %673 : vector<1x1x4x4xbf16> to vector<4x4xbf16>
    %cst_729 = arith.constant dense<0.000000e+00> : vector<4x256xf32>
    %675 = tpu.matmul %674, %663, %cst_729 {dimension_numbers = #tpu.dot_dimension_numbers<[1], [0], [0], [1], [0, 0, 1, 1], [], []>} : vector<4x4xbf16>, vector<4x256xbf16>, vector<4x256xf32> -> vector<4x256xf32>
    %676 = arith.addf %672, %675 : vector<4x256xf32>
    %677 = arith.truncf %652 : vector<4x256xf32> to vector<4x256xbf16>
    %cst_730 = arith.constant dense<0.000000e+00> : vector<4x256xf32>
    %678 = tpu.matmul %677, %654, %cst_730 {dimension_numbers = #tpu.dot_dimension_numbers<[1], [0], [0], [1], [0, 0, 1, 1], [], []>} : vector<4x256xbf16>, vector<256x256xbf16>, vector<4x256xf32> -> vector<4x256xf32>
    %679 = arith.truncf %678 : vector<4x256xf32> to vector<4x256xbf16>
    %cst_731 = arith.constant dense<0.000000e+00> : vector<4x256xf32>
    %680 = tpu.matmul %677, %656, %cst_731 {dimension_numbers = #tpu.dot_dimension_numbers<[1], [0], [0], [1], [0, 0, 1, 1], [], []>} : vector<4x256xbf16>, vector<256x256xbf16>, vector<4x256xf32> -> vector<4x256xf32>
    %681 = arith.truncf %680 : vector<4x256xf32> to vector<4x256xbf16>
    %c20_732 = arith.constant 20 : index
    %c0_733 = arith.constant 0 : index
    %c0_734 = arith.constant 0 : index
    %c4_735 = arith.constant 4 : index
    %682 = vector.load %arg2[%c20_732, %c0_733, %c0_734, %c4_735] : memref<23x3x8x16xbf16, #tpu.memory_space<vmem>>, vector<1x1x4x4xbf16>
    %683 = vector.shape_cast %682 : vector<1x1x4x4xbf16> to vector<4x4xbf16>
    %cst_736 = arith.constant dense<0.000000e+00> : vector<4x256xf32>
    %684 = tpu.matmul %683, %679, %cst_736 {dimension_numbers = #tpu.dot_dimension_numbers<[1], [0], [0], [1], [0, 0, 1, 1], [], []>} : vector<4x4xbf16>, vector<4x256xbf16>, vector<4x256xf32> -> vector<4x256xf32>
    %685 = arith.addf %676, %684 : vector<4x256xf32>
    %c20_737 = arith.constant 20 : index
    %c1_738 = arith.constant 1 : index
    %c0_739 = arith.constant 0 : index
    %c4_740 = arith.constant 4 : index
    %686 = vector.load %arg2[%c20_737, %c1_738, %c0_739, %c4_740] : memref<23x3x8x16xbf16, #tpu.memory_space<vmem>>, vector<1x1x4x4xbf16>
    %687 = vector.shape_cast %686 : vector<1x1x4x4xbf16> to vector<4x4xbf16>
    %cst_741 = arith.constant dense<0.000000e+00> : vector<4x256xf32>
    %688 = tpu.matmul %687, %677, %cst_741 {dimension_numbers = #tpu.dot_dimension_numbers<[1], [0], [0], [1], [0, 0, 1, 1], [], []>} : vector<4x4xbf16>, vector<4x256xbf16>, vector<4x256xf32> -> vector<4x256xf32>
    %689 = arith.addf %685, %688 : vector<4x256xf32>
    %c20_742 = arith.constant 20 : index
    %c2_743 = arith.constant 2 : index
    %c0_744 = arith.constant 0 : index
    %c4_745 = arith.constant 4 : index
    %690 = vector.load %arg2[%c20_742, %c2_743, %c0_744, %c4_745] : memref<23x3x8x16xbf16, #tpu.memory_space<vmem>>, vector<1x1x4x4xbf16>
    %691 = vector.shape_cast %690 : vector<1x1x4x4xbf16> to vector<4x4xbf16>
    %cst_746 = arith.constant dense<0.000000e+00> : vector<4x256xf32>
    %692 = tpu.matmul %691, %681, %cst_746 {dimension_numbers = #tpu.dot_dimension_numbers<[1], [0], [0], [1], [0, 0, 1, 1], [], []>} : vector<4x4xbf16>, vector<4x256xbf16>, vector<4x256xf32> -> vector<4x256xf32>
    %693 = arith.addf %689, %692 : vector<4x256xf32>
    %cst_747 = arith.constant 0.000000e+00 : f32
    %694 = vector.broadcast %cst_747 : f32 to vector<4x256xf32>
    %695 = arith.maximumf %693, %694 : vector<4x256xf32>
    %c0_748 = arith.constant 0 : index
    %c0_749 = arith.constant 0 : index
    %c0_750 = arith.constant 0 : index
    %c0_751 = arith.constant 0 : index
    %696 = vector.load %arg4[%c0_748, %c0_749, %c0_750, %c0_751] : memref<6x2x256x256xbf16, #tpu.memory_space<vmem>>, vector<1x1x256x256xbf16>
    %697 = vector.shape_cast %696 : vector<1x1x256x256xbf16> to vector<256x256xbf16>
    %c0_752 = arith.constant 0 : index
    %c1_753 = arith.constant 1 : index
    %c0_754 = arith.constant 0 : index
    %c0_755 = arith.constant 0 : index
    %698 = vector.load %arg4[%c0_752, %c1_753, %c0_754, %c0_755] : memref<6x2x256x256xbf16, #tpu.memory_space<vmem>>, vector<1x1x256x256xbf16>
    %699 = vector.shape_cast %698 : vector<1x1x256x256xbf16> to vector<256x256xbf16>
    %c21 = arith.constant 21 : index
    %c0_756 = arith.constant 0 : index
    %c0_757 = arith.constant 0 : index
    %700 = vector.load %arg3[%c21, %c0_756, %c0_757] : memref<23x8x1xf32, #tpu.memory_space<vmem>>, vector<1x4x1xf32>
    %701 = vector.shape_cast %700 : vector<1x4x1xf32> to vector<4x1xf32>
    %702 = arith.truncf %695 : vector<4x256xf32> to vector<4x256xbf16>
    %cst_758 = arith.constant dense<0.000000e+00> : vector<4x256xf32>
    %703 = tpu.matmul %702, %697, %cst_758 {dimension_numbers = #tpu.dot_dimension_numbers<[1], [0], [0], [1], [0, 0, 1, 1], [], []>} : vector<4x256xbf16>, vector<256x256xbf16>, vector<4x256xf32> -> vector<4x256xf32>
    %704 = arith.truncf %703 : vector<4x256xf32> to vector<4x256xbf16>
    %cst_759 = arith.constant dense<0.000000e+00> : vector<4x256xf32>
    %705 = tpu.matmul %702, %699, %cst_759 {dimension_numbers = #tpu.dot_dimension_numbers<[1], [0], [0], [1], [0, 0, 1, 1], [], []>} : vector<4x256xbf16>, vector<256x256xbf16>, vector<4x256xf32> -> vector<4x256xf32>
    %706 = arith.truncf %705 : vector<4x256xf32> to vector<4x256xbf16>
    %c21_760 = arith.constant 21 : index
    %c0_761 = arith.constant 0 : index
    %c0_762 = arith.constant 0 : index
    %c0_763 = arith.constant 0 : index
    %707 = vector.load %arg2[%c21_760, %c0_761, %c0_762, %c0_763] : memref<23x3x8x16xbf16, #tpu.memory_space<vmem>>, vector<1x1x4x4xbf16>
    %708 = vector.shape_cast %707 : vector<1x1x4x4xbf16> to vector<4x4xbf16>
    %cst_764 = arith.constant dense<0.000000e+00> : vector<4x256xf32>
    %709 = tpu.matmul %708, %704, %cst_764 {dimension_numbers = #tpu.dot_dimension_numbers<[1], [0], [0], [1], [0, 0, 1, 1], [], []>} : vector<4x4xbf16>, vector<4x256xbf16>, vector<4x256xf32> -> vector<4x256xf32>
    %710 = vector.broadcast %701 : vector<4x1xf32> to vector<4x256xf32>
    %711 = arith.addf %710, %709 : vector<4x256xf32>
    %c21_765 = arith.constant 21 : index
    %c1_766 = arith.constant 1 : index
    %c0_767 = arith.constant 0 : index
    %c0_768 = arith.constant 0 : index
    %712 = vector.load %arg2[%c21_765, %c1_766, %c0_767, %c0_768] : memref<23x3x8x16xbf16, #tpu.memory_space<vmem>>, vector<1x1x4x4xbf16>
    %713 = vector.shape_cast %712 : vector<1x1x4x4xbf16> to vector<4x4xbf16>
    %cst_769 = arith.constant dense<0.000000e+00> : vector<4x256xf32>
    %714 = tpu.matmul %713, %702, %cst_769 {dimension_numbers = #tpu.dot_dimension_numbers<[1], [0], [0], [1], [0, 0, 1, 1], [], []>} : vector<4x4xbf16>, vector<4x256xbf16>, vector<4x256xf32> -> vector<4x256xf32>
    %715 = arith.addf %711, %714 : vector<4x256xf32>
    %c21_770 = arith.constant 21 : index
    %c2_771 = arith.constant 2 : index
    %c0_772 = arith.constant 0 : index
    %c0_773 = arith.constant 0 : index
    %716 = vector.load %arg2[%c21_770, %c2_771, %c0_772, %c0_773] : memref<23x3x8x16xbf16, #tpu.memory_space<vmem>>, vector<1x1x4x4xbf16>
    %717 = vector.shape_cast %716 : vector<1x1x4x4xbf16> to vector<4x4xbf16>
    %cst_774 = arith.constant dense<0.000000e+00> : vector<4x256xf32>
    %718 = tpu.matmul %717, %706, %cst_774 {dimension_numbers = #tpu.dot_dimension_numbers<[1], [0], [0], [1], [0, 0, 1, 1], [], []>} : vector<4x4xbf16>, vector<4x256xbf16>, vector<4x256xf32> -> vector<4x256xf32>
    %719 = arith.addf %715, %718 : vector<4x256xf32>
    %cst_775 = arith.constant 0.000000e+00 : f32
    %720 = vector.broadcast %cst_775 : f32 to vector<4x256xf32>
    %721 = arith.maximumf %719, %720 : vector<4x256xf32>
    %c22 = arith.constant 22 : index
    %c1_776 = arith.constant 1 : index
    %c0_777 = arith.constant 0 : index
    %c0_778 = arith.constant 0 : index
    %722 = vector.load %arg2[%c22, %c1_776, %c0_777, %c0_778] : memref<23x3x8x16xbf16, #tpu.memory_space<vmem>>, vector<1x1x4x4xbf16>
    %723 = vector.shape_cast %722 : vector<1x1x4x4xbf16> to vector<4x4xbf16>
    %724 = arith.truncf %721 : vector<4x256xf32> to vector<4x256xbf16>
    %cst_779 = arith.constant dense<0.000000e+00> : vector<4x256xf32>
    %725 = tpu.matmul %723, %724, %cst_779 {dimension_numbers = #tpu.dot_dimension_numbers<[1], [0], [0], [1], [0, 0, 1, 1], [], []>} : vector<4x4xbf16>, vector<4x256xbf16>, vector<4x256xf32> -> vector<4x256xf32>
    %c22_780 = arith.constant 22 : index
    %c0_781 = arith.constant 0 : index
    %c0_782 = arith.constant 0 : index
    %726 = vector.load %arg3[%c22_780, %c0_781, %c0_782] : memref<23x8x1xf32, #tpu.memory_space<vmem>>, vector<1x4x1xf32>
    %727 = vector.shape_cast %726 : vector<1x4x1xf32> to vector<4x1xf32>
    %728 = vector.broadcast %727 : vector<4x1xf32> to vector<4x256xf32>
    %729 = arith.addf %725, %728 : vector<4x256xf32>
    %c0_783 = arith.constant 0 : index
    %c0_784 = arith.constant 0 : index
    %c0_785 = arith.constant 0 : index
    %730 = vector.load %arg7[%c0_783, %c0_784, %c0_785] : memref<1x4x256xf32, #tpu.memory_space<vmem>>, vector<1x4x256xf32>
    %731 = vector.shape_cast %730 : vector<1x4x256xf32> to vector<4x256xf32>
    %732 = vector.shape_cast %729 : vector<4x256xf32> to vector<1x4x256xf32>
    tpu.vector_store %arg7[%c0_783, %c0_784, %c0_785], %732 {strides = array<i32>} : memref<1x4x256xf32, #tpu.memory_space<vmem>>, vector<1x4x256xf32>,
    return
  }
  func.func @transform_0(%arg0: i32) -> (i32, i32, i32) {
    %c0_i32 = arith.constant 0 : i32
    %c0_i32_0 = arith.constant 0 : i32
    %c0_i32_1 = arith.constant 0 : i32
    return %arg0, %c0_i32, %c0_i32_0 : i32, i32, i32
  }
  func.func @transform_1(%arg0: i32) -> (i32, i32, i32, i32) {
    %c0_i32 = arith.constant 0 : i32
    %c0_i32_0 = arith.constant 0 : i32
    %c0_i32_1 = arith.constant 0 : i32
    %c0_i32_2 = arith.constant 0 : i32
    %c0_i32_3 = arith.constant 0 : i32
    return %c0_i32, %c0_i32_0, %c0_i32_1, %c0_i32_2 : i32, i32, i32, i32
  }
  func.func @transform_2(%arg0: i32) -> (i32, i32, i32) {
    %c0_i32 = arith.constant 0 : i32
    %c0_i32_0 = arith.constant 0 : i32
    %c0_i32_1 = arith.constant 0 : i32
    %c0_i32_2 = arith.constant 0 : i32
    return %c0_i32, %c0_i32_0, %c0_i32_1 : i32, i32, i32
  }
  func.func @transform_3(%arg0: i32) -> (i32, i32, i32, i32) {
    %c0_i32 = arith.constant 0 : i32
    %c0_i32_0 = arith.constant 0 : i32
    %c0_i32_1 = arith.constant 0 : i32
    %c0_i32_2 = arith.constant 0 : i32
    %c0_i32_3 = arith.constant 0 : i32
    return %c0_i32, %c0_i32_0, %c0_i32_1, %c0_i32_2 : i32, i32, i32, i32
  }
  func.func @transform_4(%arg0: i32) -> (i32, i32, i32, i32) {
    %c0_i32 = arith.constant 0 : i32
    %c0_i32_0 = arith.constant 0 : i32
    %c0_i32_1 = arith.constant 0 : i32
    %c0_i32_2 = arith.constant 0 : i32
    %c0_i32_3 = arith.constant 0 : i32
    return %c0_i32, %c0_i32_0, %c0_i32_1, %c0_i32_2 : i32, i32, i32, i32
  }
  func.func @transform_5(%arg0: i32) -> (i32, i32, i32) {
    %c0_i32 = arith.constant 0 : i32
    %c0_i32_0 = arith.constant 0 : i32
    %c0_i32_1 = arith.constant 0 : i32
    %c0_i32_2 = arith.constant 0 : i32
    return %c0_i32, %c0_i32_0, %c0_i32_1 : i32, i32, i32
  }
  func.func @transform_6(%arg0: i32) -> (i32, i32, i32) {
    %c0_i32 = arith.constant 0 : i32
    %c0_i32_0 = arith.constant 0 : i32
    %c0_i32_1 = arith.constant 0 : i32
    return %arg0, %c0_i32, %c0_i32_0 : i32, i32, i32
  }
  func.func @transform_7(%arg0: i32) -> (i32, i32, i32) {
    %c0_i32 = arith.constant 0 : i32
    %c0_i32_0 = arith.constant 0 : i32
    %c0_i32_1 = arith.constant 0 : i32
    return %arg0, %c0_i32, %c0_i32_0 : i32, i32, i32
  }
}

</mosaic_0001>

<bundles_post_ra>
// kernel: seq2seq_forward.1
= control target key start
LH: loop header
LB: loop body
LE: loop exit
PB: predicated region body
PF: predicated region fallthrough
CT: control target
= control target key end

     0   :  { %13 = vsyncpa [#allocation3], 0  ;;  %s13647_s0 = inlined_call_operand.hbm [shape: f32[1,4,256], index: 0, kind: input, shape index: {}]   ;;  %s13648_s1 = inlined_call_operand.vmem [shape: bf16[23,3,8,16], index: 1, kind: input, shape index: {}]   ;;  %s13649_s2 = inlined_call_operand.vmem [shape: f32[23,8,1], index: 2, kind: input, shape index: {}]   ;;  %s13650_s3 = inlined_call_operand.hbm [shape: bf16[6,2,256,256], index: 3, kind: input, shape index: {}]   ;;  %s13651_s4 = inlined_call_operand.hbm [shape: bf16[5,2,256,128], index: 4, kind: input, shape index: {}]   ;;  %s13652_s5 = inlined_call_operand.hbm [shape: bf16[5,128,256], index: 5, kind: input, shape index: {}]   ;;  %s13653_s6 = inlined_call_operand.vmem [shape: f32[1,4,256], index: 6, kind: output, shape index: {0}]   ;;  %s13654_s7 = inlined_call_operand.vmem [shape: f32[1,8,8], index: 7, kind: output, shape index: {1}]  }
   0x1   :  { %14 = vsyncpa [#allocation5], 0 }
   0x2   :  { %15 = vsyncpa [#allocation8], 0  ;;  %s11738_s24 = smov [#allocation4]  }
   0x3   :  { %s35_s25 = sshll.u32 %s11738_s24, 4  ;;  %s36_s25 = int_to_ptr.vmem [resolvable:$true] %s35_s25 }
   0x4   :  { %s11660_s26 = scalar_lea.vmem %s36_s25, 49152  ;;  %p11665_p1 = scmp.lt.s32.totalorder %s36_s25, %s36_s25 }
   0x5   :  { %p11661_p0 = scmp.ne.s32.totalorder %s36_s25, %s11660_s26  ;;  %p11666_p2 = scmp.lt.s32.totalorder %s11660_s26, %s11660_s26 }
   0x7   :  { %p11667_p3 = por %p11666_p2, %p11665_p1 }
   0x9   :  { %p11668_p4 = pnand %p11667_p3, %p11661_p0 }
   0xb   :  { %11671 = shalt.err (!%p11668_p4)
}
   0xc   :  { %s11739_s27 = smov 128   ;;  %s11740_s28 = smov 8  }
   0xd   :  { %41 = dma.hbm_to_vmem [thread:$0]  %s13650_s3, 49152, %s36_s25, [#allocation5], %s11739_s27, %s11739_s27, %s11740_s28  }
   0xe   :  { %s11741_s8 = smov [#allocation2]   ;;  %s11742_s10 = smov [#allocation6]  }
   0xf   :  { %s22_s9 = sshll.u32 %s11741_s8, 4  ;;  %s47_s11 = sshll.u32 %s11742_s10, 4  ;;  %s23_s9 = int_to_ptr.vmem [resolvable:$true] %s22_s9  ;;  %s48_s11 = int_to_ptr.vmem [resolvable:$true] %s47_s11 }
  0x10   :  { %s11680_s12 = scalar_lea.vmem %s23_s9, 128  ;;  %p11685_p6 = scmp.lt.s32.totalorder %s23_s9, %s23_s9 }
  0x11   :  { %p11681_p5 = scmp.ne.s32.totalorder %s23_s9, %s11680_s12  ;;  %p11686_p7 = scmp.lt.s32.totalorder %s11680_s12, %s11680_s12 }
  0x13   :  { %p11687_p8 = por %p11686_p7, %p11685_p6 }
  0x15   :  { %p11688_p9 = pnand %p11687_p8, %p11681_p5 }
  0x17   :  { %11691 = shalt.err (!%p11688_p9)
}
  0x18   :  { %25 = dma.hbm_to_vmem [thread:$0]  %s13647_s0, 128, %s23_s9, [#allocation3]  }
  0x19   :  { %s11700_s15 = scalar_lea.vmem %s48_s11, 20480  ;;  %p11705_p11 = scmp.lt.s32.totalorder %s48_s11, %s48_s11 }
  0x1a   :  { %p11701_p10 = scmp.ne.s32.totalorder %s48_s11, %s11700_s15  ;;  %p11706_p12 = scmp.lt.s32.totalorder %s11700_s15, %s11700_s15 }
  0x1c   :  { %p11707_p13 = por %p11706_p12, %p11705_p11 }
  0x1e   :  { %p11708_p0 = pnand %p11707_p13, %p11701_p10 }
  0x20   :  { %11711 = shalt.err (!%p11708_p0)
}
  0x21   :  { %s11743_s3 = smov 64   ;;  %s11744_s16 = smov 4  }
  0x22   :  { %53 = dma.hbm_to_vmem [thread:$0]  %s13651_s4, 20480, %s48_s11, [#allocation5], %s11743_s3, %s11743_s3, %s11744_s16  }
  0x23   :  { %s11745_s19 = smov [#allocation7]  }
  0x24   :  { %s59_s20 = sshll.u32 %s11745_s19, 4  ;;  %s60_s20 = int_to_ptr.vmem [resolvable:$true] %s59_s20 }
  0x25   :  { %s11720_s21 = scalar_lea.vmem %s60_s20, 10240  ;;  %p11725_p2 = scmp.lt.s32.totalorder %s60_s20, %s60_s20 }
  0x26   :  { %p11721_p1 = scmp.ne.s32.totalorder %s60_s20, %s11720_s21  ;;  %p11726_p3 = scmp.lt.s32.totalorder %s11720_s21, %s11720_s21 }
  0x28   :  { %p11727_p4 = por %p11726_p3, %p11725_p2 }
  0x2a   :  { %p11728_p5 = pnand %p11727_p4, %p11721_p1 }
  0x2c   :  { %11731 = shalt.err (!%p11728_p5)
}
  0x2d   :  { %65 = dma.hbm_to_vmem [thread:$0]  %s13652_s5, 10240, %s60_s20, [#allocation8], %s11739_s27, %s11739_s27, %s11740_s28  }
  0x2e   :  { %11732 = dma.done.wait [#allocation3], 128  }
  0x2f   :  { %11733 = vsyncadd [#allocation3], 4294967168 }
  0x30   :  { %11734 = dma.done.wait [#allocation5], 69632  }
  0x31   :  { %11735 = vsyncadd [#allocation5], 4294897664 }
  0x32   :  { %11736 = dma.done.wait [#allocation8], 10240  }
  0x33   :  { %11737 = vsyncadd [#allocation8], 4294957056  ;;  %v11809_v0 = vld [vmem:[#allocation4 + $0x74] ss:$8 sps:$4 sm:$0xff]   ;;  %v11811_v1 = vld [vmem:[#allocation4 + $0x70] ss:$8 sps:$4 sm:$0xff]  }
  0x34   :  { %311 = vmatprep.subr.bf16.mxu0 %v11809_v0  ;;  %v11254_v2 = vld [vmem:[#allocation4 + $0x174] ss:$8 sps:$4 sm:$0xff]   ;;  %v11256_v3 = vld [vmem:[#allocation4 + $0x170] ss:$8 sps:$4 sm:$0xff]   ;;  %v11815_v4 = vld [vmem:[#allocation4 + $0x64] ss:$8 sps:$4 sm:$0xff]  }
  0x35   :  { %312 = vmatpush1.bf16.msra.mxu0 %v11811_v1  ;;  %v11817_v5 = vld [vmem:[#allocation4 + $0x60] ss:$8 sps:$4 sm:$0xff]   ;;  %514 = vmatprep.subr.bf16.mxu1 %v11254_v2  ;;  %v11260_v6 = vld [vmem:[#allocation4 + $0x164] ss:$8 sps:$4 sm:$0xff]   ;;  %v11820_v8 = vld [vmem:[#allocation4 + $0x54] ss:$8 sps:$4 sm:$0xff]  }
  0x36   :  { %515 = vmatpush1.bf16.msra.mxu1 %v11256_v3  ;;  %313 = vmatprep.subr.bf16.mxu0 %v11815_v4  ;;  %v11262_v7 = vld [vmem:[#allocation4 + $0x160] ss:$8 sps:$4 sm:$0xff]   ;;  %v11823_v9 = vld [vmem:[#allocation4 + $0x50] ss:$8 sps:$4 sm:$0xff]   ;;  %v11266_v10 = vld [vmem:[#allocation4 + $0x154] ss:$8 sps:$4 sm:$0xff]  }
  0x37   :  { %516 = vmatprep.subr.bf16.mxu1 %v11260_v6  ;;  %v11826_v11 = vld [vmem:[#allocation4 + $0x44] ss:$8 sps:$4 sm:$0xff]   ;;  %v11268_v12 = vld [vmem:[#allocation4 + $0x150] ss:$8 sps:$4 sm:$0xff]   ;;  %v11829_v14 = vld [vmem:[#allocation4 + $0x40] ss:$8 sps:$4 sm:$0xff]  }
  0x38   :  { %v11272_v13 = vld [vmem:[#allocation4 + $0x144] ss:$8 sps:$4 sm:$0xff]   ;;  %v11832_v15 = vld [vmem:[#allocation4 + $0x34] ss:$8 sps:$4 sm:$0xff]   ;;  %v11274_v16 = vld [vmem:[#allocation4 + $0x140] ss:$8 sps:$4 sm:$0xff]  }
  0x39   :  { %314 = vmatpush1.bf16.msra.mxu0 %v11817_v5  ;;  %v11278_v17 = vld [vmem:[#allocation4 + $0x134] ss:$8 sps:$4 sm:$0xff]   ;;  %v11835_v18 = vld [vmem:[#allocation4 + $0x30] ss:$8 sps:$4 sm:$0xff]   ;;  %v11838_v19 = vld [vmem:[#allocation4 + $0x24] ss:$8 sps:$4 sm:$0xff]  }
  0x3a   :  { %315 = vmatprep.subr.bf16.mxu0 %v11820_v8  ;;  %517 = vmatpush1.bf16.msra.mxu1 %v11262_v7  ;;  %v11280_v20 = vld [vmem:[#allocation4 + $0x130] ss:$8 sps:$4 sm:$0xff]   ;;  %v11284_v21 = vld [vmem:[#allocation4 + $0x124] ss:$8 sps:$4 sm:$0xff]   ;;  %v11841_v22 = vld [vmem:[#allocation4 + $0x20] ss:$8 sps:$4 sm:$0xff]  }
  0x3b   :  { %518 = vmatprep.subr.bf16.mxu1 %v11266_v10  ;;  %v11844_v23 = vld [vmem:[#allocation4 + $0x14] ss:$8 sps:$4 sm:$0xff]   ;;  %v11286_v24 = vld [vmem:[#allocation4 + $0x120] ss:$8 sps:$4 sm:$0xff]   ;;  %v11847_v26 = vld [vmem:[#allocation4 + $0x10] ss:$8 sps:$4 sm:$0xff]  }
  0x3c   :  { %v11290_v25 = vld [vmem:[#allocation4 + $0x114] ss:$8 sps:$4 sm:$0xff]   ;;  %v11850_v27 = vld [vmem:[#allocation4 + $0x4] ss:$8 sps:$4 sm:$0xff]   ;;  %v11292_v28 = vld [vmem:[#allocation4 + $0x110] ss:$8 sps:$4 sm:$0xff]  }
  0x3d   :  { %316 = vmatpush1.bf16.msra.mxu0 %v11823_v9  ;;  %v11296_v29 = vld [vmem:[#allocation4 + $0x104] ss:$8 sps:$4 sm:$0xff]   ;;  %v11853_v30 = vld [vmem:[#allocation4] ss:$8 sps:$4 sm:$0xff]   ;;  %v11856_v31 = vld [vmem:[#allocation4 + $0xf4] ss:$8 sps:$4 sm:$0xff]  }
  0x3e   :  { %317 = vmatprep.subr.bf16.mxu0 %v11826_v11  ;;  %519 = vmatpush1.bf16.msra.mxu1 %v11268_v12  ;;  %v11298_v32 = vld [vmem:[#allocation4 + $0x100] ss:$8 sps:$4 sm:$0xff]   ;;  %v11302_v33 = vld [vmem:[#allocation4 + $0x1f4] ss:$8 sps:$4 sm:$0xff]   ;;  %v11859_v34 = vld [vmem:[#allocation4 + $0xf0] ss:$8 sps:$4 sm:$0xff]  }
  0x3f   :  { %520 = vmatprep.subr.bf16.mxu1 %v11272_v13  ;;  %v11862_v35 = vld [vmem:[#allocation4 + $0xe4] ss:$8 sps:$4 sm:$0xff]   ;;  %v11304_v36 = vld [vmem:[#allocation4 + $0x1f0] ss:$8 sps:$4 sm:$0xff]   ;;  %v11865_v38 = vld [vmem:[#allocation4 + $0xe0] ss:$8 sps:$4 sm:$0xff]  }
  0x40   :  { %v11308_v37 = vld [vmem:[#allocation4 + $0x1e4] ss:$8 sps:$4 sm:$0xff]   ;;  %v11868_v39 = vld [vmem:[#allocation4 + $0xd4] ss:$8 sps:$4 sm:$0xff]   ;;  %v11310_v40 = vld [vmem:[#allocation4 + $0x1e0] ss:$8 sps:$4 sm:$0xff]  }
  0x41   :  { %318 = vmatpush1.bf16.msra.mxu0 %v11829_v14  ;;  %v11314_v41 = vld [vmem:[#allocation4 + $0x1d4] ss:$8 sps:$4 sm:$0xff]   ;;  %v11871_v42 = vld [vmem:[#allocation4 + $0xd0] ss:$8 sps:$4 sm:$0xff]   ;;  %v11874_v44 = vld [vmem:[#allocation4 + $0xc4] ss:$8 sps:$4 sm:$0xff]  }
  0x42   :  { %319 = vmatprep.subr.bf16.mxu0 %v11832_v15  ;;  %521 = vmatpush1.bf16.msra.mxu1 %v11274_v16  ;;  %v11316_v43 = vld [vmem:[#allocation4 + $0x1d0] ss:$8 sps:$4 sm:$0xff]   ;;  %v11876_v45 = vld [vmem:[#allocation4 + $0xc0] ss:$8 sps:$4 sm:$0xff]   ;;  %v11320_v46 = vld [vmem:[#allocation4 + $0x1c4] ss:$8 sps:$4 sm:$0xff]  }
  0x43   :  { %522 = vmatprep.subr.bf16.mxu1 %v11278_v17  ;;  %v11878_v47 = vld [vmem:[#allocation4 + $0xb4] ss:$8 sps:$4 sm:$0xff]   ;;  %v11322_v49 = vld [vmem:[#allocation4 + $0x1c0] ss:$8 sps:$4 sm:$0xff]   ;;  %v11882_v52 = vld [vmem:[#allocation4 + $0xb0] ss:$8 sps:$4 sm:$0xff]  }
  0x44   :  { %v79_v48 = vld [vmem:[#allocation2] sm:$0xff]  ;;  %v11884_v54 = vld [vmem:[#allocation4 + $0xa4] ss:$8 sps:$4 sm:$0xff]   ;;  %v11892_v57 = vld [vmem:[#allocation4 + $0xa0] ss:$8 sps:$4 sm:$0xff]   ;;  %vm562_vm0 = vcmask 1041408  }
  0x45   :  { %320 = vmatpush1.bf16.msra.mxu0 %v11835_v18  ;;  %v147_v50 = vcombine.high %v79_v48, %v79_v48  ;;  %v11326_v51 = vld [vmem:[#allocation4 + $0x1b4] ss:$8 sps:$4 sm:$0xff]   ;;  %v11887_v55 = vld [vmem:[#allocation4 + $0x1b0] ss:$8 sps:$4 sm:$0xff]   ;;  %v11890_v56 = vld [vmem:[#allocation4 + $0x1a4] ss:$8 sps:$4 sm:$0xff]   ;;  %v149_v7 = vpack.c.bf16 %v79_v48, %v79_v48 }
  0x46   :  { %321 = vmatprep.subr.bf16.mxu0 %v11838_v19  ;;  %523 = vmatpush1.bf16.msra.mxu1 %v11280_v20  ;;  %v11894_v58 = vld [vmem:[#allocation4 + $0x94] ss:$8 sps:$4 sm:$0xff]   ;;  %v11897_v59 = vld [vmem:[#allocation4 + $0x1a0] ss:$8 sps:$4 sm:$0xff]   ;;  %v11903_v61 = vld [vmem:[#allocation4 + $0x90] ss:$8 sps:$4 sm:$0xff]  }
  0x47   :  { %524 = vmatprep.subr.bf16.mxu1 %v11284_v21  ;;  %v150_v53 = vpack.c.bf16 %v147_v50, %v147_v50  ;;  %v11900_v60 = vld [vmem:[#allocation4 + $0x194] ss:$8 sps:$4 sm:$0xff]   ;;  %v11906_v62 = vld [vmem:[#allocation4 + $0x84] ss:$8 sps:$4 sm:$0xff]   ;;  %v11909_v63 = vld [vmem:[#allocation4 + $0x190] ss:$8 sps:$4 sm:$0xff]  }
  0x48   :  { %v11912_v2 = vld [vmem:[#allocation4 + $0x184] ss:$8 sps:$4 sm:$0xff]   ;;  %v11915_v3 = vld [vmem:[#allocation4 + $0x80] ss:$8 sps:$4 sm:$0xff]   ;;  %v623_v10 = vsel %vm562_vm0, %v149_v7, 0  ;;  %v13655_v12 = vmov 0  }
  0x49   :  { %322 = vmatpush1.bf16.msra.mxu0 %v11841_v22  ;;  %343 = vmatprep.mubr.bf16.mxu0 %v150_v53  ;;  %v11919_v6 = vld [vmem:[#allocation4 + $0x180] ss:$8 sps:$4 sm:$0xff]   ;;  %vm558_vm1 = vcmask 31744   ;;  %v9356_v13 = vld [vmem:[%s13648_s1 + $0x4] sm:$0x3]  ;;  %s11747_s3 = smov 120  }
  0x4a   :  { %323 = vmatprep.subr.bf16.mxu0 %v11844_v23  ;;  %525 = vmatpush1.bf16.msra.mxu1 %v11286_v24  ;;  %v145_v16 = vld [vmem:[%s13649_s2] sm:$0xf]  ;;  %s11748_s20 = smov 124   ;;  %v9587_v20 = vld [vmem:[%s13649_s2 + $0x70] sm:$0xf]  ;;  %vm11750_vm2 = vmmov 0  }
  0x4b   :  { %526 = vmatprep.subr.bf16.mxu1 %v11290_v25  ;;  %546 = vmatprep.mubr.bf16.mxu1 %v150_v53  ;;  %v9450_v17 = vld [vmem:[%s13649_s2 + $0x20] sm:$0xf]  ;;  %v9645_v25 = vld [vmem:[%s13649_s2 + $0x88] sm:$0xf]  ;;  %vm2189_vm3 = vcmask 523264   ;;  %vm2867_vm4 = vcmask 261120  }
  0x4c   :  { %11249 = vset.pattern.permute.xlu0 %v13655_v12  ;;  %11250 = vset.pattern.permute.xlu1 %v13655_v12  ;;  %v9631_v21 = vld [vmem:[%s13648_s1 + $0xc0] sm:$0x3]  ;;  %v9359_v50 = vld [vmem:[%s13648_s1 + $0x8] sm:$0x3]  ;;  %vm3491_vm5 = vcmask 130048   ;;  %vm3829_vm6 = vcmask 1043456  }
  0x4d   :  { %324 = vmatpush1.bf16.msra.mxu0 %v11847_v26  ;;  %612 = vperm.xlu0 %11249, %v145_v16   ;;  %v11625_v16 = vld [vmem:[#allocation4 + $0x110] ss:$8 sps:$4 sm:$0xff]   ;;  %vm3825_vm7 = vcmask 64512  }
  0x4e   :  { %325 = vmatprep.subr.bf16.mxu0 %v11850_v27  ;;  %527 = vmatpush1.bf16.msra.mxu1 %v11292_v28  ;;  %v9659_v28 = vld [vmem:[%s13649_s2 + $0x90] sm:$0xf] }
  0x4f   :  { %528 = vmatprep.subr.bf16.mxu1 %v11296_v29  ;;  %v9776_v29 = vld [vmem:[%s13648_s1 + $0xf0] sm:$0x3] }
  0x51   :  { %326 = vmatpush1.bf16.msra.mxu0 %v11853_v30 }
  0x52   :  { %327 = vmatprep.subr.bf16.mxu0 %v11856_v31  ;;  %529 = vmatpush1.bf16.msra.mxu1 %v11298_v32 }
  0x53   :  { %530 = vmatprep.subr.bf16.mxu1 %v11302_v33  ;;  %v9794_v33 = vld [vmem:[%s13649_s2 + $0xa8] sm:$0xf] }
  0x55   :  { %328 = vmatpush2.bf16.msra.mxu0 %v11859_v34 }
  0x56   :  { %329 = vmatprep.subr.bf16.mxu0 %v11862_v35  ;;  %531 = vmatpush2.bf16.msra.mxu1 %v11304_v36 }
  0x57   :  { %532 = vmatprep.subr.bf16.mxu1 %v11308_v37 }
  0x59   :  { %330 = vmatpush2.bf16.msra.mxu0 %v11865_v38 }
  0x5a   :  { %331 = vmatprep.subr.bf16.mxu0 %v11868_v39  ;;  %533 = vmatpush2.bf16.msra.mxu1 %v11310_v40 }
  0x5b   :  { %534 = vmatprep.subr.bf16.mxu1 %v11314_v41 }
  0x5d   :  { %332 = vmatpush2.bf16.msra.mxu0 %v11871_v42 }
  0x5e   :  { %333 = vmatprep.subr.bf16.mxu0 %v11874_v44  ;;  %535 = vmatpush2.bf16.msra.mxu1 %v11316_v43 }
  0x5f   :  { %536 = vmatprep.subr.bf16.mxu1 %v11320_v46  ;;  %v557_v46 = vld [vmem:[%s13648_s1] sm:$0x3] }
  0x61   :  { %334 = vmatpush2.bf16.msra.mxu0 %v11876_v45 }
  0x62   :  { %335 = vmatprep.subr.bf16.mxu0 %v11878_v47  ;;  %537 = vmatpush2.bf16.msra.mxu1 %v11322_v49  ;;  %v11612_v49 = vld [vmem:[#allocation4 + $0x174] ss:$8 sps:$4 sm:$0xff]  }
  0x63   :  { %538 = vmatprep.subr.bf16.mxu1 %v11326_v51  ;;  %v11613_v51 = vld [vmem:[#allocation4 + $0x170] ss:$8 sps:$4 sm:$0xff]  }
  0x65   :  { %336 = vmatpush2.bf16.msra.mxu0 %v11882_v52 }
  0x66   :  { %337 = vmatprep.subr.bf16.mxu0 %v11884_v54  ;;  %539 = vmatpush2.bf16.msra.mxu1 %v11887_v55 }
  0x67   :  { %540 = vmatprep.subr.bf16.mxu1 %v11890_v56 }
  0x69   :  { %338 = vmatpush2.bf16.msra.mxu0 %v11892_v57 }
  0x6a   :  { %339 = vmatprep.subr.bf16.mxu0 %v11894_v58  ;;  %541 = vmatpush2.bf16.msra.mxu1 %v11897_v59 }
  0x6b   :  { %542 = vmatprep.subr.bf16.mxu1 %v11900_v60 }
  0x6d   :  { %340 = vmatpush2.bf16.msra.mxu0 %v11903_v61 }
  0x6e   :  { %341 = vmatprep.subr.bf16.mxu0 %v11906_v62  ;;  %543 = vmatpush2.bf16.msra.mxu1 %v11909_v63 }
  0x6f   :  { %544 = vmatprep.subr.bf16.mxu1 %v11912_v2 }
  0x71   :  { %342 = vmatpush2.bf16.msra.mxu0 %v11915_v3 }
  0x72   :  { %545 = vmatpush2.bf16.msra.mxu1 %v11919_v6 }
  0x73   :  { %9357 = vmatprep.subr.msk.bf16.mxu1 %vm562_vm0, %v150_v53  ;;  %v11615_v53 = vld [vmem:[#allocation4 + $0x160] ss:$8 sps:$4 sm:$0xff]  }
  0x74   :  { %344 = vmatmul.mubr.bf16.vlgmr.msra.gmra.mxu0 %v149_v7 }
  0x75   :  { %547 = vmatmul.mubr.bf16.vlgmr.msra.gmra.mxu1 %v149_v7  ;;  %601 = vmatprep.mubr.bf16.mxu0 %v13655_v12  ;;  %v11622_v7 = vld [vmem:[#allocation4 + $0x124] ss:$8 sps:$4 sm:$0xff]  }
  0x76   :  { %643 = vmatpush1.bf16.msra.mxu1 %v623_v10  ;;  %660 = vmatprep.mubr.bf16.mxu1 %v13655_v12  ;;  %v11623_v10 = vld [vmem:[#allocation4 + $0x120] ss:$8 sps:$4 sm:$0xff]  }
  0x77   :  { %731 = vmatprep.subr.bf16.mxu1 %v11809_v0  ;;  %v9362_v0 = vld [vmem:[%s13649_s2 + $0x8] sm:$0xf] }
  0x78   :  { %871 = vperm.xlu0 %11249, %v9362_v0   ;;  %v11626_v0 = vld [vmem:[#allocation4 + $0x104] ss:$8 sps:$4 sm:$0xff]  }
  0x7c   :  { %2349 = vperm.xlu0 %11249, %v9450_v17   ;;  %v11627_v17 = vld [vmem:[#allocation4 + $0x100] ss:$8 sps:$4 sm:$0xff]  }
  0x7d   :  { %9358 = vmatmul.mubr.msk.bf16.vlgmr.msra.gmra.mxu1 %vm558_vm1, %v9356_v13  ;;  %v11624_v13 = vld [vmem:[#allocation4 + $0x114] ss:$8 sps:$4 sm:$0xff]  }
  0x7e   :  { %732 = vmatpush1.bf16.msra.mxu1 %v11811_v1  ;;  %v9486_v1 = vld [vmem:[%s13649_s2 + $0x30] sm:$0xf] }
  0x7f   :  { %733 = vmatprep.subr.bf16.mxu1 %v11815_v4  ;;  %v9514_v4 = vld [vmem:[%s13649_s2 + $0x40] sm:$0xff] }
  0x80   :  { %3015 = vperm.xlu0 %11249, %v9486_v1   ;;  %v11628_v1 = vld [vmem:[#allocation4 + $0x1f4] ss:$8 sps:$4 sm:$0xff]  }
  0x82   :  { %734 = vmatpush1.bf16.msra.mxu1 %v11817_v5  ;;  %v9538_v5 = vld [vmem:[%s13649_s2 + $0x50] sm:$0xff] }
  0x83   :  { %735 = vmatprep.subr.bf16.mxu1 %v11820_v8  ;;  %v9562_v8 = vld [vmem:[%s13648_s1 + $0x90] sm:$0xf] }
  0x84   :  { %3633 = vperm.xlu0 %11249, %v9514_v4   ;;  %v11629_v4 = vld [vmem:[#allocation4 + $0x1f0] ss:$8 sps:$4 sm:$0xff]  }
  0x86   :  { %736 = vmatpush1.bf16.msra.mxu1 %v11823_v9  ;;  %v9566_v9 = vld [vmem:[%s13648_s1 + $0x98] sm:$0xf] }
  0x87   :  { %737 = vmatprep.subr.bf16.mxu1 %v11826_v11  ;;  %v9570_v11 = vcombine.low %v9562_v8, %v9562_v8  ;;  %v11631_v8 = vld [vmem:[#allocation4 + $0x1e0] ss:$8 sps:$4 sm:$0xff]  }
  0x88   :  { %4228 = vperm.xlu0 %11249, %v9538_v5   ;;  %v11630_v5 = vld [vmem:[#allocation4 + $0x1e4] ss:$8 sps:$4 sm:$0xff]  }
  0x8a   :  { %738 = vmatpush1.bf16.msra.mxu1 %v11829_v14  ;;  %v9574_v14 = vcombine.low %v9566_v9, %v9566_v9  ;;  %v11632_v9 = vld [vmem:[#allocation4 + $0x1d4] ss:$8 sps:$4 sm:$0xff]  }
  0x8b   :  { %739 = vmatprep.subr.bf16.mxu1 %v11832_v15  ;;  %v9576_v15 = vld [vmem:[%s13649_s2 + $0x68] sm:$0xff] }
  0x8c   :  { %4959 = vrot.lane.b32.xlu0 %v9570_v11, %s11747_s3  ;;  %v11633_v11 = vld [vmem:[#allocation4 + $0x1d0] ss:$8 sps:$4 sm:$0xff]  }
  0x8e   :  { %740 = vmatpush1.bf16.msra.mxu1 %v11835_v18  ;;  %v9596_v18 = vld [vmem:[%s13648_s1 + $0xac] sm:$0x3] }
  0x8f   :  { %741 = vmatprep.subr.bf16.mxu1 %v11838_v19  ;;  %v9604_v19 = vcombine.low %v9596_v18, %v9596_v18  ;;  %v11636_v18 = vld [vmem:[#allocation4 + $0x1b4] ss:$8 sps:$4 sm:$0xff]  }
  0x90   :  { %5062 = vrot.lane.b32.xlu0 %v9574_v14, %s11747_s3  ;;  %v11634_v14 = vld [vmem:[#allocation4 + $0x1c4] ss:$8 sps:$4 sm:$0xff]  }
  0x92   :  { %742 = vmatpush1.bf16.msra.mxu1 %v11841_v22  ;;  %v9639_v22 = vcombine.low %v9631_v21, %v9631_v21 }
  0x93   :  { %743 = vmatprep.subr.bf16.mxu1 %v11844_v23  ;;  %v9635_v23 = vld [vmem:[%s13648_s1 + $0xc8] sm:$0x3] }
  0x94   :  { %5250 = vperm.xlu0 %11249, %v9576_v15   ;;  %v9643_v24 = vcombine.low %v9635_v23, %v9635_v23  ;;  %v11635_v15 = vld [vmem:[#allocation4 + $0x1c0] ss:$8 sps:$4 sm:$0xff]  }
  0x96   :  { %744 = vmatpush1.bf16.msra.mxu1 %v11847_v26  ;;  %v9678_v26 = vld [vmem:[%s13648_s1 + $0xdc] sm:$0x3] }
  0x97   :  { %745 = vmatprep.subr.bf16.mxu1 %v11850_v27  ;;  %v9684_v27 = vcombine.low %v9678_v26, %v9678_v26 }
  0x98   :  { %5813 = vrot.lane.b32.xlu0 %v9604_v19, %s11748_s20 }
  0x9a   :  { %746 = vmatpush1.bf16.msra.mxu1 %v11853_v30  ;;  %v9785_v30 = vcombine.low %v9776_v29, %v9776_v29 }
  0x9b   :  { %747 = vmatprep.subr.bf16.mxu1 %v11856_v31  ;;  %v9782_v31 = vld [vmem:[%s13648_s1 + $0xf8] sm:$0x3] }
  0x9c   :  { %5571 = vperm.xlu0 %11249, %v9587_v20   ;;  %v9791_v32 = vcombine.low %v9782_v31, %v9782_v31 }
  0x9e   :  { %748 = vmatpush2.bf16.msra.mxu1 %v11859_v34 }
  0x9f   :  { %749 = vmatprep.subr.bf16.mxu1 %v11862_v35 }
  0xa0   :  { %6603 = vrot.lane.b32.xlu0 %v9639_v22, %s11748_s20 }
  0xa2   :  { %750 = vmatpush2.bf16.msra.mxu1 %v11865_v38 }
  0xa3   :  { %751 = vmatprep.subr.bf16.mxu1 %v11868_v39 }
  0xa4   :  { %6706 = vrot.lane.b32.xlu0 %v9643_v24, %s11748_s20 }
  0xa6   :  { %752 = vmatpush2.bf16.msra.mxu1 %v11871_v42 }
  0xa7   :  { %753 = vmatprep.subr.bf16.mxu1 %v11874_v44 }
  0xa8   :  { %6894 = vperm.xlu0 %11249, %v9645_v25  }
  0xaa   :  { %754 = vmatpush2.bf16.msra.mxu1 %v11876_v45 }
  0xab   :  { %755 = vmatprep.subr.bf16.mxu1 %v11878_v47 }
  0xac   :  { %7575 = vrot.lane.b32.xlu0 %v9684_v27, %s11748_s20 }
  0xae   :  { %756 = vmatpush2.bf16.msra.mxu1 %v11882_v52  ;;  %v11614_v52 = vld [vmem:[#allocation4 + $0x164] ss:$8 sps:$4 sm:$0xff]  }
  0xaf   :  { %757 = vmatprep.subr.bf16.mxu1 %v11884_v54  ;;  %v11616_v54 = vld [vmem:[#allocation4 + $0x154] ss:$8 sps:$4 sm:$0xff]  }
  0xb0   :  { %7335 = vperm.xlu0 %11249, %v9659_v28  }
  0xb2   :  { %758 = vmatpush2.bf16.msra.mxu1 %v11892_v57  ;;  %v11617_v57 = vld [vmem:[#allocation4 + $0x150] ss:$8 sps:$4 sm:$0xff]  }
  0xb3   :  { %759 = vmatprep.subr.bf16.mxu1 %v11894_v58  ;;  %v11618_v58 = vld [vmem:[#allocation4 + $0x144] ss:$8 sps:$4 sm:$0xff]  }
  0xb4   :  { %8784 = vrot.lane.b32.xlu0 %v9785_v30, %s11748_s20 }
  0xb6   :  { %760 = vmatpush2.bf16.msra.mxu1 %v11903_v61  ;;  %v11619_v61 = vld [vmem:[#allocation4 + $0x140] ss:$8 sps:$4 sm:$0xff]  }
  0xb7   :  { %761 = vmatprep.subr.bf16.mxu1 %v11906_v62  ;;  %v11620_v62 = vld [vmem:[#allocation4 + $0x134] ss:$8 sps:$4 sm:$0xff]  }
  0xb8   :  { %8898 = vrot.lane.b32.xlu0 %v9791_v32, %s11748_s20 }
  0xba   :  { %762 = vmatpush2.bf16.msra.mxu1 %v11915_v3  ;;  %v11621_v3 = vld [vmem:[#allocation4 + $0x130] ss:$8 sps:$4 sm:$0xff]  }
  0xbc   :  { %9098 = vperm.xlu0 %11249, %v9794_v33  }
  0xc8   :  { %v613_v24 = vpop.permute.xlu0 %612 }
 0x134   :  { %v345_v34 = vpop.f32.mrf.mxu0 }
 0x135   :  { %v352_v35 = vpack.c.bf16 %v345_v34, %v345_v34  ;;  %v548_v37 = vpop.f32.mrf.mxu1 }
 0x136   :  { %v347_v36 = vpop.f32.mrf.mxu0  ;;  %v555_v39 = vpack.c.bf16 %v548_v37, %v548_v37  ;;  %v11356_v37 = vld [vmem:[#allocation6 + $0x78] sm:$0xff]  }
 0x137   :  { %v353_v38 = vpack.c.bf16 %v347_v36, %v347_v36  ;;  %v550_v41 = vpop.f32.mrf.mxu1  ;;  %v564_v42 = vsel %vm562_vm0, %v352_v35, 0  ;;  %v9366_v36 = vld [vmem:[%s13648_s1 + $0x10] sm:$0x3] }
 0x138   :  { %v349_v40 = vpop.f32.mrf.mxu0  ;;  %v556_v43 = vpack.c.bf16 %v550_v41, %v550_v41  ;;  %v677_v47 = vsel %vm562_vm0, %v555_v39, 0  ;;  %v11360_v39 = vld [vmem:[#allocation6 + $0x70] sm:$0xff]   ;;  %v11364_v41 = vld [vmem:[#allocation6 + $0x68] sm:$0xff]  }
 0x139   :  { %9354 = vmatprep.subr.msk.bf16.mxu0 %vm562_vm0, %v353_v38  ;;  %v552_v45 = vpop.f32.mrf.mxu1  ;;  %v11358_v38 = vld [vmem:[#allocation6 + $0x38] sm:$0xff]   ;;  %v11362_v40 = vld [vmem:[#allocation6 + $0x30] sm:$0xff]  }
 0x13a   :  { %v350_v44 = vpop.f32.mrf.mxu0  ;;  %584 = vmatpush1.bf16.msra.mxu0 %v564_v42  ;;  %v11366_v42 = vld [vmem:[#allocation6 + $0x28] sm:$0xff]  }
 0x13b   :  { %9360 = vmatprep.subr.msk.bf16.mxu0 %vm562_vm0, %v556_v43  ;;  %v553_v48 = vpop.f32.mrf.mxu1  ;;  %v11368_v43 = vld [vmem:[#allocation6 + $0x60] sm:$0xff]  }
 0x13c   :  { %v11370_v44 = vld [vmem:[#allocation6 + $0x20] sm:$0xff]  }
 0x13d   :  { %9355 = vmatmul.mubr.msk.bf16.vlgmr.msra.gmra.mxu0 %vm558_vm1, %v557_v46  ;;  %v662_v19 = vpop.f32.mrf.mxu1 }
 0x13e   :  { %697 = vmatpush1.bf16.msra.mxu0 %v677_v47  ;;  %714 = vmatprep.mubr.bf16.mxu0 %v13655_v12 }
 0x13f   :  { %774 = vmatprep.subr.bf16.mxu0 %v11612_v49  ;;  %v664_v20 = vpop.f32.mrf.mxu1 }
 0x141   :  { %v666_v21 = vpop.f32.mrf.mxu1 }
 0x142   :  { %v11377_v21 = vld [vmem:[#allocation6 + $0xd0] sm:$0xff]  }
 0x143   :  { %v667_v22 = vpop.f32.mrf.mxu1 }
 0x144   :  { %v11378_v22 = vld [vmem:[#allocation6 + $0x10] sm:$0xff]  }
 0x145   :  { %9361 = vmatmul.mubr.msk.bf16.vlgmr.msra.gmra.mxu0 %vm558_vm1, %v9359_v50 }
 0x146   :  { %775 = vmatpush1.bf16.msra.mxu0 %v11613_v51 }
 0x147   :  { %776 = vmatprep.subr.bf16.mxu0 %v11614_v52 }
 0x14a   :  { %777 = vmatpush1.bf16.msra.mxu0 %v11615_v53 }
 0x14b   :  { %778 = vmatprep.subr.bf16.mxu0 %v11616_v54 }
 0x14e   :  { %779 = vmatpush1.bf16.msra.mxu0 %v11617_v57 }
 0x14f   :  { %780 = vmatprep.subr.bf16.mxu0 %v11618_v58 }
 0x152   :  { %781 = vmatpush1.bf16.msra.mxu0 %v11619_v61  ;;  %v9363_v61 = vld [vmem:[%s13648_s1 + $0xc] sm:$0x3] }
 0x153   :  { %782 = vmatprep.subr.bf16.mxu0 %v11620_v62 }
 0x156   :  { %783 = vmatpush1.bf16.msra.mxu0 %v11621_v3  ;;  %v11357_v3 = vld [vmem:[#allocation6 + $0xf8] sm:$0xff]  }
 0x157   :  { %784 = vmatprep.subr.bf16.mxu0 %v11622_v7 }
 0x15a   :  { %785 = vmatpush1.bf16.msra.mxu0 %v11623_v10  ;;  %v9369_v10 = vld [vmem:[%s13648_s1 + $0x14] sm:$0x3] }
 0x15b   :  { %786 = vmatprep.subr.bf16.mxu0 %v11624_v13  ;;  %v11359_v13 = vld [vmem:[#allocation6 + $0xb8] sm:$0xff]  }
 0x15e   :  { %787 = vmatpush1.bf16.msra.mxu0 %v11625_v16  ;;  %v11361_v16 = vld [vmem:[#allocation6 + $0xf0] sm:$0xff]  }
 0x15f   :  { %788 = vmatprep.subr.bf16.mxu0 %v11626_v0  ;;  %v11363_v0 = vld [vmem:[#allocation6 + $0xb0] sm:$0xff]  }
 0x162   :  { %789 = vmatpush1.bf16.msra.mxu0 %v11627_v17  ;;  %v11365_v17 = vld [vmem:[#allocation6 + $0xe8] sm:$0xff]  }
 0x163   :  { %790 = vmatprep.subr.bf16.mxu0 %v11628_v1  ;;  %v11367_v1 = vld [vmem:[#allocation6 + $0xa8] sm:$0xff]  }
 0x166   :  { %791 = vmatpush2.bf16.msra.mxu0 %v11629_v4  ;;  %v11369_v4 = vld [vmem:[#allocation6 + $0xe0] sm:$0xff]  }
 0x167   :  { %792 = vmatprep.subr.bf16.mxu0 %v11630_v5  ;;  %v11371_v5 = vld [vmem:[#allocation6 + $0xa0] sm:$0xff]  }
 0x16a   :  { %793 = vmatpush2.bf16.msra.mxu0 %v11631_v8 }
 0x16b   :  { %794 = vmatprep.subr.bf16.mxu0 %v11632_v9  ;;  %v11372_v9 = vld [vmem:[#allocation6 + $0x58] sm:$0xff]  }
 0x16e   :  { %795 = vmatpush2.bf16.msra.mxu0 %v11633_v11  ;;  %v11373_v11 = vld [vmem:[#allocation6 + $0xd8] sm:$0xff]  }
 0x16f   :  { %796 = vmatprep.subr.bf16.mxu0 %v11634_v14 }
 0x172   :  { %797 = vmatpush2.bf16.msra.mxu0 %v11635_v15  ;;  %v11374_v15 = vld [vmem:[#allocation6 + $0x18] sm:$0xff]  }
 0x173   :  { %798 = vmatprep.subr.bf16.mxu0 %v11636_v18  ;;  %v11375_v18 = vld [vmem:[#allocation6 + $0x98] sm:$0xff]  }
 0x176   :  { %799 = vmatpush2.bf16.msra.mxu0 %v11887_v55 }
 0x177   :  { %800 = vmatprep.subr.bf16.mxu0 %v11890_v56 }
 0x17a   :  { %801 = vmatpush2.bf16.msra.mxu0 %v11897_v59 }
 0x17b   :  { %802 = vmatprep.subr.bf16.mxu0 %v11900_v60 }
 0x17e   :  { %803 = vmatpush2.bf16.msra.mxu0 %v11909_v63 }
 0x17f   :  { %804 = vmatprep.subr.bf16.mxu0 %v11912_v2 }
 0x182   :  { %805 = vmatpush2.bf16.msra.mxu0 %v11919_v6 }
 0x1fd   :  { %v603_v23 = vpop.f32.mrf.mxu0 }
 0x1fe   :  { %v615_v55 = vadd.f32 %v613_v24, %v603_v23 }
 0x1ff   :  { %v605_v25 = vpop.f32.mrf.mxu0 }
 0x200   :  { %v616_v56 = vadd.f32 %v613_v24, %v605_v25  ;;  %v669_v59 = vadd.f32 %v662_v19, %v615_v55  ;;  %v11379_v24 = vld [vmem:[#allocation6 + $0x90] sm:$0xff]   ;;  %v11380_v25 = vld [vmem:[#allocation6 + $0x48] sm:$0xff]  }
 0x201   :  { %v607_v26 = vpop.f32.mrf.mxu0  ;;  %v11381_v55 = vld [vmem:[#allocation6 + $0xc8] sm:$0xff]  }
 0x202   :  { %v670_v60 = vadd.f32 %v664_v20, %v616_v56  ;;  %v11376_v20 = vld [vmem:[#allocation6 + $0x50] sm:$0xff]   ;;  %v11382_v26 = vld [vmem:[#allocation6 + $0x8] sm:$0xff]  }
 0x203   :  { %v608_v27 = vpop.f32.mrf.mxu0  ;;  %v11383_v56 = vld [vmem:[#allocation6 + $0x88] sm:$0xff]  }
 0x204   :  { %v11384_v27 = vld [vmem:[#allocation6 + $0x40] sm:$0xff]  }
 0x205   :  { %v716_v28 = vpop.f32.mrf.mxu0 }
 0x206   :  { %v723_v29 = vadd.f32 %v716_v28, %v669_v59  ;;  %v11385_v59 = vld [vmem:[#allocation6 + $0xc0] sm:$0xff]  }
 0x207   :  { %v718_v30 = vpop.f32.mrf.mxu0  ;;  %v11386_v28 = vld [vmem:[#allocation6] sm:$0xff]  }
 0x208   :  { %v725_v63 = vmax.f32 %v723_v29, 0.0  ;;  %v724_v31 = vadd.f32 %v718_v30, %v670_v60  ;;  %v11387_v60 = vld [vmem:[#allocation6 + $0x80] sm:$0xff]   ;;  %v11749_v29 = vmov 0.0  }
 0x209   :  { %v720_v32 = vpop.f32.mrf.mxu0 }
 0x20a   :  { %v726_v2 = vmax.f32 %v724_v31, 0.0  ;;  %v729_v34 = vpack.c.bf16 %v725_v63, %v725_v63  ;;  %v872_v63 = vpop.permute.xlu0 %871 }
 0x20b   :  { %v721_v33 = vpop.f32.mrf.mxu0 }
 0x20c   :  { %v730_v6 = vpack.c.bf16 %v726_v2, %v726_v2  ;;  %v882_v35 = vsel %vm562_vm0, %v729_v34, 0 }
 0x20e   :  { %763 = vmatprep.mubr.bf16.mxu1 %v730_v6  ;;  %806 = vmatprep.mubr.bf16.mxu0 %v730_v6 }
 0x20f   :  { %9367 = vmatprep.subr.msk.bf16.mxu0 %vm562_vm0, %v730_v6  ;;  %764 = vmatmul.mubr.bf16.vlgmr.msra.gmra.mxu1 %v729_v34 }
 0x210   :  { %807 = vmatmul.mubr.bf16.vlgmr.msra.gmra.mxu0 %v729_v34  ;;  %860 = vmatprep.mubr.bf16.mxu1 %v13655_v12 }
 0x211   :  { %902 = vmatpush1.bf16.msra.mxu0 %v882_v35  ;;  %919 = vmatprep.mubr.bf16.mxu0 %v13655_v12 }
 0x212   :  { %9808 = vmatprep.subr.bf16.mxu0 %v11356_v37 }
 0x218   :  { %9368 = vmatmul.mubr.msk.bf16.vlgmr.msra.gmra.mxu0 %vm558_vm1, %v9366_v36 }
 0x219   :  { %9809 = vmatpush3.bf16.msra.mxu0 %v11358_v38 }
 0x21a   :  { %9810 = vmatprep.subr.bf16.mxu0 %v11360_v39 }
 0x21d   :  { %9811 = vmatpush3.bf16.msra.mxu0 %v11362_v40 }
 0x21e   :  { %9812 = vmatprep.subr.bf16.mxu0 %v11364_v41 }
 0x221   :  { %9813 = vmatpush3.bf16.msra.mxu0 %v11366_v42 }
 0x222   :  { %9814 = vmatprep.subr.bf16.mxu0 %v11368_v43 }
 0x225   :  { %9815 = vmatpush3.bf16.msra.mxu0 %v11370_v44 }
 0x226   :  { %9816 = vmatprep.subr.bf16.mxu0 %v11372_v9 }
 0x229   :  { %9817 = vmatpush3.bf16.msra.mxu0 %v11374_v15 }
 0x22a   :  { %9818 = vmatprep.subr.bf16.mxu0 %v11376_v20  ;;  %v9404_v20 = vld [vmem:[%s13649_s2 + $0x10] sm:$0xf] }
 0x22b   :  { %1591 = vperm.xlu1 %11250, %v9404_v20   ;;  %v11411_v20 = vld [vmem:[#allocation6 + $0x138] sm:$0xff]  }
 0x22d   :  { %9819 = vmatpush3.bf16.msra.mxu0 %v11378_v22  ;;  %v9467_v22 = vld [vmem:[%s13649_s2 + $0x28] sm:$0xf] }
 0x22e   :  { %9820 = vmatprep.subr.bf16.mxu0 %v11380_v25  ;;  %v9547_v25 = vld [vmem:[%s13649_s2 + $0x58] sm:$0xff] }
 0x231   :  { %9821 = vmatpush3.bf16.msra.mxu0 %v11382_v26 }
 0x232   :  { %9822 = vmatprep.subr.bf16.mxu0 %v11384_v27  ;;  %v9594_v27 = vld [vmem:[%s13648_s1 + $0xa8] sm:$0x3] }
 0x235   :  { %9823 = vmatpush3.bf16.msra.mxu0 %v11386_v28  ;;  %v9598_v28 = vld [vmem:[%s13648_s1 + $0xb0] sm:$0x3] }
 0x236   :  { %10232 = vmatprep.subr.bf16.mxu0 %v11749_v29 }
 0x2cf   :  { %v765_v45 = vpop.f32.mrf.mxu1 }
 0x2d0   :  { %v772_v46 = vpack.c.bf16 %v765_v45, %v765_v45  ;;  %v808_v47 = vpop.f32.mrf.mxu0  ;;  %v12078_v45 = vld [vmem:[#allocation4 + $0x270] ss:$8 sps:$4 sm:$0xff]  }
 0x2d1   :  { %v767_v48 = vpop.f32.mrf.mxu1  ;;  %v815_v53 = vpack.c.bf16 %v808_v47, %v808_v47 }
 0x2d2   :  { %v773_v49 = vpack.c.bf16 %v767_v48, %v767_v48  ;;  %v810_v50 = vpop.f32.mrf.mxu0  ;;  %v823_v52 = vsel %vm562_vm0, %v772_v46, 0  ;;  %v12080_v46 = vld [vmem:[#allocation4 + $0x370] ss:$8 sps:$4 sm:$0xff]   ;;  %v12090_v48 = vld [vmem:[#allocation4 + $0x260] ss:$8 sps:$4 sm:$0xff]  }
 0x2d3   :  { %v769_v51 = vpop.f32.mrf.mxu1  ;;  %v816_v54 = vpack.c.bf16 %v810_v50, %v810_v50  ;;  %v936_v7 = vsel %vm562_vm0, %v815_v53, 0  ;;  %v12098_v50 = vld [vmem:[#allocation4 + $0x250] ss:$8 sps:$4 sm:$0xff]   ;;  %v12108_v53 = vld [vmem:[#allocation4 + $0x340] ss:$8 sps:$4 sm:$0xff]  }
 0x2d4   :  { %v812_v57 = vpop.f32.mrf.mxu0  ;;  %9364 = vmatprep.subr.msk.bf16.mxu1 %vm562_vm0, %v773_v49  ;;  %v12092_v49 = vld [vmem:[#allocation4 + $0x360] ss:$8 sps:$4 sm:$0xff]   ;;  %v12100_v51 = vld [vmem:[#allocation4 + $0x350] ss:$8 sps:$4 sm:$0xff]  }
 0x2d5   :  { %v770_v58 = vpop.f32.mrf.mxu1  ;;  %843 = vmatpush1.bf16.msra.mxu1 %v823_v52  ;;  %v12106_v52 = vld [vmem:[#allocation4 + $0x240] ss:$8 sps:$4 sm:$0xff]   ;;  %v12116_v57 = vld [vmem:[#allocation4 + $0x330] ss:$8 sps:$4 sm:$0xff]  }
 0x2d6   :  { %v813_v62 = vpop.f32.mrf.mxu0  ;;  %9370 = vmatprep.subr.msk.bf16.mxu1 %vm562_vm0, %v816_v54  ;;  %v12114_v54 = vld [vmem:[#allocation4 + $0x230] ss:$8 sps:$4 sm:$0xff]   ;;  %v12122_v58 = vld [vmem:[#allocation4 + $0x220] ss:$8 sps:$4 sm:$0xff]  }
 0x2d7   :  { %v12132_v62 = vld [vmem:[#allocation4 + $0x210] ss:$8 sps:$4 sm:$0xff]  }
 0x2d8   :  { %9365 = vmatmul.mubr.msk.bf16.vlgmr.msra.gmra.mxu1 %vm558_vm1, %v9363_v61  ;;  %v921_v8 = vpop.f32.mrf.mxu0  ;;  %v12124_v61 = vld [vmem:[#allocation4 + $0x320] ss:$8 sps:$4 sm:$0xff]  }
 0x2d9   :  { %956 = vmatpush1.bf16.msra.mxu1 %v936_v7  ;;  %973 = vmatprep.mubr.bf16.mxu1 %v13655_v12  ;;  %v12140_v7 = vld [vmem:[#allocation4 + $0x200] ss:$8 sps:$4 sm:$0xff]  }
 0x2da   :  { %9830 = vmatprep.subr.bf16.mxu1 %v11357_v3  ;;  %v923_v14 = vpop.f32.mrf.mxu0  ;;  %v12134_v3 = vld [vmem:[#allocation4 + $0x310] ss:$8 sps:$4 sm:$0xff]  }
 0x2dc   :  { %v925_v19 = vpop.f32.mrf.mxu0 }
 0x2dd   :  { %v9423_v19 = vld [vmem:[%s13648_s1 + $0x1c] sm:$0x3] }
 0x2de   :  { %v926_v23 = vpop.f32.mrf.mxu0 }
 0x2df   :  { %v9499_v23 = vld [vmem:[%s13649_s2 + $0x38] sm:$0xf] }
 0x2e0   :  { %9371 = vmatmul.mubr.msk.bf16.vlgmr.msra.gmra.mxu1 %vm558_vm1, %v9369_v10  ;;  %v12142_v10 = vld [vmem:[#allocation4 + $0x300] ss:$8 sps:$4 sm:$0xff]  }
 0x2e1   :  { %9831 = vmatpush3.bf16.msra.mxu1 %v11359_v13 }
 0x2e2   :  { %9832 = vmatprep.subr.bf16.mxu1 %v11361_v16 }
 0x2e5   :  { %9833 = vmatpush3.bf16.msra.mxu1 %v11363_v0 }
 0x2e6   :  { %9834 = vmatprep.subr.bf16.mxu1 %v11365_v17 }
 0x2e9   :  { %9835 = vmatpush3.bf16.msra.mxu1 %v11367_v1 }
 0x2ea   :  { %9836 = vmatprep.subr.bf16.mxu1 %v11369_v4 }
 0x2ed   :  { %9837 = vmatpush3.bf16.msra.mxu1 %v11371_v5 }
 0x2ee   :  { %9838 = vmatprep.subr.bf16.mxu1 %v11373_v11 }
 0x2f1   :  { %9839 = vmatpush3.bf16.msra.mxu1 %v11375_v18 }
 0x2f2   :  { %9840 = vmatprep.subr.bf16.mxu1 %v11377_v21  ;;  %v9427_v21 = vld [vmem:[%s13649_s2 + $0x18] sm:$0xf] }
 0x2f3   :  { %1829 = vperm.xlu1 %11250, %v9427_v21   ;;  %v11413_v21 = vld [vmem:[#allocation6 + $0x130] sm:$0xff]  }
 0x2f5   :  { %9841 = vmatpush3.bf16.msra.mxu1 %v11379_v24  ;;  %v9525_v24 = vld [vmem:[%s13649_s2 + $0x48] sm:$0xff] }
 0x2f6   :  { %9842 = vmatprep.subr.bf16.mxu1 %v11381_v55  ;;  %v9564_v55 = vld [vmem:[%s13648_s1 + $0x94] sm:$0xf] }
 0x2f7   :  { %2589 = vperm.xlu1 %11250, %v9467_v22   ;;  %v9572_v26 = vcombine.low %v9564_v55, %v9564_v55  ;;  %v11415_v22 = vld [vmem:[#allocation6 + $0x128] sm:$0xff]  }
 0x2f9   :  { %9843 = vmatpush3.bf16.msra.mxu1 %v11383_v56  ;;  %v9557_v56 = vld [vmem:[%s13649_s2 + $0x60] sm:$0xff] }
 0x2fa   :  { %9844 = vmatprep.subr.bf16.mxu1 %v11385_v59  ;;  %v9602_v59 = vcombine.low %v9594_v27, %v9594_v27 }
 0x2fb   :  { %3255 = vperm.xlu1 %11250, %v9499_v23   ;;  %v11417_v23 = vld [vmem:[#allocation6 + $0x120] sm:$0xff]  }
 0x2fd   :  { %9845 = vmatpush3.bf16.msra.mxu1 %v11387_v60  ;;  %v9606_v60 = vcombine.low %v9598_v28, %v9598_v28 }
 0x2fe   :  { %10252 = vmatprep.subr.bf16.mxu1 %v11749_v29 }
 0x2ff   :  { %3875 = vperm.xlu1 %11250, %v9525_v24  }
 0x303   :  { %4468 = vperm.xlu1 %11250, %v9547_v25  }
 0x307   :  { %5011 = vrot.lane.b32.xlu1 %v9572_v26, %s11747_s3 }
 0x30b   :  { %4769 = vperm.xlu1 %11250, %v9557_v56  }
 0x30f   :  { %5761 = vrot.lane.b32.xlu1 %v9602_v59, %s11748_s20 }
 0x313   :  { %5864 = vrot.lane.b32.xlu1 %v9606_v60, %s11748_s20 }
 0x398   :  { %v862_v30 = vpop.f32.mrf.mxu1 }
 0x399   :  { %v874_v32 = vadd.f32 %v872_v63, %v862_v30  ;;  %v9608_v30 = vld [vmem:[%s13649_s2 + $0x78] sm:$0xf] }
 0x39a   :  { %v864_v31 = vpop.f32.mrf.mxu1  ;;  %6052 = vperm.xlu1 %11250, %v9608_v30   ;;  %v9428_v30 = vld [vmem:[%s13648_s1 + $0x24] sm:$0x3] }
 0x39b   :  { %v875_v33 = vadd.f32 %v872_v63, %v864_v31  ;;  %v928_v6 = vadd.f32 %v921_v8, %v874_v32  ;;  %v9633_v63 = vld [vmem:[%s13648_s1 + $0xc4] sm:$0x3]  ;;  %v9620_v32 = vld [vmem:[%s13649_s2 + $0x80] sm:$0xf] }
 0x39c   :  { %v866_v2 = vpop.f32.mrf.mxu1  ;;  %v9641_v31 = vcombine.low %v9633_v63, %v9633_v63 }
 0x39d   :  { %v929_v36 = vadd.f32 %v923_v14, %v875_v33  ;;  %v9676_v2 = vld [vmem:[%s13648_s1 + $0xd8] sm:$0x3] }
 0x39e   :  { %v867_v34 = vpop.f32.mrf.mxu1  ;;  %6655 = vrot.lane.b32.xlu1 %v9641_v31, %s11748_s20  ;;  %v9682_v33 = vcombine.low %v9676_v2, %v9676_v2  ;;  %v9432_v2 = vld [vmem:[%s13648_s1 + $0x2c] sm:$0x3] }
 0x39f   :  { %v9680_v34 = vld [vmem:[%s13648_s1 + $0xe0] sm:$0x3] }
 0x3a0   :  { %v975_v35 = vpop.f32.mrf.mxu1 }
 0x3a1   :  { %v982_v37 = vadd.f32 %v975_v35, %v928_v6  ;;  %v9686_v6 = vcombine.low %v9680_v34, %v9680_v34  ;;  %v9688_v35 = vld [vmem:[%s13649_s2 + $0x98] sm:$0xf] }
 0x3a2   :  { %v977_v38 = vpop.f32.mrf.mxu1  ;;  %6413 = vperm.xlu1 %11250, %v9620_v32   ;;  %v11414_v34 = vld [vmem:[#allocation6 + $0x1b0] sm:$0xff]  }
 0x3a3   :  { %v983_v39 = vadd.f32 %v977_v38, %v929_v36  ;;  %v984_v40 = vmax.f32 %v982_v37, 0.0  ;;  %v9779_v36 = vld [vmem:[%s13648_s1 + $0xf4] sm:$0x3]  ;;  %v9711_v38 = vld [vmem:[%s13649_s2 + $0xa0] sm:$0xf] }
 0x3a4   :  { %v979_v41 = vpop.f32.mrf.mxu1  ;;  %v9788_v37 = vcombine.low %v9779_v36, %v9779_v36  ;;  %v11419_v36 = vld [vmem:[#allocation6 + $0x118] sm:$0xff]  }
 0x3a5   :  { %v985_v42 = vmax.f32 %v983_v39, 0.0  ;;  %v12082_v47 = vpack.c.bf16 %v984_v40, %v984_v40  ;;  %v9805_v39 = vld [vmem:[%s13649_s2 + $0xb0] sm:$0xf] }
 0x3a6   :  { %v980_v43 = vpop.f32.mrf.mxu1  ;;  %7523 = vrot.lane.b32.xlu1 %v9682_v33, %s11748_s20  ;;  %v11412_v33 = vld [vmem:[#allocation6 + $0x1b8] sm:$0xff]  }
 0x3a7   :  { %v12076_v44 = vpack.c.bf16 %v985_v42, %v985_v42 }
 0x3a9   :  { %1148 = vmatprep.mubr.bf16.mxu0 %v12076_v44  ;;  %1317 = vmatprep.mubr.bf16.mxu1 %v12076_v44 }
 0x3aa   :  { %1149 = vmatmul.mubr.bf16.vlgmr.msra.gmra.mxu0 %v12082_v47  ;;  %1318 = vmatmul.mubr.bf16.vlgmr.msra.gmra.mxu1 %v12082_v47 }
 0x3ab   :  { %10233 = vmatpush3.bf16.msra.mxu0 %v12078_v45  ;;  %10253 = vmatpush3.bf16.msra.mxu1 %v12080_v46 }
 0x3ac   :  { %10234 = vmatprep.subr.bf16.mxu0 %v11749_v29  ;;  %10254 = vmatprep.subr.bf16.mxu1 %v11749_v29 }
 0x3ad   :  { %10248 = vmatprep.mubr.msk.bf16.mxu0 %vm11750_vm2, %v11749_v29  ;;  %10268 = vmatprep.mubr.msk.bf16.mxu1 %vm11750_vm2, %v11749_v29 }
 0x3ae   :  { %7627 = vrot.lane.b32.xlu1 %v9686_v6, %s11748_s20  ;;  %v11416_v6 = vld [vmem:[#allocation6 + $0x1a8] sm:$0xff]  }
 0x3af   :  { %10235 = vmatpush3.bf16.msra.mxu0 %v12090_v48  ;;  %10255 = vmatpush3.bf16.msra.mxu1 %v12092_v49 }
 0x3b0   :  { %10236 = vmatprep.subr.bf16.mxu0 %v11749_v29  ;;  %10256 = vmatprep.subr.bf16.mxu1 %v11749_v29 }
 0x3b2   :  { %7812 = vperm.xlu1 %11250, %v9688_v35   ;;  %v11418_v35 = vld [vmem:[#allocation6 + $0x1a0] sm:$0xff]  }
 0x3b3   :  { %10237 = vmatpush3.bf16.msra.mxu0 %v12098_v50  ;;  %10257 = vmatpush3.bf16.msra.mxu1 %v12100_v51 }
 0x3b4   :  { %10238 = vmatprep.subr.bf16.mxu0 %v11749_v29  ;;  %10258 = vmatprep.subr.bf16.mxu1 %v11749_v29 }
 0x3b6   :  { %8841 = vrot.lane.b32.xlu1 %v9788_v37, %s11748_s20  ;;  %v11420_v37 = vld [vmem:[#allocation6 + $0x198] sm:$0xff]  }
 0x3b7   :  { %10239 = vmatpush3.bf16.msra.mxu0 %v12106_v52  ;;  %10259 = vmatpush3.bf16.msra.mxu1 %v12108_v53 }
 0x3b8   :  { %10240 = vmatprep.subr.bf16.mxu0 %v11749_v29  ;;  %10260 = vmatprep.subr.bf16.mxu1 %v11749_v29 }
 0x3ba   :  { %8580 = vperm.xlu1 %11250, %v9711_v38  }
 0x3bb   :  { %10241 = vmatpush3.bf16.msra.mxu0 %v12114_v54  ;;  %10261 = vmatpush3.bf16.msra.mxu1 %v12116_v57 }
 0x3bc   :  { %10242 = vmatprep.subr.bf16.mxu0 %v11749_v29  ;;  %10262 = vmatprep.subr.bf16.mxu1 %v11749_v29 }
 0x3be   :  { %9221 = vperm.xlu1 %11250, %v9805_v39  }
 0x3bf   :  { %10243 = vmatpush3.bf16.msra.mxu0 %v12122_v58  ;;  %10263 = vmatpush3.bf16.msra.mxu1 %v12124_v61 }
 0x3c0   :  { %10244 = vmatprep.subr.bf16.mxu0 %v11749_v29  ;;  %10264 = vmatprep.subr.bf16.mxu1 %v11749_v29 }
 0x3c3   :  { %10245 = vmatpush3.bf16.msra.mxu0 %v12132_v62  ;;  %10265 = vmatpush3.bf16.msra.mxu1 %v12134_v3 }
 0x3c4   :  { %10246 = vmatprep.subr.bf16.mxu0 %v11749_v29  ;;  %10266 = vmatprep.subr.bf16.mxu1 %v11749_v29 }
 0x3c7   :  { %10247 = vmatpush3.bf16.msra.mxu0 %v12140_v7  ;;  %10267 = vmatpush3.bf16.msra.mxu1 %v12142_v10 }
 0x3c8   :  { %10278 = vmatprep.subr.bf16.mxu1 %v11749_v29  ;;  %10272 = vmatprep.subr.bf16.mxu0 %v11749_v29 }
 0x46a   :  { %v9824_v13 = vpop.f32.mrf.mxu0  ;;  %v9846_v16 = vpop.f32.mrf.mxu1 }
 0x46c   :  { %v9825_v0 = vpop.f32.mrf.mxu0  ;;  %v9847_v17 = vpop.f32.mrf.mxu1 }
 0x46d   :  { %v9826_v1 = vadd.f32 %v9825_v0, %v9824_v13  ;;  %v9848_v4 = vadd.f32 %v9847_v17, %v9846_v16  ;;  %v9425_v16 = vld [vmem:[%s13648_s1 + $0x20] sm:$0x3] }
 0x46e   :  { %v9827_v5 = vpop.f32.mrf.mxu0  ;;  %v9849_v8 = vpop.f32.mrf.mxu1 }
 0x46f   :  { %v1325_v9 = vmax.f32 %v9826_v1, %v9848_v4 }
 0x470   :  { %v9828_v11 = vpop.f32.mrf.mxu0  ;;  %v9850_v14 = vpop.f32.mrf.mxu1 }
 0x471   :  { %v1362_v15 = vpack.c.bf16 %v1325_v9, %v1325_v9 }
 0x473   :  { %10249 = vmatmul.mubr.bf16.vlgmr.msra.gmra.mxu0 %v1362_v15  ;;  %10269 = vmatmul.mubr.bf16.vlgmr.msra.gmra.mxu1 %v1362_v15  ;;  %v1601_v18 = vsel %vm562_vm0, %v1362_v15, 0 }
 0x474   :  { %10279 = vmatpush3.bf16.msra.mxu1 %v1601_v18  ;;  %10274 = vmatprep.mubr.msk.bf16.mxu0 %vm11750_vm2, %v11749_v29 }
 0x475   :  { %10280 = vmatprep.mubr.msk.bf16.mxu1 %vm11750_vm2, %v11749_v29  ;;  %10290 = vmatprep.subr.bf16.mxu1 %v11749_v29 }
 0x47b   :  { %10281 = vmatmul.mubr.msk.bf16.vlgmr.msra.gmra.mxu1 %vm558_vm1, %v9423_v19  ;;  %v9430_v19 = vld [vmem:[%s13648_s1 + $0x28] sm:$0x3] }
 0x47c   :  { %10291 = vmatpush3.bf16.msra.mxu1 %v12078_v45  ;;  %10306 = vmatprep.mubr.msk.bf16.mxu1 %vm11750_vm2, %v11749_v29 }
 0x47d   :  { %10292 = vmatprep.subr.bf16.mxu1 %v11749_v29 }
 0x480   :  { %10293 = vmatpush3.bf16.msra.mxu1 %v12090_v48 }
 0x481   :  { %10294 = vmatprep.subr.bf16.mxu1 %v11749_v29 }
 0x484   :  { %10295 = vmatpush3.bf16.msra.mxu1 %v12098_v50 }
 0x485   :  { %10296 = vmatprep.subr.bf16.mxu1 %v11749_v29 }
 0x488   :  { %10297 = vmatpush3.bf16.msra.mxu1 %v12106_v52 }
 0x489   :  { %10298 = vmatprep.subr.bf16.mxu1 %v11749_v29 }
 0x48c   :  { %10299 = vmatpush3.bf16.msra.mxu1 %v12114_v54 }
 0x48d   :  { %10300 = vmatprep.subr.bf16.mxu1 %v11749_v29 }
 0x490   :  { %10301 = vmatpush3.bf16.msra.mxu1 %v12122_v58  ;;  %v9421_v58 = vld [vmem:[%s13648_s1 + $0x18] sm:$0x3] }
 0x491   :  { %10302 = vmatprep.subr.bf16.mxu1 %v11749_v29 }
 0x494   :  { %10303 = vmatpush3.bf16.msra.mxu1 %v12132_v62 }
 0x495   :  { %10304 = vmatprep.subr.bf16.mxu1 %v11749_v29 }
 0x498   :  { %10305 = vmatpush3.bf16.msra.mxu1 %v12140_v7 }
 0x499   :  { %10330 = vmatprep.subr.bf16.mxu1 %v11749_v29 }
 0x533   :  { %v1445_v40 = vpop.f32.mrf.mxu0  ;;  %v1534_v41 = vpop.f32.mrf.mxu1 }
 0x534   :  { %v1451_v42 = vpack.c.bf16 %v1445_v40, %v1445_v40  ;;  %v1540_v50 = vpack.c.bf16 %v1534_v41, %v1534_v41  ;;  %v11421_v40 = vld [vmem:[#allocation6 + $0x110] sm:$0xff]  }
 0x535   :  { %v10250_v43 = vpop.f32.mrf.mxu0  ;;  %v10270_v45 = vpop.f32.mrf.mxu1  ;;  %v11422_v41 = vld [vmem:[#allocation6 + $0x190] sm:$0xff]  }
 0x536   :  { %v1547_v48 = vsel %vm562_vm0, %v1451_v42, 0  ;;  %v1650_v13 = vsel %vm562_vm0, %v1540_v50, 0  ;;  %v11423_v45 = vld [vmem:[#allocation6 + $0x108] sm:$0xff]   ;;  %v11425_v50 = vld [vmem:[#allocation6 + $0x100] sm:$0xff]  }
 0x537   :  { %v1448_v52 = vpop.f32.mrf.mxu0  ;;  %v1537_v54 = vpop.f32.mrf.mxu1  ;;  %10273 = vmatpush3.bf16.msra.mxu0 %v1547_v48  ;;  %v11424_v48 = vld [vmem:[#allocation6 + $0x188] sm:$0xff]  }
 0x538   :  { %10284 = vmatprep.subr.bf16.mxu0 %v11749_v29  ;;  %v11426_v52 = vld [vmem:[#allocation6 + $0x180] sm:$0xff]  }
 0x539   :  { %v10251_v62 = vpop.f32.mrf.mxu0  ;;  %v10271_v7 = vpop.f32.mrf.mxu1 }
 0x53a   :  { %10275 = vmatmul.mubr.msk.bf16.vlgmr.msra.gmra.mxu0 %vm558_vm1, %v9421_v58 }
 0x53b   :  { %10285 = vmatpush3.bf16.msra.mxu0 %v1650_v13  ;;  %10286 = vmatprep.mubr.msk.bf16.mxu0 %vm11750_vm2, %v11749_v29 }
 0x53c   :  { %10310 = vmatprep.subr.bf16.mxu0 %v11749_v29 }
 0x542   :  { %10287 = vmatmul.mubr.msk.bf16.vlgmr.msra.gmra.mxu0 %vm558_vm1, %v9425_v16 }
 0x543   :  { %10311 = vmatpush3.bf16.msra.mxu0 %v12080_v46  ;;  %10326 = vmatprep.mubr.msk.bf16.mxu0 %vm11750_vm2, %v11749_v29  ;;  %v1637_v46 = vpop.f32.mrf.mxu1 }
 0x544   :  { %10312 = vmatprep.subr.bf16.mxu0 %v11749_v29 }
 0x547   :  { %10313 = vmatpush3.bf16.msra.mxu0 %v12092_v49  ;;  %v10282_v49 = vpop.f32.mrf.mxu1 }
 0x548   :  { %10314 = vmatprep.subr.bf16.mxu0 %v11749_v29 }
 0x54b   :  { %10315 = vmatpush3.bf16.msra.mxu0 %v12100_v51  ;;  %v1640_v51 = vpop.f32.mrf.mxu1 }
 0x54c   :  { %10316 = vmatprep.subr.bf16.mxu0 %v11749_v29 }
 0x54f   :  { %10317 = vmatpush3.bf16.msra.mxu0 %v12108_v53  ;;  %v10283_v53 = vpop.f32.mrf.mxu1 }
 0x550   :  { %10318 = vmatprep.subr.bf16.mxu0 %v11749_v29 }
 0x553   :  { %10319 = vmatpush3.bf16.msra.mxu0 %v12116_v57  ;;  %v1592_v57 = vpop.permute.xlu1 %1591 }
 0x554   :  { %10320 = vmatprep.subr.bf16.mxu0 %v11749_v29 }
 0x557   :  { %10321 = vmatpush3.bf16.msra.mxu0 %v12124_v61  ;;  %v1830_v58 = vpop.permute.xlu1 %1829 }
 0x558   :  { %10322 = vmatprep.subr.bf16.mxu0 %v11749_v29 }
 0x55b   :  { %10323 = vmatpush3.bf16.msra.mxu0 %v12134_v3 }
 0x55c   :  { %10324 = vmatprep.subr.bf16.mxu0 %v11749_v29 }
 0x55f   :  { %10325 = vmatpush3.bf16.msra.mxu0 %v12142_v10 }
 0x560   :  { %10336 = vmatprep.subr.bf16.mxu0 %v11749_v29 }
 0x5fa   :  { %v1583_v0 = vpop.f32.mrf.mxu0 }
 0x5fb   :  { %v1594_v1 = vadd.f32 %v1592_v57, %v1583_v0 }
 0x5fc   :  { %v10276_v17 = vpop.f32.mrf.mxu0 }
 0x5fd   :  { %v1643_v5 = vadd.f32 %v1637_v46, %v1594_v1  ;;  %v11427_v17 = vld [vmem:[#allocation4 + $0x430] ss:$8 sps:$4 sm:$0xff]  }
 0x5fe   :  { %v1586_v4 = vpop.f32.mrf.mxu0  ;;  %v12320_v1 = vld [vmem:[#allocation4 + $0x530] ss:$8 sps:$4 sm:$0xff]  }
 0x600   :  { %v10277_v61 = vpop.f32.mrf.mxu0 }
 0x602   :  { %v1686_v8 = vpop.f32.mrf.mxu0 }
 0x603   :  { %v1692_v9 = vadd.f32 %v1686_v8, %v1643_v5  ;;  %v11429_v5 = vld [vmem:[#allocation4 + $0x420] ss:$8 sps:$4 sm:$0xff]  }
 0x604   :  { %v10288_v3 = vpop.f32.mrf.mxu0  ;;  %v12327_v8 = vld [vmem:[#allocation4 + $0x520] ss:$8 sps:$4 sm:$0xff]  }
 0x605   :  { %v1693_v11 = vmax.f32 %v1692_v9, 0.0  ;;  %v11431_v9 = vld [vmem:[#allocation4 + $0x410] ss:$8 sps:$4 sm:$0xff]  }
 0x606   :  { %v1689_v14 = vpop.f32.mrf.mxu0  ;;  %v12336_v3 = vld [vmem:[#allocation4 + $0x510] ss:$8 sps:$4 sm:$0xff]  }
 0x607   :  { %v1696_v15 = vpack.c.bf16 %v1693_v11, %v1693_v11  ;;  %v11433_v11 = vld [vmem:[#allocation4 + $0x400] ss:$8 sps:$4 sm:$0xff]  }
 0x608   :  { %v10289_v10 = vpop.f32.mrf.mxu0  ;;  %v11434_v14 = vld [vmem:[#allocation4 + $0x500] ss:$8 sps:$4 sm:$0xff]  }
 0x609   :  { %10307 = vmatmul.mubr.bf16.vlgmr.msra.gmra.mxu1 %v1696_v15  ;;  %10327 = vmatmul.mubr.bf16.vlgmr.msra.gmra.mxu0 %v1696_v15  ;;  %v1839_v18 = vsel %vm562_vm0, %v1696_v15, 0 }
 0x60a   :  { %10337 = vmatpush3.bf16.msra.mxu0 %v1839_v18  ;;  %10332 = vmatprep.mubr.msk.bf16.mxu1 %vm11750_vm2, %v11749_v29 }
 0x60b   :  { %10338 = vmatprep.mubr.msk.bf16.mxu0 %vm11750_vm2, %v11749_v29  ;;  %10348 = vmatprep.subr.bf16.mxu0 %v11749_v29 }
 0x611   :  { %10339 = vmatmul.mubr.msk.bf16.vlgmr.msra.gmra.mxu0 %vm558_vm1, %v9430_v19 }
 0x612   :  { %10364 = vmatprep.mubr.msk.bf16.mxu0 %vm11750_vm2, %v11749_v29  ;;  %10349 = vmatpush3.bf16.msra.mxu0 %v11411_v20 }
 0x613   :  { %10350 = vmatprep.subr.bf16.mxu0 %v11749_v29 }
 0x616   :  { %10351 = vmatpush3.bf16.msra.mxu0 %v11413_v21 }
 0x617   :  { %10352 = vmatprep.subr.bf16.mxu0 %v11749_v29 }
 0x61a   :  { %10353 = vmatpush3.bf16.msra.mxu0 %v11415_v22 }
 0x61b   :  { %10354 = vmatprep.subr.bf16.mxu0 %v11749_v29 }
 0x61e   :  { %10355 = vmatpush3.bf16.msra.mxu0 %v11417_v23 }
 0x61f   :  { %10356 = vmatprep.subr.bf16.mxu0 %v11749_v29 }
 0x622   :  { %10357 = vmatpush3.bf16.msra.mxu0 %v11419_v36 }
 0x623   :  { %10358 = vmatprep.subr.bf16.mxu0 %v11749_v29 }
 0x626   :  { %10359 = vmatpush3.bf16.msra.mxu0 %v11421_v40 }
 0x627   :  { %10360 = vmatprep.subr.bf16.mxu0 %v11749_v29 }
 0x62a   :  { %10361 = vmatpush3.bf16.msra.mxu0 %v11423_v45 }
 0x62b   :  { %10362 = vmatprep.subr.bf16.mxu0 %v11749_v29 }
 0x62e   :  { %10363 = vmatpush3.bf16.msra.mxu0 %v11425_v50 }
 0x62f   :  { %10388 = vmatprep.subr.bf16.mxu0 %v11749_v29 }
 0x6c9   :  { %v1731_v24 = vpop.f32.mrf.mxu1  ;;  %v1772_v25 = vpop.f32.mrf.mxu0 }
 0x6ca   :  { %v1737_v55 = vpack.c.bf16 %v1731_v24, %v1731_v24  ;;  %v1778_v59 = vpack.c.bf16 %v1772_v25, %v1772_v25 }
 0x6cb   :  { %v10308_v26 = vpop.f32.mrf.mxu1  ;;  %v10328_v56 = vpop.f32.mrf.mxu0 }
 0x6cc   :  { %v1785_v27 = vsel %vm562_vm0, %v1737_v55, 0  ;;  %v1888_v32 = vsel %vm562_vm0, %v1778_v59, 0  ;;  %v9463_v26 = vld [vmem:[%s13648_s1 + $0x34] sm:$0x3] }
 0x6cd   :  { %v1734_v28 = vpop.f32.mrf.mxu1  ;;  %v1775_v60 = vpop.f32.mrf.mxu0  ;;  %10331 = vmatpush3.bf16.msra.mxu1 %v1785_v27 }
 0x6ce   :  { %10342 = vmatprep.subr.bf16.mxu1 %v11749_v29 }
 0x6cf   :  { %v10309_v63 = vpop.f32.mrf.mxu1  ;;  %v10329_v31 = vpop.f32.mrf.mxu0 }
 0x6d0   :  { %10333 = vmatmul.mubr.msk.bf16.vlgmr.msra.gmra.mxu1 %vm558_vm1, %v9428_v30 }
 0x6d1   :  { %10343 = vmatpush3.bf16.msra.mxu1 %v1888_v32  ;;  %10344 = vmatprep.mubr.msk.bf16.mxu1 %vm11750_vm2, %v11749_v29  ;;  %v1875_v38 = vpop.f32.mrf.mxu0 }
 0x6d2   :  { %10368 = vmatprep.subr.bf16.mxu1 %v11749_v29 }
 0x6d3   :  { %v10340_v39 = vpop.f32.mrf.mxu0 }
 0x6d5   :  { %v1878_v42 = vpop.f32.mrf.mxu0 }
 0x6d7   :  { %v10341_v43 = vpop.f32.mrf.mxu0 }
 0x6d8   :  { %10345 = vmatmul.mubr.msk.bf16.vlgmr.msra.gmra.mxu1 %vm558_vm1, %v9432_v2  ;;  %v9461_v2 = vld [vmem:[%s13648_s1 + $0x30] sm:$0x3] }
 0x6d9   :  { %10369 = vmatpush3.bf16.msra.mxu1 %v11412_v33  ;;  %10384 = vmatprep.mubr.msk.bf16.mxu1 %vm11750_vm2, %v11749_v29 }
 0x6da   :  { %10370 = vmatprep.subr.bf16.mxu1 %v11749_v29 }
 0x6dd   :  { %10371 = vmatpush3.bf16.msra.mxu1 %v11414_v34 }
 0x6de   :  { %10372 = vmatprep.subr.bf16.mxu1 %v11749_v29 }
 0x6e1   :  { %10373 = vmatpush3.bf16.msra.mxu1 %v11416_v6 }
 0x6e2   :  { %10374 = vmatprep.subr.bf16.mxu1 %v11749_v29 }
 0x6e5   :  { %10375 = vmatpush3.bf16.msra.mxu1 %v11418_v35  ;;  %v9465_v35 = vld [vmem:[%s13648_s1 + $0x38] sm:$0x3] }
 0x6e6   :  { %10376 = vmatprep.subr.bf16.mxu1 %v11749_v29 }
 0x6e9   :  { %10377 = vmatpush3.bf16.msra.mxu1 %v11420_v37 }
 0x6ea   :  { %10378 = vmatprep.subr.bf16.mxu1 %v11749_v29 }
 0x6ed   :  { %10379 = vmatpush3.bf16.msra.mxu1 %v11422_v41  ;;  %v2350_v41 = vpop.permute.xlu0 %2349 }
 0x6ee   :  { %10380 = vmatprep.subr.bf16.mxu1 %v11749_v29 }
 0x6f1   :  { %10381 = vmatpush3.bf16.msra.mxu1 %v11424_v48 }
 0x6f2   :  { %10382 = vmatprep.subr.bf16.mxu1 %v11749_v29 }
 0x6f5   :  { %10383 = vmatpush3.bf16.msra.mxu1 %v11426_v52 }
 0x6f6   :  { %10400 = vmatprep.subr.bf16.mxu1 %v11749_v29 }
 0x790   :  { %v1821_v54 = vpop.f32.mrf.mxu1 }
 0x791   :  { %v1832_v7 = vadd.f32 %v1830_v58, %v1821_v54 }
 0x792   :  { %v10334_v62 = vpop.f32.mrf.mxu1 }
 0x793   :  { %v1881_v46 = vadd.f32 %v1875_v38, %v1832_v7 }
 0x794   :  { %v1824_v13 = vpop.f32.mrf.mxu1 }
 0x796   :  { %v10335_v16 = vpop.f32.mrf.mxu1 }
 0x798   :  { %v1924_v49 = vpop.f32.mrf.mxu1 }
 0x799   :  { %v1930_v51 = vadd.f32 %v1924_v49, %v1881_v46  ;;  %v9472_v49 = vld [vmem:[%s13648_s1 + $0x40] sm:$0x3] }
 0x79a   :  { %v10346_v53 = vpop.f32.mrf.mxu1 }
 0x79b   :  { %v1931_v0 = vmax.f32 %v1930_v51, 0.0 }
 0x79c   :  { %v1927_v57 = vpop.f32.mrf.mxu1 }
 0x79d   :  { %v12322_v4 = vpack.c.bf16 %v1931_v0, %v1931_v0 }
 0x79e   :  { %v10347_v61 = vpop.f32.mrf.mxu1 }
 0x79f   :  { %10365 = vmatmul.mubr.bf16.vlgmr.msra.gmra.mxu0 %v12322_v4  ;;  %10385 = vmatmul.mubr.bf16.vlgmr.msra.gmra.mxu1 %v12322_v4 }
 0x7a0   :  { %10389 = vmatpush3.bf16.msra.mxu0 %v11427_v17  ;;  %10401 = vmatpush3.bf16.msra.mxu1 %v12320_v1 }
 0x7a1   :  { %10390 = vmatprep.subr.bf16.mxu0 %v11749_v29  ;;  %10402 = vmatprep.subr.bf16.mxu1 %v11749_v29 }
 0x7a2   :  { %10396 = vmatprep.mubr.msk.bf16.mxu0 %vm11750_vm2, %v11749_v29  ;;  %10408 = vmatprep.mubr.msk.bf16.mxu1 %vm11750_vm2, %v11749_v29 }
 0x7a4   :  { %10391 = vmatpush3.bf16.msra.mxu0 %v11429_v5  ;;  %10403 = vmatpush3.bf16.msra.mxu1 %v12327_v8 }
 0x7a5   :  { %10392 = vmatprep.subr.bf16.mxu0 %v11749_v29  ;;  %10404 = vmatprep.subr.bf16.mxu1 %v11749_v29 }
 0x7a8   :  { %10393 = vmatpush3.bf16.msra.mxu0 %v11431_v9  ;;  %10405 = vmatpush3.bf16.msra.mxu1 %v12336_v3 }
 0x7a9   :  { %10394 = vmatprep.subr.bf16.mxu0 %v11749_v29  ;;  %10406 = vmatprep.subr.bf16.mxu1 %v11749_v29 }
 0x7ac   :  { %10395 = vmatpush3.bf16.msra.mxu0 %v11433_v11  ;;  %10407 = vmatpush3.bf16.msra.mxu1 %v11434_v14 }
 0x7ad   :  { %10418 = vmatprep.subr.bf16.mxu1 %v11749_v29  ;;  %10412 = vmatprep.subr.bf16.mxu0 %v11749_v29 }
 0x85f   :  { %v2032_v15 = vpop.f32.mrf.mxu0  ;;  %v2137_v10 = vpop.f32.mrf.mxu1 }
 0x860   :  { %v2143_v18 = vmax.f32 %v2032_v15, %v2137_v10  ;;  %v9474_v15 = vld [vmem:[%s13648_s1 + $0x44] sm:$0x3] }
 0x861   :  { %v10366_v19 = vpop.f32.mrf.mxu0  ;;  %v10386_v20 = vpop.f32.mrf.mxu1  ;;  %v11435_v10 = vld [vmem:[#allocation6 + $0x218] sm:$0xff]  }
 0x862   :  { %v2164_v21 = vpack.c.bf16 %v2143_v18, %v2143_v18  ;;  %v11436_v18 = vld [vmem:[#allocation6 + $0x298] sm:$0xff]  }
 0x863   :  { %v2035_v22 = vpop.f32.mrf.mxu0  ;;  %v2140_v23 = vpop.f32.mrf.mxu1 }
 0x864   :  { %10397 = vmatmul.mubr.msk.bf16.vlgmr.msra.gmra.mxu0 %vm2189_vm3, %v2164_v21  ;;  %10409 = vmatmul.mubr.msk.bf16.vlgmr.msra.gmra.mxu1 %vm2189_vm3, %v2164_v21  ;;  %v2358_v24 = vsel %vm562_vm0, %v2164_v21, 0  ;;  %v11437_v21 = vld [vmem:[#allocation6 + $0x210] sm:$0xff]  }
 0x865   :  { %v10367_v25 = vpop.f32.mrf.mxu0  ;;  %v10387_v55 = vpop.f32.mrf.mxu1  ;;  %10419 = vmatpush3.bf16.msra.mxu1 %v2358_v24  ;;  %10414 = vmatprep.mubr.msk.bf16.mxu0 %vm11750_vm2, %v11749_v29  ;;  %v11438_v22 = vld [vmem:[#allocation6 + $0x290] sm:$0xff]  }
 0x866   :  { %10420 = vmatprep.mubr.msk.bf16.mxu1 %vm11750_vm2, %v11749_v29  ;;  %10430 = vmatprep.subr.bf16.mxu1 %v11749_v29  ;;  %v11439_v25 = vld [vmem:[#allocation6 + $0x208] sm:$0xff]  }
 0x867   :  { %v11440_v55 = vld [vmem:[#allocation6 + $0x288] sm:$0xff]  }
 0x86c   :  { %10421 = vmatmul.mubr.msk.bf16.vlgmr.msra.gmra.mxu1 %vm558_vm1, %v9463_v26  ;;  %v11441_v26 = vld [vmem:[#allocation6 + $0x200] sm:$0xff]  }
 0x86d   :  { %10431 = vmatpush3.bf16.msra.mxu1 %v11427_v17  ;;  %10438 = vmatprep.mubr.msk.bf16.mxu1 %vm11750_vm2, %v11749_v29 }
 0x86e   :  { %10432 = vmatprep.subr.bf16.mxu1 %v11749_v29 }
 0x871   :  { %10433 = vmatpush3.bf16.msra.mxu1 %v11429_v5 }
 0x872   :  { %10434 = vmatprep.subr.bf16.mxu1 %v11749_v29 }
 0x875   :  { %10435 = vmatpush3.bf16.msra.mxu1 %v11431_v9  ;;  %v9470_v9 = vld [vmem:[%s13648_s1 + $0x3c] sm:$0x3] }
 0x876   :  { %10436 = vmatprep.subr.bf16.mxu1 %v11749_v29 }
 0x879   :  { %10437 = vmatpush3.bf16.msra.mxu1 %v11433_v11 }
 0x87a   :  { %10454 = vmatprep.subr.bf16.mxu1 %v11749_v29 }
 0x924   :  { %v2227_v56 = vpop.f32.mrf.mxu0  ;;  %v2292_v27 = vpop.f32.mrf.mxu1 }
 0x925   :  { %v2233_v59 = vpack.c.bf16 %v2227_v56, %v2227_v56  ;;  %v2298_v63 = vpack.c.bf16 %v2292_v27, %v2292_v27  ;;  %v11442_v56 = vld [vmem:[#allocation6 + $0x280] sm:$0xff]  }
 0x926   :  { %v10398_v28 = vpop.f32.mrf.mxu0  ;;  %v10410_v60 = vpop.f32.mrf.mxu1 }
 0x927   :  { %v2305_v30 = vsel %vm562_vm0, %v2233_v59, 0  ;;  %v2407_v6 = vsel %vm562_vm0, %v2298_v63, 0  ;;  %v2590_v59 = vpop.permute.xlu1 %2589 }
 0x928   :  { %v2230_v31 = vpop.f32.mrf.mxu0  ;;  %v2295_v32 = vpop.f32.mrf.mxu1  ;;  %10413 = vmatpush3.bf16.msra.mxu0 %v2305_v30 }
 0x929   :  { %10424 = vmatprep.subr.bf16.mxu0 %v11749_v29 }
 0x92a   :  { %v10399_v33 = vpop.f32.mrf.mxu0  ;;  %v10411_v34 = vpop.f32.mrf.mxu1 }
 0x92b   :  { %10415 = vmatmul.mubr.msk.bf16.vlgmr.msra.gmra.mxu0 %vm558_vm1, %v9461_v2 }
 0x92c   :  { %10425 = vmatpush3.bf16.msra.mxu0 %v2407_v6  ;;  %10426 = vmatprep.mubr.msk.bf16.mxu0 %vm11750_vm2, %v11749_v29  ;;  %v2394_v36 = vpop.f32.mrf.mxu1 }
 0x92d   :  { %10442 = vmatprep.subr.bf16.mxu0 %v11749_v29 }
 0x92e   :  { %v10422_v37 = vpop.f32.mrf.mxu1 }
 0x930   :  { %v2397_v38 = vpop.f32.mrf.mxu1 }
 0x932   :  { %v10423_v39 = vpop.f32.mrf.mxu1 }
 0x933   :  { %10427 = vmatmul.mubr.msk.bf16.vlgmr.msra.gmra.mxu0 %vm558_vm1, %v9465_v35  ;;  %v11443_v35 = vld [vmem:[#allocation4 + $0x610] ss:$8 sps:$4 sm:$0xff]   ;;  %v11445_v39 = vld [vmem:[#allocation4 + $0x600] ss:$8 sps:$4 sm:$0xff]  }
 0x934   :  { %10443 = vmatpush3.bf16.msra.mxu0 %v12320_v1  ;;  %10450 = vmatprep.mubr.msk.bf16.mxu0 %vm11750_vm2, %v11749_v29 }
 0x935   :  { %10444 = vmatprep.subr.bf16.mxu0 %v11749_v29 }
 0x938   :  { %10445 = vmatpush3.bf16.msra.mxu0 %v12327_v8 }
 0x939   :  { %10446 = vmatprep.subr.bf16.mxu0 %v11749_v29 }
 0x93c   :  { %10447 = vmatpush3.bf16.msra.mxu0 %v12336_v3 }
 0x93d   :  { %10448 = vmatprep.subr.bf16.mxu0 %v11749_v29 }
 0x940   :  { %10449 = vmatpush3.bf16.msra.mxu0 %v11434_v14 }
 0x941   :  { %10460 = vmatprep.subr.bf16.mxu0 %v11749_v29 }
 0x9eb   :  { %v2341_v40 = vpop.f32.mrf.mxu0 }
 0x9ec   :  { %v2352_v43 = vadd.f32 %v2350_v41, %v2341_v40  ;;  %v11446_v40 = vld [vmem:[#allocation4 + $0x700] ss:$8 sps:$4 sm:$0xff]  }
 0x9ed   :  { %v10416_v42 = vpop.f32.mrf.mxu0 }
 0x9ee   :  { %v2400_v50 = vadd.f32 %v2394_v36, %v2352_v43  ;;  %v12424_v36 = vld [vmem:[#allocation4 + $0x710] ss:$8 sps:$4 sm:$0xff]  }
 0x9ef   :  { %v2344_v45 = vpop.f32.mrf.mxu0 }
 0x9f1   :  { %v10417_v48 = vpop.f32.mrf.mxu0 }
 0x9f3   :  { %v2443_v52 = vpop.f32.mrf.mxu0 }
 0x9f4   :  { %v2449_v54 = vadd.f32 %v2443_v52, %v2400_v50 }
 0x9f5   :  { %v10428_v58 = vpop.f32.mrf.mxu0 }
 0x9f6   :  { %v2450_v62 = vmax.f32 %v2449_v54, 0.0 }
 0x9f7   :  { %v2446_v7 = vpop.f32.mrf.mxu0 }
 0x9f8   :  { %v2453_v13 = vpack.c.bf16 %v2450_v62, %v2450_v62 }
 0x9f9   :  { %v10429_v16 = vpop.f32.mrf.mxu0 }
 0x9fa   :  { %10439 = vmatmul.mubr.msk.bf16.vlgmr.msra.gmra.mxu1 %vm2189_vm3, %v2453_v13  ;;  %10451 = vmatmul.mubr.msk.bf16.vlgmr.msra.gmra.mxu0 %vm2189_vm3, %v2453_v13  ;;  %v2598_v46 = vsel %vm562_vm0, %v2453_v13, 0  ;;  %v9495_v13 = vld [vmem:[%s13648_s1 + $0x4c] sm:$0x3] }
 0x9fb   :  { %10461 = vmatpush3.bf16.msra.mxu0 %v2598_v46  ;;  %10456 = vmatprep.mubr.msk.bf16.mxu1 %vm11750_vm2, %v11749_v29 }
 0x9fc   :  { %10462 = vmatprep.mubr.msk.bf16.mxu0 %vm11750_vm2, %v11749_v29  ;;  %10472 = vmatprep.subr.bf16.mxu0 %v11749_v29 }
 0xa02   :  { %10463 = vmatmul.mubr.msk.bf16.vlgmr.msra.gmra.mxu0 %vm558_vm1, %v9472_v49 }
 0xa03   :  { %10480 = vmatprep.mubr.msk.bf16.mxu0 %vm11750_vm2, %v11749_v29  ;;  %10473 = vmatpush3.bf16.msra.mxu0 %v11435_v10 }
 0xa04   :  { %10474 = vmatprep.subr.bf16.mxu0 %v11749_v29 }
 0xa07   :  { %10475 = vmatpush3.bf16.msra.mxu0 %v11437_v21 }
 0xa08   :  { %10476 = vmatprep.subr.bf16.mxu0 %v11749_v29 }
 0xa0b   :  { %10477 = vmatpush3.bf16.msra.mxu0 %v11439_v25 }
 0xa0c   :  { %10478 = vmatprep.subr.bf16.mxu0 %v11749_v29 }
 0xa0f   :  { %10479 = vmatpush3.bf16.msra.mxu0 %v11441_v26 }
 0xa10   :  { %10496 = vmatprep.subr.bf16.mxu0 %v11749_v29 }
 0xaba   :  { %v2491_v51 = vpop.f32.mrf.mxu1  ;;  %v2532_v53 = vpop.f32.mrf.mxu0 }
 0xabb   :  { %v2497_v0 = vpack.c.bf16 %v2491_v51, %v2491_v51  ;;  %v2538_v61 = vpack.c.bf16 %v2532_v53, %v2532_v53 }
 0xabc   :  { %v10440_v57 = vpop.f32.mrf.mxu1  ;;  %v10452_v17 = vpop.f32.mrf.mxu0 }
 0xabd   :  { %v2545_v1 = vsel %vm562_vm0, %v2497_v0, 0  ;;  %v2647_v14 = vsel %vm562_vm0, %v2538_v61, 0  ;;  %v9493_v61 = vld [vmem:[%s13648_s1 + $0x48] sm:$0x3] }
 0xabe   :  { %v2494_v5 = vpop.f32.mrf.mxu1  ;;  %v2535_v8 = vpop.f32.mrf.mxu0  ;;  %10455 = vmatpush3.bf16.msra.mxu1 %v2545_v1 }
 0xabf   :  { %10466 = vmatprep.subr.bf16.mxu1 %v11749_v29 }
 0xac0   :  { %v10441_v3 = vpop.f32.mrf.mxu1  ;;  %v10453_v11 = vpop.f32.mrf.mxu0 }
 0xac1   :  { %10457 = vmatmul.mubr.msk.bf16.vlgmr.msra.gmra.mxu1 %vm558_vm1, %v9470_v9  ;;  %v9497_v3 = vld [vmem:[%s13648_s1 + $0x50] sm:$0x3] }
 0xac2   :  { %10467 = vmatpush3.bf16.msra.mxu1 %v2647_v14  ;;  %10468 = vmatprep.mubr.msk.bf16.mxu1 %vm11750_vm2, %v11749_v29  ;;  %v2634_v19 = vpop.f32.mrf.mxu0 }
 0xac3   :  { %10484 = vmatprep.subr.bf16.mxu1 %v11749_v29 }
 0xac4   :  { %v10464_v20 = vpop.f32.mrf.mxu0 }
 0xac6   :  { %v2637_v23 = vpop.f32.mrf.mxu0 }
 0xac8   :  { %v10465_v24 = vpop.f32.mrf.mxu0 }
 0xac9   :  { %10469 = vmatmul.mubr.msk.bf16.vlgmr.msra.gmra.mxu1 %vm558_vm1, %v9474_v15 }
 0xaca   :  { %10492 = vmatprep.mubr.msk.bf16.mxu1 %vm11750_vm2, %v11749_v29  ;;  %10485 = vmatpush3.bf16.msra.mxu1 %v11436_v18 }
 0xacb   :  { %10486 = vmatprep.subr.bf16.mxu1 %v11749_v29 }
 0xace   :  { %10487 = vmatpush3.bf16.msra.mxu1 %v11438_v22 }
 0xacf   :  { %10488 = vmatprep.subr.bf16.mxu1 %v11749_v29 }
 0xad2   :  { %10489 = vmatpush3.bf16.msra.mxu1 %v11440_v55 }
 0xad3   :  { %10490 = vmatprep.subr.bf16.mxu1 %v11749_v29 }
 0xad6   :  { %10491 = vmatpush3.bf16.msra.mxu1 %v11442_v56 }
 0xad7   :  { %10504 = vmatprep.subr.bf16.mxu1 %v11749_v29 }
 0xb81   :  { %v2581_v27 = vpop.f32.mrf.mxu1 }
 0xb82   :  { %v2592_v60 = vadd.f32 %v2590_v59, %v2581_v27 }
 0xb83   :  { %v10458_v28 = vpop.f32.mrf.mxu1 }
 0xb84   :  { %v2640_v31 = vadd.f32 %v2634_v19, %v2592_v60  ;;  %v3016_v19 = vpop.permute.xlu0 %3015 }
 0xb85   :  { %v2584_v30 = vpop.f32.mrf.mxu1 }
 0xb86   :  { %v9504_v30 = vld [vmem:[%s13648_s1 + $0x58] sm:$0x3] }
 0xb87   :  { %v10459_v63 = vpop.f32.mrf.mxu1 }
 0xb89   :  { %v2683_v32 = vpop.f32.mrf.mxu1 }
 0xb8a   :  { %v2689_v2 = vadd.f32 %v2683_v32, %v2640_v31 }
 0xb8b   :  { %v10470_v33 = vpop.f32.mrf.mxu1 }
 0xb8c   :  { %v2690_v34 = vmax.f32 %v2689_v2, 0.0 }
 0xb8d   :  { %v2686_v6 = vpop.f32.mrf.mxu1 }
 0xb8e   :  { %v12426_v37 = vpack.c.bf16 %v2690_v34, %v2690_v34 }
 0xb8f   :  { %v10471_v38 = vpop.f32.mrf.mxu1 }
 0xb90   :  { %10481 = vmatmul.mubr.msk.bf16.vlgmr.msra.gmra.mxu0 %vm2189_vm3, %v12426_v37  ;;  %10493 = vmatmul.mubr.msk.bf16.vlgmr.msra.gmra.mxu1 %vm2189_vm3, %v12426_v37  ;;  %v9502_v38 = vld [vmem:[%s13648_s1 + $0x54] sm:$0x3] }
 0xb91   :  { %10497 = vmatpush3.bf16.msra.mxu0 %v11443_v35  ;;  %10505 = vmatpush3.bf16.msra.mxu1 %v12424_v36 }
 0xb92   :  { %10498 = vmatprep.subr.bf16.mxu0 %v11749_v29  ;;  %10506 = vmatprep.subr.bf16.mxu1 %v11749_v29 }
 0xb93   :  { %10500 = vmatprep.mubr.msk.bf16.mxu0 %vm11750_vm2, %v11749_v29  ;;  %10508 = vmatprep.mubr.msk.bf16.mxu1 %vm11750_vm2, %v11749_v29 }
 0xb95   :  { %10499 = vmatpush3.bf16.msra.mxu0 %v11445_v39  ;;  %10507 = vmatpush3.bf16.msra.mxu1 %v11446_v40 }
 0xb96   :  { %10518 = vmatprep.subr.bf16.mxu1 %v11749_v29  ;;  %10512 = vmatprep.subr.bf16.mxu0 %v11749_v29 }
 0xc50   :  { %v2762_v41 = vpop.f32.mrf.mxu0  ;;  %v2835_v42 = vpop.f32.mrf.mxu1 }
 0xc51   :  { %v2841_v43 = vmax.f32 %v2762_v41, %v2835_v42  ;;  %v9506_v42 = vld [vmem:[%s13648_s1 + $0x5c] sm:$0x3] }
 0xc52   :  { %v10482_v45 = vpop.f32.mrf.mxu0  ;;  %v10494_v48 = vpop.f32.mrf.mxu1 }
 0xc53   :  { %v2854_v50 = vpack.c.bf16 %v2841_v43, %v2841_v43 }
 0xc54   :  { %v2765_v52 = vpop.f32.mrf.mxu0  ;;  %v2838_v54 = vpop.f32.mrf.mxu1 }
 0xc55   :  { %10501 = vmatmul.mubr.msk.bf16.vlgmr.msra.gmra.mxu0 %vm2867_vm4, %v2854_v50  ;;  %10509 = vmatmul.mubr.msk.bf16.vlgmr.msra.gmra.mxu1 %vm2867_vm4, %v2854_v50  ;;  %v3024_v58 = vsel %vm562_vm0, %v2854_v50, 0  ;;  %v11447_v52 = vld [vmem:[#allocation6 + $0x308] sm:$0xff]  }
 0xc56   :  { %v10483_v62 = vpop.f32.mrf.mxu0  ;;  %v10495_v7 = vpop.f32.mrf.mxu1  ;;  %10519 = vmatpush3.bf16.msra.mxu1 %v3024_v58  ;;  %10514 = vmatprep.mubr.msk.bf16.mxu0 %vm11750_vm2, %v11749_v29  ;;  %v11448_v54 = vld [vmem:[#allocation6 + $0x388] sm:$0xff]   ;;  %v11449_v58 = vld [vmem:[#allocation6 + $0x300] sm:$0xff]  }
 0xc57   :  { %10520 = vmatprep.mubr.msk.bf16.mxu1 %vm11750_vm2, %v11749_v29  ;;  %10530 = vmatprep.subr.bf16.mxu1 %v11749_v29  ;;  %v11450_v62 = vld [vmem:[#allocation6 + $0x380] sm:$0xff]  }
 0xc5d   :  { %10521 = vmatmul.mubr.msk.bf16.vlgmr.msra.gmra.mxu1 %vm558_vm1, %v9495_v13  ;;  %v3256_v13 = vpop.permute.xlu1 %3255 }
 0xc5e   :  { %10531 = vmatpush3.bf16.msra.mxu1 %v11443_v35  ;;  %10534 = vmatprep.mubr.msk.bf16.mxu1 %vm11750_vm2, %v11749_v29 }
 0xc5f   :  { %10532 = vmatprep.subr.bf16.mxu1 %v11749_v29 }
 0xc62   :  { %10533 = vmatpush3.bf16.msra.mxu1 %v11445_v39 }
 0xc63   :  { %10546 = vmatprep.subr.bf16.mxu1 %v11749_v29 }
 0xd15   :  { %v2905_v16 = vpop.f32.mrf.mxu0  ;;  %v2958_v46 = vpop.f32.mrf.mxu1 }
 0xd16   :  { %v2911_v49 = vpack.c.bf16 %v2905_v16, %v2905_v16  ;;  %v2964_v57 = vpack.c.bf16 %v2958_v46, %v2958_v46 }
 0xd17   :  { %v10502_v51 = vpop.f32.mrf.mxu0  ;;  %v10510_v53 = vpop.f32.mrf.mxu1 }
 0xd18   :  { %v2971_v0 = vsel %vm562_vm0, %v2911_v49, 0  ;;  %v3073_v9 = vsel %vm562_vm0, %v2964_v57, 0 }
 0xd19   :  { %v2908_v17 = vpop.f32.mrf.mxu0  ;;  %v2961_v1 = vpop.f32.mrf.mxu1  ;;  %10513 = vmatpush3.bf16.msra.mxu0 %v2971_v0 }
 0xd1a   :  { %10524 = vmatprep.subr.bf16.mxu0 %v11749_v29 }
 0xd1b   :  { %v10503_v5 = vpop.f32.mrf.mxu0  ;;  %v10511_v8 = vpop.f32.mrf.mxu1 }
 0xd1c   :  { %10515 = vmatmul.mubr.msk.bf16.vlgmr.msra.gmra.mxu0 %vm558_vm1, %v9493_v61 }
 0xd1d   :  { %10525 = vmatpush3.bf16.msra.mxu0 %v3073_v9  ;;  %10526 = vmatprep.mubr.msk.bf16.mxu0 %vm11750_vm2, %v11749_v29  ;;  %v3060_v11 = vpop.f32.mrf.mxu1  ;;  %v11451_v9 = vld [vmem:[#allocation4 + $0x800] ss:$8 sps:$4 sm:$0xff]  }
 0xd1e   :  { %10538 = vmatprep.subr.bf16.mxu0 %v11749_v29 }
 0xd1f   :  { %v10522_v14 = vpop.f32.mrf.mxu1 }
 0xd21   :  { %v3063_v15 = vpop.f32.mrf.mxu1 }
 0xd23   :  { %v10523_v10 = vpop.f32.mrf.mxu1 }
 0xd24   :  { %10527 = vmatmul.mubr.msk.bf16.vlgmr.msra.gmra.mxu0 %vm558_vm1, %v9497_v3  ;;  %v11452_v3 = vld [vmem:[#allocation4 + $0x900] ss:$8 sps:$4 sm:$0xff]  }
 0xd25   :  { %10539 = vmatpush3.bf16.msra.mxu0 %v12424_v36  ;;  %10542 = vmatprep.mubr.msk.bf16.mxu0 %vm11750_vm2, %v11749_v29 }
 0xd26   :  { %10540 = vmatprep.subr.bf16.mxu0 %v11749_v29 }
 0xd29   :  { %10541 = vmatpush3.bf16.msra.mxu0 %v11446_v40 }
 0xd2a   :  { %10552 = vmatprep.subr.bf16.mxu0 %v11749_v29 }
 0xddc   :  { %v3007_v18 = vpop.f32.mrf.mxu0 }
 0xddd   :  { %v3018_v21 = vadd.f32 %v3016_v19, %v3007_v18 }
 0xdde   :  { %v10516_v20 = vpop.f32.mrf.mxu0 }
 0xddf   :  { %v3066_v24 = vadd.f32 %v3060_v11, %v3018_v21 }
 0xde0   :  { %v3010_v22 = vpop.f32.mrf.mxu0 }
 0xde2   :  { %v10517_v23 = vpop.f32.mrf.mxu0 }
 0xde4   :  { %v3109_v25 = vpop.f32.mrf.mxu0 }
 0xde5   :  { %v3115_v55 = vadd.f32 %v3109_v25, %v3066_v24  ;;  %v9521_v25 = vld [vmem:[%s13648_s1 + $0x64] sm:$0xf] }
 0xde6   :  { %v10528_v26 = vpop.f32.mrf.mxu0 }
 0xde7   :  { %v3116_v56 = vmax.f32 %v3115_v55, 0.0 }
 0xde8   :  { %v3112_v27 = vpop.f32.mrf.mxu0 }
 0xde9   :  { %v3119_v59 = vpack.c.bf16 %v3116_v56, %v3116_v56 }
 0xdea   :  { %v10529_v28 = vpop.f32.mrf.mxu0 }
 0xdeb   :  { %10535 = vmatmul.mubr.msk.bf16.vlgmr.msra.gmra.mxu1 %vm2867_vm4, %v3119_v59  ;;  %10543 = vmatmul.mubr.msk.bf16.vlgmr.msra.gmra.mxu0 %vm2867_vm4, %v3119_v59  ;;  %v3264_v60 = vsel %vm562_vm0, %v3119_v59, 0 }
 0xdec   :  { %10553 = vmatpush3.bf16.msra.mxu0 %v3264_v60  ;;  %10548 = vmatprep.mubr.msk.bf16.mxu1 %vm11750_vm2, %v11749_v29 }
 0xded   :  { %10554 = vmatprep.mubr.msk.bf16.mxu0 %vm11750_vm2, %v11749_v29  ;;  %10564 = vmatprep.subr.bf16.mxu0 %v11749_v29 }
 0xdf3   :  { %10555 = vmatmul.mubr.msk.bf16.vlgmr.msra.gmra.mxu0 %vm558_vm1, %v9504_v30 }
 0xdf4   :  { %10568 = vmatprep.mubr.msk.bf16.mxu0 %vm11750_vm2, %v11749_v29  ;;  %10565 = vmatpush3.bf16.msra.mxu0 %v11447_v52 }
 0xdf5   :  { %10566 = vmatprep.subr.bf16.mxu0 %v11749_v29 }
 0xdf8   :  { %10567 = vmatpush3.bf16.msra.mxu0 %v11449_v58 }
 0xdf9   :  { %10580 = vmatprep.subr.bf16.mxu0 %v11749_v29 }
 0xeab   :  { %v3157_v63 = vpop.f32.mrf.mxu1  ;;  %v3198_v31 = vpop.f32.mrf.mxu0 }
 0xeac   :  { %v3163_v32 = vpack.c.bf16 %v3157_v63, %v3157_v63  ;;  %v3204_v6 = vpack.c.bf16 %v3198_v31, %v3198_v31  ;;  %v9519_v31 = vld [vmem:[%s13648_s1 + $0x60] sm:$0xf] }
 0xead   :  { %v10536_v2 = vpop.f32.mrf.mxu1  ;;  %v10544_v33 = vpop.f32.mrf.mxu0 }
 0xeae   :  { %v3211_v34 = vsel %vm562_vm0, %v3163_v32, 0  ;;  %v3313_v41 = vsel %vm562_vm0, %v3204_v6, 0 }
 0xeaf   :  { %v3160_v35 = vpop.f32.mrf.mxu1  ;;  %v3201_v36 = vpop.f32.mrf.mxu0  ;;  %10547 = vmatpush3.bf16.msra.mxu1 %v3211_v34  ;;  %v9523_v34 = vld [vmem:[%s13648_s1 + $0x68] sm:$0xf] }
 0xeb0   :  { %10558 = vmatprep.subr.bf16.mxu1 %v11749_v29 }
 0xeb1   :  { %v10537_v39 = vpop.f32.mrf.mxu1  ;;  %v10545_v40 = vpop.f32.mrf.mxu0 }
 0xeb2   :  { %10549 = vmatmul.mubr.msk.bf16.vlgmr.msra.gmra.mxu1 %vm558_vm1, %v9502_v38  ;;  %v3634_v40 = vpop.permute.xlu0 %3633 }
 0xeb3   :  { %10559 = vmatpush3.bf16.msra.mxu1 %v3313_v41  ;;  %10560 = vmatprep.mubr.msk.bf16.mxu1 %vm11750_vm2, %v11749_v29  ;;  %v3300_v43 = vpop.f32.mrf.mxu0 }
 0xeb4   :  { %10572 = vmatprep.subr.bf16.mxu1 %v11749_v29 }
 0xeb5   :  { %v10556_v45 = vpop.f32.mrf.mxu0 }
 0xeb7   :  { %v3303_v48 = vpop.f32.mrf.mxu0 }
 0xeb9   :  { %v10557_v50 = vpop.f32.mrf.mxu0 }
 0xeba   :  { %10561 = vmatmul.mubr.msk.bf16.vlgmr.msra.gmra.mxu1 %vm558_vm1, %v9506_v42 }
 0xebb   :  { %10576 = vmatprep.mubr.msk.bf16.mxu1 %vm11750_vm2, %v11749_v29  ;;  %10573 = vmatpush3.bf16.msra.mxu1 %v11448_v54 }
 0xebc   :  { %10574 = vmatprep.subr.bf16.mxu1 %v11749_v29 }
 0xebf   :  { %10575 = vmatpush3.bf16.msra.mxu1 %v11450_v62 }
 0xec0   :  { %10586 = vmatprep.subr.bf16.mxu1 %v11749_v29 }
 0xf72   :  { %v3247_v7 = vpop.f32.mrf.mxu1 }
 0xf73   :  { %v3258_v46 = vadd.f32 %v3256_v13, %v3247_v7 }
 0xf74   :  { %v10550_v16 = vpop.f32.mrf.mxu1 }
 0xf75   :  { %v3306_v53 = vadd.f32 %v3300_v43, %v3258_v46  ;;  %v9530_v46 = vld [vmem:[%s13648_s1 + $0x70] sm:$0xf] }
 0xf76   :  { %v3250_v49 = vpop.f32.mrf.mxu1 }
 0xf78   :  { %v10551_v51 = vpop.f32.mrf.mxu1 }
 0xf7a   :  { %v3349_v0 = vpop.f32.mrf.mxu1 }
 0xf7b   :  { %v3355_v57 = vadd.f32 %v3349_v0, %v3306_v53 }
 0xf7c   :  { %v10562_v17 = vpop.f32.mrf.mxu1 }
 0xf7d   :  { %v3356_v1 = vmax.f32 %v3355_v57, 0.0 }
 0xf7e   :  { %v3352_v61 = vpop.f32.mrf.mxu1 }
 0xf7f   :  { %v12510_v5 = vpack.c.bf16 %v3356_v1, %v3356_v1 }
 0xf80   :  { %v10563_v8 = vpop.f32.mrf.mxu1 }
 0xf81   :  { %10569 = vmatmul.mubr.msk.bf16.vlgmr.msra.gmra.mxu0 %vm2867_vm4, %v12510_v5  ;;  %10577 = vmatmul.mubr.msk.bf16.vlgmr.msra.gmra.mxu1 %vm2867_vm4, %v12510_v5 }
 0xf82   :  { %10582 = vmatprep.mubr.msk.bf16.mxu0 %vm11750_vm2, %v11749_v29  ;;  %10588 = vmatprep.mubr.msk.bf16.mxu1 %vm11750_vm2, %v11749_v29 }
 0xf83   :  { %10581 = vmatpush3.bf16.msra.mxu0 %v11451_v9  ;;  %10587 = vmatpush3.bf16.msra.mxu1 %v11452_v3 }
 0xf84   :  { %10598 = vmatprep.subr.bf16.mxu1 %v11749_v29  ;;  %10592 = vmatprep.subr.bf16.mxu0 %v11749_v29 }
0x1041   :  { %v3412_v11 = vpop.f32.mrf.mxu0  ;;  %v3469_v14 = vpop.f32.mrf.mxu1 }
0x1042   :  { %v3475_v15 = vmax.f32 %v3412_v11, %v3469_v14 }
0x1043   :  { %v10570_v10 = vpop.f32.mrf.mxu0  ;;  %v10578_v18 = vpop.f32.mrf.mxu1 }
0x1044   :  { %v3484_v19 = vpack.c.bf16 %v3475_v15, %v3475_v15  ;;  %v9532_v15 = vld [vmem:[%s13648_s1 + $0x74] sm:$0xf] }
0x1045   :  { %v3415_v20 = vpop.f32.mrf.mxu0  ;;  %v3472_v21 = vpop.f32.mrf.mxu1 }
0x1046   :  { %10583 = vmatmul.mubr.msk.bf16.vlgmr.msra.gmra.mxu0 %vm3491_vm5, %v3484_v19  ;;  %10589 = vmatmul.mubr.msk.bf16.vlgmr.msra.gmra.mxu1 %vm3491_vm5, %v3484_v19  ;;  %v3642_v22 = vsel %vm562_vm0, %v3484_v19, 0  ;;  %v11453_v21 = vld [vmem:[#allocation6 + $0x400] sm:$0xff]  }
0x1047   :  { %v10571_v23 = vpop.f32.mrf.mxu0  ;;  %v10579_v24 = vpop.f32.mrf.mxu1  ;;  %10599 = vmatpush3.bf16.msra.mxu1 %v3642_v22  ;;  %10594 = vmatprep.mubr.msk.bf16.mxu0 %vm11750_vm2, %v11749_v29  ;;  %v11454_v22 = vld [vmem:[#allocation6 + $0x480] sm:$0xff]  }
0x1048   :  { %10600 = vmatprep.mubr.msk.bf16.mxu1 %vm11750_vm2, %v11749_v29  ;;  %10610 = vmatprep.subr.bf16.mxu1 %v11749_v29  ;;  %v3876_v24 = vpop.permute.xlu1 %3875 }
0x104e   :  { %10601 = vmatmul.mubr.msk.bf16.vlgmr.msra.gmra.mxu1 %vm558_vm1, %v9521_v25 }
0x104f   :  { %10611 = vmatpush3.bf16.msra.mxu1 %v11451_v9  ;;  %10612 = vmatprep.mubr.msk.bf16.mxu1 %vm11750_vm2, %v11749_v29  ;;  %v9528_v9 = vld [vmem:[%s13648_s1 + $0x6c] sm:$0xf] }
0x1050   :  { %10622 = vmatprep.subr.bf16.mxu1 %v11749_v29 }
0x1106   :  { %v3529_v55 = vpop.f32.mrf.mxu0  ;;  %v3576_v26 = vpop.f32.mrf.mxu1 }
0x1107   :  { %v3535_v56 = vpack.c.bf16 %v3529_v55, %v3529_v55  ;;  %v3582_v60 = vpack.c.bf16 %v3576_v26, %v3576_v26 }
0x1108   :  { %v10584_v27 = vpop.f32.mrf.mxu0  ;;  %v10590_v59 = vpop.f32.mrf.mxu1 }
0x1109   :  { %v3589_v28 = vsel %vm562_vm0, %v3535_v56, 0  ;;  %v3691_v33 = vsel %vm562_vm0, %v3582_v60, 0 }
0x110a   :  { %v3532_v30 = vpop.f32.mrf.mxu0  ;;  %v3579_v63 = vpop.f32.mrf.mxu1  ;;  %10593 = vmatpush3.bf16.msra.mxu0 %v3589_v28 }
0x110b   :  { %10604 = vmatprep.subr.bf16.mxu0 %v11749_v29 }
0x110c   :  { %v10585_v32 = vpop.f32.mrf.mxu0  ;;  %v10591_v2 = vpop.f32.mrf.mxu1 }
0x110d   :  { %10595 = vmatmul.mubr.msk.bf16.vlgmr.msra.gmra.mxu0 %vm558_vm1, %v9519_v31  ;;  %v4081_v2 = vld [vmem:[#allocation4 + $0xa00] sm:$0xf] }
0x110e   :  { %10605 = vmatpush3.bf16.msra.mxu0 %v3691_v33  ;;  %10606 = vmatprep.mubr.msk.bf16.mxu0 %vm11750_vm2, %v11749_v29  ;;  %v3678_v6 = vpop.f32.mrf.mxu1  ;;  %v4083_v33 = vld [vmem:[#allocation4 + $0xb00] sm:$0xf] }
0x110f   :  { %10616 = vmatprep.subr.bf16.mxu0 %v11749_v29 }
0x1110   :  { %v10602_v35 = vpop.f32.mrf.mxu1 }
0x1112   :  { %v3681_v36 = vpop.f32.mrf.mxu1 }
0x1114   :  { %v10603_v38 = vpop.f32.mrf.mxu1 }
0x1115   :  { %10607 = vmatmul.mubr.msk.bf16.vlgmr.msra.gmra.mxu0 %vm558_vm1, %v9523_v34  ;;  %v4091_v34 = vsel %vm3829_vm6, %v4081_v2, 0 }
0x1116   :  { %10617 = vmatpush3.bf16.msra.mxu0 %v11452_v3  ;;  %10618 = vmatprep.mubr.msk.bf16.mxu0 %vm11750_vm2, %v11749_v29 }
0x1117   :  { %10628 = vmatprep.subr.bf16.mxu0 %v11749_v29 }
0x11cd   :  { %v3625_v39 = vpop.f32.mrf.mxu0 }
0x11ce   :  { %v3636_v42 = vadd.f32 %v3634_v40, %v3625_v39 }
0x11cf   :  { %v10596_v41 = vpop.f32.mrf.mxu0 }
0x11d0   :  { %v3684_v48 = vadd.f32 %v3678_v6, %v3636_v42  ;;  %v4135_v6 = vsel %vm3829_vm6, %v4083_v33, 0 }
0x11d1   :  { %v3628_v43 = vpop.f32.mrf.mxu0 }
0x11d3   :  { %v10597_v45 = vpop.f32.mrf.mxu0 }
0x11d5   :  { %v3727_v50 = vpop.f32.mrf.mxu0 }
0x11d6   :  { %v3733_v52 = vadd.f32 %v3727_v50, %v3684_v48 }
0x11d7   :  { %v10608_v54 = vpop.f32.mrf.mxu0 }
0x11d8   :  { %v3734_v58 = vmax.f32 %v3733_v52, 0.0  ;;  %v9543_v52 = vld [vmem:[%s13648_s1 + $0x7c] sm:$0xf] }
0x11d9   :  { %v3730_v62 = vpop.f32.mrf.mxu0 }
0x11da   :  { %v3737_v7 = vpack.c.bf16 %v3734_v58, %v3734_v58 }
0x11db   :  { %v10609_v13 = vpop.f32.mrf.mxu0 }
0x11dc   :  { %10613 = vmatmul.mubr.msk.bf16.vlgmr.msra.gmra.mxu1 %vm3491_vm5, %v3737_v7  ;;  %10619 = vmatmul.mubr.msk.bf16.vlgmr.msra.gmra.mxu0 %vm3491_vm5, %v3737_v7  ;;  %v3884_v16 = vsel %vm3829_vm6, %v3737_v7, 0 }
0x11dd   :  { %10629 = vmatpush3.bf16.msra.mxu0 %v3884_v16  ;;  %10624 = vmatprep.mubr.msk.bf16.mxu1 %vm11750_vm2, %v11749_v29 }
0x11de   :  { %10630 = vmatprep.mubr.msk.bf16.mxu0 %vm11750_vm2, %v11749_v29  ;;  %10640 = vmatprep.subr.bf16.mxu0 %v11749_v29 }
0x11e4   :  { %10631 = vmatmul.mubr.msk.bf16.vlgmr.msra.gmra.mxu0 %vm3825_vm7, %v9530_v46 }
0x11e5   :  { %10642 = vmatprep.mubr.msk.bf16.mxu0 %vm11750_vm2, %v11749_v29  ;;  %10641 = vmatpush3.bf16.msra.mxu0 %v11453_v21 }
0x11e6   :  { %10652 = vmatprep.subr.bf16.mxu0 %v11749_v29 }
0x129c   :  { %v3775_v49 = vpop.f32.mrf.mxu1  ;;  %v3816_v51 = vpop.f32.mrf.mxu0 }
0x129d   :  { %v3781_v53 = vpack.c.bf16 %v3775_v49, %v3775_v49  ;;  %v3822_v1 = vpack.c.bf16 %v3816_v51, %v3816_v51 }
0x129e   :  { %v10614_v0 = vpop.f32.mrf.mxu1  ;;  %v10620_v57 = vpop.f32.mrf.mxu0 }
0x129f   :  { %v3831_v17 = vsel %vm3829_vm6, %v3781_v53, 0  ;;  %v3933_v14 = vsel %vm3829_vm6, %v3822_v1, 0  ;;  %v9541_v53 = vld [vmem:[%s13648_s1 + $0x78] sm:$0xf]  ;;  %v9545_v1 = vld [vmem:[%s13648_s1 + $0x80] sm:$0xf] }
0x12a0   :  { %v3778_v61 = vpop.f32.mrf.mxu1  ;;  %v3819_v8 = vpop.f32.mrf.mxu0  ;;  %10623 = vmatpush3.bf16.msra.mxu1 %v3831_v17 }
0x12a1   :  { %10634 = vmatprep.subr.bf16.mxu1 %v11749_v29 }
0x12a2   :  { %v10615_v3 = vpop.f32.mrf.mxu1  ;;  %v10621_v11 = vpop.f32.mrf.mxu0 }
0x12a3   :  { %10625 = vmatmul.mubr.msk.bf16.vlgmr.msra.gmra.mxu1 %vm3825_vm7, %v9528_v9 }
0x12a4   :  { %10635 = vmatpush3.bf16.msra.mxu1 %v3933_v14  ;;  %10636 = vmatprep.mubr.msk.bf16.mxu1 %vm11750_vm2, %v11749_v29  ;;  %v3920_v10 = vpop.f32.mrf.mxu0  ;;  %v4229_v14 = vpop.permute.xlu0 %4228 }
0x12a5   :  { %10646 = vmatprep.subr.bf16.mxu1 %v11749_v29 }
0x12a6   :  { %v10632_v18 = vpop.f32.mrf.mxu0 }
0x12a8   :  { %v3923_v19 = vpop.f32.mrf.mxu0 }
0x12aa   :  { %v10633_v20 = vpop.f32.mrf.mxu0 }
0x12ab   :  { %10637 = vmatmul.mubr.msk.bf16.vlgmr.msra.gmra.mxu1 %vm3825_vm7, %v9532_v15 }
0x12ac   :  { %10648 = vmatprep.mubr.msk.bf16.mxu1 %vm11750_vm2, %v11749_v29  ;;  %10647 = vmatpush3.bf16.msra.mxu1 %v11454_v22 }
0x12ad   :  { %10658 = vmatprep.subr.bf16.mxu1 %v11749_v29 }
0x1363   :  { %v3867_v23 = vpop.f32.mrf.mxu1 }
0x1364   :  { %v3878_v55 = vadd.f32 %v3876_v24, %v3867_v23 }
0x1365   :  { %v10626_v25 = vpop.f32.mrf.mxu1 }
0x1366   :  { %v3926_v27 = vadd.f32 %v3920_v10, %v3878_v55 }
0x1367   :  { %v3870_v26 = vpop.f32.mrf.mxu1 }
0x1369   :  { %v10627_v56 = vpop.f32.mrf.mxu1 }
0x136b   :  { %v3969_v59 = vpop.f32.mrf.mxu1 }
0x136c   :  { %v3975_v28 = vadd.f32 %v3969_v59, %v3926_v27  ;;  %v9552_v27 = vld [vmem:[%s13648_s1 + $0x88] sm:$0xf] }
0x136d   :  { %v10638_v60 = vpop.f32.mrf.mxu1 }
0x136e   :  { %v3976_v30 = vmax.f32 %v3975_v28, 0.0 }
0x136f   :  { %v3972_v63 = vpop.f32.mrf.mxu1 }
0x1370   :  { %v12586_v31 = vpack.c.bf16 %v3976_v30, %v3976_v30 }
0x1371   :  { %v10639_v32 = vpop.f32.mrf.mxu1 }
0x1372   :  { %10643 = vmatmul.mubr.msk.bf16.vlgmr.msra.gmra.mxu0 %vm3491_vm5, %v12586_v31  ;;  %10649 = vmatmul.mubr.msk.bf16.vlgmr.msra.gmra.mxu1 %vm3491_vm5, %v12586_v31 }
0x1373   :  { %10654 = vmatprep.mubr.msk.bf16.mxu0 %vm11750_vm2, %v11749_v29  ;;  %10660 = vmatprep.mubr.msk.bf16.mxu1 %vm11750_vm2, %v11749_v29 }
0x1374   :  { %10653 = vmatpush3.bf16.msra.mxu0 %v4091_v34  ;;  %10659 = vmatpush3.bf16.msra.mxu1 %v4135_v6 }
0x1375   :  { %10670 = vmatprep.subr.bf16.mxu1 %v11749_v29  ;;  %10664 = vmatprep.subr.bf16.mxu0 %v11749_v29 }
0x1432   :  { %v4024_v35 = vpop.f32.mrf.mxu0  ;;  %v4073_v36 = vpop.f32.mrf.mxu1 }
0x1433   :  { %v4079_v38 = vmax.f32 %v4024_v35, %v4073_v36 }
0x1434   :  { %v10644_v39 = vpop.f32.mrf.mxu0  ;;  %v10650_v40 = vpop.f32.mrf.mxu1 }
0x1435   :  { %v4086_v41 = vpack.c.bf16 %v4079_v38, %v4079_v38  ;;  %v9554_v39 = vld [vmem:[%s13648_s1 + $0x8c] sm:$0xf]  ;;  %v12659_v40 = vld [vmem:[#allocation4 + $0x800] ss:$8 sps:$4 sm:$0xff]  }
0x1436   :  { %v4027_v42 = vpop.f32.mrf.mxu0  ;;  %v4076_v43 = vpop.f32.mrf.mxu1 }
0x1437   :  { %10655 = vmatmul.mubr.msk.bf16.vlgmr.msra.gmra.mxu0 %vm3825_vm7, %v4086_v41  ;;  %10661 = vmatmul.mubr.msk.bf16.vlgmr.msra.gmra.mxu1 %vm3825_vm7, %v4086_v41  ;;  %v4237_v45 = vsel %vm3829_vm6, %v4086_v41, 0 }
0x1438   :  { %v10645_v48 = vpop.f32.mrf.mxu0  ;;  %v10651_v50 = vpop.f32.mrf.mxu1  ;;  %10671 = vmatpush3.bf16.msra.mxu1 %v4237_v45  ;;  %10666 = vmatprep.mubr.msk.bf16.mxu0 %vm11750_vm2, %v11749_v29 }
0x1439   :  { %10672 = vmatprep.mubr.msk.bf16.mxu1 %vm11750_vm2, %v11749_v29  ;;  %10682 = vmatprep.subr.bf16.mxu1 %v11749_v29  ;;  %v4572_v48 = vld [vmem:[#allocation7] sm:$0xf] }
0x143a   :  { %v4577_v50 = vsel %vm3829_vm6, %v4572_v48, 0  ;;  %v4960_v48 = vpop.permute.xlu0 %4959 }
0x143f   :  { %10673 = vmatmul.mubr.msk.bf16.vlgmr.msra.gmra.mxu1 %vm3825_vm7, %v9543_v52 }
0x1440   :  { %10683 = vmatpush3.bf16.msra.mxu1 %v4091_v34  ;;  %10684 = vmatprep.mubr.msk.bf16.mxu1 %vm11750_vm2, %v11749_v29 }
0x1441   :  { %10694 = vmatprep.subr.bf16.mxu1 %v11749_v29 }
0x14f7   :  { %v4127_v54 = vpop.f32.mrf.mxu0  ;;  %v4171_v58 = vpop.f32.mrf.mxu1 }
0x14f8   :  { %v4133_v62 = vpack.c.bf16 %v4127_v54, %v4127_v54  ;;  %v4177_v46 = vpack.c.bf16 %v4171_v58, %v4171_v58  ;;  %v4469_v54 = vpop.permute.xlu1 %4468 }
0x14f9   :  { %v10656_v7 = vpop.f32.mrf.mxu0  ;;  %v10662_v13 = vpop.f32.mrf.mxu1 }
0x14fa   :  { %v4184_v16 = vsel %vm3829_vm6, %v4133_v62, 0  ;;  %v4286_v17 = vsel %vm3829_vm6, %v4177_v46, 0 }
0x14fb   :  { %v4130_v49 = vpop.f32.mrf.mxu0  ;;  %v4174_v51 = vpop.f32.mrf.mxu1  ;;  %10665 = vmatpush3.bf16.msra.mxu0 %v4184_v16 }
0x14fc   :  { %10676 = vmatprep.subr.bf16.mxu0 %v11749_v29 }
0x14fd   :  { %v10657_v0 = vpop.f32.mrf.mxu0  ;;  %v10663_v57 = vpop.f32.mrf.mxu1 }
0x14fe   :  { %10667 = vmatmul.mubr.msk.bf16.vlgmr.msra.gmra.mxu0 %vm3825_vm7, %v9541_v53  ;;  %v12672_v57 = vld [vmem:[#allocation4 + $0x900] ss:$8 sps:$4 sm:$0xff]  }
0x14ff   :  { %10677 = vmatpush3.bf16.msra.mxu0 %v4286_v17  ;;  %10678 = vmatprep.mubr.msk.bf16.mxu0 %vm11750_vm2, %v11749_v29  ;;  %v4273_v61 = vpop.f32.mrf.mxu1 }
0x1500   :  { %10688 = vmatprep.subr.bf16.mxu0 %v11749_v29 }
0x1501   :  { %v10674_v8 = vpop.f32.mrf.mxu1 }
0x1503   :  { %v4276_v9 = vpop.f32.mrf.mxu1 }
0x1505   :  { %v10675_v3 = vpop.f32.mrf.mxu1 }
0x1506   :  { %10679 = vmatmul.mubr.msk.bf16.vlgmr.msra.gmra.mxu0 %vm3825_vm7, %v9545_v1 }
0x1507   :  { %10689 = vmatpush3.bf16.msra.mxu0 %v4135_v6  ;;  %10690 = vmatprep.mubr.msk.bf16.mxu0 %vm11750_vm2, %v11749_v29  ;;  %v9550_v6 = vld [vmem:[%s13648_s1 + $0x84] sm:$0xf] }
0x1508   :  { %10700 = vmatprep.subr.bf16.mxu0 %v11749_v29 }
0x15be   :  { %v4220_v11 = vpop.f32.mrf.mxu0 }
0x15bf   :  { %v4231_v10 = vadd.f32 %v4229_v14, %v4220_v11 }
0x15c0   :  { %v10668_v15 = vpop.f32.mrf.mxu0 }
0x15c1   :  { %v4279_v20 = vadd.f32 %v4273_v61, %v4231_v10  ;;  %v11637_v15 = vld [vmem:[%s13648_s1 + $0x90] sm:$0xf]  ;;  %v4778_v10 = vsel %vm3829_vm6, %v12586_v31, 0 }
0x15c2   :  { %v4223_v18 = vpop.f32.mrf.mxu0 }
0x15c3   :  { %v11638_v18 = vld [vmem:[%s13648_s1 + $0x94] sm:$0xf] }
0x15c4   :  { %v10669_v19 = vpop.f32.mrf.mxu0 }
0x15c6   :  { %v4322_v21 = vpop.f32.mrf.mxu0 }
0x15c7   :  { %v4328_v22 = vadd.f32 %v4322_v21, %v4279_v20 }
0x15c8   :  { %v10680_v23 = vpop.f32.mrf.mxu0 }
0x15c9   :  { %v4329_v24 = vmax.f32 %v4328_v22, 0.0  ;;  %v5012_v23 = vpop.permute.xlu1 %5011 }
0x15ca   :  { %v4325_v25 = vpop.f32.mrf.mxu0 }
0x15cb   :  { %v4332_v55 = vpack.c.bf16 %v4329_v24, %v4329_v24 }
0x15cc   :  { %v10681_v26 = vpop.f32.mrf.mxu0 }
0x15cd   :  { %10685 = vmatmul.mubr.msk.bf16.vlgmr.msra.gmra.mxu1 %vm3825_vm7, %v4332_v55  ;;  %10691 = vmatmul.mubr.msk.bf16.vlgmr.msra.gmra.mxu0 %vm3825_vm7, %v4332_v55  ;;  %v4477_v56 = vsel %vm3829_vm6, %v4332_v55, 0 }
0x15ce   :  { %10701 = vmatpush3.bf16.msra.mxu0 %v4477_v56  ;;  %10696 = vmatprep.mubr.msk.bf16.mxu1 %vm11750_vm2, %v11749_v29 }
0x15cf   :  { %10702 = vmatprep.mubr.msk.bf16.mxu0 %vm11750_vm2, %v11749_v29  ;;  %10712 = vmatprep.subr.bf16.mxu0 %v11749_v29 }
0x15d5   :  { %10703 = vmatmul.mubr.msk.bf16.vlgmr.msra.gmra.mxu0 %vm3825_vm7, %v9552_v27 }
0x15d6   :  { %10714 = vmatprep.mubr.msk.bf16.mxu0 %vm11750_vm2, %v11749_v29  ;;  %10713 = vmatpush3.bf16.msra.mxu0 %v4577_v50 }
0x15d7   :  { %10724 = vmatprep.subr.bf16.mxu0 %v11749_v29 }
0x168d   :  { %v4370_v59 = vpop.f32.mrf.mxu1  ;;  %v4411_v28 = vpop.f32.mrf.mxu0 }
0x168e   :  { %v4376_v60 = vpack.c.bf16 %v4370_v59, %v4370_v59  ;;  %v4417_v2 = vpack.c.bf16 %v4411_v28, %v4411_v28 }
0x168f   :  { %v10686_v30 = vpop.f32.mrf.mxu1  ;;  %v10692_v63 = vpop.f32.mrf.mxu0 }
0x1690   :  { %v4424_v32 = vsel %vm3829_vm6, %v4376_v60, 0  ;;  %v4526_v38 = vsel %vm3829_vm6, %v4417_v2, 0  ;;  %v4770_v60 = vpop.permute.xlu1 %4769  ;;  %v11639_v2 = vld [vmem:[%s13648_s1 + $0x98] sm:$0xf] }
0x1691   :  { %v4373_v33 = vpop.f32.mrf.mxu1  ;;  %v4414_v34 = vpop.f32.mrf.mxu0  ;;  %10695 = vmatpush3.bf16.msra.mxu1 %v4424_v32 }
0x1692   :  { %10706 = vmatprep.subr.bf16.mxu1 %v11749_v29 }
0x1693   :  { %v10687_v35 = vpop.f32.mrf.mxu1  ;;  %v10693_v36 = vpop.f32.mrf.mxu0 }
0x1694   :  { %10697 = vmatmul.mubr.msk.bf16.vlgmr.msra.gmra.mxu1 %vm3825_vm7, %v9550_v6 }
0x1695   :  { %10707 = vmatpush3.bf16.msra.mxu1 %v4526_v38  ;;  %10708 = vmatprep.mubr.msk.bf16.mxu1 %vm11750_vm2, %v11749_v29  ;;  %v4513_v41 = vpop.f32.mrf.mxu0 }
0x1696   :  { %10718 = vmatprep.subr.bf16.mxu1 %v11749_v29 }
0x1697   :  { %v10704_v42 = vpop.f32.mrf.mxu0 }
0x1699   :  { %v4516_v43 = vpop.f32.mrf.mxu0 }
0x169b   :  { %v10705_v45 = vpop.f32.mrf.mxu0 }
0x169c   :  { %10709 = vmatmul.mubr.msk.bf16.vlgmr.msra.gmra.mxu1 %vm3825_vm7, %v9554_v39 }
0x169d   :  { %10719 = vmatpush3.bf16.msra.mxu1 %v12659_v40  ;;  %10720 = vmatprep.mubr.msk.bf16.mxu1 %vm11750_vm2, %v11749_v29 }
0x169e   :  { %10730 = vmatprep.subr.bf16.mxu1 %v11749_v29 }
0x16a4   :  { %10721 = vmatmul.mubr.msk.bf16.vlgmr.msra.gmra.mxu1 %vm3491_vm5, %v12586_v31 }
0x16a5   :  { %10732 = vmatprep.mubr.msk.bf16.mxu1 %vm11750_vm2, %v11749_v29 }
0x1754   :  { %v4460_v52 = vpop.f32.mrf.mxu1 }
0x1755   :  { %v4471_v62 = vadd.f32 %v4469_v54, %v4460_v52 }
0x1756   :  { %v10698_v58 = vpop.f32.mrf.mxu1 }
0x1757   :  { %v4519_v16 = vadd.f32 %v4513_v41, %v4471_v62 }
0x1758   :  { %v4463_v7 = vpop.f32.mrf.mxu1 }
0x175a   :  { %v10699_v13 = vpop.f32.mrf.mxu1 }
0x175c   :  { %v4562_v46 = vpop.f32.mrf.mxu1 }
0x175d   :  { %v4568_v49 = vadd.f32 %v4562_v46, %v4519_v16 }
0x175e   :  { %v10710_v51 = vpop.f32.mrf.mxu1 }
0x175f   :  { %v4569_v53 = vmax.f32 %v4568_v49, 0.0  ;;  %v5063_v51 = vpop.permute.xlu0 %5062 }
0x1760   :  { %v4565_v0 = vpop.f32.mrf.mxu1 }
0x1761   :  { %4570 = vst.msk [vmem:[%s13654_s7] sm:$0xff] %vm3825_vm7, %v4569_v53  ;;  %v4571_v17 = vpack.c.bf16 %v4569_v53, %v4569_v53 }
0x1762   :  { %v10711_v1 = vpop.f32.mrf.mxu1 }
0x1763   :  { %10715 = vmatmul.mubr.msk.bf16.vlgmr.msra.gmra.mxu0 %vm3825_vm7, %v4571_v17 }
0x1764   :  { %v4665_v61 = vpop.f32.mrf.mxu1  ;;  %10725 = vmatpush3.bf16.msra.mxu0 %v12672_v57  ;;  %10726 = vmatprep.mubr.msk.bf16.mxu0 %vm11750_vm2, %v11749_v29 }
0x1765   :  { %v4671_v8 = vpack.c.bf16 %v4665_v61, %v4665_v61  ;;  %10736 = vmatprep.subr.bf16.mxu0 %v11749_v29 }
0x1766   :  { %v10722_v9 = vpop.f32.mrf.mxu1 }
0x1767   :  { %v4725_v3 = vsel %vm3829_vm6, %v4671_v8, 0 }
0x1768   :  { %v4668_v11 = vpop.f32.mrf.mxu1  ;;  %10731 = vmatpush3.bf16.msra.mxu1 %v4725_v3 }
0x1769   :  { %10742 = vmatprep.subr.bf16.mxu1 %v11749_v29 }
0x176a   :  { %v10723_v14 = vpop.f32.mrf.mxu1 }
0x176b   :  { %10727 = vmatmul.mubr.msk.bf16.vlgmr.msra.gmra.mxu0 %vm3491_vm5, %v12586_v31  ;;  %10733 = vmatmul.mubr.msk.bf16.vlgmr.msra.gmra.mxu1 %vm3825_vm7, %v11637_v15 }
0x176c   :  { %10737 = vmatpush3.bf16.msra.mxu0 %v4778_v10  ;;  %10738 = vmatprep.mubr.msk.bf16.mxu0 %vm11750_vm2, %v11749_v29 }
0x176d   :  { %10748 = vmatprep.subr.bf16.mxu0 %v11749_v29  ;;  %10744 = vmatprep.mubr.msk.bf16.mxu1 %vm11750_vm2, %v11749_v29 }
0x1773   :  { %10739 = vmatmul.mubr.msk.bf16.vlgmr.msra.gmra.mxu0 %vm3825_vm7, %v11638_v18 }
0x1774   :  { %10749 = vmatpush3.bf16.msra.mxu0 %v12659_v40  ;;  %10750 = vmatprep.mubr.msk.bf16.mxu0 %vm11750_vm2, %v11749_v29 }
0x1775   :  { %10760 = vmatprep.subr.bf16.mxu0 %v11749_v29 }
0x1823   :  { %v4613_v31 = vpop.f32.mrf.mxu0 }
0x1824   :  { %v4870_v19 = vpack.c.bf16 %v4613_v31, %v4613_v31 }
0x1825   :  { %v10716_v20 = vpop.f32.mrf.mxu0 }
0x1826   :  { %10751 = vmatmul.mubr.msk.bf16.vlgmr.msra.gmra.mxu0 %vm3491_vm5, %v4870_v19  ;;  %v5016_v38 = vsel %vm3829_vm6, %v4870_v19, 0 }
0x1827   :  { %v4616_v21 = vpop.f32.mrf.mxu0  ;;  %10762 = vmatprep.mubr.msk.bf16.mxu0 %vm11750_vm2, %v11749_v29 }
0x1829   :  { %v10717_v22 = vpop.f32.mrf.mxu0 }
0x182b   :  { %v4712_v24 = vpop.f32.mrf.mxu0  ;;  %v4761_v25 = vpop.f32.mrf.mxu1 }
0x182c   :  { %v4718_v55 = vpack.c.bf16 %v4712_v24, %v4712_v24  ;;  %v4772_v32 = vadd.f32 %v4770_v60, %v4761_v25 }
0x182d   :  { %v10728_v26 = vpop.f32.mrf.mxu0  ;;  %v10734_v56 = vpop.f32.mrf.mxu1 }
0x182e   :  { %v4827_v27 = vsel %vm3829_vm6, %v4718_v55, 0 }
0x182f   :  { %v4715_v59 = vpop.f32.mrf.mxu0  ;;  %10743 = vmatpush3.bf16.msra.mxu1 %v4827_v27  ;;  %v4764_v28 = vpop.f32.mrf.mxu1 }
0x1830   :  { %10754 = vmatprep.subr.bf16.mxu1 %v11749_v29 }
0x1831   :  { %v10729_v30 = vpop.f32.mrf.mxu0  ;;  %v10735_v63 = vpop.f32.mrf.mxu1 }
0x1832   :  { %10745 = vmatmul.mubr.msk.bf16.vlgmr.msra.gmra.mxu1 %vm3825_vm7, %v11639_v2  ;;  %v9579_v30 = vld [vmem:[%s13648_s1 + $0x9c] sm:$0xf] }
0x1833   :  { %v4814_v33 = vpop.f32.mrf.mxu0  ;;  %10755 = vmatpush3.bf16.msra.mxu1 %v12672_v57  ;;  %10756 = vmatprep.mubr.msk.bf16.mxu1 %vm11750_vm2, %v11749_v29 }
0x1834   :  { %v4820_v34 = vadd.f32 %v4814_v33, %v4772_v32  ;;  %10766 = vmatprep.subr.bf16.mxu1 %v11749_v29  ;;  %v9583_v33 = vld [vmem:[%s13648_s1 + $0xa4] sm:$0xf] }
0x1835   :  { %v10740_v6 = vpop.f32.mrf.mxu0 }
0x1836   :  { %v12772_v6 = vld [vmem:[#allocation4 + $0x600] ss:$8 sps:$4 sm:$0xff]  }
0x1837   :  { %v4817_v35 = vpop.f32.mrf.mxu0 }
0x1839   :  { %v10741_v36 = vpop.f32.mrf.mxu0 }
0x183a   :  { %10757 = vmatmul.mubr.msk.bf16.vlgmr.msra.gmra.mxu1 %vm3491_vm5, %v4870_v19 }
0x183b   :  { %10767 = vmatpush3.bf16.msra.mxu1 %v5016_v38  ;;  %10768 = vmatprep.mubr.msk.bf16.mxu1 %vm11750_vm2, %v11749_v29 }
0x183c   :  { %10778 = vmatprep.subr.bf16.mxu1 %v11749_v29 }
0x1842   :  { %10769 = vmatmul.mubr.msk.bf16.vlgmr.msra.gmra.mxu1 %vm3825_vm7, %v5012_v23  ;;  %v9581_v23 = vld [vmem:[%s13648_s1 + $0xa0] sm:$0xf] }
0x1843   :  { %10779 = vmatpush3.bf16.msra.mxu1 %v12659_v40  ;;  %10780 = vmatprep.mubr.msk.bf16.mxu1 %vm11750_vm2, %v11749_v29 }
0x1844   :  { %10790 = vmatprep.subr.bf16.mxu1 %v11749_v29 }
0x18e6   :  { %v4908_v39 = vpop.f32.mrf.mxu0 }
0x18e7   :  { %v4914_v41 = vpack.c.bf16 %v4908_v39, %v4908_v39 }
0x18e8   :  { %v10752_v42 = vpop.f32.mrf.mxu0 }
0x18e9   :  { %v4965_v43 = vsel %vm3829_vm6, %v4914_v41, 0  ;;  %v11459_v41 = vld [vmem:[#allocation7 + $0x80] ss:$8 sps:$4 sm:$0xff]  }
0x18ea   :  { %v4911_v45 = vpop.f32.mrf.mxu0  ;;  %10761 = vmatpush3.bf16.msra.mxu0 %v4965_v43  ;;  %v5251_v43 = vpop.permute.xlu0 %5250 }
0x18eb   :  { %10772 = vmatprep.subr.bf16.mxu0 %v11749_v29 }
0x18ec   :  { %v10753_v50 = vpop.f32.mrf.mxu0 }
0x18ed   :  { %10763 = vmatmul.mubr.msk.bf16.vlgmr.msra.gmra.mxu0 %vm3825_vm7, %v4960_v48 }
0x18ee   :  { %10774 = vmatprep.mubr.msk.bf16.mxu0 %vm11750_vm2, %v11749_v29 }
0x18f2   :  { %v4863_v40 = vpop.f32.mrf.mxu1 }
0x18f3   :  { %v4869_v52 = vadd.f32 %v4863_v40, %v4820_v34  ;;  %v12768_v34 = vld [vmem:[#allocation4 + $0x610] ss:$8 sps:$4 sm:$0xff]  }
0x18f4   :  { %v10746_v54 = vpop.f32.mrf.mxu1 }
0x18f6   :  { %v4866_v58 = vpop.f32.mrf.mxu1 }
0x18f8   :  { %v10747_v62 = vpop.f32.mrf.mxu1 }
0x18fa   :  { %v4949_v7 = vpop.f32.mrf.mxu1 }
0x18fb   :  { %v4955_v13 = vpack.c.bf16 %v4949_v7, %v4949_v7 }
0x18fc   :  { %v10758_v16 = vpop.f32.mrf.mxu1 }
0x18fd   :  { %v5068_v46 = vsel %vm3829_vm6, %v4955_v13, 0  ;;  %v12784_v16 = vld [vmem:[#allocation4 + $0x710] ss:$8 sps:$4 sm:$0xff]  }
0x18fe   :  { %v4952_v49 = vpop.f32.mrf.mxu1  ;;  %10773 = vmatpush3.bf16.msra.mxu0 %v5068_v46 }
0x18ff   :  { %10784 = vmatprep.subr.bf16.mxu0 %v11749_v29 }
0x1900   :  { %v10759_v53 = vpop.f32.mrf.mxu1 }
0x1901   :  { %10775 = vmatmul.mubr.msk.bf16.vlgmr.msra.gmra.mxu0 %vm3825_vm7, %v5063_v51  ;;  %v12788_v53 = vld [vmem:[#allocation4 + $0x700] ss:$8 sps:$4 sm:$0xff]  }
0x1902   :  { %10785 = vmatpush3.bf16.msra.mxu0 %v12672_v57  ;;  %10786 = vmatprep.mubr.msk.bf16.mxu0 %vm11750_vm2, %v11749_v29  ;;  %v5052_v0 = vpop.f32.mrf.mxu1 }
0x1903   :  { %10796 = vmatprep.subr.bf16.mxu0 %v11749_v29 }
0x1904   :  { %v10770_v17 = vpop.f32.mrf.mxu1 }
0x1906   :  { %v5055_v1 = vpop.f32.mrf.mxu1 }
0x1908   :  { %v10771_v61 = vpop.f32.mrf.mxu1 }
0x19ad   :  { %v5001_v8 = vpop.f32.mrf.mxu0 }
0x19ae   :  { %v5007_v14 = vadd.f32 %v5001_v8, %v4869_v52 }
0x19af   :  { %v10764_v9 = vpop.f32.mrf.mxu0 }
0x19b0   :  { %v5058_v15 = vadd.f32 %v5052_v0, %v5007_v14  ;;  %v11640_v9 = vld [vmem:[%s13648_s1 + $0xa8] sm:$0x3] }
0x19b1   :  { %v5004_v3 = vpop.f32.mrf.mxu0 }
0x19b2   :  { %v5580_v3 = vsel %vm562_vm0, %v12510_v5, 0 }
0x19b3   :  { %v10765_v11 = vpop.f32.mrf.mxu0 }
0x19b4   :  { %v11641_v11 = vld [vmem:[%s13648_s1 + $0xac] sm:$0x3] }
0x19c1   :  { %v5104_v10 = vpop.f32.mrf.mxu0 }
0x19c2   :  { %v5110_v18 = vadd.f32 %v5104_v10, %v5058_v15 }
0x19c3   :  { %v10776_v31 = vpop.f32.mrf.mxu0 }
0x19c4   :  { %v5111_v19 = vmax.f32 %v5110_v18, 0.0  ;;  %v5814_v31 = vpop.permute.xlu0 %5813 }
0x19c5   :  { %v5107_v57 = vpop.f32.mrf.mxu0 }
0x19c6   :  { %v5114_v20 = vpack.c.bf16 %v5111_v19, %v5111_v19 }
0x19c7   :  { %v10777_v21 = vpop.f32.mrf.mxu0 }
0x19c8   :  { %10781 = vmatmul.mubr.msk.bf16.vlgmr.msra.gmra.mxu1 %vm3491_vm5, %v5114_v20  ;;  %10787 = vmatmul.mubr.msk.bf16.vlgmr.msra.gmra.mxu0 %vm3491_vm5, %v5114_v20  ;;  %v5259_v22 = vsel %vm3829_vm6, %v5114_v20, 0 }
0x19c9   :  { %10797 = vmatpush3.bf16.msra.mxu0 %v5259_v22  ;;  %10792 = vmatprep.mubr.msk.bf16.mxu1 %vm11750_vm2, %v11749_v29 }
0x19ca   :  { %10798 = vmatprep.mubr.msk.bf16.mxu0 %vm11750_vm2, %v11749_v29  ;;  %10808 = vmatprep.subr.bf16.mxu0 %v11749_v29 }
0x19d0   :  { %10799 = vmatmul.mubr.msk.bf16.vlgmr.msra.gmra.mxu0 %vm3825_vm7, %v9581_v23 }
0x19d1   :  { %10810 = vmatprep.mubr.msk.bf16.mxu0 %vm11750_vm2, %v11749_v29  ;;  %10809 = vmatpush3.bf16.msra.mxu0 %v11459_v41  ;;  %v5762_v41 = vpop.permute.xlu1 %5761 }
0x19d2   :  { %10822 = vmatprep.subr.bf16.mxu0 %v11749_v29 }
0x1a88   :  { %v5152_v24 = vpop.f32.mrf.mxu1  ;;  %v5193_v25 = vpop.f32.mrf.mxu0 }
0x1a89   :  { %v5158_v55 = vpack.c.bf16 %v5152_v24, %v5152_v24  ;;  %v5199_v59 = vpack.c.bf16 %v5193_v25, %v5193_v25 }
0x1a8a   :  { %v10782_v26 = vpop.f32.mrf.mxu1  ;;  %v10788_v56 = vpop.f32.mrf.mxu0 }
0x1a8b   :  { %v5206_v27 = vsel %vm3829_vm6, %v5158_v55, 0  ;;  %v5308_v2 = vsel %vm3829_vm6, %v5199_v59, 0  ;;  %v5572_v55 = vpop.permute.xlu0 %5571  ;;  %v11642_v59 = vld [vmem:[%s13648_s1 + $0xb0] sm:$0x3] }
0x1a8c   :  { %v5155_v28 = vpop.f32.mrf.mxu1  ;;  %v5196_v60 = vpop.f32.mrf.mxu0  ;;  %10791 = vmatpush3.bf16.msra.mxu1 %v5206_v27 }
0x1a8d   :  { %10802 = vmatprep.subr.bf16.mxu1 %v11749_v29 }
0x1a8e   :  { %v10783_v63 = vpop.f32.mrf.mxu1  ;;  %v10789_v32 = vpop.f32.mrf.mxu0 }
0x1a8f   :  { %10793 = vmatmul.mubr.msk.bf16.vlgmr.msra.gmra.mxu1 %vm3825_vm7, %v9579_v30 }
0x1a90   :  { %10803 = vmatpush3.bf16.msra.mxu1 %v5308_v2  ;;  %10804 = vmatprep.mubr.msk.bf16.mxu1 %vm11750_vm2, %v11749_v29  ;;  %v5295_v35 = vpop.f32.mrf.mxu0 }
0x1a91   :  { %10814 = vmatprep.subr.bf16.mxu1 %v11749_v29 }
0x1a92   :  { %v10800_v36 = vpop.f32.mrf.mxu0 }
0x1a94   :  { %v5298_v38 = vpop.f32.mrf.mxu0 }
0x1a96   :  { %v10801_v39 = vpop.f32.mrf.mxu0 }
0x1a97   :  { %10805 = vmatmul.mubr.msk.bf16.vlgmr.msra.gmra.mxu1 %vm3825_vm7, %v9583_v33 }
0x1a98   :  { %10815 = vmatpush3.bf16.msra.mxu1 %v12768_v34  ;;  %10818 = vmatprep.mubr.msk.bf16.mxu1 %vm11750_vm2, %v11749_v29 }
0x1a99   :  { %10816 = vmatprep.subr.bf16.mxu1 %v11749_v29 }
0x1a9c   :  { %10817 = vmatpush3.bf16.msra.mxu1 %v12772_v6 }
0x1a9d   :  { %10830 = vmatprep.subr.bf16.mxu1 %v11749_v29 }
0x1a9f   :  { %10819 = vmatmul.mubr.msk.bf16.vlgmr.msra.gmra.mxu1 %vm2867_vm4, %v12510_v5 }
0x1aa0   :  { %10832 = vmatprep.mubr.msk.bf16.mxu1 %vm11750_vm2, %v11749_v29 }
0x1b4f   :  { %v5242_v42 = vpop.f32.mrf.mxu1 }
0x1b50   :  { %v5253_v48 = vadd.f32 %v5251_v43, %v5242_v42 }
0x1b51   :  { %v10794_v45 = vpop.f32.mrf.mxu1 }
0x1b52   :  { %v5301_v52 = vadd.f32 %v5295_v35, %v5253_v48 }
0x1b53   :  { %v5245_v50 = vpop.f32.mrf.mxu1 }
0x1b55   :  { %v10795_v40 = vpop.f32.mrf.mxu1 }
0x1b57   :  { %v5344_v54 = vpop.f32.mrf.mxu1 }
0x1b58   :  { %v5350_v58 = vadd.f32 %v5344_v54, %v5301_v52 }
0x1b59   :  { %v10806_v62 = vpop.f32.mrf.mxu1 }
0x1b5a   :  { %v5351_v7 = vmax.f32 %v5350_v58, 0.0  ;;  %v5865_v62 = vpop.permute.xlu1 %5864 }
0x1b5b   :  { %v5347_v13 = vpop.f32.mrf.mxu1 }
0x1b5c   :  { %v5352_v46 = vpack.c.bf16 %v5351_v7, %v5351_v7 }
0x1b5d   :  { %v10807_v49 = vpop.f32.mrf.mxu1 }
0x1b5e   :  { %10811 = vmatmul.mubr.msk.bf16.vlgmr.msra.gmra.mxu0 %vm3491_vm5, %v5352_v46 }
0x1b5f   :  { %10823 = vmatpush3.bf16.msra.mxu0 %v12784_v16  ;;  %v5461_v51 = vpop.f32.mrf.mxu1  ;;  %10826 = vmatprep.mubr.msk.bf16.mxu0 %vm11750_vm2, %v11749_v29 }
0x1b60   :  { %v5467_v0 = vpack.c.bf16 %v5461_v51, %v5461_v51  ;;  %10824 = vmatprep.subr.bf16.mxu0 %v11749_v29 }
0x1b61   :  { %v10820_v17 = vpop.f32.mrf.mxu1 }
0x1b62   :  { %v5527_v1 = vsel %vm562_vm0, %v5467_v0, 0 }
0x1b63   :  { %10825 = vmatpush3.bf16.msra.mxu0 %v12788_v53  ;;  %v5464_v61 = vpop.f32.mrf.mxu1  ;;  %10831 = vmatpush3.bf16.msra.mxu1 %v5527_v1 }
0x1b64   :  { %10836 = vmatprep.subr.bf16.mxu0 %v11749_v29  ;;  %10842 = vmatprep.subr.bf16.mxu1 %v11749_v29 }
0x1b65   :  { %v10821_v8 = vpop.f32.mrf.mxu1 }
0x1b66   :  { %10827 = vmatmul.mubr.msk.bf16.vlgmr.msra.gmra.mxu0 %vm2867_vm4, %v12510_v5  ;;  %10833 = vmatmul.mubr.msk.bf16.vlgmr.msra.gmra.mxu1 %vm558_vm1, %v11640_v9 }
0x1b67   :  { %10837 = vmatpush3.bf16.msra.mxu0 %v5580_v3  ;;  %10838 = vmatprep.mubr.msk.bf16.mxu0 %vm11750_vm2, %v11749_v29 }
0x1b68   :  { %10848 = vmatprep.subr.bf16.mxu0 %v11749_v29  ;;  %10844 = vmatprep.mubr.msk.bf16.mxu1 %vm11750_vm2, %v11749_v29 }
0x1b6e   :  { %10839 = vmatmul.mubr.msk.bf16.vlgmr.msra.gmra.mxu0 %vm558_vm1, %v11641_v11 }
0x1b6f   :  { %10849 = vmatpush3.bf16.msra.mxu0 %v12768_v34  ;;  %10852 = vmatprep.mubr.msk.bf16.mxu0 %vm11750_vm2, %v11749_v29 }
0x1b70   :  { %10850 = vmatprep.subr.bf16.mxu0 %v11749_v29 }
0x1b73   :  { %10851 = vmatpush3.bf16.msra.mxu0 %v12772_v6 }
0x1b74   :  { %10864 = vmatprep.subr.bf16.mxu0 %v11749_v29 }
0x1c1e   :  { %v5399_v5 = vpop.f32.mrf.mxu0 }
0x1c1f   :  { %v5672_v14 = vpack.c.bf16 %v5399_v5, %v5399_v5 }
0x1c20   :  { %v10812_v15 = vpop.f32.mrf.mxu0 }
0x1c21   :  { %10853 = vmatmul.mubr.msk.bf16.vlgmr.msra.gmra.mxu0 %vm2867_vm4, %v5672_v14  ;;  %v5818_v2 = vsel %vm3829_vm6, %v5672_v14, 0 }
0x1c22   :  { %v5402_v10 = vpop.f32.mrf.mxu0  ;;  %10866 = vmatprep.mubr.msk.bf16.mxu0 %vm11750_vm2, %v11749_v29 }
0x1c24   :  { %v10813_v18 = vpop.f32.mrf.mxu0 }
0x1c25   :  { %v9613_v18 = vld [vmem:[%s13648_s1 + $0xb8] sm:$0x3] }
0x1c26   :  { %v5514_v19 = vpop.f32.mrf.mxu0  ;;  %v5563_v57 = vpop.f32.mrf.mxu1 }
0x1c27   :  { %v5520_v20 = vpack.c.bf16 %v5514_v19, %v5514_v19  ;;  %v5574_v27 = vadd.f32 %v5572_v55, %v5563_v57  ;;  %v9611_v55 = vld [vmem:[%s13648_s1 + $0xb4] sm:$0x3] }
0x1c28   :  { %v10828_v21 = vpop.f32.mrf.mxu0  ;;  %v10834_v22 = vpop.f32.mrf.mxu1 }
0x1c29   :  { %v5629_v23 = vsel %vm562_vm0, %v5520_v20, 0 }
0x1c2a   :  { %v5517_v24 = vpop.f32.mrf.mxu0  ;;  %10843 = vmatpush3.bf16.msra.mxu1 %v5629_v23  ;;  %v5566_v25 = vpop.f32.mrf.mxu1 }
0x1c2b   :  { %10856 = vmatprep.subr.bf16.mxu1 %v11749_v29 }
0x1c2c   :  { %v10829_v26 = vpop.f32.mrf.mxu0  ;;  %v10835_v56 = vpop.f32.mrf.mxu1 }
0x1c2d   :  { %10845 = vmatmul.mubr.msk.bf16.vlgmr.msra.gmra.mxu1 %vm558_vm1, %v11642_v59  ;;  %v9615_v59 = vld [vmem:[%s13648_s1 + $0xbc] sm:$0x3] }
0x1c2e   :  { %v5616_v28 = vpop.f32.mrf.mxu0  ;;  %10857 = vmatpush3.bf16.msra.mxu1 %v12784_v16  ;;  %10860 = vmatprep.mubr.msk.bf16.mxu1 %vm11750_vm2, %v11749_v29 }
0x1c2f   :  { %v5622_v60 = vadd.f32 %v5616_v28, %v5574_v27  ;;  %10858 = vmatprep.subr.bf16.mxu1 %v11749_v29  ;;  %v12888_v28 = vld [vmem:[#allocation4 + $0x430] ss:$8 sps:$4 sm:$0xff]  }
0x1c30   :  { %v10840_v30 = vpop.f32.mrf.mxu0 }
0x1c31   :  { %v12898_v30 = vld [vmem:[#allocation4 + $0x410] ss:$8 sps:$4 sm:$0xff]  }
0x1c32   :  { %10859 = vmatpush3.bf16.msra.mxu1 %v12788_v53  ;;  %v5619_v63 = vpop.f32.mrf.mxu0 }
0x1c33   :  { %10870 = vmatprep.subr.bf16.mxu1 %v11749_v29  ;;  %v12902_v63 = vld [vmem:[#allocation4 + $0x400] ss:$8 sps:$4 sm:$0xff]  }
0x1c34   :  { %v10841_v32 = vpop.f32.mrf.mxu0 }
0x1c35   :  { %10861 = vmatmul.mubr.msk.bf16.vlgmr.msra.gmra.mxu1 %vm2867_vm4, %v5672_v14 }
0x1c36   :  { %10871 = vmatpush3.bf16.msra.mxu1 %v5818_v2  ;;  %10872 = vmatprep.mubr.msk.bf16.mxu1 %vm11750_vm2, %v11749_v29 }
0x1c37   :  { %10882 = vmatprep.subr.bf16.mxu1 %v11749_v29 }
0x1c3d   :  { %10873 = vmatmul.mubr.msk.bf16.vlgmr.msra.gmra.mxu1 %vm3825_vm7, %v5814_v31 }
0x1c3e   :  { %10883 = vmatpush3.bf16.msra.mxu1 %v12768_v34  ;;  %10886 = vmatprep.mubr.msk.bf16.mxu1 %vm11750_vm2, %v11749_v29 }
0x1c3f   :  { %10884 = vmatprep.subr.bf16.mxu1 %v11749_v29 }
0x1c42   :  { %10885 = vmatpush3.bf16.msra.mxu1 %v12772_v6 }
0x1c43   :  { %10898 = vmatprep.subr.bf16.mxu1 %v11749_v29 }
0x1ce1   :  { %v5710_v33 = vpop.f32.mrf.mxu0 }
0x1ce2   :  { %v5716_v35 = vpack.c.bf16 %v5710_v33, %v5710_v33 }
0x1ce3   :  { %v10854_v36 = vpop.f32.mrf.mxu0 }
0x1ce4   :  { %v5767_v38 = vsel %vm3829_vm6, %v5716_v35, 0  ;;  %v11466_v35 = vld [vmem:[#allocation7 + $0x110] ss:$8 sps:$4 sm:$0xff]  }
0x1ce5   :  { %v5713_v39 = vpop.f32.mrf.mxu0  ;;  %10865 = vmatpush3.bf16.msra.mxu0 %v5767_v38  ;;  %v11467_v38 = vld [vmem:[#allocation7 + $0x100] ss:$8 sps:$4 sm:$0xff]  }
0x1ce6   :  { %10876 = vmatprep.subr.bf16.mxu0 %v11749_v29 }
0x1ce7   :  { %v10855_v34 = vpop.f32.mrf.mxu0 }
0x1ce8   :  { %10867 = vmatmul.mubr.msk.bf16.vlgmr.msra.gmra.mxu0 %vm3825_vm7, %v5762_v41  ;;  %v6053_v41 = vpop.permute.xlu1 %6052 }
0x1ce9   :  { %10878 = vmatprep.mubr.msk.bf16.mxu0 %vm11750_vm2, %v11749_v29 }
0x1ced   :  { %v5665_v42 = vpop.f32.mrf.mxu1 }
0x1cee   :  { %v5671_v6 = vadd.f32 %v5665_v42, %v5622_v60  ;;  %v12892_v60 = vld [vmem:[#allocation4 + $0x420] ss:$8 sps:$4 sm:$0xff]  }
0x1cef   :  { %v10846_v43 = vpop.f32.mrf.mxu1 }
0x1cf1   :  { %v5668_v45 = vpop.f32.mrf.mxu1 }
0x1cf3   :  { %v10847_v48 = vpop.f32.mrf.mxu1 }
0x1cf5   :  { %v5751_v50 = vpop.f32.mrf.mxu1 }
0x1cf6   :  { %v5757_v40 = vpack.c.bf16 %v5751_v50, %v5751_v50 }
0x1cf7   :  { %v10862_v52 = vpop.f32.mrf.mxu1 }
0x1cf8   :  { %v5870_v54 = vsel %vm3829_vm6, %v5757_v40, 0 }
0x1cf9   :  { %v5754_v58 = vpop.f32.mrf.mxu1  ;;  %10877 = vmatpush3.bf16.msra.mxu0 %v5870_v54 }
0x1cfa   :  { %10890 = vmatprep.subr.bf16.mxu0 %v11749_v29  ;;  %v12913_v58 = vld [vmem:[#allocation4 + $0x530] ss:$8 sps:$4 sm:$0xff]  }
0x1cfb   :  { %v10863_v7 = vpop.f32.mrf.mxu1 }
0x1cfc   :  { %10879 = vmatmul.mubr.msk.bf16.vlgmr.msra.gmra.mxu0 %vm3825_vm7, %v5865_v62 }
0x1cfd   :  { %10891 = vmatpush3.bf16.msra.mxu0 %v12784_v16  ;;  %10894 = vmatprep.mubr.msk.bf16.mxu0 %vm11750_vm2, %v11749_v29  ;;  %v5854_v13 = vpop.f32.mrf.mxu1 }
0x1cfe   :  { %10892 = vmatprep.subr.bf16.mxu0 %v11749_v29 }
0x1cff   :  { %v10874_v46 = vpop.f32.mrf.mxu1 }
0x1d00   :  { %v12923_v46 = vld [vmem:[#allocation4 + $0x510] ss:$8 sps:$4 sm:$0xff]  }
0x1d01   :  { %10893 = vmatpush3.bf16.msra.mxu0 %v12788_v53  ;;  %v5857_v49 = vpop.f32.mrf.mxu1 }
0x1d02   :  { %10904 = vmatprep.subr.bf16.mxu0 %v11749_v29 }
0x1d03   :  { %v10875_v51 = vpop.f32.mrf.mxu1 }
0x1d04   :  { %v12927_v51 = vld [vmem:[#allocation4 + $0x500] ss:$8 sps:$4 sm:$0xff]  }
0x1da8   :  { %v5803_v0 = vpop.f32.mrf.mxu0 }
0x1da9   :  { %v5809_v8 = vadd.f32 %v5803_v0, %v5671_v6 }
0x1daa   :  { %v10868_v17 = vpop.f32.mrf.mxu0 }
0x1dab   :  { %v5860_v9 = vadd.f32 %v5854_v13, %v5809_v8  ;;  %v12917_v13 = vld [vmem:[#allocation4 + $0x520] ss:$8 sps:$4 sm:$0xff]  }
0x1dac   :  { %v5806_v1 = vpop.f32.mrf.mxu0 }
0x1dae   :  { %v10869_v61 = vpop.f32.mrf.mxu0 }
0x1dbc   :  { %v5906_v16 = vpop.f32.mrf.mxu0 }
0x1dbd   :  { %v5912_v3 = vadd.f32 %v5906_v16, %v5860_v9  ;;  %v11643_v9 = vld [vmem:[%s13648_s1 + $0xc0] sm:$0x3]  ;;  %v6422_v16 = vsel %vm562_vm0, %v12426_v37, 0 }
0x1dbe   :  { %v10880_v11 = vpop.f32.mrf.mxu0 }
0x1dbf   :  { %v5913_v5 = vmax.f32 %v5912_v3, 0.0  ;;  %v11644_v3 = vld [vmem:[%s13648_s1 + $0xc4] sm:$0x3] }
0x1dc0   :  { %v5909_v14 = vpop.f32.mrf.mxu0 }
0x1dc1   :  { %v5916_v15 = vpack.c.bf16 %v5913_v5, %v5913_v5 }
0x1dc2   :  { %v10881_v10 = vpop.f32.mrf.mxu0 }
0x1dc3   :  { %10887 = vmatmul.mubr.msk.bf16.vlgmr.msra.gmra.mxu1 %vm2867_vm4, %v5916_v15  ;;  %10895 = vmatmul.mubr.msk.bf16.vlgmr.msra.gmra.mxu0 %vm2867_vm4, %v5916_v15  ;;  %v6061_v53 = vsel %vm562_vm0, %v5916_v15, 0  ;;  %v6656_v10 = vpop.permute.xlu1 %6655 }
0x1dc4   :  { %10905 = vmatpush3.bf16.msra.mxu0 %v6061_v53  ;;  %10900 = vmatprep.mubr.msk.bf16.mxu1 %vm11750_vm2, %v11749_v29 }
0x1dc5   :  { %10906 = vmatprep.mubr.msk.bf16.mxu0 %vm11750_vm2, %v11749_v29  ;;  %10916 = vmatprep.subr.bf16.mxu0 %v11749_v29 }
0x1dcb   :  { %10907 = vmatmul.mubr.msk.bf16.vlgmr.msra.gmra.mxu0 %vm558_vm1, %v9613_v18 }
0x1dcc   :  { %10920 = vmatprep.mubr.msk.bf16.mxu0 %vm11750_vm2, %v11749_v29  ;;  %10917 = vmatpush3.bf16.msra.mxu0 %v11466_v35 }
0x1dcd   :  { %10918 = vmatprep.subr.bf16.mxu0 %v11749_v29 }
0x1dd0   :  { %10919 = vmatpush3.bf16.msra.mxu0 %v11467_v38 }
0x1dd1   :  { %10936 = vmatprep.subr.bf16.mxu0 %v11749_v29 }
0x1e83   :  { %v5954_v31 = vpop.f32.mrf.mxu1  ;;  %v5995_v19 = vpop.f32.mrf.mxu0 }
0x1e84   :  { %v5960_v57 = vpack.c.bf16 %v5954_v31, %v5954_v31  ;;  %v6001_v23 = vpack.c.bf16 %v5995_v19, %v5995_v19 }
0x1e85   :  { %v10888_v20 = vpop.f32.mrf.mxu1  ;;  %v10896_v21 = vpop.f32.mrf.mxu0 }
0x1e86   :  { %v6008_v22 = vsel %vm562_vm0, %v5960_v57, 0  ;;  %v6110_v27 = vsel %vm562_vm0, %v6001_v23, 0  ;;  %v6414_v23 = vpop.permute.xlu1 %6413 }
0x1e87   :  { %v5957_v24 = vpop.f32.mrf.mxu1  ;;  %v5998_v25 = vpop.f32.mrf.mxu0  ;;  %10899 = vmatpush3.bf16.msra.mxu1 %v6008_v22 }
0x1e88   :  { %10910 = vmatprep.subr.bf16.mxu1 %v11749_v29 }
0x1e89   :  { %v10889_v26 = vpop.f32.mrf.mxu1  ;;  %v10897_v56 = vpop.f32.mrf.mxu0 }
0x1e8a   :  { %10901 = vmatmul.mubr.msk.bf16.vlgmr.msra.gmra.mxu1 %vm558_vm1, %v9611_v55  ;;  %v11645_v26 = vld [vmem:[%s13648_s1 + $0xc8] sm:$0x3] }
0x1e8b   :  { %10911 = vmatpush3.bf16.msra.mxu1 %v6110_v27  ;;  %10912 = vmatprep.mubr.msk.bf16.mxu1 %vm11750_vm2, %v11749_v29  ;;  %v6097_v32 = vpop.f32.mrf.mxu0 }
0x1e8c   :  { %10924 = vmatprep.subr.bf16.mxu1 %v11749_v29 }
0x1e8d   :  { %v10908_v2 = vpop.f32.mrf.mxu0 }
0x1e8f   :  { %v6100_v33 = vpop.f32.mrf.mxu0 }
0x1e91   :  { %v10909_v36 = vpop.f32.mrf.mxu0 }
0x1e92   :  { %10913 = vmatmul.mubr.msk.bf16.vlgmr.msra.gmra.mxu1 %vm558_vm1, %v9615_v59 }
0x1e93   :  { %10925 = vmatpush3.bf16.msra.mxu1 %v12888_v28  ;;  %10932 = vmatprep.mubr.msk.bf16.mxu1 %vm11750_vm2, %v11749_v29 }
0x1e94   :  { %10926 = vmatprep.subr.bf16.mxu1 %v11749_v29 }
0x1e97   :  { %10927 = vmatpush3.bf16.msra.mxu1 %v12892_v60 }
0x1e98   :  { %10928 = vmatprep.subr.bf16.mxu1 %v11749_v29 }
0x1e9b   :  { %10929 = vmatpush3.bf16.msra.mxu1 %v12898_v30 }
0x1e9c   :  { %10930 = vmatprep.subr.bf16.mxu1 %v11749_v29 }
0x1e9f   :  { %10931 = vmatpush3.bf16.msra.mxu1 %v12902_v63 }
0x1ea0   :  { %10948 = vmatprep.subr.bf16.mxu1 %v11749_v29 }
0x1ea2   :  { %10933 = vmatmul.mubr.msk.bf16.vlgmr.msra.gmra.mxu1 %vm2189_vm3, %v12426_v37 }
0x1ea3   :  { %10950 = vmatprep.mubr.msk.bf16.mxu1 %vm11750_vm2, %v11749_v29 }
0x1f4a   :  { %v6044_v39 = vpop.f32.mrf.mxu1 }
0x1f4b   :  { %v6055_v42 = vadd.f32 %v6053_v41, %v6044_v39 }
0x1f4c   :  { %v10902_v34 = vpop.f32.mrf.mxu1 }
0x1f4d   :  { %v6103_v45 = vadd.f32 %v6097_v32, %v6055_v42 }
0x1f4e   :  { %v6047_v6 = vpop.f32.mrf.mxu1 }
0x1f50   :  { %v10903_v43 = vpop.f32.mrf.mxu1 }
0x1f52   :  { %v6146_v48 = vpop.f32.mrf.mxu1 }
0x1f53   :  { %v6152_v50 = vadd.f32 %v6146_v48, %v6103_v45 }
0x1f54   :  { %v10914_v40 = vpop.f32.mrf.mxu1 }
0x1f55   :  { %v6153_v52 = vmax.f32 %v6152_v50, 0.0 }
0x1f56   :  { %v6149_v54 = vpop.f32.mrf.mxu1 }
0x1f57   :  { %v6154_v62 = vpack.c.bf16 %v6153_v52, %v6153_v52 }
0x1f58   :  { %v10915_v7 = vpop.f32.mrf.mxu1 }
0x1f59   :  { %10921 = vmatmul.mubr.msk.bf16.vlgmr.msra.gmra.mxu0 %vm2867_vm4, %v6154_v62 }
0x1f5a   :  { %10937 = vmatpush3.bf16.msra.mxu0 %v12913_v58  ;;  %10944 = vmatprep.mubr.msk.bf16.mxu0 %vm11750_vm2, %v11749_v29 }
0x1f5b   :  { %10938 = vmatprep.subr.bf16.mxu0 %v11749_v29 }
0x1f5e   :  { %10939 = vmatpush3.bf16.msra.mxu0 %v12917_v13 }
0x1f5f   :  { %10940 = vmatprep.subr.bf16.mxu0 %v11749_v29 }
0x1f62   :  { %v6291_v49 = vpop.f32.mrf.mxu1  ;;  %10941 = vmatpush3.bf16.msra.mxu0 %v12923_v46 }
0x1f63   :  { %v6297_v0 = vpack.c.bf16 %v6291_v49, %v6291_v49  ;;  %10942 = vmatprep.subr.bf16.mxu0 %v11749_v29 }
0x1f64   :  { %v10934_v17 = vpop.f32.mrf.mxu1 }
0x1f65   :  { %v6369_v1 = vsel %vm562_vm0, %v6297_v0, 0 }
0x1f66   :  { %v6294_v61 = vpop.f32.mrf.mxu1  ;;  %10943 = vmatpush3.bf16.msra.mxu0 %v12927_v51  ;;  %10949 = vmatpush3.bf16.msra.mxu1 %v6369_v1 }
0x1f67   :  { %10954 = vmatprep.subr.bf16.mxu0 %v11749_v29  ;;  %10960 = vmatprep.subr.bf16.mxu1 %v11749_v29 }
0x1f68   :  { %v10935_v8 = vpop.f32.mrf.mxu1 }
0x1f69   :  { %10945 = vmatmul.mubr.msk.bf16.vlgmr.msra.gmra.mxu0 %vm2189_vm3, %v12426_v37  ;;  %10951 = vmatmul.mubr.msk.bf16.vlgmr.msra.gmra.mxu1 %vm558_vm1, %v11643_v9 }
0x1f6a   :  { %10955 = vmatpush3.bf16.msra.mxu0 %v6422_v16  ;;  %10956 = vmatprep.mubr.msk.bf16.mxu0 %vm11750_vm2, %v11749_v29 }
0x1f6b   :  { %10966 = vmatprep.subr.bf16.mxu0 %v11749_v29  ;;  %10962 = vmatprep.mubr.msk.bf16.mxu1 %vm11750_vm2, %v11749_v29 }
0x1f71   :  { %10957 = vmatmul.mubr.msk.bf16.vlgmr.msra.gmra.mxu0 %vm558_vm1, %v11644_v3 }
0x1f72   :  { %10967 = vmatpush3.bf16.msra.mxu0 %v12888_v28  ;;  %10974 = vmatprep.mubr.msk.bf16.mxu0 %vm11750_vm2, %v11749_v29 }
0x1f73   :  { %10968 = vmatprep.subr.bf16.mxu0 %v11749_v29 }
0x1f76   :  { %10969 = vmatpush3.bf16.msra.mxu0 %v12892_v60 }
0x1f77   :  { %10970 = vmatprep.subr.bf16.mxu0 %v11749_v29 }
0x1f7a   :  { %10971 = vmatpush3.bf16.msra.mxu0 %v12898_v30 }
0x1f7b   :  { %10972 = vmatprep.subr.bf16.mxu0 %v11749_v29 }
0x1f7e   :  { %10973 = vmatpush3.bf16.msra.mxu0 %v12902_v63 }
0x1f7f   :  { %10990 = vmatprep.subr.bf16.mxu0 %v11749_v29 }
0x2019   :  { %v6209_v37 = vpop.f32.mrf.mxu0 }
0x201a   :  { %v6514_v11 = vpack.c.bf16 %v6209_v37, %v6209_v37 }
0x201b   :  { %v10922_v5 = vpop.f32.mrf.mxu0 }
0x201c   :  { %10975 = vmatmul.mubr.msk.bf16.vlgmr.msra.gmra.mxu0 %vm2189_vm3, %v6514_v11  ;;  %v6660_v33 = vsel %vm562_vm0, %v6514_v11, 0 }
0x201d   :  { %v6212_v14 = vpop.f32.mrf.mxu0  ;;  %10992 = vmatprep.mubr.msk.bf16.mxu0 %vm11750_vm2, %v11749_v29 }
0x201e   :  { %v9650_v14 = vld [vmem:[%s13648_s1 + $0xd0] sm:$0x3] }
0x201f   :  { %v10923_v15 = vpop.f32.mrf.mxu0 }
0x2020   :  { %v11480_v15 = vld [vmem:[#allocation7 + $0x1b0] ss:$8 sps:$4 sm:$0xff]  }
0x2029   :  { %v6356_v53 = vpop.f32.mrf.mxu0  ;;  %v6405_v18 = vpop.f32.mrf.mxu1 }
0x202a   :  { %v6362_v31 = vpack.c.bf16 %v6356_v53, %v6356_v53  ;;  %v6416_v55 = vadd.f32 %v6414_v23, %v6405_v18  ;;  %v9648_v23 = vld [vmem:[%s13648_s1 + $0xcc] sm:$0x3] }
0x202b   :  { %v10946_v19 = vpop.f32.mrf.mxu0  ;;  %v10952_v57 = vpop.f32.mrf.mxu1 }
0x202c   :  { %v6471_v20 = vsel %vm562_vm0, %v6362_v31, 0 }
0x202d   :  { %v6359_v21 = vpop.f32.mrf.mxu0  ;;  %10961 = vmatpush3.bf16.msra.mxu1 %v6471_v20  ;;  %v6408_v22 = vpop.f32.mrf.mxu1 }
0x202e   :  { %10978 = vmatprep.subr.bf16.mxu1 %v11749_v29 }
0x202f   :  { %v10947_v24 = vpop.f32.mrf.mxu0  ;;  %v10953_v25 = vpop.f32.mrf.mxu1 }
0x2030   :  { %10963 = vmatmul.mubr.msk.bf16.vlgmr.msra.gmra.mxu1 %vm558_vm1, %v11645_v26  ;;  %v9652_v26 = vld [vmem:[%s13648_s1 + $0xd4] sm:$0x3] }
0x2031   :  { %v6458_v56 = vpop.f32.mrf.mxu0  ;;  %10979 = vmatpush3.bf16.msra.mxu1 %v12913_v58  ;;  %10986 = vmatprep.mubr.msk.bf16.mxu1 %vm11750_vm2, %v11749_v29 }
0x2032   :  { %v6464_v27 = vadd.f32 %v6458_v56, %v6416_v55  ;;  %10980 = vmatprep.subr.bf16.mxu1 %v11749_v29  ;;  %v13042_v56 = vld [vmem:[#allocation4 + $0x270] ss:$8 sps:$4 sm:$0xff]  }
0x2033   :  { %v10958_v59 = vpop.f32.mrf.mxu0 }
0x2034   :  { %v13052_v59 = vld [vmem:[#allocation4 + $0x250] ss:$8 sps:$4 sm:$0xff]  }
0x2035   :  { %10981 = vmatpush3.bf16.msra.mxu1 %v12917_v13  ;;  %v6461_v32 = vpop.f32.mrf.mxu0 }
0x2036   :  { %10982 = vmatprep.subr.bf16.mxu1 %v11749_v29  ;;  %v13056_v32 = vld [vmem:[#allocation4 + $0x240] ss:$8 sps:$4 sm:$0xff]  }
0x2037   :  { %v10959_v2 = vpop.f32.mrf.mxu0 }
0x2038   :  { %v13060_v2 = vld [vmem:[#allocation4 + $0x230] ss:$8 sps:$4 sm:$0xff]  }
0x2039   :  { %10983 = vmatpush3.bf16.msra.mxu1 %v12923_v46 }
0x203a   :  { %10984 = vmatprep.subr.bf16.mxu1 %v11749_v29 }
0x203d   :  { %10985 = vmatpush3.bf16.msra.mxu1 %v12927_v51 }
0x203e   :  { %10996 = vmatprep.subr.bf16.mxu1 %v11749_v29 }
0x2040   :  { %10987 = vmatmul.mubr.msk.bf16.vlgmr.msra.gmra.mxu1 %vm2189_vm3, %v6514_v11 }
0x2041   :  { %10997 = vmatpush3.bf16.msra.mxu1 %v6660_v33  ;;  %10998 = vmatprep.mubr.msk.bf16.mxu1 %vm11750_vm2, %v11749_v29  ;;  %v13064_v33 = vld [vmem:[#allocation4 + $0x220] ss:$8 sps:$4 sm:$0xff]  }
0x2042   :  { %11008 = vmatprep.subr.bf16.mxu1 %v11749_v29 }
0x2048   :  { %10999 = vmatmul.mubr.msk.bf16.vlgmr.msra.gmra.mxu1 %vm558_vm1, %v6656_v10 }
0x2049   :  { %11009 = vmatpush3.bf16.msra.mxu1 %v12888_v28  ;;  %11016 = vmatprep.mubr.msk.bf16.mxu1 %vm11750_vm2, %v11749_v29 }
0x204a   :  { %11010 = vmatprep.subr.bf16.mxu1 %v11749_v29 }
0x204d   :  { %11011 = vmatpush3.bf16.msra.mxu1 %v12892_v60  ;;  %v6604_v60 = vpop.permute.xlu0 %6603 }
0x204e   :  { %11012 = vmatprep.subr.bf16.mxu1 %v11749_v29 }
0x2051   :  { %11013 = vmatpush3.bf16.msra.mxu1 %v12898_v30  ;;  %v6707_v52 = vpop.permute.xlu0 %6706 }
0x2052   :  { %11014 = vmatprep.subr.bf16.mxu1 %v11749_v29 }
0x2055   :  { %11015 = vmatpush3.bf16.msra.mxu1 %v12902_v63 }
0x2056   :  { %11032 = vmatprep.subr.bf16.mxu1 %v11749_v29 }
0x20dc   :  { %v6552_v35 = vpop.f32.mrf.mxu0 }
0x20dd   :  { %v6558_v36 = vpack.c.bf16 %v6552_v35, %v6552_v35  ;;  %v13068_v35 = vld [vmem:[#allocation4 + $0x210] ss:$8 sps:$4 sm:$0xff]  }
0x20de   :  { %v10976_v28 = vpop.f32.mrf.mxu0 }
0x20df   :  { %v6609_v38 = vsel %vm562_vm0, %v6558_v36, 0  ;;  %v13072_v36 = vld [vmem:[#allocation4 + $0x200] ss:$8 sps:$4 sm:$0xff]  }
0x20e0   :  { %v6555_v39 = vpop.f32.mrf.mxu0  ;;  %10991 = vmatpush3.bf16.msra.mxu0 %v6609_v38  ;;  %v11481_v38 = vld [vmem:[#allocation7 + $0x1a0] ss:$8 sps:$4 sm:$0xff]  }
0x20e1   :  { %11002 = vmatprep.subr.bf16.mxu0 %v11749_v29 }
0x20e2   :  { %v10977_v41 = vpop.f32.mrf.mxu0 }
0x20e3   :  { %10993 = vmatmul.mubr.msk.bf16.vlgmr.msra.gmra.mxu0 %vm558_vm1, %v6604_v60  ;;  %v11482_v41 = vld [vmem:[#allocation7 + $0x190] ss:$8 sps:$4 sm:$0xff]  }
0x20e4   :  { %11004 = vmatprep.mubr.msk.bf16.mxu0 %vm11750_vm2, %v11749_v29 }
0x20f0   :  { %v6507_v30 = vpop.f32.mrf.mxu1 }
0x20f1   :  { %v6513_v63 = vadd.f32 %v6507_v30, %v6464_v27  ;;  %v13046_v27 = vld [vmem:[#allocation4 + $0x260] ss:$8 sps:$4 sm:$0xff]  }
0x20f2   :  { %v10964_v34 = vpop.f32.mrf.mxu1 }
0x20f4   :  { %v6510_v42 = vpop.f32.mrf.mxu1 }
0x20f5   :  { %v6895_v42 = vpop.permute.xlu0 %6894 }
0x20f6   :  { %v10965_v6 = vpop.f32.mrf.mxu1 }
0x2100   :  { %v6593_v43 = vpop.f32.mrf.mxu1 }
0x2101   :  { %v6599_v45 = vpack.c.bf16 %v6593_v43, %v6593_v43 }
0x2102   :  { %v10988_v48 = vpop.f32.mrf.mxu1 }
0x2103   :  { %v6712_v50 = vsel %vm562_vm0, %v6599_v45, 0 }
0x2104   :  { %v6596_v40 = vpop.f32.mrf.mxu1  ;;  %11003 = vmatpush3.bf16.msra.mxu0 %v6712_v50 }
0x2105   :  { %11020 = vmatprep.subr.bf16.mxu0 %v11749_v29 }
0x2106   :  { %v10989_v54 = vpop.f32.mrf.mxu1 }
0x2107   :  { %11005 = vmatmul.mubr.msk.bf16.vlgmr.msra.gmra.mxu0 %vm558_vm1, %v6707_v52 }
0x2108   :  { %11021 = vmatpush3.bf16.msra.mxu0 %v12913_v58  ;;  %11028 = vmatprep.mubr.msk.bf16.mxu0 %vm11750_vm2, %v11749_v29  ;;  %v6696_v62 = vpop.f32.mrf.mxu1 }
0x2109   :  { %11022 = vmatprep.subr.bf16.mxu0 %v11749_v29 }
0x210a   :  { %v11000_v7 = vpop.f32.mrf.mxu1 }
0x210c   :  { %11023 = vmatpush3.bf16.msra.mxu0 %v12917_v13  ;;  %v6699_v58 = vpop.f32.mrf.mxu1 }
0x210d   :  { %11024 = vmatprep.subr.bf16.mxu0 %v11749_v29  ;;  %v13083_v58 = vld [vmem:[#allocation4 + $0x370] ss:$8 sps:$4 sm:$0xff]  }
0x210e   :  { %v11001_v49 = vpop.f32.mrf.mxu1 }
0x2110   :  { %11025 = vmatpush3.bf16.msra.mxu0 %v12923_v46 }
0x2111   :  { %11026 = vmatprep.subr.bf16.mxu0 %v11749_v29 }
0x2114   :  { %11027 = vmatpush3.bf16.msra.mxu0 %v12927_v51 }
0x2115   :  { %11038 = vmatprep.subr.bf16.mxu0 %v11749_v29 }
0x21a3   :  { %v6645_v0 = vpop.f32.mrf.mxu0 }
0x21a4   :  { %v6651_v8 = vadd.f32 %v6645_v0, %v6513_v63  ;;  %v11483_v63 = vld [vmem:[#allocation7 + $0x180] ss:$8 sps:$4 sm:$0xff]  }
0x21a5   :  { %v10994_v17 = vpop.f32.mrf.mxu0 }
0x21a6   :  { %v6702_v13 = vadd.f32 %v6696_v62, %v6651_v8  ;;  %v13087_v17 = vld [vmem:[#allocation4 + $0x360] ss:$8 sps:$4 sm:$0xff]   ;;  %v13101_v8 = vld [vmem:[#allocation4 + $0x330] ss:$8 sps:$4 sm:$0xff]  }
0x21a7   :  { %v6648_v1 = vpop.f32.mrf.mxu0 }
0x21a8   :  { %v13093_v1 = vld [vmem:[#allocation4 + $0x350] ss:$8 sps:$4 sm:$0xff]  }
0x21a9   :  { %v10995_v61 = vpop.f32.mrf.mxu0 }
0x21aa   :  { %v13097_v61 = vld [vmem:[#allocation4 + $0x340] ss:$8 sps:$4 sm:$0xff]  }
0x21c7   :  { %v6748_v9 = vpop.f32.mrf.mxu0 }
0x21c8   :  { %v6754_v16 = vadd.f32 %v6748_v9, %v6702_v13  ;;  %v13105_v13 = vld [vmem:[#allocation4 + $0x320] ss:$8 sps:$4 sm:$0xff]   ;;  %v13109_v9 = vld [vmem:[#allocation4 + $0x310] ss:$8 sps:$4 sm:$0xff]  }
0x21c9   :  { %v11006_v3 = vpop.f32.mrf.mxu0 }
0x21ca   :  { %v6755_v46 = vmax.f32 %v6754_v16, 0.0  ;;  %v13113_v3 = vld [vmem:[#allocation4 + $0x300] ss:$8 sps:$4 sm:$0xff]  }
0x21cb   :  { %v6751_v37 = vpop.f32.mrf.mxu0 }
0x21cc   :  { %v6758_v11 = vpack.c.bf16 %v6755_v46, %v6755_v46 }
0x21cd   :  { %v11007_v5 = vpop.f32.mrf.mxu0 }
0x21ce   :  { %11017 = vmatmul.mubr.msk.bf16.vlgmr.msra.gmra.mxu1 %vm2189_vm3, %v6758_v11  ;;  %11029 = vmatmul.mubr.msk.bf16.vlgmr.msra.gmra.mxu0 %vm2189_vm3, %v6758_v11  ;;  %v6903_v51 = vsel %vm562_vm0, %v6758_v11, 0 }
0x21cf   :  { %11039 = vmatpush3.bf16.msra.mxu0 %v6903_v51  ;;  %11034 = vmatprep.mubr.msk.bf16.mxu1 %vm11750_vm2, %v11749_v29 }
0x21d0   :  { %11040 = vmatprep.mubr.msk.bf16.mxu0 %vm11750_vm2, %v11749_v29  ;;  %11050 = vmatprep.subr.bf16.mxu0 %v11749_v29 }
0x21d6   :  { %11041 = vmatmul.mubr.msk.bf16.vlgmr.msra.gmra.mxu0 %vm558_vm1, %v9650_v14  ;;  %v11646_v14 = vld [vmem:[%s13648_s1 + $0xd8] sm:$0x3] }
0x21d7   :  { %11058 = vmatprep.mubr.msk.bf16.mxu0 %vm11750_vm2, %v11749_v29  ;;  %11051 = vmatpush3.bf16.msra.mxu0 %v11480_v15  ;;  %v7345_v15 = vsel %vm562_vm0, %v12322_v4, 0 }
0x21d8   :  { %11052 = vmatprep.subr.bf16.mxu0 %v11749_v29 }
0x21db   :  { %11053 = vmatpush3.bf16.msra.mxu0 %v11481_v38 }
0x21dc   :  { %11054 = vmatprep.subr.bf16.mxu0 %v11749_v29 }
0x21df   :  { %11055 = vmatpush3.bf16.msra.mxu0 %v11482_v41  ;;  %v11648_v41 = vld [vmem:[%s13648_s1 + $0xe0] sm:$0x3] }
0x21e0   :  { %11056 = vmatprep.subr.bf16.mxu0 %v11749_v29 }
0x21e3   :  { %11057 = vmatpush3.bf16.msra.mxu0 %v11483_v63 }
0x21e4   :  { %11082 = vmatprep.subr.bf16.mxu0 %v11749_v29 }
0x228e   :  { %v6796_v10 = vpop.f32.mrf.mxu1  ;;  %v6837_v53 = vpop.f32.mrf.mxu0 }
0x228f   :  { %v6802_v18 = vpack.c.bf16 %v6796_v10, %v6796_v10  ;;  %v6843_v20 = vpack.c.bf16 %v6837_v53, %v6837_v53  ;;  %v11647_v10 = vld [vmem:[%s13648_s1 + $0xdc] sm:$0x3] }
0x2290   :  { %v11018_v31 = vpop.f32.mrf.mxu1  ;;  %v11030_v19 = vpop.f32.mrf.mxu0 }
0x2291   :  { %v6850_v57 = vsel %vm562_vm0, %v6802_v18, 0  ;;  %v6952_v55 = vsel %vm562_vm0, %v6843_v20, 0 }
0x2292   :  { %v6799_v21 = vpop.f32.mrf.mxu1  ;;  %v6840_v22 = vpop.f32.mrf.mxu0  ;;  %11033 = vmatpush3.bf16.msra.mxu1 %v6850_v57 }
0x2293   :  { %11044 = vmatprep.subr.bf16.mxu1 %v11749_v29  ;;  %v7576_v57 = vpop.permute.xlu0 %7575 }
0x2294   :  { %v11019_v24 = vpop.f32.mrf.mxu1  ;;  %v11031_v25 = vpop.f32.mrf.mxu0 }
0x2295   :  { %11035 = vmatmul.mubr.msk.bf16.vlgmr.msra.gmra.mxu1 %vm558_vm1, %v9648_v23 }
0x2296   :  { %11045 = vmatpush3.bf16.msra.mxu1 %v6952_v55  ;;  %11046 = vmatprep.mubr.msk.bf16.mxu1 %vm11750_vm2, %v11749_v29  ;;  %v6939_v28 = vpop.f32.mrf.mxu0 }
0x2297   :  { %11062 = vmatprep.subr.bf16.mxu1 %v11749_v29 }
0x2298   :  { %v11042_v39 = vpop.f32.mrf.mxu0 }
0x229a   :  { %v6942_v60 = vpop.f32.mrf.mxu0 }
0x229c   :  { %v11043_v30 = vpop.f32.mrf.mxu0 }
0x229d   :  { %11047 = vmatmul.mubr.msk.bf16.vlgmr.msra.gmra.mxu1 %vm558_vm1, %v9652_v26 }
0x229e   :  { %11063 = vmatpush3.bf16.msra.mxu1 %v13042_v56  ;;  %11078 = vmatprep.mubr.msk.bf16.mxu1 %vm11750_vm2, %v11749_v29 }
0x229f   :  { %11064 = vmatprep.subr.bf16.mxu1 %v11749_v29 }
0x22a2   :  { %11065 = vmatpush3.bf16.msra.mxu1 %v13046_v27 }
0x22a3   :  { %11066 = vmatprep.subr.bf16.mxu1 %v11749_v29 }
0x22a6   :  { %11067 = vmatpush3.bf16.msra.mxu1 %v13052_v59 }
0x22a7   :  { %11068 = vmatprep.subr.bf16.mxu1 %v11749_v29 }
0x22aa   :  { %11069 = vmatpush3.bf16.msra.mxu1 %v13056_v32 }
0x22ab   :  { %11070 = vmatprep.subr.bf16.mxu1 %v11749_v29 }
0x22ae   :  { %11071 = vmatpush3.bf16.msra.mxu1 %v13060_v2 }
0x22af   :  { %11072 = vmatprep.subr.bf16.mxu1 %v11749_v29 }
0x22b2   :  { %11073 = vmatpush3.bf16.msra.mxu1 %v13064_v33 }
0x22b3   :  { %11074 = vmatprep.subr.bf16.mxu1 %v11749_v29 }
0x22b6   :  { %11075 = vmatpush3.bf16.msra.mxu1 %v13068_v35 }
0x22b7   :  { %11076 = vmatprep.subr.bf16.mxu1 %v11749_v29 }
0x22ba   :  { %11077 = vmatpush3.bf16.msra.mxu1 %v13072_v36 }
0x22bb   :  { %11102 = vmatprep.subr.bf16.mxu1 %v11749_v29 }
0x22bd   :  { %11079 = vmatmul.mubr.bf16.vlgmr.msra.gmra.mxu1 %v12322_v4 }
0x22be   :  { %11104 = vmatprep.mubr.msk.bf16.mxu1 %vm11750_vm2, %v11749_v29 }
0x2355   :  { %v6886_v34 = vpop.f32.mrf.mxu1 }
0x2356   :  { %v6897_v43 = vadd.f32 %v6895_v42, %v6886_v34 }
0x2357   :  { %v11036_v6 = vpop.f32.mrf.mxu1 }
0x2358   :  { %v6945_v50 = vadd.f32 %v6939_v28, %v6897_v43  ;;  %v7336_v28 = vpop.permute.xlu0 %7335 }
0x2359   :  { %v6889_v45 = vpop.f32.mrf.mxu1 }
0x235b   :  { %v11037_v48 = vpop.f32.mrf.mxu1 }
0x235d   :  { %v6988_v40 = vpop.f32.mrf.mxu1 }
0x235e   :  { %v6994_v52 = vadd.f32 %v6988_v40, %v6945_v50 }
0x235f   :  { %v11048_v54 = vpop.f32.mrf.mxu1 }
0x2360   :  { %v6995_v62 = vmax.f32 %v6994_v52, 0.0 }
0x2361   :  { %v6991_v7 = vpop.f32.mrf.mxu1 }
0x2362   :  { %v6996_v49 = vpack.c.bf16 %v6995_v62, %v6995_v62 }
0x2363   :  { %v11049_v0 = vpop.f32.mrf.mxu1 }
0x2364   :  { %11059 = vmatmul.mubr.msk.bf16.vlgmr.msra.gmra.mxu0 %vm2189_vm3, %v6996_v49 }
0x2365   :  { %11083 = vmatpush3.bf16.msra.mxu0 %v13083_v58  ;;  %11098 = vmatprep.mubr.msk.bf16.mxu0 %vm11750_vm2, %v11749_v29 }
0x2366   :  { %11084 = vmatprep.subr.bf16.mxu0 %v11749_v29 }
0x2369   :  { %11085 = vmatpush3.bf16.msra.mxu0 %v13087_v17 }
0x236a   :  { %11086 = vmatprep.subr.bf16.mxu0 %v11749_v29 }
0x236d   :  { %11087 = vmatpush3.bf16.msra.mxu0 %v13093_v1 }
0x236e   :  { %11088 = vmatprep.subr.bf16.mxu0 %v11749_v29 }
0x2371   :  { %11089 = vmatpush3.bf16.msra.mxu0 %v13097_v61 }
0x2372   :  { %11090 = vmatprep.subr.bf16.mxu0 %v11749_v29 }
0x2375   :  { %11091 = vmatpush3.bf16.msra.mxu0 %v13101_v8 }
0x2376   :  { %11092 = vmatprep.subr.bf16.mxu0 %v11749_v29 }
0x2379   :  { %11093 = vmatpush3.bf16.msra.mxu0 %v13105_v13 }
0x237a   :  { %11094 = vmatprep.subr.bf16.mxu0 %v11749_v29 }
0x237d   :  { %v7189_v16 = vpop.f32.mrf.mxu1  ;;  %11095 = vmatpush3.bf16.msra.mxu0 %v13109_v9 }
0x237e   :  { %v7195_v46 = vpack.c.bf16 %v7189_v16, %v7189_v16  ;;  %11096 = vmatprep.subr.bf16.mxu0 %v11749_v29 }
0x237f   :  { %v11080_v37 = vpop.f32.mrf.mxu1 }
0x2380   :  { %v7291_v11 = vsel %vm562_vm0, %v7195_v46, 0 }
0x2381   :  { %v7192_v5 = vpop.f32.mrf.mxu1  ;;  %11097 = vmatpush3.bf16.msra.mxu0 %v13113_v3  ;;  %11103 = vmatpush3.bf16.msra.mxu1 %v7291_v11 }
0x2382   :  { %11108 = vmatprep.subr.bf16.mxu1 %v11749_v29  ;;  %11114 = vmatprep.subr.bf16.mxu0 %v11749_v29 }
0x2383   :  { %v11081_v51 = vpop.f32.mrf.mxu1 }
0x2384   :  { %11099 = vmatmul.mubr.bf16.vlgmr.msra.gmra.mxu0 %v12322_v4  ;;  %11105 = vmatmul.mubr.msk.bf16.vlgmr.msra.gmra.mxu1 %vm558_vm1, %v11646_v14 }
0x2385   :  { %11109 = vmatpush3.bf16.msra.mxu1 %v7345_v15  ;;  %11110 = vmatprep.mubr.msk.bf16.mxu1 %vm11750_vm2, %v11749_v29 }
0x2386   :  { %11120 = vmatprep.subr.bf16.mxu1 %v11749_v29  ;;  %11116 = vmatprep.mubr.msk.bf16.mxu0 %vm11750_vm2, %v11749_v29 }
0x238c   :  { %11111 = vmatmul.mubr.msk.bf16.vlgmr.msra.gmra.mxu1 %vm558_vm1, %v11647_v10 }
0x238d   :  { %11121 = vmatpush3.bf16.msra.mxu1 %v13042_v56  ;;  %11136 = vmatprep.mubr.msk.bf16.mxu1 %vm11750_vm2, %v11749_v29 }
0x238e   :  { %11122 = vmatprep.subr.bf16.mxu1 %v11749_v29 }
0x2391   :  { %11123 = vmatpush3.bf16.msra.mxu1 %v13046_v27 }
0x2392   :  { %11124 = vmatprep.subr.bf16.mxu1 %v11749_v29 }
0x2395   :  { %11125 = vmatpush3.bf16.msra.mxu1 %v13052_v59 }
0x2396   :  { %11126 = vmatprep.subr.bf16.mxu1 %v11749_v29 }
0x2399   :  { %11127 = vmatpush3.bf16.msra.mxu1 %v13056_v32 }
0x239a   :  { %11128 = vmatprep.subr.bf16.mxu1 %v11749_v29 }
0x239d   :  { %11129 = vmatpush3.bf16.msra.mxu1 %v13060_v2 }
0x239e   :  { %11130 = vmatprep.subr.bf16.mxu1 %v11749_v29 }
0x23a1   :  { %11131 = vmatpush3.bf16.msra.mxu1 %v13064_v33 }
0x23a2   :  { %11132 = vmatprep.subr.bf16.mxu1 %v11749_v29 }
0x23a5   :  { %11133 = vmatpush3.bf16.msra.mxu1 %v13068_v35 }
0x23a6   :  { %11134 = vmatprep.subr.bf16.mxu1 %v11749_v29 }
0x23a9   :  { %11135 = vmatpush3.bf16.msra.mxu1 %v13072_v36 }
0x23aa   :  { %11160 = vmatprep.subr.bf16.mxu1 %v11749_v29 }
0x2424   :  { %v7067_v4 = vpop.f32.mrf.mxu0 }
0x2425   :  { %v7437_v53 = vpack.c.bf16 %v7067_v4, %v7067_v4 }
0x2426   :  { %v11060_v18 = vpop.f32.mrf.mxu0 }
0x2427   :  { %11137 = vmatmul.mubr.bf16.vlgmr.msra.gmra.mxu1 %v7437_v53  ;;  %v7581_v43 = vsel %vm562_vm0, %v7437_v53, 0 }
0x2428   :  { %v7070_v31 = vpop.f32.mrf.mxu0  ;;  %11162 = vmatprep.mubr.msk.bf16.mxu1 %vm11750_vm2, %v11749_v29 }
0x2429   :  { %v11540_v31 = vld [vmem:[#allocation7 + $0x270] ss:$8 sps:$4 sm:$0xff]  }
0x242a   :  { %v11061_v19 = vpop.f32.mrf.mxu0 }
0x242b   :  { %v11542_v19 = vld [vmem:[#allocation7 + $0x274] ss:$8 sps:$4 sm:$0xff]  }
0x2444   :  { %v7278_v20 = vpop.f32.mrf.mxu0  ;;  %v7327_v21 = vpop.f32.mrf.mxu1 }
0x2445   :  { %v7284_v22 = vpack.c.bf16 %v7278_v20, %v7278_v20  ;;  %v7338_v60 = vadd.f32 %v7336_v28, %v7327_v21  ;;  %v11543_v20 = vld [vmem:[#allocation7 + $0x260] ss:$8 sps:$4 sm:$0xff]   ;;  %v11548_v21 = vld [vmem:[#allocation7 + $0x254] ss:$8 sps:$4 sm:$0xff]  }
0x2446   :  { %v11100_v23 = vpop.f32.mrf.mxu0  ;;  %v11106_v24 = vpop.f32.mrf.mxu1 }
0x2447   :  { %v7394_v25 = vsel %vm562_vm0, %v7284_v22, 0  ;;  %v11546_v22 = vld [vmem:[#allocation7 + $0x250] ss:$8 sps:$4 sm:$0xff]   ;;  %v11551_v23 = vld [vmem:[#allocation7 + $0x244] ss:$8 sps:$4 sm:$0xff]  }
0x2448   :  { %v7281_v55 = vpop.f32.mrf.mxu0  ;;  %v7330_v26 = vpop.f32.mrf.mxu1  ;;  %11115 = vmatpush3.bf16.msra.mxu0 %v7394_v25  ;;  %v11549_v24 = vld [vmem:[#allocation7 + $0x240] ss:$8 sps:$4 sm:$0xff]   ;;  %v11554_v25 = vld [vmem:[#allocation7 + $0x234] ss:$8 sps:$4 sm:$0xff]  }
0x2449   :  { %11140 = vmatprep.subr.bf16.mxu0 %v11749_v29  ;;  %v11552_v55 = vld [vmem:[#allocation7 + $0x230] ss:$8 sps:$4 sm:$0xff]  }
0x244a   :  { %v11101_v38 = vpop.f32.mrf.mxu0  ;;  %v11107_v39 = vpop.f32.mrf.mxu1 }
0x244b   :  { %11117 = vmatmul.mubr.msk.bf16.vlgmr.msra.gmra.mxu0 %vm558_vm1, %v11648_v41 }
0x244c   :  { %v7381_v30 = vpop.f32.mrf.mxu1  ;;  %11141 = vmatpush3.bf16.msra.mxu0 %v13083_v58  ;;  %11156 = vmatprep.mubr.msk.bf16.mxu0 %vm11750_vm2, %v11749_v29 }
0x244d   :  { %v7387_v63 = vadd.f32 %v7381_v30, %v7338_v60  ;;  %11142 = vmatprep.subr.bf16.mxu0 %v11749_v29 }
0x244e   :  { %v11112_v34 = vpop.f32.mrf.mxu1 }
0x2450   :  { %11143 = vmatpush3.bf16.msra.mxu0 %v13087_v17  ;;  %v7384_v42 = vpop.f32.mrf.mxu1 }
0x2451   :  { %11144 = vmatprep.subr.bf16.mxu0 %v11749_v29  ;;  %v9689_v42 = vld [vmem:[%s13648_s1 + $0xe4] sm:$0x3] }
0x2452   :  { %v11113_v6 = vpop.f32.mrf.mxu1 }
0x2453   :  { %v13244_v6 = vld [vmem:[#allocation4 + $0x74] ss:$8 sps:$4 sm:$0xff]  }
0x2454   :  { %11145 = vmatpush3.bf16.msra.mxu0 %v13093_v1 }
0x2455   :  { %11146 = vmatprep.subr.bf16.mxu0 %v11749_v29 }
0x2458   :  { %11147 = vmatpush3.bf16.msra.mxu0 %v13097_v61 }
0x2459   :  { %11148 = vmatprep.subr.bf16.mxu0 %v11749_v29 }
0x245c   :  { %11149 = vmatpush3.bf16.msra.mxu0 %v13101_v8 }
0x245d   :  { %11150 = vmatprep.subr.bf16.mxu0 %v11749_v29 }
0x2460   :  { %11151 = vmatpush3.bf16.msra.mxu0 %v13105_v13 }
0x2461   :  { %11152 = vmatprep.subr.bf16.mxu0 %v11749_v29 }
0x2464   :  { %11153 = vmatpush3.bf16.msra.mxu0 %v13109_v9 }
0x2465   :  { %11154 = vmatprep.subr.bf16.mxu0 %v11749_v29 }
0x2468   :  { %11155 = vmatpush3.bf16.msra.mxu0 %v13113_v3 }
0x2469   :  { %11166 = vmatprep.subr.bf16.mxu0 %v11749_v29 }
0x246b   :  { %11157 = vmatmul.mubr.bf16.vlgmr.msra.gmra.mxu0 %v7437_v53 }
0x246c   :  { %11167 = vmatpush3.bf16.msra.mxu0 %v7581_v43  ;;  %11168 = vmatprep.mubr.msk.bf16.mxu0 %vm11750_vm2, %v11749_v29 }
0x246d   :  { %11178 = vmatprep.subr.bf16.mxu0 %v11749_v29 }
0x2473   :  { %11169 = vmatmul.mubr.msk.bf16.vlgmr.msra.gmra.mxu0 %vm558_vm1, %v7576_v57  ;;  %v11545_v57 = vld [vmem:[#allocation7 + $0x264] ss:$8 sps:$4 sm:$0xff]  }
0x2474   :  { %11179 = vmatpush3.bf16.msra.mxu0 %v13042_v56  ;;  %11194 = vmatprep.mubr.msk.bf16.mxu0 %vm11750_vm2, %v11749_v29 }
0x2475   :  { %11180 = vmatprep.subr.bf16.mxu0 %v11749_v29 }
0x2478   :  { %11181 = vmatpush3.bf16.msra.mxu0 %v13046_v27 }
0x2479   :  { %11182 = vmatprep.subr.bf16.mxu0 %v11749_v29 }
0x247c   :  { %11183 = vmatpush3.bf16.msra.mxu0 %v13052_v59 }
0x247d   :  { %11184 = vmatprep.subr.bf16.mxu0 %v11749_v29 }
0x2480   :  { %11185 = vmatpush3.bf16.msra.mxu0 %v13056_v32 }
0x2481   :  { %11186 = vmatprep.subr.bf16.mxu0 %v11749_v29 }
0x2484   :  { %11187 = vmatpush3.bf16.msra.mxu0 %v13060_v2 }
0x2485   :  { %11188 = vmatprep.subr.bf16.mxu0 %v11749_v29 }
0x2488   :  { %11189 = vmatpush3.bf16.msra.mxu0 %v13064_v33  ;;  %v7524_v33 = vpop.permute.xlu1 %7523 }
0x2489   :  { %11190 = vmatprep.subr.bf16.mxu0 %v11749_v29 }
0x248c   :  { %11191 = vmatpush3.bf16.msra.mxu0 %v13068_v35  ;;  %v7628_v0 = vpop.permute.xlu1 %7627 }
0x248d   :  { %11192 = vmatprep.subr.bf16.mxu0 %v11749_v29 }
0x2490   :  { %11193 = vmatpush3.bf16.msra.mxu0 %v13072_v36 }
0x2491   :  { %11218 = vmatprep.subr.bf16.mxu0 %v11749_v29 }
0x24e7   :  { %v7472_v56 = vpop.f32.mrf.mxu1 }
0x24e8   :  { %v7478_v27 = vpack.c.bf16 %v7472_v56, %v7472_v56 }
0x24e9   :  { %v11138_v59 = vpop.f32.mrf.mxu1 }
0x24ea   :  { %v7529_v32 = vsel %vm562_vm0, %v7478_v27, 0  ;;  %v13251_v59 = vld [vmem:[#allocation4 + $0x70] ss:$8 sps:$4 sm:$0xff]  }
0x24eb   :  { %v7475_v2 = vpop.f32.mrf.mxu1  ;;  %11161 = vmatpush3.bf16.msra.mxu1 %v7529_v32  ;;  %v9693_v32 = vld [vmem:[%s13648_s1 + $0xec] sm:$0x3] }
0x24ec   :  { %11172 = vmatprep.subr.bf16.mxu1 %v11749_v29  ;;  %v13256_v2 = vld [vmem:[#allocation4 + $0x64] ss:$8 sps:$4 sm:$0xff]  }
0x24ed   :  { %v11139_v45 = vpop.f32.mrf.mxu1 }
0x24ee   :  { %11163 = vmatmul.mubr.msk.bf16.vlgmr.msra.gmra.mxu1 %vm558_vm1, %v7524_v33  ;;  %v13261_v33 = vld [vmem:[#allocation4 + $0x60] ss:$8 sps:$4 sm:$0xff]   ;;  %v13267_v45 = vld [vmem:[#allocation4 + $0x50] ss:$8 sps:$4 sm:$0xff]  }
0x24ef   :  { %11174 = vmatprep.mubr.msk.bf16.mxu1 %vm11750_vm2, %v11749_v29 }
0x250b   :  { %v7430_v35 = vpop.f32.mrf.mxu0 }
0x250c   :  { %v7436_v36 = vadd.f32 %v7430_v35, %v7387_v63  ;;  %v13270_v35 = vld [vmem:[#allocation4 + $0x44] ss:$8 sps:$4 sm:$0xff]  }
0x250d   :  { %v11118_v48 = vpop.f32.mrf.mxu0 }
0x250e   :  { %v13276_v48 = vld [vmem:[#allocation4 + $0x34] ss:$8 sps:$4 sm:$0xff]  }
0x250f   :  { %v7433_v50 = vpop.f32.mrf.mxu0 }
0x2510   :  { %v13279_v50 = vld [vmem:[#allocation4 + $0x30] ss:$8 sps:$4 sm:$0xff]  }
0x2511   :  { %v11119_v40 = vpop.f32.mrf.mxu0 }
0x2512   :  { %v13282_v40 = vld [vmem:[#allocation4 + $0x24] ss:$8 sps:$4 sm:$0xff]  }
0x252b   :  { %v7513_v52 = vpop.f32.mrf.mxu0 }
0x252c   :  { %v7519_v54 = vpack.c.bf16 %v7513_v52, %v7513_v52  ;;  %v13285_v52 = vld [vmem:[#allocation4 + $0x20] ss:$8 sps:$4 sm:$0xff]  }
0x252d   :  { %v11158_v62 = vpop.f32.mrf.mxu0 }
0x252e   :  { %v7633_v7 = vsel %vm562_vm0, %v7519_v54, 0  ;;  %v13288_v54 = vld [vmem:[#allocation4 + $0x14] ss:$8 sps:$4 sm:$0xff]   ;;  %v13291_v62 = vld [vmem:[#allocation4 + $0x10] ss:$8 sps:$4 sm:$0xff]  }
0x252f   :  { %v7516_v49 = vpop.f32.mrf.mxu0  ;;  %11173 = vmatpush3.bf16.msra.mxu1 %v7633_v7  ;;  %v13294_v7 = vld [vmem:[#allocation4 + $0x4] ss:$8 sps:$4 sm:$0xff]  }
0x2530   :  { %11198 = vmatprep.subr.bf16.mxu1 %v11749_v29  ;;  %v13297_v49 = vld [vmem:[#allocation4] ss:$8 sps:$4 sm:$0xff]  }
0x2531   :  { %v11159_v16 = vpop.f32.mrf.mxu0 }
0x2532   :  { %11175 = vmatmul.mubr.msk.bf16.vlgmr.msra.gmra.mxu1 %vm558_vm1, %v7628_v0  ;;  %v13300_v0 = vld [vmem:[#allocation4 + $0xf4] ss:$8 sps:$4 sm:$0xff]   ;;  %v13303_v16 = vld [vmem:[#allocation4 + $0xf0] ss:$8 sps:$4 sm:$0xff]  }
0x2533   :  { %v7617_v46 = vpop.f32.mrf.mxu0  ;;  %11199 = vmatpush3.bf16.msra.mxu1 %v13083_v58  ;;  %11214 = vmatprep.mubr.msk.bf16.mxu1 %vm11750_vm2, %v11749_v29 }
0x2534   :  { %11200 = vmatprep.subr.bf16.mxu1 %v11749_v29 }
0x2535   :  { %v11170_v37 = vpop.f32.mrf.mxu0 }
0x2536   :  { %v13309_v37 = vld [vmem:[#allocation4 + $0xe0] ss:$8 sps:$4 sm:$0xff]  }
0x2537   :  { %11201 = vmatpush3.bf16.msra.mxu1 %v13087_v17  ;;  %v7620_v11 = vpop.f32.mrf.mxu0 }
0x2538   :  { %11202 = vmatprep.subr.bf16.mxu1 %v11749_v29  ;;  %v13312_v11 = vld [vmem:[#allocation4 + $0xd4] ss:$8 sps:$4 sm:$0xff]  }
0x2539   :  { %v11171_v5 = vpop.f32.mrf.mxu0 }
0x253a   :  { %v13315_v5 = vld [vmem:[#allocation4 + $0xd0] ss:$8 sps:$4 sm:$0xff]  }
0x253b   :  { %11203 = vmatpush3.bf16.msra.mxu1 %v13093_v1 }
0x253c   :  { %11204 = vmatprep.subr.bf16.mxu1 %v11749_v29 }
0x253f   :  { %11205 = vmatpush3.bf16.msra.mxu1 %v13097_v61 }
0x2540   :  { %11206 = vmatprep.subr.bf16.mxu1 %v11749_v29 }
0x2543   :  { %11207 = vmatpush3.bf16.msra.mxu1 %v13101_v8 }
0x2544   :  { %11208 = vmatprep.subr.bf16.mxu1 %v11749_v29 }
0x2547   :  { %11209 = vmatpush3.bf16.msra.mxu1 %v13105_v13 }
0x2548   :  { %11210 = vmatprep.subr.bf16.mxu1 %v11749_v29 }
0x254b   :  { %11211 = vmatpush3.bf16.msra.mxu1 %v13109_v9 }
0x254c   :  { %11212 = vmatprep.subr.bf16.mxu1 %v11749_v29 }
0x254f   :  { %11213 = vmatpush3.bf16.msra.mxu1 %v13113_v3  ;;  %v9691_v3 = vld [vmem:[%s13648_s1 + $0xe8] sm:$0x3] }
0x2550   :  { %11224 = vmatprep.subr.bf16.mxu1 %v11749_v29 }
0x25ae   :  { %v7565_v58 = vpop.f32.mrf.mxu1 }
0x25af   :  { %v7571_v17 = vadd.f32 %v7565_v58, %v7436_v36  ;;  %v13273_v36 = vld [vmem:[#allocation4 + $0x40] ss:$8 sps:$4 sm:$0xff]   ;;  %v13318_v58 = vld [vmem:[#allocation4 + $0xc4] ss:$8 sps:$4 sm:$0xff]  }
0x25b0   :  { %v11164_v1 = vpop.f32.mrf.mxu1 }
0x25b1   :  { %v7623_v8 = vadd.f32 %v7617_v46, %v7571_v17  ;;  %v13306_v46 = vld [vmem:[#allocation4 + $0xe4] ss:$8 sps:$4 sm:$0xff]   ;;  %v13321_v17 = vld [vmem:[#allocation4 + $0xc0] ss:$8 sps:$4 sm:$0xff]   ;;  %v13324_v1 = vld [vmem:[#allocation4 + $0xb4] ss:$8 sps:$4 sm:$0xff]  }
0x25b2   :  { %v7568_v61 = vpop.f32.mrf.mxu1  ;;  %13688 = vst [vmem:[#allocation12_spill] sm:$0xff] %v13321_v17  ;;  %13689 = vst [vmem:[#allocation13_spill] sm:$0xff] %v13324_v1 }
0x25b3   :  { %v13327_v61 = vld [vmem:[#allocation4 + $0xb0] ss:$8 sps:$4 sm:$0xff]  }
0x25b4   :  { %v11165_v51 = vpop.f32.mrf.mxu1  ;;  %13690 = vst [vmem:[#allocation14_spill] sm:$0xff] %v13327_v61 }
0x25b5   :  { %v13330_v51 = vld [vmem:[#allocation4 + $0xa4] ss:$8 sps:$4 sm:$0xff]  }
0x25b6   :  { %13691 = vst [vmem:[#allocation15_spill] sm:$0xff] %v13330_v51 }
0x25f2   :  { %v7669_v14 = vpop.f32.mrf.mxu1 }
0x25f3   :  { %v7675_v15 = vadd.f32 %v7669_v14, %v7623_v8  ;;  %v13333_v8 = vld [vmem:[#allocation4 + $0xa0] ss:$8 sps:$4 sm:$0xff]   ;;  %v13336_v14 = vld [vmem:[#allocation4 + $0x94] ss:$8 sps:$4 sm:$0xff]  }
0x25f4   :  { %v11176_v10 = vpop.f32.mrf.mxu1  ;;  %13692 = vst [vmem:[#allocation16_spill] sm:$0xff] %v13333_v8  ;;  %13693 = vst [vmem:[#allocation17_spill] sm:$0xff] %v13336_v14 }
0x25f5   :  { %v7676_v13 = vmax.f32 %v7675_v15, 0.0  ;;  %v13339_v15 = vld [vmem:[#allocation4 + $0x90] ss:$8 sps:$4 sm:$0xff]   ;;  %v13342_v10 = vld [vmem:[#allocation4 + $0x84] ss:$8 sps:$4 sm:$0xff]  }
0x25f6   :  { %v7672_v4 = vpop.f32.mrf.mxu1  ;;  %13694 = vst [vmem:[#allocation18_spill] sm:$0xff] %v13339_v15  ;;  %13695 = vst [vmem:[#allocation19_spill] sm:$0xff] %v13342_v10 }
0x25f7   :  { %v7679_v53 = vpack.c.bf16 %v7676_v13, %v7676_v13  ;;  %v13345_v13 = vld [vmem:[#allocation4 + $0x80] ss:$8 sps:$4 sm:$0xff]  }
0x25f8   :  { %v11177_v18 = vpop.f32.mrf.mxu1  ;;  %13696 = vst [vmem:[#allocation20_spill] sm:$0xff] %v13345_v13 }
0x25f9   :  { %11195 = vmatmul.mubr.bf16.vlgmr.msra.gmra.mxu0 %v7679_v53  ;;  %11215 = vmatmul.mubr.bf16.vlgmr.msra.gmra.mxu1 %v7679_v53  ;;  %v7822_v9 = vsel %vm562_vm0, %v7679_v53, 0  ;;  %v11557_v53 = vld [vmem:[#allocation7 + $0x224] ss:$8 sps:$4 sm:$0xff]   ;;  %v11555_v18 = vld [vmem:[#allocation7 + $0x220] ss:$8 sps:$4 sm:$0xff]  }
0x25fa   :  { %11225 = vmatpush3.bf16.msra.mxu1 %v7822_v9  ;;  %11220 = vmatprep.mubr.msk.bf16.mxu0 %vm11750_vm2, %v11749_v29 }
0x25fb   :  { %11226 = vmatprep.mubr.msk.bf16.mxu1 %vm11750_vm2, %v11749_v29  ;;  %8013 = vmatprep.subr.bf16.mxu1 %v11542_v19  ;;  %v11558_v19 = vld [vmem:[#allocation7 + $0x210] ss:$8 sps:$4 sm:$0xff]  }
0x2601   :  { %11227 = vmatmul.mubr.msk.bf16.vlgmr.msra.gmra.mxu1 %vm558_vm1, %v9691_v3 }
0x2602   :  { %8045 = vmatprep.mubr.bf16.mxu1 %v13655_v12  ;;  %8014 = vmatpush1.bf16.msra.mxu1 %v11540_v31  ;;  %v11560_v31 = vld [vmem:[#allocation7 + $0x214] ss:$8 sps:$4 sm:$0xff]  }
0x2603   :  { %8015 = vmatprep.subr.bf16.mxu1 %v11545_v57 }
0x2606   :  { %8016 = vmatpush1.bf16.msra.mxu1 %v11543_v20  ;;  %v11563_v20 = vld [vmem:[#allocation7 + $0x204] ss:$8 sps:$4 sm:$0xff]  }
0x2607   :  { %8017 = vmatprep.subr.bf16.mxu1 %v11548_v21  ;;  %v11561_v21 = vld [vmem:[#allocation7 + $0x200] ss:$8 sps:$4 sm:$0xff]  }
0x260a   :  { %8018 = vmatpush1.bf16.msra.mxu1 %v11546_v22  ;;  %v13351_v22 = vld [vmem:[#allocation4 + $0x174] ss:$8 sps:$4 sm:$0xff]  }
0x260b   :  { %8019 = vmatprep.subr.bf16.mxu1 %v11551_v23 }
0x260e   :  { %8020 = vmatpush1.bf16.msra.mxu1 %v11549_v24  ;;  %v7813_v24 = vpop.permute.xlu1 %7812 }
0x260f   :  { %8021 = vmatprep.subr.bf16.mxu1 %v11554_v25 }
0x2612   :  { %8022 = vmatpush1.bf16.msra.mxu1 %v11552_v55 }
0x2613   :  { %8023 = vmatprep.subr.bf16.mxu1 %v11557_v53  ;;  %v13369_v53 = vld [vmem:[#allocation4 + $0x144] ss:$8 sps:$4 sm:$0xff]  }
0x2616   :  { %8024 = vmatpush1.bf16.msra.mxu1 %v11555_v18  ;;  %v13372_v18 = vld [vmem:[#allocation4 + $0x140] ss:$8 sps:$4 sm:$0xff]  }
0x2617   :  { %8025 = vmatprep.subr.bf16.mxu1 %v11560_v31  ;;  %v13381_v31 = vld [vmem:[#allocation4 + $0x124] ss:$8 sps:$4 sm:$0xff]  }
0x261a   :  { %8026 = vmatpush1.bf16.msra.mxu1 %v11558_v19  ;;  %v13384_v19 = vld [vmem:[#allocation4 + $0x120] ss:$8 sps:$4 sm:$0xff]  }
0x261b   :  { %8027 = vmatprep.subr.bf16.mxu1 %v11563_v20  ;;  %v13390_v20 = vld [vmem:[#allocation4 + $0x110] ss:$8 sps:$4 sm:$0xff]  }
0x261e   :  { %8028 = vmatpush1.bf16.msra.mxu1 %v11561_v21  ;;  %v13393_v21 = vld [vmem:[#allocation4 + $0x104] ss:$8 sps:$4 sm:$0xff]  }
0x261f   :  { %8483 = vmatprep.subr.bf16.mxu1 %v13351_v22 }
0x26b9   :  { %v7714_v26 = vpop.f32.mrf.mxu0  ;;  %v7755_v28 = vpop.f32.mrf.mxu1 }
0x26ba   :  { %v7720_v38 = vpack.c.bf16 %v7714_v26, %v7714_v26  ;;  %v7761_v30 = vpack.c.bf16 %v7755_v28, %v7755_v28 }
0x26bb   :  { %v11196_v39 = vpop.f32.mrf.mxu0  ;;  %v11216_v60 = vpop.f32.mrf.mxu1 }
0x26bc   :  { %v7768_v41 = vsel %vm562_vm0, %v7720_v38, 0  ;;  %v7871_v27 = vsel %vm562_vm0, %v7761_v30, 0 }
0x26bd   :  { %v7717_v63 = vpop.f32.mrf.mxu0  ;;  %v7758_v34 = vpop.f32.mrf.mxu1  ;;  %11219 = vmatpush3.bf16.msra.mxu0 %v7768_v41 }
0x26be   :  { %11230 = vmatprep.subr.bf16.mxu0 %v11749_v29  ;;  %v13354_v34 = vld [vmem:[#allocation4 + $0x170] ss:$8 sps:$4 sm:$0xff]  }
0x26bf   :  { %v11197_v43 = vpop.f32.mrf.mxu0  ;;  %v11217_v56 = vpop.f32.mrf.mxu1 }
0x26c0   :  { %11221 = vmatmul.mubr.msk.bf16.vlgmr.msra.gmra.mxu0 %vm558_vm1, %v9689_v42  ;;  %v13356_v43 = vld [vmem:[#allocation4 + $0x164] ss:$8 sps:$4 sm:$0xff]  }
0x26c1   :  { %11231 = vmatpush3.bf16.msra.mxu0 %v7871_v27  ;;  %11232 = vmatprep.mubr.msk.bf16.mxu0 %vm11750_vm2, %v11749_v29  ;;  %v13264_v29 = vld [vmem:[#allocation4 + $0x54] ss:$8 sps:$4 sm:$0xff]   ;;  %v7858_v4 = vpop.f32.mrf.mxu1  ;;  %v13360_v27 = vld [vmem:[#allocation4 + $0x160] ss:$8 sps:$4 sm:$0xff]  }
0x26c2   :  { %8280 = vmatprep.subr.bf16.mxu0 %v13244_v6 }
0x26c3   :  { %v11228_v9 = vpop.f32.mrf.mxu1 }
0x26c4   :  { %v13375_v9 = vld [vmem:[#allocation4 + $0x134] ss:$8 sps:$4 sm:$0xff]  }
0x26c5   :  { %v7861_v3 = vpop.f32.mrf.mxu1 }
0x26c6   :  { %v13378_v3 = vld [vmem:[#allocation4 + $0x130] ss:$8 sps:$4 sm:$0xff]  }
0x26c7   :  { %v11229_v57 = vpop.f32.mrf.mxu1 }
0x26c8   :  { %11233 = vmatmul.mubr.msk.bf16.vlgmr.msra.gmra.mxu0 %vm558_vm1, %v9693_v32  ;;  %v13363_v32 = vld [vmem:[#allocation4 + $0x154] ss:$8 sps:$4 sm:$0xff]  }
0x26c9   :  { %8281 = vmatpush1.bf16.msra.mxu0 %v13251_v59  ;;  %8312 = vmatprep.mubr.bf16.mxu0 %v12076_v44  ;;  %v13387_v57 = vld [vmem:[#allocation4 + $0x114] ss:$8 sps:$4 sm:$0xff]  }
0x26ca   :  { %8282 = vmatprep.subr.bf16.mxu0 %v13256_v2 }
0x26cd   :  { %8283 = vmatpush1.bf16.msra.mxu0 %v13261_v33 }
0x26ce   :  { %8284 = vmatprep.subr.bf16.mxu0 %v13264_v29 }
0x26d1   :  { %8285 = vmatpush1.bf16.msra.mxu0 %v13267_v45 }
0x26d2   :  { %8286 = vmatprep.subr.bf16.mxu0 %v13270_v35 }
0x26d5   :  { %8287 = vmatpush1.bf16.msra.mxu0 %v13273_v36 }
0x26d6   :  { %8288 = vmatprep.subr.bf16.mxu0 %v13276_v48 }
0x26d9   :  { %8289 = vmatpush1.bf16.msra.mxu0 %v13279_v50 }
0x26da   :  { %8290 = vmatprep.subr.bf16.mxu0 %v13282_v40 }
0x26dd   :  { %8291 = vmatpush1.bf16.msra.mxu0 %v13285_v52 }
0x26de   :  { %8292 = vmatprep.subr.bf16.mxu0 %v13288_v54 }
0x26e1   :  { %8293 = vmatpush1.bf16.msra.mxu0 %v13291_v62 }
0x26e2   :  { %8294 = vmatprep.subr.bf16.mxu0 %v13294_v7 }
0x26e5   :  { %8295 = vmatpush1.bf16.msra.mxu0 %v13297_v49 }
0x26e6   :  { %8296 = vmatprep.subr.bf16.mxu0 %v13300_v0 }
0x26e9   :  { %8297 = vmatpush2.bf16.msra.mxu0 %v13303_v16 }
0x26ea   :  { %8298 = vmatprep.subr.bf16.mxu0 %v13306_v46 }
0x26ed   :  { %8299 = vmatpush2.bf16.msra.mxu0 %v13309_v37 }
0x26ee   :  { %8300 = vmatprep.subr.bf16.mxu0 %v13312_v11 }
0x26f1   :  { %8301 = vmatpush2.bf16.msra.mxu0 %v13315_v5 }
0x26f2   :  { %8302 = vmatprep.subr.bf16.mxu0 %v13318_v58 }
0x26f5   :  { %8303 = vmatpush2.bf16.msra.mxu0 %v13321_v17 }
0x26f6   :  { %8304 = vmatprep.subr.bf16.mxu0 %v13324_v1 }
0x26f9   :  { %8305 = vmatpush2.bf16.msra.mxu0 %v13327_v61 }
0x26fa   :  { %8306 = vmatprep.subr.bf16.mxu0 %v13330_v51 }
0x26fd   :  { %8307 = vmatpush2.bf16.msra.mxu0 %v13333_v8 }
0x26fe   :  { %8308 = vmatprep.subr.bf16.mxu0 %v13336_v14 }
0x2701   :  { %8309 = vmatpush2.bf16.msra.mxu0 %v13339_v15  ;;  %v13444_v15 = vld [vmem:[#allocation4 + $0x180] ss:$8 sps:$4 sm:$0xff]  }
0x2702   :  { %8310 = vmatprep.subr.bf16.mxu0 %v13342_v10  ;;  %13709 = vst [vmem:[#allocation33_spill] sm:$0xff] %v13444_v15 }
0x2705   :  { %8311 = vmatpush2.bf16.msra.mxu0 %v13345_v13  ;;  %v13441_v13 = vld [vmem:[#allocation4 + $0x184] ss:$8 sps:$4 sm:$0xff]  }
0x2706   :  { %13708 = vst [vmem:[#allocation32_spill] sm:$0xff] %v13441_v13 }
0x2708   :  { %8313 = vmatmul.mubr.bf16.vlgmr.msra.gmra.mxu0 %v12082_v47 }
0x2709   :  { %8569 = vmatprep.mubr.bf16.mxu0 %v13655_v12  ;;  %v13438_v12 = vld [vmem:[#allocation4 + $0x190] ss:$8 sps:$4 sm:$0xff]  }
0x270a   :  { %13707 = vst [vmem:[#allocation31_spill] sm:$0xff] %v13438_v12 }
0x2780   :  { %v7804_v23 = vpop.f32.mrf.mxu0 }
0x2781   :  { %v7815_v55 = vadd.f32 %v7813_v24, %v7804_v23  ;;  %v13396_v23 = vld [vmem:[#allocation4 + $0x100] ss:$8 sps:$4 sm:$0xff]   ;;  %v13399_v24 = vld [vmem:[#allocation4 + $0x1f4] ss:$8 sps:$4 sm:$0xff]  }
0x2782   :  { %v11222_v25 = vpop.f32.mrf.mxu0 }
0x2783   :  { %v7864_v38 = vadd.f32 %v7858_v4, %v7815_v55  ;;  %v13366_v4 = vld [vmem:[#allocation4 + $0x150] ss:$8 sps:$4 sm:$0xff]   ;;  %v13405_v55 = vld [vmem:[#allocation4 + $0x1e4] ss:$8 sps:$4 sm:$0xff]  }
0x2784   :  { %v7807_v26 = vpop.f32.mrf.mxu0  ;;  %v13402_v25 = vld [vmem:[#allocation4 + $0x1f0] ss:$8 sps:$4 sm:$0xff]  }
0x2785   :  { %v13408_v26 = vld [vmem:[#allocation4 + $0x1e0] ss:$8 sps:$4 sm:$0xff]  }
0x2786   :  { %v11223_v28 = vpop.f32.mrf.mxu0  ;;  %13697 = vst [vmem:[#allocation21_spill] sm:$0xff] %v13408_v26 }
0x2787   :  { %v13411_v28 = vld [vmem:[#allocation4 + $0x1d4] ss:$8 sps:$4 sm:$0xff]  }
0x2788   :  { %v7907_v39 = vpop.f32.mrf.mxu0  ;;  %13698 = vst [vmem:[#allocation22_spill] sm:$0xff] %v13411_v28 }
0x2789   :  { %v7913_v60 = vadd.f32 %v7907_v39, %v7864_v38  ;;  %v13414_v38 = vld [vmem:[#allocation4 + $0x1d0] ss:$8 sps:$4 sm:$0xff]   ;;  %v13417_v39 = vld [vmem:[#allocation4 + $0x1c4] ss:$8 sps:$4 sm:$0xff]  }
0x278a   :  { %v11234_v41 = vpop.f32.mrf.mxu0  ;;  %13699 = vst [vmem:[#allocation23_spill] sm:$0xff] %v13414_v38  ;;  %13700 = vst [vmem:[#allocation24_spill] sm:$0xff] %v13417_v39 }
0x278b   :  { %v7914_v30 = vmax.f32 %v7913_v60, 0.0  ;;  %v13420_v60 = vld [vmem:[#allocation4 + $0x1c0] ss:$8 sps:$4 sm:$0xff]   ;;  %v13423_v41 = vld [vmem:[#allocation4 + $0x1b4] ss:$8 sps:$4 sm:$0xff]  }
0x278c   :  { %v7910_v63 = vpop.f32.mrf.mxu0  ;;  %13701 = vst [vmem:[#allocation25_spill] sm:$0xff] %v13420_v60  ;;  %13702 = vst [vmem:[#allocation26_spill] sm:$0xff] %v13423_v41 }
0x278d   :  { %v7915_v42 = vpack.c.bf16 %v7914_v30, %v7914_v30  ;;  %v13426_v30 = vld [vmem:[#allocation4 + $0x1b0] ss:$8 sps:$4 sm:$0xff]   ;;  %v13429_v63 = vld [vmem:[#allocation4 + $0x1a4] ss:$8 sps:$4 sm:$0xff]  }
0x278e   :  { %v11235_v56 = vpop.f32.mrf.mxu0  ;;  %13703 = vst [vmem:[#allocation27_spill] sm:$0xff] %v13426_v30  ;;  %13704 = vst [vmem:[#allocation28_spill] sm:$0xff] %v13429_v63 }
0x278f   :  { %8046 = vmatmul.mubr.bf16.vlgmr.msra.gmra.mxu1 %v7915_v42  ;;  %v13432_v42 = vld [vmem:[#allocation4 + $0x1a0] ss:$8 sps:$4 sm:$0xff]   ;;  %v13435_v56 = vld [vmem:[#allocation4 + $0x194] ss:$8 sps:$4 sm:$0xff]  }
0x2790   :  { %8484 = vmatpush1.bf16.msra.mxu1 %v13354_v34  ;;  %8515 = vmatprep.mubr.bf16.mxu1 %v12076_v44  ;;  %13705 = vst [vmem:[#allocation29_spill] sm:$0xff] %v13432_v42  ;;  %13706 = vst [vmem:[#allocation30_spill] sm:$0xff] %v13435_v56 }
0x2791   :  { %8485 = vmatprep.subr.bf16.mxu1 %v13356_v43 }
0x2794   :  { %8486 = vmatpush1.bf16.msra.mxu1 %v13360_v27 }
0x2795   :  { %8487 = vmatprep.subr.bf16.mxu1 %v13363_v32 }
0x2798   :  { %8488 = vmatpush1.bf16.msra.mxu1 %v13366_v4 }
0x2799   :  { %8489 = vmatprep.subr.bf16.mxu1 %v13369_v53 }
0x279c   :  { %8490 = vmatpush1.bf16.msra.mxu1 %v13372_v18 }
0x279d   :  { %8491 = vmatprep.subr.bf16.mxu1 %v13375_v9 }
0x27a0   :  { %8492 = vmatpush1.bf16.msra.mxu1 %v13378_v3 }
0x27a1   :  { %8493 = vmatprep.subr.bf16.mxu1 %v13381_v31 }
0x27a4   :  { %8494 = vmatpush1.bf16.msra.mxu1 %v13384_v19 }
0x27a5   :  { %8495 = vmatprep.subr.bf16.mxu1 %v13387_v57 }
0x27a8   :  { %8496 = vmatpush1.bf16.msra.mxu1 %v13390_v20 }
0x27a9   :  { %8497 = vmatprep.subr.bf16.mxu1 %v13393_v21 }
0x27ac   :  { %8498 = vmatpush1.bf16.msra.mxu1 %v13396_v23 }
0x27ad   :  { %8499 = vmatprep.subr.bf16.mxu1 %v13399_v24 }
0x27b0   :  { %8500 = vmatpush2.bf16.msra.mxu1 %v13402_v25 }
0x27b1   :  { %8501 = vmatprep.subr.bf16.mxu1 %v13405_v55 }
0x27b4   :  { %8502 = vmatpush2.bf16.msra.mxu1 %v13408_v26 }
0x27b5   :  { %8503 = vmatprep.subr.bf16.mxu1 %v13411_v28 }
0x27b8   :  { %8504 = vmatpush2.bf16.msra.mxu1 %v13414_v38 }
0x27b9   :  { %8505 = vmatprep.subr.bf16.mxu1 %v13417_v39 }
0x27bc   :  { %8506 = vmatpush2.bf16.msra.mxu1 %v13420_v60 }
0x27bd   :  { %8507 = vmatprep.subr.bf16.mxu1 %v13423_v41 }
0x27c0   :  { %8508 = vmatpush2.bf16.msra.mxu1 %v13426_v30 }
0x27c1   :  { %8509 = vmatprep.subr.bf16.mxu1 %v13429_v63 }
0x27c4   :  { %8510 = vmatpush2.bf16.msra.mxu1 %v13432_v42 }
0x27c5   :  { %8511 = vmatprep.subr.bf16.mxu1 %v13435_v56 }
0x27c8   :  { %v8314_v10 = vpop.f32.mrf.mxu0  ;;  %8512 = vmatpush2.bf16.msra.mxu1 %v13438_v12 }
0x27c9   :  { %v8321_v14 = vpack.c.bf16 %v8314_v10, %v8314_v10  ;;  %8513 = vmatprep.subr.bf16.mxu1 %v13441_v13 }
0x27ca   :  { %v8316_v8 = vpop.f32.mrf.mxu0 }
0x27cb   :  { %v8322_v51 = vpack.c.bf16 %v8316_v8, %v8316_v8  ;;  %v8532_v1 = vsel %vm562_vm0, %v8321_v14, 0 }
0x27cc   :  { %v8318_v61 = vpop.f32.mrf.mxu0  ;;  %8514 = vmatpush2.bf16.msra.mxu1 %v13444_v15 }
0x27cd   :  { %9777 = vmatprep.subr.msk.bf16.mxu0 %vm562_vm0, %v8322_v51  ;;  %8738 = vmatprep.subr.bf16.mxu1 %v13351_v22  ;;  %v11649_v61 = vld [vmem:[%s13648_s1 + $0xf0] sm:$0x3]  ;;  %v8591_v51 = vsel %vm562_vm0, %v12082_v47, 0 }
0x27ce   :  { %v8319_v17 = vpop.f32.mrf.mxu0  ;;  %8552 = vmatpush1.bf16.msra.mxu0 %v8532_v1 }
0x27cf   :  { %8516 = vmatmul.mubr.bf16.vlgmr.msra.gmra.mxu1 %v12082_v47  ;;  %9780 = vmatprep.subr.msk.bf16.mxu0 %vm562_vm0, %v12076_v44  ;;  %v13710_v17 = vmov 0   ;;  %v11650_v44 = vld [vmem:[%s13648_s1 + $0xf4] sm:$0x3] }
0x27d0   :  { %8739 = vmatpush1.bf16.msra.mxu1 %v13354_v34 }
0x27d1   :  { %9778 = vmatmul.mubr.msk.bf16.vlgmr.msra.gmra.mxu0 %vm558_vm1, %v11649_v61  ;;  %8740 = vmatprep.subr.bf16.mxu1 %v13356_v43 }
0x27d2   :  { %8611 = vmatpush1.bf16.msra.mxu0 %v8591_v51  ;;  %8628 = vmatprep.mubr.bf16.mxu0 %v13710_v17 }
0x27d4   :  { %8741 = vmatpush1.bf16.msra.mxu1 %v13360_v27 }
0x27d5   :  { %8742 = vmatprep.subr.bf16.mxu1 %v13363_v32 }
0x27d8   :  { %8743 = vmatpush1.bf16.msra.mxu1 %v13366_v4 }
0x27d9   :  { %9781 = vmatmul.mubr.msk.bf16.vlgmr.msra.gmra.mxu0 %vm558_vm1, %v11650_v44  ;;  %8744 = vmatprep.subr.bf16.mxu1 %v13369_v53  ;;  %v8842_v44 = vpop.permute.xlu1 %8841 }
0x27da   :  { %8682 = vmatprep.mubr.bf16.mxu0 %v13710_v17 }
0x27dc   :  { %8745 = vmatpush1.bf16.msra.mxu1 %v13372_v18 }
0x27dd   :  { %8746 = vmatprep.subr.bf16.mxu1 %v13375_v9 }
0x27e0   :  { %8747 = vmatpush1.bf16.msra.mxu1 %v13378_v3 }
0x27e1   :  { %8748 = vmatprep.subr.bf16.mxu1 %v13381_v31 }
0x27e4   :  { %8749 = vmatpush1.bf16.msra.mxu1 %v13384_v19 }
0x27e5   :  { %8750 = vmatprep.subr.bf16.mxu1 %v13387_v57 }
0x27e8   :  { %8751 = vmatpush1.bf16.msra.mxu1 %v13390_v20 }
0x27e9   :  { %8752 = vmatprep.subr.bf16.mxu1 %v13393_v21 }
0x27ec   :  { %8753 = vmatpush1.bf16.msra.mxu1 %v13396_v23 }
0x27ed   :  { %8754 = vmatprep.subr.bf16.mxu1 %v13399_v24 }
0x27f0   :  { %8755 = vmatpush2.bf16.msra.mxu1 %v13402_v25 }
0x27f1   :  { %8756 = vmatprep.subr.bf16.mxu1 %v13405_v55 }
0x27f4   :  { %8757 = vmatpush2.bf16.msra.mxu1 %v13408_v26 }
0x27f5   :  { %8758 = vmatprep.subr.bf16.mxu1 %v13411_v28 }
0x27f8   :  { %8759 = vmatpush2.bf16.msra.mxu1 %v13414_v38  ;;  %v13717_v38 = vld [vmem:[#allocation18_spill] sm:$0xff] }
0x27f9   :  { %8760 = vmatprep.subr.bf16.mxu1 %v13417_v39 }
0x27fc   :  { %8761 = vmatpush2.bf16.msra.mxu1 %v13420_v60 }
0x27fd   :  { %8762 = vmatprep.subr.bf16.mxu1 %v13423_v41 }
0x2800   :  { %8763 = vmatpush2.bf16.msra.mxu1 %v13426_v30  ;;  %v13716_v30 = vld [vmem:[#allocation17_spill] sm:$0xff] }
0x2801   :  { %8764 = vmatprep.subr.bf16.mxu1 %v13429_v63 }
0x2804   :  { %8765 = vmatpush2.bf16.msra.mxu1 %v13432_v42 }
0x2805   :  { %8766 = vmatprep.subr.bf16.mxu1 %v13435_v56  ;;  %v13715_v56 = vld [vmem:[#allocation16_spill] sm:$0xff] }
0x2808   :  { %8767 = vmatpush2.bf16.msra.mxu1 %v13438_v12 }
0x2809   :  { %8768 = vmatprep.subr.bf16.mxu1 %v13441_v13 }
0x280c   :  { %8769 = vmatpush2.bf16.msra.mxu1 %v13444_v15 }
0x284f   :  { %v8047_v47 = vpop.f32.mrf.mxu1 }
0x2850   :  { %v13497_v1 = vpack.c.bf16 %v8047_v47, %v8047_v47  ;;  %v13711_v47 = vld [vmem:[#allocation12_spill] sm:$0xff] }
0x2851   :  { %v8049_v8 = vpop.f32.mrf.mxu1 }
0x2852   :  { %v8694_v14 = vpack.c.bf16 %v8049_v8, %v8049_v8  ;;  %v8847_v51 = vsel %vm562_vm0, %v13497_v1, 0  ;;  %v13712_v8 = vld [vmem:[#allocation13_spill] sm:$0xff] }
0x2853   :  { %v8051_v10 = vpop.f32.mrf.mxu1 }
0x2854   :  { %8770 = vmatprep.mubr.bf16.mxu1 %v8694_v14  ;;  %9789 = vmatprep.subr.msk.bf16.mxu1 %vm562_vm0, %v8694_v14  ;;  %v13713_v10 = vld [vmem:[#allocation14_spill] sm:$0xff] }
0x2855   :  { %v8052_v61 = vpop.f32.mrf.mxu1  ;;  %8771 = vmatmul.mubr.bf16.vlgmr.msra.gmra.mxu1 %v13497_v1 }
0x2856   :  { %8867 = vmatpush1.bf16.msra.mxu1 %v8847_v51  ;;  %8884 = vmatprep.mubr.bf16.mxu1 %v13710_v17  ;;  %v13714_v51 = vld [vmem:[#allocation15_spill] sm:$0xff] }
0x2857   :  { %8958 = vmatprep.subr.bf16.mxu1 %v13244_v6 }
0x285d   :  { %9790 = vmatmul.mubr.msk.bf16.vlgmr.msra.gmra.mxu1 %vm558_vm1, %v8842_v44 }
0x285e   :  { %8959 = vmatpush1.bf16.msra.mxu1 %v13251_v59 }
0x285f   :  { %8960 = vmatprep.subr.bf16.mxu1 %v13256_v2 }
0x2862   :  { %8961 = vmatpush1.bf16.msra.mxu1 %v13261_v33 }
0x2863   :  { %8962 = vmatprep.subr.bf16.mxu1 %v13264_v29 }
0x2866   :  { %8963 = vmatpush1.bf16.msra.mxu1 %v13267_v45 }
0x2867   :  { %8964 = vmatprep.subr.bf16.mxu1 %v13270_v35 }
0x286a   :  { %8965 = vmatpush1.bf16.msra.mxu1 %v13273_v36 }
0x286b   :  { %8966 = vmatprep.subr.bf16.mxu1 %v13276_v48 }
0x286e   :  { %8967 = vmatpush1.bf16.msra.mxu1 %v13279_v50 }
0x286f   :  { %8968 = vmatprep.subr.bf16.mxu1 %v13282_v40 }
0x2872   :  { %8969 = vmatpush1.bf16.msra.mxu1 %v13285_v52 }
0x2873   :  { %8970 = vmatprep.subr.bf16.mxu1 %v13288_v54 }
0x2876   :  { %8971 = vmatpush1.bf16.msra.mxu1 %v13291_v62 }
0x2877   :  { %8972 = vmatprep.subr.bf16.mxu1 %v13294_v7 }
0x287a   :  { %8973 = vmatpush1.bf16.msra.mxu1 %v13297_v49 }
0x287b   :  { %8974 = vmatprep.subr.bf16.mxu1 %v13300_v0 }
0x287e   :  { %8975 = vmatpush2.bf16.msra.mxu1 %v13303_v16 }
0x287f   :  { %8976 = vmatprep.subr.bf16.mxu1 %v13306_v46 }
0x2882   :  { %8977 = vmatpush2.bf16.msra.mxu1 %v13309_v37 }
0x2883   :  { %8978 = vmatprep.subr.bf16.mxu1 %v13312_v11 }
0x2886   :  { %8979 = vmatpush2.bf16.msra.mxu1 %v13315_v5 }
0x2887   :  { %8980 = vmatprep.subr.bf16.mxu1 %v13318_v58 }
0x288a   :  { %8981 = vmatpush2.bf16.msra.mxu1 %v13711_v47 }
0x288b   :  { %8982 = vmatprep.subr.bf16.mxu1 %v13712_v8 }
0x288e   :  { %8983 = vmatpush2.bf16.msra.mxu1 %v13713_v10 }
0x288f   :  { %v8517_v61 = vpop.f32.mrf.mxu1  ;;  %8984 = vmatprep.subr.bf16.mxu1 %v13714_v51 }
0x2890   :  { %v8524_v44 = vpack.c.bf16 %v8517_v61, %v8517_v61  ;;  %v8581_v61 = vpop.permute.xlu1 %8580 }
0x2891   :  { %v8519_v15 = vpop.f32.mrf.mxu1  ;;  %v8571_v13 = vpop.f32.mrf.mxu0 }
0x2892   :  { %v8525_v12 = vpack.c.bf16 %v8519_v15, %v8519_v15  ;;  %8985 = vmatpush2.bf16.msra.mxu1 %v13715_v56  ;;  %v8645_v41 = vsel %vm562_vm0, %v8524_v44, 0  ;;  %v13718_v15 = vld [vmem:[#allocation19_spill] sm:$0xff]  ;;  %v8583_v26 = vadd.f32 %v8581_v61, %v8571_v13 }
0x2893   :  { %v8521_v42 = vpop.f32.mrf.mxu1  ;;  %v8573_v63 = vpop.f32.mrf.mxu0  ;;  %8986 = vmatprep.subr.bf16.mxu1 %v13716_v30 }
0x2894   :  { %9783 = vmatprep.subr.msk.bf16.mxu0 %vm562_vm0, %v8525_v12  ;;  %v11651_v42 = vld [vmem:[%s13648_s1 + $0xf8] sm:$0x3]  ;;  %v8584_v12 = vadd.f32 %v8581_v61, %v8573_v63 }
0x2895   :  { %v8522_v60 = vpop.f32.mrf.mxu1  ;;  %v8575_v39 = vpop.f32.mrf.mxu0  ;;  %8665 = vmatpush1.bf16.msra.mxu0 %v8645_v41 }
0x2896   :  { %8695 = vmatprep.subr.bf16.mxu0 %v13244_v6  ;;  %8987 = vmatpush2.bf16.msra.mxu1 %v13717_v38  ;;  %v13719_v6 = vld [vmem:[#allocation20_spill] sm:$0xff] }
0x2897   :  { %v8576_v28 = vpop.f32.mrf.mxu0  ;;  %8988 = vmatprep.subr.bf16.mxu1 %v13718_v15 }
0x2898   :  { %9784 = vmatmul.mubr.msk.bf16.vlgmr.msra.gmra.mxu0 %vm558_vm1, %v11651_v42 }
0x2899   :  { %v8630_v44 = vpop.f32.mrf.mxu0  ;;  %8696 = vmatpush1.bf16.msra.mxu0 %v13251_v59  ;;  %8727 = vmatprep.mubr.bf16.mxu0 %v8694_v14 }
0x289a   :  { %v8637_v39 = vadd.f32 %v8630_v44, %v8583_v26  ;;  %8697 = vmatprep.subr.bf16.mxu0 %v13256_v2  ;;  %8989 = vmatpush2.bf16.msra.mxu1 %v13719_v6 }
0x289b   :  { %v8632_v28 = vpop.f32.mrf.mxu0 }
0x289c   :  { %v8638_v60 = vadd.f32 %v8632_v28, %v8584_v12 }
0x289d   :  { %8698 = vmatpush1.bf16.msra.mxu0 %v13261_v33  ;;  %v8634_v13 = vpop.f32.mrf.mxu0 }
0x289e   :  { %8699 = vmatprep.subr.bf16.mxu0 %v13264_v29 }
0x289f   :  { %v8635_v41 = vpop.f32.mrf.mxu0 }
0x28a1   :  { %8700 = vmatpush1.bf16.msra.mxu0 %v13267_v45 }
0x28a2   :  { %8701 = vmatprep.subr.bf16.mxu0 %v13270_v35 }
0x28a5   :  { %8702 = vmatpush1.bf16.msra.mxu0 %v13273_v36 }
0x28a6   :  { %8703 = vmatprep.subr.bf16.mxu0 %v13276_v48 }
0x28a9   :  { %8704 = vmatpush1.bf16.msra.mxu0 %v13279_v50 }
0x28aa   :  { %8705 = vmatprep.subr.bf16.mxu0 %v13282_v40 }
0x28ad   :  { %8706 = vmatpush1.bf16.msra.mxu0 %v13285_v52 }
0x28ae   :  { %8707 = vmatprep.subr.bf16.mxu0 %v13288_v54 }
0x28b1   :  { %8708 = vmatpush1.bf16.msra.mxu0 %v13291_v62 }
0x28b2   :  { %8709 = vmatprep.subr.bf16.mxu0 %v13294_v7 }
0x28b5   :  { %8710 = vmatpush1.bf16.msra.mxu0 %v13297_v49 }
0x28b6   :  { %8711 = vmatprep.subr.bf16.mxu0 %v13300_v0 }
0x28b9   :  { %8712 = vmatpush2.bf16.msra.mxu0 %v13303_v16 }
0x28ba   :  { %8713 = vmatprep.subr.bf16.mxu0 %v13306_v46 }
0x28bd   :  { %8714 = vmatpush2.bf16.msra.mxu0 %v13309_v37 }
0x28be   :  { %8715 = vmatprep.subr.bf16.mxu0 %v13312_v11  ;;  %v8785_v11 = vpop.permute.xlu0 %8784 }
0x28c1   :  { %8716 = vmatpush2.bf16.msra.mxu0 %v13315_v5 }
0x28c2   :  { %8717 = vmatprep.subr.bf16.mxu0 %v13318_v58  ;;  %v8899_v58 = vpop.permute.xlu0 %8898 }
0x28c5   :  { %8718 = vmatpush2.bf16.msra.mxu0 %v13711_v47 }
0x28c6   :  { %8719 = vmatprep.subr.bf16.mxu0 %v13712_v8 }
0x28c9   :  { %8720 = vmatpush2.bf16.msra.mxu0 %v13713_v10 }
0x28ca   :  { %8721 = vmatprep.subr.bf16.mxu0 %v13714_v51 }
0x28cd   :  { %8722 = vmatpush2.bf16.msra.mxu0 %v13715_v56 }
0x28ce   :  { %8723 = vmatprep.subr.bf16.mxu0 %v13716_v30 }
0x28d1   :  { %8724 = vmatpush2.bf16.msra.mxu0 %v13717_v38 }
0x28d2   :  { %8725 = vmatprep.subr.bf16.mxu0 %v13718_v15 }
0x28d5   :  { %8726 = vmatpush2.bf16.msra.mxu0 %v13719_v6  ;;  %v9798_v6 = vld [vmem:[%s13648_s1 + $0x100] sm:$0x3] }
0x28d8   :  { %8728 = vmatmul.mubr.bf16.vlgmr.msra.gmra.mxu0 %v13497_v1 }
0x28d9   :  { %8827 = vmatprep.mubr.bf16.mxu0 %v13710_v17 }
0x2915   :  { %v8772_v59 = vpop.f32.mrf.mxu1 }
0x2916   :  { %v8779_v0 = vpack.c.bf16 %v8772_v59, %v8772_v59 }
0x2917   :  { %v8774_v2 = vpop.f32.mrf.mxu1 }
0x2918   :  { %v8780_v16 = vpack.c.bf16 %v8774_v2, %v8774_v2  ;;  %v8904_v5 = vsel %vm562_vm0, %v8779_v0, 0 }
0x2919   :  { %v8776_v33 = vpop.f32.mrf.mxu1 }
0x291b   :  { %v8777_v29 = vpop.f32.mrf.mxu1 }
0x2958   :  { %v8684_v45 = vpop.f32.mrf.mxu0 }
0x2959   :  { %v8691_v35 = vadd.f32 %v8684_v45, %v8637_v39 }
0x295a   :  { %v8686_v36 = vpop.f32.mrf.mxu0 }
0x295b   :  { %v8692_v48 = vadd.f32 %v8686_v36, %v8638_v60 }
0x295c   :  { %v8688_v50 = vpop.f32.mrf.mxu0 }
0x295d   :  { %v9795_v50 = vld [vmem:[%s13648_s1 + $0xfc] sm:$0x3] }
0x295e   :  { %v8689_v40 = vpop.f32.mrf.mxu0 }
0x2998   :  { %v8729_v52 = vpop.f32.mrf.mxu0 }
0x2999   :  { %v8736_v54 = vpack.c.bf16 %v8729_v52, %v8729_v52 }
0x299a   :  { %v8731_v62 = vpop.f32.mrf.mxu0 }
0x299b   :  { %v8737_v7 = vpack.c.bf16 %v8731_v62, %v8731_v62  ;;  %v8790_v46 = vsel %vm562_vm0, %v8736_v54, 0  ;;  %v9801_v54 = vld [vmem:[%s13648_s1 + $0x104] sm:$0x3] }
0x299c   :  { %v8733_v49 = vpop.f32.mrf.mxu0 }
0x299d   :  { %9786 = vmatprep.subr.msk.bf16.mxu0 %vm562_vm0, %v8737_v7 }
0x299e   :  { %v8734_v37 = vpop.f32.mrf.mxu0  ;;  %8810 = vmatpush1.bf16.msra.mxu0 %v8790_v46  ;;  %v9099_v46 = vpop.permute.xlu0 %9098 }
0x299f   :  { %9792 = vmatprep.subr.msk.bf16.mxu0 %vm562_vm0, %v8780_v16 }
0x29a1   :  { %9787 = vmatmul.mubr.msk.bf16.vlgmr.msra.gmra.mxu0 %vm558_vm1, %v8785_v11 }
0x29a2   :  { %8924 = vmatpush1.bf16.msra.mxu0 %v8904_v5  ;;  %8941 = vmatprep.mubr.bf16.mxu0 %v13710_v17 }
0x29a3   :  { %9001 = vmatprep.subr.bf16.mxu0 %v13351_v22  ;;  %v13720_v22 = vld [vmem:[#allocation21_spill] sm:$0xff] }
0x29a9   :  { %9793 = vmatmul.mubr.msk.bf16.vlgmr.msra.gmra.mxu0 %vm558_vm1, %v8899_v58 }
0x29aa   :  { %9002 = vmatpush1.bf16.msra.mxu0 %v13354_v34  ;;  %v13721_v34 = vld [vmem:[#allocation22_spill] sm:$0xff] }
0x29ab   :  { %9003 = vmatprep.subr.bf16.mxu0 %v13356_v43  ;;  %v13722_v43 = vld [vmem:[#allocation23_spill] sm:$0xff] }
0x29ae   :  { %9004 = vmatpush1.bf16.msra.mxu0 %v13360_v27  ;;  %v13723_v27 = vld [vmem:[#allocation24_spill] sm:$0xff] }
0x29af   :  { %9005 = vmatprep.subr.bf16.mxu0 %v13363_v32  ;;  %v13724_v32 = vld [vmem:[#allocation25_spill] sm:$0xff] }
0x29b2   :  { %9006 = vmatpush1.bf16.msra.mxu0 %v13366_v4  ;;  %v13725_v4 = vld [vmem:[#allocation26_spill] sm:$0xff] }
0x29b3   :  { %9007 = vmatprep.subr.bf16.mxu0 %v13369_v53  ;;  %v13726_v53 = vld [vmem:[#allocation27_spill] sm:$0xff] }
0x29b6   :  { %9008 = vmatpush1.bf16.msra.mxu0 %v13372_v18  ;;  %v13727_v18 = vld [vmem:[#allocation28_spill] sm:$0xff] }
0x29b7   :  { %9009 = vmatprep.subr.bf16.mxu0 %v13375_v9  ;;  %v13728_v9 = vld [vmem:[#allocation29_spill] sm:$0xff] }
0x29ba   :  { %9010 = vmatpush1.bf16.msra.mxu0 %v13378_v3  ;;  %v13729_v3 = vld [vmem:[#allocation30_spill] sm:$0xff] }
0x29bb   :  { %9011 = vmatprep.subr.bf16.mxu0 %v13381_v31  ;;  %v8886_v31 = vpop.f32.mrf.mxu1 }
0x29be   :  { %9012 = vmatpush1.bf16.msra.mxu0 %v13384_v19  ;;  %v13730_v19 = vld [vmem:[#allocation31_spill] sm:$0xff] }
0x29bf   :  { %9013 = vmatprep.subr.bf16.mxu0 %v13387_v57  ;;  %v8888_v57 = vpop.f32.mrf.mxu1 }
0x29c2   :  { %9014 = vmatpush1.bf16.msra.mxu0 %v13390_v20  ;;  %v13731_v20 = vld [vmem:[#allocation32_spill] sm:$0xff] }
0x29c3   :  { %9015 = vmatprep.subr.bf16.mxu0 %v13393_v21  ;;  %v8890_v21 = vpop.f32.mrf.mxu1 }
0x29c6   :  { %9016 = vmatpush1.bf16.msra.mxu0 %v13396_v23  ;;  %v13732_v23 = vld [vmem:[#allocation33_spill] sm:$0xff] }
0x29c7   :  { %9017 = vmatprep.subr.bf16.mxu0 %v13399_v24  ;;  %v8891_v24 = vpop.f32.mrf.mxu1 }
0x29ca   :  { %9018 = vmatpush2.bf16.msra.mxu0 %v13402_v25 }
0x29cb   :  { %9019 = vmatprep.subr.bf16.mxu0 %v13405_v55 }
0x29ce   :  { %9020 = vmatpush2.bf16.msra.mxu0 %v13720_v22 }
0x29cf   :  { %9021 = vmatprep.subr.bf16.mxu0 %v13721_v34 }
0x29d2   :  { %9022 = vmatpush2.bf16.msra.mxu0 %v13722_v43 }
0x29d3   :  { %9023 = vmatprep.subr.bf16.mxu0 %v13723_v27 }
0x29d6   :  { %9024 = vmatpush2.bf16.msra.mxu0 %v13724_v32 }
0x29d7   :  { %9025 = vmatprep.subr.bf16.mxu0 %v13725_v4 }
0x29da   :  { %9026 = vmatpush2.bf16.msra.mxu0 %v13726_v53 }
0x29db   :  { %9027 = vmatprep.subr.bf16.mxu0 %v13727_v18 }
0x29de   :  { %9028 = vmatpush2.bf16.msra.mxu0 %v13728_v9 }
0x29df   :  { %9029 = vmatprep.subr.bf16.mxu0 %v13729_v3 }
0x29e2   :  { %9030 = vmatpush2.bf16.msra.mxu0 %v13730_v19 }
0x29e3   :  { %9031 = vmatprep.subr.bf16.mxu0 %v13731_v20  ;;  %v9804_v20 = vld [vmem:[%s13648_s1 + $0x10c] sm:$0x3] }
0x29e6   :  { %9032 = vmatpush2.bf16.msra.mxu0 %v13732_v23  ;;  %v9222_v23 = vpop.permute.xlu1 %9221 }
0x2a61   :  { %v8829_v25 = vpop.f32.mrf.mxu0 }
0x2a62   :  { %v8836_v26 = vadd.f32 %v8829_v25, %v8691_v35 }
0x2a63   :  { %v8831_v55 = vpop.f32.mrf.mxu0 }
0x2a64   :  { %v8837_v30 = vadd.f32 %v8831_v55, %v8692_v48  ;;  %v8893_v56 = vadd.f32 %v8886_v31, %v8836_v26 }
0x2a65   :  { %v8833_v38 = vpop.f32.mrf.mxu0 }
0x2a66   :  { %v8894_v14 = vadd.f32 %v8888_v57, %v8837_v30 }
0x2a67   :  { %v8834_v63 = vpop.f32.mrf.mxu0 }
0x2a69   :  { %v8943_v1 = vpop.f32.mrf.mxu0 }
0x2a6a   :  { %v8950_v47 = vadd.f32 %v8943_v1, %v8893_v56 }
0x2a6b   :  { %v8945_v8 = vpop.f32.mrf.mxu0 }
0x2a6c   :  { %v8952_v10 = vmax.f32 %v8950_v47, 0.0  ;;  %v8951_v51 = vadd.f32 %v8945_v8, %v8894_v14 }
0x2a6d   :  { %v8947_v61 = vpop.f32.mrf.mxu0 }
0x2a6e   :  { %v8953_v15 = vmax.f32 %v8951_v51, 0.0  ;;  %v8956_v44 = vpack.c.bf16 %v8952_v10, %v8952_v10 }
0x2a6f   :  { %v8948_v42 = vpop.f32.mrf.mxu0 }
0x2a70   :  { %v8957_v12 = vpack.c.bf16 %v8953_v15, %v8953_v15  ;;  %v9109_v39 = vsel %vm562_vm0, %v8956_v44, 0 }
0x2a72   :  { %8990 = vmatprep.mubr.bf16.mxu1 %v8957_v12  ;;  %9033 = vmatprep.mubr.bf16.mxu0 %v8957_v12 }
0x2a73   :  { %9799 = vmatprep.subr.msk.bf16.mxu0 %vm562_vm0, %v8957_v12  ;;  %8991 = vmatmul.mubr.bf16.vlgmr.msra.gmra.mxu1 %v8956_v44 }
0x2a74   :  { %9034 = vmatmul.mubr.bf16.vlgmr.msra.gmra.mxu0 %v8956_v44  ;;  %9087 = vmatprep.mubr.bf16.mxu1 %v13710_v17 }
0x2a75   :  { %9129 = vmatpush1.bf16.msra.mxu0 %v9109_v39  ;;  %9146 = vmatprep.mubr.bf16.mxu0 %v13710_v17 }
0x2a7c   :  { %9800 = vmatmul.mubr.msk.bf16.vlgmr.msra.gmra.mxu0 %vm558_vm1, %v9798_v6 }
0x2a7d   :  { %9265 = vmatprep.mubr.bf16.mxu0 %v13710_v17 }
0x2b33   :  { %v8992_v28 = vpop.f32.mrf.mxu1 }
0x2b34   :  { %v8999_v60 = vpack.c.bf16 %v8992_v28, %v8992_v28  ;;  %v9035_v13 = vpop.f32.mrf.mxu0 }
0x2b35   :  { %v8994_v41 = vpop.f32.mrf.mxu1  ;;  %v9042_v45 = vpack.c.bf16 %v9035_v13, %v9035_v13 }
0x2b36   :  { %v9000_v59 = vpack.c.bf16 %v8994_v41, %v8994_v41  ;;  %v9037_v2 = vpop.f32.mrf.mxu0  ;;  %v9050_v29 = vsel %vm562_vm0, %v8999_v60, 0 }
0x2b37   :  { %v8996_v33 = vpop.f32.mrf.mxu1  ;;  %v9043_v35 = vpack.c.bf16 %v9037_v2, %v9037_v2  ;;  %v9163_v52 = vsel %vm562_vm0, %v9042_v45, 0 }
0x2b38   :  { %v9039_v36 = vpop.f32.mrf.mxu0  ;;  %9796 = vmatprep.subr.msk.bf16.mxu1 %vm562_vm0, %v9000_v59 }
0x2b39   :  { %v8997_v48 = vpop.f32.mrf.mxu1  ;;  %9070 = vmatpush1.bf16.msra.mxu1 %v9050_v29 }
0x2b3a   :  { %v9040_v40 = vpop.f32.mrf.mxu0  ;;  %9802 = vmatprep.subr.msk.bf16.mxu1 %vm562_vm0, %v9043_v35 }
0x2b3c   :  { %9797 = vmatmul.mubr.msk.bf16.vlgmr.msra.gmra.mxu1 %vm558_vm1, %v9795_v50  ;;  %v9148_v62 = vpop.f32.mrf.mxu0 }
0x2b3d   :  { %9183 = vmatpush1.bf16.msra.mxu1 %v9163_v52  ;;  %9200 = vmatprep.mubr.bf16.mxu1 %v13710_v17 }
0x2b3e   :  { %v9150_v7 = vpop.f32.mrf.mxu0 }
0x2b40   :  { %v9152_v49 = vpop.f32.mrf.mxu0 }
0x2b42   :  { %v9153_v0 = vpop.f32.mrf.mxu0 }
0x2b44   :  { %9803 = vmatmul.mubr.msk.bf16.vlgmr.msra.gmra.mxu1 %vm558_vm1, %v9801_v54 }
0x2bfc   :  { %v9089_v16 = vpop.f32.mrf.mxu1 }
0x2bfd   :  { %v9101_v11 = vadd.f32 %v9099_v46, %v9089_v16 }
0x2bfe   :  { %v9091_v37 = vpop.f32.mrf.mxu1 }
0x2bff   :  { %v9102_v58 = vadd.f32 %v9099_v46, %v9091_v37  ;;  %v9155_v34 = vadd.f32 %v9148_v62, %v9101_v11 }
0x2c00   :  { %v9093_v5 = vpop.f32.mrf.mxu1 }
0x2c01   :  { %v9156_v17 = vadd.f32 %v9150_v7, %v9102_v58 }
0x2c02   :  { %v9094_v22 = vpop.f32.mrf.mxu1 }
0x2c04   :  { %v9202_v43 = vpop.f32.mrf.mxu1 }
0x2c05   :  { %v9209_v27 = vadd.f32 %v9202_v43, %v9155_v34 }
0x2c06   :  { %v9204_v32 = vpop.f32.mrf.mxu1 }
0x2c07   :  { %v9211_v4 = vmax.f32 %v9209_v27, 0.0  ;;  %v9210_v53 = vadd.f32 %v9204_v32, %v9156_v17 }
0x2c08   :  { %v9206_v18 = vpop.f32.mrf.mxu1 }
0x2c09   :  { %v9215_v9 = vpack.c.bf16 %v9211_v4, %v9211_v4  ;;  %v9212_v3 = vmax.f32 %v9210_v53, 0.0 }
0x2c0a   :  { %v9207_v31 = vpop.f32.mrf.mxu1 }
0x2c0b   :  { %v9216_v19 = vpack.c.bf16 %v9212_v3, %v9212_v3  ;;  %v9228_v57 = vsel %vm562_vm0, %v9215_v9, 0 }
0x2c0d   :  { %9806 = vmatprep.subr.msk.bf16.mxu0 %vm562_vm0, %v9216_v19 }
0x2c0e   :  { %9248 = vmatpush1.bf16.msra.mxu0 %v9228_v57 }
0x2c11   :  { %9807 = vmatmul.mubr.msk.bf16.vlgmr.msra.gmra.mxu0 %vm558_vm1, %v9804_v20 }
0x2cd1   :  { %v9267_v21 = vpop.f32.mrf.mxu0 }
0x2cd2   :  { %v9268_v25 = vadd.f32 %v9267_v21, %v9222_v23 }
0x2cd3   :  { %v9269_v24 = vpop.f32.mrf.mxu0 }
0x2cd4   :  { %v9270_v55 = vadd.f32 %v9269_v24, %v9222_v23 }
0x2cd5   :  { %v9271_v26 = vpop.f32.mrf.mxu0 }
0x2cd6   :  { %v9276_v38 = vcombine.low %v9268_v25, %v9270_v55 }
0x2cd7   :  { %v9272_v30 = vpop.f32.mrf.mxu0 }
0x2cd8   :  { %9278 = vst [vmem:[%s13653_s6] sm:$0xff] %v9276_v38 }
0x2cd9   :  { %9287 = vsyncpa [#allocation3], 1 }
0x2cda   :  { %9288 = vsyncpa [#allocation5], 1 }
0x2cdb   :  { %9289 = vsyncpa [#allocation8], 1 }

</bundles_post_ra>
